<compile_context>
chip_gen: v6e
topology: v6e:2x2x1
jax: 0.10.0
libtpu: 0.0.40
codegen_flags: <defaults>
</compile_context>

<pallas_src>
import functools
import math

import jax
import jax.numpy as jnp
from jax.experimental import pallas as pl
from jax.experimental.pallas import tpu as pltpu  # noqa: F401  (TPU backend)

MXU_DTYPE = jnp.bfloat16   # MXU operand dtype; accumulation stays f32
LN_EPS = 1e-5              # PyTorch LayerNorm default

# Fixed key ordering used both to build the operand list and to unpack refs
# inside the kernels (weights are stacked over layers along a leading L axis).
ENC_WKEYS = ("wq", "wk", "wv", "bq", "bk", "bv", "wo", "bo",
             "g1", "b1", "w1", "bf1", "w2", "bf2", "g2", "b2")
DEC_WKEYS = ("sa_wq", "sa_wk", "sa_wv", "sa_bq", "sa_bk", "sa_bv",
             "sa_wo", "sa_bo", "g1", "b1",
             "ca_wq", "ca_wk", "ca_wv", "ca_bq", "ca_bk", "ca_bv",
             "ca_wo", "ca_bo", "g2", "b2",
             "w1", "bf1", "w2", "bf2", "g3", "b3")


# ----------------------------------------------------------------------------
# In-kernel building blocks (operate on values)
# ----------------------------------------------------------------------------

def _linear(x, w, b):
    # x: (M, K) f32; w: (K, N) bf16 (pre-transposed); b: (1, N) f32
    return jnp.dot(x.astype(MXU_DTYPE), w,
                   preferred_element_type=jnp.float32) + b


def _layernorm(h, g, b):
    mu = jnp.mean(h, axis=-1, keepdims=True)
    var = jnp.mean(jnp.square(h - mu), axis=-1, keepdims=True)
    return (h - mu) * jax.lax.rsqrt(var + LN_EPS) * g + b


def _mha(x_q, x_kv, wq, wk, wv, bq, bk, bv, wo, bo, *, B, Sq, Sk, H, D, bias):
    """Multi-head attention on a batch-major (B*Sq, D) f32 slab.

    Per-head weights: wq/wk/wv (H, D, Dh) bf16 (1/sqrt(Dh) folded into wq/bq),
    wo (H, Dh, D) bf16, bq/bk/bv (H, 1, Dh) f32, bo (1, D) f32.
    bias: optional (H, Sq, Sk) additive f32 mask.
    All matmuls are leading-batch-dim einsums (no lane slices / lane concat);
    heads are merged by summing per-head out-projection partials.
    """
    outs = []
    for b in range(B):                       # B is tiny & static -> unrolled
        xq = jnp.broadcast_to(
            x_q[b * Sq:(b + 1) * Sq].astype(MXU_DTYPE), (H, Sq, D))
        xk = jnp.broadcast_to(
            x_kv[b * Sk:(b + 1) * Sk].astype(MXU_DTYPE), (H, Sk, D))
        q = jnp.einsum("hsd,hde->hse", xq, wq,
                       preferred_element_type=jnp.float32) + bq
        k = jnp.einsum("hsd,hde->hse", xk, wk,
                       preferred_element_type=jnp.float32) + bk
        v = jnp.einsum("hsd,hde->hse", xk, wv,
                       preferred_element_type=jnp.float32) + bv
        s = jnp.einsum("hqe,hke->hqk", q.astype(MXU_DTYPE),
                       k.astype(MXU_DTYPE),
                       preferred_element_type=jnp.float32)
        if bias is not None:
            s = s + bias
        s = s - jnp.max(s, axis=-1, keepdims=True)
        p = jnp.exp(s)
        p = p * pl.reciprocal(jnp.sum(p, axis=-1, keepdims=True), approx=True)
        o = jnp.einsum("hqk,hke->hqe", p.astype(MXU_DTYPE),
                       v.astype(MXU_DTYPE),
                       preferred_element_type=jnp.float32)
        po = jnp.einsum("hse,hef->hsf", o.astype(MXU_DTYPE), wo,
                        preferred_element_type=jnp.float32)   # (H, Sq, D)
        acc = po[0]
        for h in range(1, H):
            acc = acc + po[h]
        outs.append(acc + bo)                                 # (Sq, D)
    return jnp.concatenate(outs, axis=0)                      # (B*Sq, D)


# ----------------------------------------------------------------------------
# Kernels: one per stack (encoder / decoder), no grid, whole slab per call
# ----------------------------------------------------------------------------

def _encoder_kernel(*refs, num_layers, num_heads, head_dim, batch, seq,
                    emb_scale):
    nw = len(ENC_WKEYS)
    x_ref, pe_ref = refs[0], refs[1]
    w = dict(zip(ENC_WKEYS, refs[2:2 + nw]))
    gn_ref, bn_ref, o_ref = refs[2 + nw], refs[3 + nw], refs[4 + nw]
    D = num_heads * head_dim

    # embedding scale + positional encoding fused in (pos_dropout = id in eval)
    x = x_ref[...] * emb_scale + pe_ref[...]
    for l in range(num_layers):              # static, unrolled
        a = _mha(x, x, w["wq"][l], w["wk"][l], w["wv"][l],
                 w["bq"][l], w["bk"][l], w["bv"][l], w["wo"][l], w["bo"][l],
                 B=batch, Sq=seq, Sk=seq, H=num_heads, D=D, bias=None)
        x = _layernorm(x + a, w["g1"][l], w["b1"][l])
        ff = jnp.maximum(_linear(x, w["w1"][l], w["bf1"][l]), 0.0)
        ff = _linear(ff, w["w2"][l], w["bf2"][l])
        x = _layernorm(x + ff, w["g2"][l], w["b2"][l])
    x = _layernorm(x, gn_ref[...], bn_ref[...])       # final encoder norm
    o_ref[...] = x.astype(o_ref.dtype)                # bf16 boundary activation


def _decoder_kernel(*refs, num_layers, num_heads, head_dim, batch, seq_t,
                    seq_s, emb_scale, causal):
    nw = len(DEC_WKEYS)
    x_ref, pe_ref, mem_ref = refs[0], refs[1], refs[2]
    w = dict(zip(DEC_WKEYS, refs[3:3 + nw]))
    gn_ref, bn_ref = refs[3 + nw], refs[4 + nw]
    ow_ref, ob_ref = refs[5 + nw], refs[6 + nw]
    o_ref = refs[7 + nw]
    D = num_heads * head_dim
    H = num_heads

    x = x_ref[...] * emb_scale + pe_ref[...]
    mem = mem_ref[...].astype(jnp.float32)

    # Causal mask generated in-kernel (no mask DMA), hoisted out of the loop.
    # TODO(synk): arbitrary float tgt_mask / key-padding masks not supported.
    bias = None
    if causal:
        rows = jax.lax.broadcasted_iota(jnp.int32, (H, seq_t, seq_t), 1)
        cols = jax.lax.broadcasted_iota(jnp.int32, (H, seq_t, seq_t), 2)
        bias = jnp.where(cols > rows, jnp.float32(-1e9), jnp.float32(0.0))

    for l in range(num_layers):
        a = _mha(x, x, w["sa_wq"][l], w["sa_wk"][l], w["sa_wv"][l],
                 w["sa_bq"][l], w["sa_bk"][l], w["sa_bv"][l],
                 w["sa_wo"][l], w["sa_bo"][l],
                 B=batch, Sq=seq_t, Sk=seq_t, H=H, D=D, bias=bias)
        x = _layernorm(x + a, w["g1"][l], w["b1"][l])
        a = _mha(x, mem, w["ca_wq"][l], w["ca_wk"][l], w["ca_wv"][l],
                 w["ca_bq"][l], w["ca_bk"][l], w["ca_bv"][l],
                 w["ca_wo"][l], w["ca_bo"][l],
                 B=batch, Sq=seq_t, Sk=seq_s, H=H, D=D, bias=None)
        x = _layernorm(x + a, w["g2"][l], w["b2"][l])
        ff = jnp.maximum(_linear(x, w["w1"][l], w["bf1"][l]), 0.0)
        ff = _linear(ff, w["w2"][l], w["bf2"][l])
        x = _layernorm(x + ff, w["g3"][l], w["b3"][l])
    x = _layernorm(x, gn_ref[...], bn_ref[...])       # final decoder norm
    o_ref[...] = _linear(x, ow_ref[...], ob_ref[...])  # fused output projection


# ----------------------------------------------------------------------------
# pallas_call wrappers (no grid: whole arrays in VMEM; everything fits easily)
# ----------------------------------------------------------------------------

def run_encoder(x_emb, pe_rows, enc, enc_norm, *, B, S, num_heads, emb_scale):
    D = x_emb.shape[1]
    L = enc[ENC_WKEYS[0]].shape[0]
    ops = ([x_emb, pe_rows] + [enc[k] for k in ENC_WKEYS]
           + [enc_norm["g"], enc_norm["b"]])
    return pl.pallas_call(
        functools.partial(_encoder_kernel, num_layers=L, num_heads=num_heads,
                          head_dim=D // num_heads, batch=B, seq=S,
                          emb_scale=emb_scale),
        out_shape=jax.ShapeDtypeStruct((B * S, D), MXU_DTYPE),
    )(*ops)


def run_decoder(x_emb, pe_rows, memory, dec, dec_norm, out_w, out_b, *,
                B, S_t, S_s, num_heads, emb_scale, causal):
    D = x_emb.shape[1]
    V = out_w.shape[1]
    L = dec[DEC_WKEYS[0]].shape[0]
    ops = ([x_emb, pe_rows, memory] + [dec[k] for k in DEC_WKEYS]
           + [dec_norm["g"], dec_norm["b"], out_w, out_b])
    return pl.pallas_call(
        functools.partial(_decoder_kernel, num_layers=L, num_heads=num_heads,
                          head_dim=D // num_heads, batch=B, seq_t=S_t,
                          seq_s=S_s, emb_scale=emb_scale, causal=causal),
        out_shape=jax.ShapeDtypeStruct((B * S_t, V), jnp.float32),
    )(*ops)


# ----------------------------------------------------------------------------
# Parameters: PyTorch-layout init + one-time kernel-ready preparation
# ----------------------------------------------------------------------------

def make_positional_encoding(max_len, d_model):
    position = jnp.arange(max_len, dtype=jnp.float32)[:, None]
    div_term = jnp.exp(jnp.arange(0, d_model, 2, dtype=jnp.float32)
                       * (-math.log(10000.0) / d_model))
    pe = jnp.zeros((max_len, d_model), dtype=jnp.float32)
    pe = pe.at[:, 0::2].set(jnp.sin(position * div_term))
    pe = pe.at[:, 1::2].set(jnp.cos(position * div_term))
    return pe                                            # (max_len, d_model)


def init_raw_params(key, input_dim, output_dim, d_model,
                    num_encoder_layers, num_decoder_layers, dim_feedforward):
    keys = iter(jax.random.split(key, 256))

    def dense(shape, scale=0.02):
        return scale * jax.random.normal(next(keys), shape, dtype=jnp.float32)

    def mha():
        return dict(wq=dense((d_model, d_model)), bq=jnp.zeros((d_model,)),
                    wk=dense((d_model, d_model)), bk=jnp.zeros((d_model,)),
                    wv=dense((d_model, d_model)), bv=jnp.zeros((d_model,)),
                    wo=dense((d_model, d_model)), bo=jnp.zeros((d_model,)))

    def ffn():
        return dict(w1=dense((dim_feedforward, d_model)),
                    b1=jnp.zeros((dim_feedforward,)),
                    w2=dense((d_model, dim_feedforward)),
                    b2=jnp.zeros((d_model,)))

    def ln():
        return dict(g=jnp.ones((d_model,)), b=jnp.zeros((d_model,)))

    return dict(
        embed_src=dense((input_dim, d_model), 1.0),
        embed_tgt=dense((output_dim, d_model), 1.0),
        enc_layers=[dict(attn=mha(), ffn=ffn(), ln1=ln(), ln2=ln())
                    for _ in range(num_encoder_layers)],
        enc_norm=ln(),
        dec_layers=[dict(self_attn=mha(), cross_attn=mha(), ffn=ffn(),
                         ln1=ln(), ln2=ln(), ln3=ln())
                    for _ in range(num_decoder_layers)],
        dec_norm=ln(),
        out_w=dense((output_dim, d_model)),
        out_b=jnp.zeros((output_dim,)),
    )


def prepare_params(raw, num_heads, max_seq_length):
    """One-time conversion from PyTorch (out,in) layout to kernel layout:
    per-head split (H, D, Dh)/(H, Dh, D), 1/sqrt(Dh) folded into Wq/bq,
    bf16 MXU operands, (1, N) biases/LN params, layers stacked along L."""
    d_model = raw["embed_src"].shape[1]
    assert d_model % num_heads == 0
    head_dim = d_model // num_heads
    inv_scale = 1.0 / math.sqrt(head_dim)

    def row(b):
        return b.reshape(1, -1).astype(jnp.float32)

    def heads_in(w):     # (out=D, in=D) -> (H, D, Dh) so x @ Wh gives head h
        return jnp.transpose(w.reshape(num_heads, head_dim, d_model),
                             (0, 2, 1))

    def heads_out(w):    # (out=D, in=D) -> (H, Dh, D): per-head out-projection
        return jnp.transpose(w).reshape(num_heads, head_dim, d_model)

    def head_bias(b):    # (D,) -> (H, 1, Dh)
        return b.reshape(num_heads, 1, head_dim).astype(jnp.float32)

    def ln(p):
        return dict(g=row(p["g"]), b=row(p["b"]))

    def attn_block(a, prefix=""):
        return {
            prefix + "wq": (heads_in(a["wq"]) * inv_scale).astype(MXU_DTYPE),
            prefix + "wk": heads_in(a["wk"]).astype(MXU_DTYPE),
            prefix + "wv": heads_in(a["wv"]).astype(MXU_DTYPE),
            prefix + "bq": head_bias(a["bq"]) * inv_scale,
            prefix + "bk": head_bias(a["bk"]),
            prefix + "bv": head_bias(a["bv"]),
            prefix + "wo": heads_out(a["wo"]).astype(MXU_DTYPE),
            prefix + "bo": row(a["bo"]),
        }

    def ffn_block(f):
        return dict(w1=jnp.transpose(f["w1"]).astype(MXU_DTYPE),
                    bf1=row(f["b1"]),
                    w2=jnp.transpose(f["w2"]).astype(MXU_DTYPE),
                    bf2=row(f["b2"]))

    def enc_layer(p):
        d = attn_block(p["attn"])
        d.update(ffn_block(p["ffn"]))
        d.update(g1=row(p["ln1"]["g"]), b1=row(p["ln1"]["b"]),
                 g2=row(p["ln2"]["g"]), b2=row(p["ln2"]["b"]))
        return d

    def dec_layer(p):
        d = attn_block(p["self_attn"], "sa_")
        d.update(attn_block(p["cross_attn"], "ca_"))
        d.update(ffn_block(p["ffn"]))
        d.update(g1=row(p["ln1"]["g"]), b1=row(p["ln1"]["b"]),
                 g2=row(p["ln2"]["g"]), b2=row(p["ln2"]["b"]),
                 g3=row(p["ln3"]["g"]), b3=row(p["ln3"]["b"]))
        return d

    def stack(layer_dicts, keys):
        return {k: jnp.stack([d[k] for d in layer_dicts], axis=0)
                for k in keys}

    return dict(
        embed_src=raw["embed_src"].astype(jnp.float32),
        embed_tgt=raw["embed_tgt"].astype(jnp.float32),
        pe=make_positional_encoding(max_seq_length, d_model),
        enc=stack([enc_layer(p) for p in raw["enc_layers"]], ENC_WKEYS),
        enc_norm=ln(raw["enc_norm"]),
        dec=stack([dec_layer(p) for p in raw["dec_layers"]], DEC_WKEYS),
        dec_norm=ln(raw["dec_norm"]),
        out_w=jnp.transpose(raw["out_w"]).astype(MXU_DTYPE),
        out_b=row(raw["out_b"]),
    )


# ----------------------------------------------------------------------------
# Forward pass (jitted; thin XLA glue around the two fused stack kernels)
# ----------------------------------------------------------------------------

def transformer_forward(prep, src, tgt, *, num_heads, causal_tgt_mask=True):
    """src, tgt: (S, B) int32 tokens (sequence-first, as in nn.Transformer).
    Returns (S_tgt, B, output_dim) f32 logits.  Eval mode."""
    d_model = prep["embed_src"].shape[1]
    S_src, B = src.shape
    S_tgt = tgt.shape[0]
    emb_scale = math.sqrt(d_model)

    # Embedding gather stays in XLA (data-dependent row gather).  Activations
    # run batch-major (B*S, D) so the kernel sees contiguous sequences.
    # TODO(synk): src_mask / *_key_padding_mask arguments are not supported.
    src_e = prep["embed_src"][src.T].reshape(B * S_src, d_model)
    tgt_e = prep["embed_tgt"][tgt.T].reshape(B * S_tgt, d_model)
    pe_src = jnp.tile(prep["pe"][:S_src], (B, 1))
    pe_tgt = jnp.tile(prep["pe"][:S_tgt], (B, 1))

    memory = run_encoder(src_e, pe_src, prep["enc"], prep["enc_norm"],
                         B=B, S=S_src, num_heads=num_heads,
                         emb_scale=emb_scale)
    logits = run_decoder(tgt_e, pe_tgt, memory, prep["dec"], prep["dec_norm"],
                         prep["out_w"], prep["out_b"],
                         B=B, S_t=S_tgt, S_s=S_src, num_heads=num_heads,
                         emb_scale=emb_scale, causal=causal_tgt_mask)
    V = prep["out_w"].shape[1]
    return logits.reshape(B, S_tgt, V).transpose(1, 0, 2)   # (S_tgt, B, V)


# ----------------------------------------------------------------------------
# Driver
# ----------------------------------------------------------------------------

if __name__ == "__main__":
    input_dim = 16        # src vocab
    output_dim = 16       # tgt vocab
    d_model = 32
    num_heads = 4
    num_encoder_layers = 2
    num_decoder_layers = 2
    dim_feedforward = 64
    max_seq_length = 100
    S_src, S_tgt, B = 8, 8, 2

    key = jax.random.PRNGKey(0)
    kp, ks, kt = jax.random.split(key, 3)

    raw = init_raw_params(kp, input_dim, output_dim, d_model,
                          num_encoder_layers, num_decoder_layers,
                          dim_feedforward)
    prep = prepare_params(raw, num_heads, max_seq_length)

    src = jax.random.randint(ks, (S_src, B), 0, input_dim, dtype=jnp.int32)
    tgt = jax.random.randint(kt, (S_tgt, B), 0, output_dim, dtype=jnp.int32)

    # tgt_mask = generate_square_subsequent_mask equivalent, built in-kernel.
    fwd = jax.jit(functools.partial(transformer_forward, num_heads=num_heads,
                                    causal_tgt_mask=True))
    out = jax.block_until_ready(fwd(prep, src, tgt))

    assert out.shape == (S_tgt, B, output_dim), out.shape
    assert bool(jnp.all(jnp.isfinite(out)))
    print("KERNEL_OK")
</pallas_src>

<mosaic_0001>
module attributes {stable_mosaic.version = 11 : i64} {
  func.func @_encoder_kernel(%arg0: memref<16x32xf32, #tpu.memory_space<vmem>>, %arg1: memref<16x32xf32, #tpu.memory_space<vmem>>, %arg2: memref<2x4x32x8xbf16, #tpu.memory_space<vmem>>, %arg3: memref<2x4x32x8xbf16, #tpu.memory_space<vmem>>, %arg4: memref<2x4x32x8xbf16, #tpu.memory_space<vmem>>, %arg5: memref<2x4x1x8xf32, #tpu.memory_space<vmem>>, %arg6: memref<2x4x1x8xf32, #tpu.memory_space<vmem>>, %arg7: memref<2x4x1x8xf32, #tpu.memory_space<vmem>>, %arg8: memref<2x4x8x32xbf16, #tpu.memory_space<vmem>>, %arg9: memref<2x1x32xf32, #tpu.memory_space<vmem>>, %arg10: memref<2x1x32xf32, #tpu.memory_space<vmem>>, %arg11: memref<2x1x32xf32, #tpu.memory_space<vmem>>, %arg12: memref<2x32x64xbf16, #tpu.memory_space<vmem>>, %arg13: memref<2x1x64xf32, #tpu.memory_space<vmem>>, %arg14: memref<2x64x32xbf16, #tpu.memory_space<vmem>>, %arg15: memref<2x1x32xf32, #tpu.memory_space<vmem>>, %arg16: memref<2x1x32xf32, #tpu.memory_space<vmem>>, %arg17: memref<2x1x32xf32, #tpu.memory_space<vmem>>, %arg18: memref<1x32xf32, #tpu.memory_space<vmem>>, %arg19: memref<1x32xf32, #tpu.memory_space<vmem>>, %arg20: memref<16x32xbf16, #tpu.memory_space<vmem>>) attributes {dimension_semantics = [], scalar_prefetch = 0 : i64, scratch_operands = 0 : i64, tpu.core_type = #tpu.core_type<tc>} {
    %c0 = arith.constant 0 : index
    %c0_0 = arith.constant 0 : index
    %0 = vector.load %arg0[%c0, %c0_0] : memref<16x32xf32, #tpu.memory_space<vmem>>, vector<16x32xf32>
    %cst = arith.constant 5.65685415 : f32
    %1 = vector.broadcast %cst : f32 to vector<16x32xf32>
    %2 = arith.mulf %0, %1 : vector<16x32xf32>
    %c0_1 = arith.constant 0 : index
    %c0_2 = arith.constant 0 : index
    %3 = vector.load %arg1[%c0_1, %c0_2] : memref<16x32xf32, #tpu.memory_space<vmem>>, vector<16x32xf32>
    %4 = arith.addf %2, %3 : vector<16x32xf32>
    %c0_3 = arith.constant 0 : index
    %c0_4 = arith.constant 0 : index
    %c0_5 = arith.constant 0 : index
    %c0_6 = arith.constant 0 : index
    %5 = vector.load %arg2[%c0_3, %c0_4, %c0_5, %c0_6] : memref<2x4x32x8xbf16, #tpu.memory_space<vmem>>, vector<1x4x32x8xbf16>
    %6 = vector.shape_cast %5 : vector<1x4x32x8xbf16> to vector<4x32x8xbf16>
    %c0_7 = arith.constant 0 : index
    %c0_8 = arith.constant 0 : index
    %c0_9 = arith.constant 0 : index
    %c0_10 = arith.constant 0 : index
    %7 = vector.load %arg3[%c0_7, %c0_8, %c0_9, %c0_10] : memref<2x4x32x8xbf16, #tpu.memory_space<vmem>>, vector<1x4x32x8xbf16>
    %8 = vector.shape_cast %7 : vector<1x4x32x8xbf16> to vector<4x32x8xbf16>
    %c0_11 = arith.constant 0 : index
    %c0_12 = arith.constant 0 : index
    %c0_13 = arith.constant 0 : index
    %c0_14 = arith.constant 0 : index
    %9 = vector.load %arg4[%c0_11, %c0_12, %c0_13, %c0_14] : memref<2x4x32x8xbf16, #tpu.memory_space<vmem>>, vector<1x4x32x8xbf16>
    %10 = vector.shape_cast %9 : vector<1x4x32x8xbf16> to vector<4x32x8xbf16>
    %c0_15 = arith.constant 0 : index
    %c0_16 = arith.constant 0 : index
    %c0_17 = arith.constant 0 : index
    %c0_18 = arith.constant 0 : index
    %11 = vector.load %arg5[%c0_15, %c0_16, %c0_17, %c0_18] : memref<2x4x1x8xf32, #tpu.memory_space<vmem>>, vector<1x4x1x8xf32>
    %12 = vector.shape_cast %11 : vector<1x4x1x8xf32> to vector<4x1x8xf32>
    %c0_19 = arith.constant 0 : index
    %c0_20 = arith.constant 0 : index
    %c0_21 = arith.constant 0 : index
    %c0_22 = arith.constant 0 : index
    %13 = vector.load %arg6[%c0_19, %c0_20, %c0_21, %c0_22] : memref<2x4x1x8xf32, #tpu.memory_space<vmem>>, vector<1x4x1x8xf32>
    %14 = vector.shape_cast %13 : vector<1x4x1x8xf32> to vector<4x1x8xf32>
    %c0_23 = arith.constant 0 : index
    %c0_24 = arith.constant 0 : index
    %c0_25 = arith.constant 0 : index
    %c0_26 = arith.constant 0 : index
    %15 = vector.load %arg7[%c0_23, %c0_24, %c0_25, %c0_26] : memref<2x4x1x8xf32, #tpu.memory_space<vmem>>, vector<1x4x1x8xf32>
    %16 = vector.shape_cast %15 : vector<1x4x1x8xf32> to vector<4x1x8xf32>
    %c0_27 = arith.constant 0 : index
    %c0_28 = arith.constant 0 : index
    %c0_29 = arith.constant 0 : index
    %c0_30 = arith.constant 0 : index
    %17 = vector.load %arg8[%c0_27, %c0_28, %c0_29, %c0_30] : memref<2x4x8x32xbf16, #tpu.memory_space<vmem>>, vector<1x4x8x32xbf16>
    %18 = vector.shape_cast %17 : vector<1x4x8x32xbf16> to vector<4x8x32xbf16>
    %c0_31 = arith.constant 0 : index
    %c0_32 = arith.constant 0 : index
    %c0_33 = arith.constant 0 : index
    %19 = vector.load %arg9[%c0_31, %c0_32, %c0_33] : memref<2x1x32xf32, #tpu.memory_space<vmem>>, vector<1x1x32xf32>
    %20 = vector.shape_cast %19 : vector<1x1x32xf32> to vector<1x32xf32>
    %21 = vector.extract_strided_slice %4 {offsets = [0, 0], sizes = [8, 32], strides = [1, 1]} : vector<16x32xf32> to vector<8x32xf32>
    %22 = arith.truncf %21 : vector<8x32xf32> to vector<8x32xbf16>
    %23 = vector.shape_cast %22 : vector<8x32xbf16> to vector<1x8x32xbf16>
    %24 = vector.broadcast %23 : vector<1x8x32xbf16> to vector<4x8x32xbf16>
    %25 = vector.extract_strided_slice %4 {offsets = [0, 0], sizes = [8, 32], strides = [1, 1]} : vector<16x32xf32> to vector<8x32xf32>
    %26 = arith.truncf %25 : vector<8x32xf32> to vector<8x32xbf16>
    %27 = vector.shape_cast %26 : vector<8x32xbf16> to vector<1x8x32xbf16>
    %28 = vector.broadcast %27 : vector<1x8x32xbf16> to vector<4x8x32xbf16>
    "tpu.trace_start"() <{level = 10 : i32, message = "hsd,hde->hse"}> : () -> ()
    %cst_34 = arith.constant dense<0.000000e+00> : vector<4x8x8xf32>
    %29 = tpu.matmul %24, %6, %cst_34 {dimension_numbers = #tpu.dot_dimension_numbers<[2], [1], [1], [2], [0, 0, 0, 1, 1, 2], [0], [0]>} : vector<4x8x32xbf16>, vector<4x32x8xbf16>, vector<4x8x8xf32> -> vector<4x8x8xf32>
    "tpu.trace_stop"() : () -> ()
    %30 = vector.broadcast %12 : vector<4x1x8xf32> to vector<4x8x8xf32>
    %31 = arith.addf %29, %30 : vector<4x8x8xf32>
    "tpu.trace_start"() <{level = 10 : i32, message = "hsd,hde->hse"}> : () -> ()
    %cst_35 = arith.constant dense<0.000000e+00> : vector<4x8x8xf32>
    %32 = tpu.matmul %28, %8, %cst_35 {dimension_numbers = #tpu.dot_dimension_numbers<[2], [1], [1], [2], [0, 0, 0, 1, 1, 2], [0], [0]>} : vector<4x8x32xbf16>, vector<4x32x8xbf16>, vector<4x8x8xf32> -> vector<4x8x8xf32>
    "tpu.trace_stop"() : () -> ()
    %33 = vector.broadcast %14 : vector<4x1x8xf32> to vector<4x8x8xf32>
    %34 = arith.addf %32, %33 : vector<4x8x8xf32>
    "tpu.trace_start"() <{level = 10 : i32, message = "hsd,hde->hse"}> : () -> ()
    %cst_36 = arith.constant dense<0.000000e+00> : vector<4x8x8xf32>
    %35 = tpu.matmul %28, %10, %cst_36 {dimension_numbers = #tpu.dot_dimension_numbers<[2], [1], [1], [2], [0, 0, 0, 1, 1, 2], [0], [0]>} : vector<4x8x32xbf16>, vector<4x32x8xbf16>, vector<4x8x8xf32> -> vector<4x8x8xf32>
    "tpu.trace_stop"() : () -> ()
    %36 = vector.broadcast %16 : vector<4x1x8xf32> to vector<4x8x8xf32>
    %37 = arith.addf %35, %36 : vector<4x8x8xf32>
    %38 = arith.truncf %31 : vector<4x8x8xf32> to vector<4x8x8xbf16>
    %39 = arith.truncf %34 : vector<4x8x8xf32> to vector<4x8x8xbf16>
    "tpu.trace_start"() <{level = 10 : i32, message = "hqe,hke->hqk"}> : () -> ()
    %cst_37 = arith.constant dense<0.000000e+00> : vector<4x8x8xf32>
    %40 = tpu.matmul %38, %39, %cst_37 {dimension_numbers = #tpu.dot_dimension_numbers<[2], [2], [1], [1], [0, 0, 0, 1, 1, 1], [0], [0]>} : vector<4x8x8xbf16>, vector<4x8x8xbf16>, vector<4x8x8xf32> -> vector<4x8x8xf32>
    "tpu.trace_stop"() : () -> ()
    %cst_38 = arith.constant dense<0xFF800000> : vector<4x8xf32>
    %41 = vector.multi_reduction <maximumf>, %40, %cst_38 [2] : vector<4x8x8xf32> to vector<4x8xf32>
    %42 = vector.shape_cast %41 : vector<4x8xf32> to vector<4x8x1xf32>
    %43 = vector.broadcast %42 : vector<4x8x1xf32> to vector<4x8x8xf32>
    %44 = arith.subf %40, %43 : vector<4x8x8xf32>
    %45 = math.exp %44 : vector<4x8x8xf32>
    %cst_39 = arith.constant dense<0.000000e+00> : vector<4x8xf32>
    %46 = vector.multi_reduction <add>, %45, %cst_39 [2] : vector<4x8x8xf32> to vector<4x8xf32>
    %47 = vector.shape_cast %46 : vector<4x8xf32> to vector<4x8x1xf32>
    %48 = tpu.reciprocal %47 {approx = true} : vector<4x8x1xf32> -> vector<4x8x1xf32>
    %49 = vector.broadcast %48 : vector<4x8x1xf32> to vector<4x8x8xf32>
    %50 = arith.mulf %45, %49 : vector<4x8x8xf32>
    %51 = arith.truncf %50 : vector<4x8x8xf32> to vector<4x8x8xbf16>
    %52 = arith.truncf %37 : vector<4x8x8xf32> to vector<4x8x8xbf16>
    "tpu.trace_start"() <{level = 10 : i32, message = "hqk,hke->hqe"}> : () -> ()
    %cst_40 = arith.constant dense<0.000000e+00> : vector<4x8x8xf32>
    %53 = tpu.matmul %51, %52, %cst_40 {dimension_numbers = #tpu.dot_dimension_numbers<[2], [1], [1], [2], [0, 0, 0, 1, 1, 2], [0], [0]>} : vector<4x8x8xbf16>, vector<4x8x8xbf16>, vector<4x8x8xf32> -> vector<4x8x8xf32>
    "tpu.trace_stop"() : () -> ()
    %54 = arith.truncf %53 : vector<4x8x8xf32> to vector<4x8x8xbf16>
    "tpu.trace_start"() <{level = 10 : i32, message = "hse,hef->hsf"}> : () -> ()
    %cst_41 = arith.constant dense<0.000000e+00> : vector<4x8x32xf32>
    %55 = tpu.matmul %54, %18, %cst_41 {dimension_numbers = #tpu.dot_dimension_numbers<[2], [1], [1], [2], [0, 0, 0, 1, 1, 2], [0], [0]>} : vector<4x8x8xbf16>, vector<4x8x32xbf16>, vector<4x8x32xf32> -> vector<4x8x32xf32>
    "tpu.trace_stop"() : () -> ()
    %56 = vector.extract_strided_slice %55 {offsets = [0, 0, 0], sizes = [1, 8, 32], strides = [1, 1, 1]} : vector<4x8x32xf32> to vector<1x8x32xf32>
    %57 = vector.shape_cast %56 : vector<1x8x32xf32> to vector<8x32xf32>
    %58 = vector.extract_strided_slice %55 {offsets = [1, 0, 0], sizes = [1, 8, 32], strides = [1, 1, 1]} : vector<4x8x32xf32> to vector<1x8x32xf32>
    %59 = vector.shape_cast %58 : vector<1x8x32xf32> to vector<8x32xf32>
    %60 = arith.addf %57, %59 : vector<8x32xf32>
    %61 = vector.extract_strided_slice %55 {offsets = [2, 0, 0], sizes = [1, 8, 32], strides = [1, 1, 1]} : vector<4x8x32xf32> to vector<1x8x32xf32>
    %62 = vector.shape_cast %61 : vector<1x8x32xf32> to vector<8x32xf32>
    %63 = arith.addf %60, %62 : vector<8x32xf32>
    %64 = vector.extract_strided_slice %55 {offsets = [3, 0, 0], sizes = [1, 8, 32], strides = [1, 1, 1]} : vector<4x8x32xf32> to vector<1x8x32xf32>
    %65 = vector.shape_cast %64 : vector<1x8x32xf32> to vector<8x32xf32>
    %66 = arith.addf %63, %65 : vector<8x32xf32>
    %67 = vector.broadcast %20 : vector<1x32xf32> to vector<8x32xf32>
    %68 = arith.addf %66, %67 : vector<8x32xf32>
    %69 = vector.extract_strided_slice %4 {offsets = [8, 0], sizes = [8, 32], strides = [1, 1]} : vector<16x32xf32> to vector<8x32xf32>
    %70 = arith.truncf %69 : vector<8x32xf32> to vector<8x32xbf16>
    %71 = vector.shape_cast %70 : vector<8x32xbf16> to vector<1x8x32xbf16>
    %72 = vector.broadcast %71 : vector<1x8x32xbf16> to vector<4x8x32xbf16>
    %73 = vector.extract_strided_slice %4 {offsets = [8, 0], sizes = [8, 32], strides = [1, 1]} : vector<16x32xf32> to vector<8x32xf32>
    %74 = arith.truncf %73 : vector<8x32xf32> to vector<8x32xbf16>
    %75 = vector.shape_cast %74 : vector<8x32xbf16> to vector<1x8x32xbf16>
    %76 = vector.broadcast %75 : vector<1x8x32xbf16> to vector<4x8x32xbf16>
    "tpu.trace_start"() <{level = 10 : i32, message = "hsd,hde->hse"}> : () -> ()
    %cst_42 = arith.constant dense<0.000000e+00> : vector<4x8x8xf32>
    %77 = tpu.matmul %72, %6, %cst_42 {dimension_numbers = #tpu.dot_dimension_numbers<[2], [1], [1], [2], [0, 0, 0, 1, 1, 2], [0], [0]>} : vector<4x8x32xbf16>, vector<4x32x8xbf16>, vector<4x8x8xf32> -> vector<4x8x8xf32>
    "tpu.trace_stop"() : () -> ()
    %78 = vector.broadcast %12 : vector<4x1x8xf32> to vector<4x8x8xf32>
    %79 = arith.addf %77, %78 : vector<4x8x8xf32>
    "tpu.trace_start"() <{level = 10 : i32, message = "hsd,hde->hse"}> : () -> ()
    %cst_43 = arith.constant dense<0.000000e+00> : vector<4x8x8xf32>
    %80 = tpu.matmul %76, %8, %cst_43 {dimension_numbers = #tpu.dot_dimension_numbers<[2], [1], [1], [2], [0, 0, 0, 1, 1, 2], [0], [0]>} : vector<4x8x32xbf16>, vector<4x32x8xbf16>, vector<4x8x8xf32> -> vector<4x8x8xf32>
    "tpu.trace_stop"() : () -> ()
    %81 = vector.broadcast %14 : vector<4x1x8xf32> to vector<4x8x8xf32>
    %82 = arith.addf %80, %81 : vector<4x8x8xf32>
    "tpu.trace_start"() <{level = 10 : i32, message = "hsd,hde->hse"}> : () -> ()
    %cst_44 = arith.constant dense<0.000000e+00> : vector<4x8x8xf32>
    %83 = tpu.matmul %76, %10, %cst_44 {dimension_numbers = #tpu.dot_dimension_numbers<[2], [1], [1], [2], [0, 0, 0, 1, 1, 2], [0], [0]>} : vector<4x8x32xbf16>, vector<4x32x8xbf16>, vector<4x8x8xf32> -> vector<4x8x8xf32>
    "tpu.trace_stop"() : () -> ()
    %84 = vector.broadcast %16 : vector<4x1x8xf32> to vector<4x8x8xf32>
    %85 = arith.addf %83, %84 : vector<4x8x8xf32>
    %86 = arith.truncf %79 : vector<4x8x8xf32> to vector<4x8x8xbf16>
    %87 = arith.truncf %82 : vector<4x8x8xf32> to vector<4x8x8xbf16>
    "tpu.trace_start"() <{level = 10 : i32, message = "hqe,hke->hqk"}> : () -> ()
    %cst_45 = arith.constant dense<0.000000e+00> : vector<4x8x8xf32>
    %88 = tpu.matmul %86, %87, %cst_45 {dimension_numbers = #tpu.dot_dimension_numbers<[2], [2], [1], [1], [0, 0, 0, 1, 1, 1], [0], [0]>} : vector<4x8x8xbf16>, vector<4x8x8xbf16>, vector<4x8x8xf32> -> vector<4x8x8xf32>
    "tpu.trace_stop"() : () -> ()
    %cst_46 = arith.constant dense<0xFF800000> : vector<4x8xf32>
    %89 = vector.multi_reduction <maximumf>, %88, %cst_46 [2] : vector<4x8x8xf32> to vector<4x8xf32>
    %90 = vector.shape_cast %89 : vector<4x8xf32> to vector<4x8x1xf32>
    %91 = vector.broadcast %90 : vector<4x8x1xf32> to vector<4x8x8xf32>
    %92 = arith.subf %88, %91 : vector<4x8x8xf32>
    %93 = math.exp %92 : vector<4x8x8xf32>
    %cst_47 = arith.constant dense<0.000000e+00> : vector<4x8xf32>
    %94 = vector.multi_reduction <add>, %93, %cst_47 [2] : vector<4x8x8xf32> to vector<4x8xf32>
    %95 = vector.shape_cast %94 : vector<4x8xf32> to vector<4x8x1xf32>
    %96 = tpu.reciprocal %95 {approx = true} : vector<4x8x1xf32> -> vector<4x8x1xf32>
    %97 = vector.broadcast %96 : vector<4x8x1xf32> to vector<4x8x8xf32>
    %98 = arith.mulf %93, %97 : vector<4x8x8xf32>
    %99 = arith.truncf %98 : vector<4x8x8xf32> to vector<4x8x8xbf16>
    %100 = arith.truncf %85 : vector<4x8x8xf32> to vector<4x8x8xbf16>
    "tpu.trace_start"() <{level = 10 : i32, message = "hqk,hke->hqe"}> : () -> ()
    %cst_48 = arith.constant dense<0.000000e+00> : vector<4x8x8xf32>
    %101 = tpu.matmul %99, %100, %cst_48 {dimension_numbers = #tpu.dot_dimension_numbers<[2], [1], [1], [2], [0, 0, 0, 1, 1, 2], [0], [0]>} : vector<4x8x8xbf16>, vector<4x8x8xbf16>, vector<4x8x8xf32> -> vector<4x8x8xf32>
    "tpu.trace_stop"() : () -> ()
    %102 = arith.truncf %101 : vector<4x8x8xf32> to vector<4x8x8xbf16>
    "tpu.trace_start"() <{level = 10 : i32, message = "hse,hef->hsf"}> : () -> ()
    %cst_49 = arith.constant dense<0.000000e+00> : vector<4x8x32xf32>
    %103 = tpu.matmul %102, %18, %cst_49 {dimension_numbers = #tpu.dot_dimension_numbers<[2], [1], [1], [2], [0, 0, 0, 1, 1, 2], [0], [0]>} : vector<4x8x8xbf16>, vector<4x8x32xbf16>, vector<4x8x32xf32> -> vector<4x8x32xf32>
    "tpu.trace_stop"() : () -> ()
    %104 = vector.extract_strided_slice %103 {offsets = [0, 0, 0], sizes = [1, 8, 32], strides = [1, 1, 1]} : vector<4x8x32xf32> to vector<1x8x32xf32>
    %105 = vector.shape_cast %104 : vector<1x8x32xf32> to vector<8x32xf32>
    %106 = vector.extract_strided_slice %103 {offsets = [1, 0, 0], sizes = [1, 8, 32], strides = [1, 1, 1]} : vector<4x8x32xf32> to vector<1x8x32xf32>
    %107 = vector.shape_cast %106 : vector<1x8x32xf32> to vector<8x32xf32>
    %108 = arith.addf %105, %107 : vector<8x32xf32>
    %109 = vector.extract_strided_slice %103 {offsets = [2, 0, 0], sizes = [1, 8, 32], strides = [1, 1, 1]} : vector<4x8x32xf32> to vector<1x8x32xf32>
    %110 = vector.shape_cast %109 : vector<1x8x32xf32> to vector<8x32xf32>
    %111 = arith.addf %108, %110 : vector<8x32xf32>
    %112 = vector.extract_strided_slice %103 {offsets = [3, 0, 0], sizes = [1, 8, 32], strides = [1, 1, 1]} : vector<4x8x32xf32> to vector<1x8x32xf32>
    %113 = vector.shape_cast %112 : vector<1x8x32xf32> to vector<8x32xf32>
    %114 = arith.addf %111, %113 : vector<8x32xf32>
    %115 = vector.broadcast %20 : vector<1x32xf32> to vector<8x32xf32>
    %116 = arith.addf %114, %115 : vector<8x32xf32>
    %117 = tpu.concatenate %68, %116 in 0 : vector<8x32xf32>, vector<8x32xf32> -> vector<16x32xf32>
    %118 = arith.addf %4, %117 : vector<16x32xf32>
    %c0_50 = arith.constant 0 : index
    %c0_51 = arith.constant 0 : index
    %c0_52 = arith.constant 0 : index
    %119 = vector.load %arg10[%c0_50, %c0_51, %c0_52] : memref<2x1x32xf32, #tpu.memory_space<vmem>>, vector<1x1x32xf32>
    %120 = vector.shape_cast %119 : vector<1x1x32xf32> to vector<1x32xf32>
    %c0_53 = arith.constant 0 : index
    %c0_54 = arith.constant 0 : index
    %c0_55 = arith.constant 0 : index
    %121 = vector.load %arg11[%c0_53, %c0_54, %c0_55] : memref<2x1x32xf32, #tpu.memory_space<vmem>>, vector<1x1x32xf32>
    %122 = vector.shape_cast %121 : vector<1x1x32xf32> to vector<1x32xf32>
    %cst_56 = arith.constant dense<0.000000e+00> : vector<16xf32>
    %123 = vector.multi_reduction <add>, %118, %cst_56 [1] : vector<16x32xf32> to vector<16xf32>
    %124 = vector.shape_cast %123 : vector<16xf32> to vector<16x1xf32>
    %cst_57 = arith.constant 3.200000e+01 : f32
    %125 = vector.broadcast %cst_57 : f32 to vector<16x1xf32>
    %126 = arith.divf %124, %125 : vector<16x1xf32>
    %127 = vector.broadcast %126 : vector<16x1xf32> to vector<16x32xf32>
    %128 = arith.subf %118, %127 : vector<16x32xf32>
    %129 = arith.mulf %128, %128 : vector<16x32xf32>
    %cst_58 = arith.constant dense<0.000000e+00> : vector<16xf32>
    %130 = vector.multi_reduction <add>, %129, %cst_58 [1] : vector<16x32xf32> to vector<16xf32>
    %131 = vector.shape_cast %130 : vector<16xf32> to vector<16x1xf32>
    %cst_59 = arith.constant 3.200000e+01 : f32
    %132 = vector.broadcast %cst_59 : f32 to vector<16x1xf32>
    %133 = arith.divf %131, %132 : vector<16x1xf32>
    %134 = vector.broadcast %126 : vector<16x1xf32> to vector<16x32xf32>
    %135 = arith.subf %118, %134 : vector<16x32xf32>
    %cst_60 = arith.constant 9.99999974E-6 : f32
    %136 = vector.broadcast %cst_60 : f32 to vector<16x1xf32>
    %137 = arith.addf %133, %136 : vector<16x1xf32>
    %138 = math.rsqrt %137 : vector<16x1xf32>
    %139 = vector.broadcast %138 : vector<16x1xf32> to vector<16x32xf32>
    %140 = arith.mulf %135, %139 : vector<16x32xf32>
    %141 = vector.broadcast %120 : vector<1x32xf32> to vector<16x32xf32>
    %142 = arith.mulf %140, %141 : vector<16x32xf32>
    %143 = vector.broadcast %122 : vector<1x32xf32> to vector<16x32xf32>
    %144 = arith.addf %142, %143 : vector<16x32xf32>
    %c0_61 = arith.constant 0 : index
    %c0_62 = arith.constant 0 : index
    %c0_63 = arith.constant 0 : index
    %145 = vector.load %arg12[%c0_61, %c0_62, %c0_63] : memref<2x32x64xbf16, #tpu.memory_space<vmem>>, vector<1x32x64xbf16>
    %146 = vector.shape_cast %145 : vector<1x32x64xbf16> to vector<32x64xbf16>
    %c0_64 = arith.constant 0 : index
    %c0_65 = arith.constant 0 : index
    %c0_66 = arith.constant 0 : index
    %147 = vector.load %arg13[%c0_64, %c0_65, %c0_66] : memref<2x1x64xf32, #tpu.memory_space<vmem>>, vector<1x1x64xf32>
    %148 = vector.shape_cast %147 : vector<1x1x64xf32> to vector<1x64xf32>
    %149 = arith.truncf %144 : vector<16x32xf32> to vector<16x32xbf16>
    %cst_67 = arith.constant dense<0.000000e+00> : vector<16x64xf32>
    %150 = tpu.matmul %149, %146, %cst_67 {dimension_numbers = #tpu.dot_dimension_numbers<[1], [0], [0], [1], [0, 0, 1, 1], [], []>} : vector<16x32xbf16>, vector<32x64xbf16>, vector<16x64xf32> -> vector<16x64xf32>
    %151 = vector.broadcast %148 : vector<1x64xf32> to vector<16x64xf32>
    %152 = arith.addf %150, %151 : vector<16x64xf32>
    %cst_68 = arith.constant 0.000000e+00 : f32
    %153 = vector.broadcast %cst_68 : f32 to vector<16x64xf32>
    %154 = arith.maximumf %152, %153 : vector<16x64xf32>
    %c0_69 = arith.constant 0 : index
    %c0_70 = arith.constant 0 : index
    %c0_71 = arith.constant 0 : index
    %155 = vector.load %arg14[%c0_69, %c0_70, %c0_71] : memref<2x64x32xbf16, #tpu.memory_space<vmem>>, vector<1x64x32xbf16>
    %156 = vector.shape_cast %155 : vector<1x64x32xbf16> to vector<64x32xbf16>
    %c0_72 = arith.constant 0 : index
    %c0_73 = arith.constant 0 : index
    %c0_74 = arith.constant 0 : index
    %157 = vector.load %arg15[%c0_72, %c0_73, %c0_74] : memref<2x1x32xf32, #tpu.memory_space<vmem>>, vector<1x1x32xf32>
    %158 = vector.shape_cast %157 : vector<1x1x32xf32> to vector<1x32xf32>
    %159 = arith.truncf %154 : vector<16x64xf32> to vector<16x64xbf16>
    %cst_75 = arith.constant dense<0.000000e+00> : vector<16x32xf32>
    %160 = tpu.matmul %159, %156, %cst_75 {dimension_numbers = #tpu.dot_dimension_numbers<[1], [0], [0], [1], [0, 0, 1, 1], [], []>} : vector<16x64xbf16>, vector<64x32xbf16>, vector<16x32xf32> -> vector<16x32xf32>
    %161 = vector.broadcast %158 : vector<1x32xf32> to vector<16x32xf32>
    %162 = arith.addf %160, %161 : vector<16x32xf32>
    %163 = arith.addf %144, %162 : vector<16x32xf32>
    %c0_76 = arith.constant 0 : index
    %c0_77 = arith.constant 0 : index
    %c0_78 = arith.constant 0 : index
    %164 = vector.load %arg16[%c0_76, %c0_77, %c0_78] : memref<2x1x32xf32, #tpu.memory_space<vmem>>, vector<1x1x32xf32>
    %165 = vector.shape_cast %164 : vector<1x1x32xf32> to vector<1x32xf32>
    %c0_79 = arith.constant 0 : index
    %c0_80 = arith.constant 0 : index
    %c0_81 = arith.constant 0 : index
    %166 = vector.load %arg17[%c0_79, %c0_80, %c0_81] : memref<2x1x32xf32, #tpu.memory_space<vmem>>, vector<1x1x32xf32>
    %167 = vector.shape_cast %166 : vector<1x1x32xf32> to vector<1x32xf32>
    %cst_82 = arith.constant dense<0.000000e+00> : vector<16xf32>
    %168 = vector.multi_reduction <add>, %163, %cst_82 [1] : vector<16x32xf32> to vector<16xf32>
    %169 = vector.shape_cast %168 : vector<16xf32> to vector<16x1xf32>
    %cst_83 = arith.constant 3.200000e+01 : f32
    %170 = vector.broadcast %cst_83 : f32 to vector<16x1xf32>
    %171 = arith.divf %169, %170 : vector<16x1xf32>
    %172 = vector.broadcast %171 : vector<16x1xf32> to vector<16x32xf32>
    %173 = arith.subf %163, %172 : vector<16x32xf32>
    %174 = arith.mulf %173, %173 : vector<16x32xf32>
    %cst_84 = arith.constant dense<0.000000e+00> : vector<16xf32>
    %175 = vector.multi_reduction <add>, %174, %cst_84 [1] : vector<16x32xf32> to vector<16xf32>
    %176 = vector.shape_cast %175 : vector<16xf32> to vector<16x1xf32>
    %cst_85 = arith.constant 3.200000e+01 : f32
    %177 = vector.broadcast %cst_85 : f32 to vector<16x1xf32>
    %178 = arith.divf %176, %177 : vector<16x1xf32>
    %179 = vector.broadcast %171 : vector<16x1xf32> to vector<16x32xf32>
    %180 = arith.subf %163, %179 : vector<16x32xf32>
    %cst_86 = arith.constant 9.99999974E-6 : f32
    %181 = vector.broadcast %cst_86 : f32 to vector<16x1xf32>
    %182 = arith.addf %178, %181 : vector<16x1xf32>
    %183 = math.rsqrt %182 : vector<16x1xf32>
    %184 = vector.broadcast %183 : vector<16x1xf32> to vector<16x32xf32>
    %185 = arith.mulf %180, %184 : vector<16x32xf32>
    %186 = vector.broadcast %165 : vector<1x32xf32> to vector<16x32xf32>
    %187 = arith.mulf %185, %186 : vector<16x32xf32>
    %188 = vector.broadcast %167 : vector<1x32xf32> to vector<16x32xf32>
    %189 = arith.addf %187, %188 : vector<16x32xf32>
    %c1 = arith.constant 1 : index
    %c0_87 = arith.constant 0 : index
    %c0_88 = arith.constant 0 : index
    %c0_89 = arith.constant 0 : index
    %190 = vector.load %arg2[%c1, %c0_87, %c0_88, %c0_89] : memref<2x4x32x8xbf16, #tpu.memory_space<vmem>>, vector<1x4x32x8xbf16>
    %191 = vector.shape_cast %190 : vector<1x4x32x8xbf16> to vector<4x32x8xbf16>
    %c1_90 = arith.constant 1 : index
    %c0_91 = arith.constant 0 : index
    %c0_92 = arith.constant 0 : index
    %c0_93 = arith.constant 0 : index
    %192 = vector.load %arg3[%c1_90, %c0_91, %c0_92, %c0_93] : memref<2x4x32x8xbf16, #tpu.memory_space<vmem>>, vector<1x4x32x8xbf16>
    %193 = vector.shape_cast %192 : vector<1x4x32x8xbf16> to vector<4x32x8xbf16>
    %c1_94 = arith.constant 1 : index
    %c0_95 = arith.constant 0 : index
    %c0_96 = arith.constant 0 : index
    %c0_97 = arith.constant 0 : index
    %194 = vector.load %arg4[%c1_94, %c0_95, %c0_96, %c0_97] : memref<2x4x32x8xbf16, #tpu.memory_space<vmem>>, vector<1x4x32x8xbf16>
    %195 = vector.shape_cast %194 : vector<1x4x32x8xbf16> to vector<4x32x8xbf16>
    %c1_98 = arith.constant 1 : index
    %c0_99 = arith.constant 0 : index
    %c0_100 = arith.constant 0 : index
    %c0_101 = arith.constant 0 : index
    %196 = vector.load %arg5[%c1_98, %c0_99, %c0_100, %c0_101] : memref<2x4x1x8xf32, #tpu.memory_space<vmem>>, vector<1x4x1x8xf32>
    %197 = vector.shape_cast %196 : vector<1x4x1x8xf32> to vector<4x1x8xf32>
    %c1_102 = arith.constant 1 : index
    %c0_103 = arith.constant 0 : index
    %c0_104 = arith.constant 0 : index
    %c0_105 = arith.constant 0 : index
    %198 = vector.load %arg6[%c1_102, %c0_103, %c0_104, %c0_105] : memref<2x4x1x8xf32, #tpu.memory_space<vmem>>, vector<1x4x1x8xf32>
    %199 = vector.shape_cast %198 : vector<1x4x1x8xf32> to vector<4x1x8xf32>
    %c1_106 = arith.constant 1 : index
    %c0_107 = arith.constant 0 : index
    %c0_108 = arith.constant 0 : index
    %c0_109 = arith.constant 0 : index
    %200 = vector.load %arg7[%c1_106, %c0_107, %c0_108, %c0_109] : memref<2x4x1x8xf32, #tpu.memory_space<vmem>>, vector<1x4x1x8xf32>
    %201 = vector.shape_cast %200 : vector<1x4x1x8xf32> to vector<4x1x8xf32>
    %c1_110 = arith.constant 1 : index
    %c0_111 = arith.constant 0 : index
    %c0_112 = arith.constant 0 : index
    %c0_113 = arith.constant 0 : index
    %202 = vector.load %arg8[%c1_110, %c0_111, %c0_112, %c0_113] : memref<2x4x8x32xbf16, #tpu.memory_space<vmem>>, vector<1x4x8x32xbf16>
    %203 = vector.shape_cast %202 : vector<1x4x8x32xbf16> to vector<4x8x32xbf16>
    %c1_114 = arith.constant 1 : index
    %c0_115 = arith.constant 0 : index
    %c0_116 = arith.constant 0 : index
    %204 = vector.load %arg9[%c1_114, %c0_115, %c0_116] : memref<2x1x32xf32, #tpu.memory_space<vmem>>, vector<1x1x32xf32>
    %205 = vector.shape_cast %204 : vector<1x1x32xf32> to vector<1x32xf32>
    %206 = vector.extract_strided_slice %189 {offsets = [0, 0], sizes = [8, 32], strides = [1, 1]} : vector<16x32xf32> to vector<8x32xf32>
    %207 = arith.truncf %206 : vector<8x32xf32> to vector<8x32xbf16>
    %208 = vector.shape_cast %207 : vector<8x32xbf16> to vector<1x8x32xbf16>
    %209 = vector.broadcast %208 : vector<1x8x32xbf16> to vector<4x8x32xbf16>
    %210 = vector.extract_strided_slice %189 {offsets = [0, 0], sizes = [8, 32], strides = [1, 1]} : vector<16x32xf32> to vector<8x32xf32>
    %211 = arith.truncf %210 : vector<8x32xf32> to vector<8x32xbf16>
    %212 = vector.shape_cast %211 : vector<8x32xbf16> to vector<1x8x32xbf16>
    %213 = vector.broadcast %212 : vector<1x8x32xbf16> to vector<4x8x32xbf16>
    "tpu.trace_start"() <{level = 10 : i32, message = "hsd,hde->hse"}> : () -> ()
    %cst_117 = arith.constant dense<0.000000e+00> : vector<4x8x8xf32>
    %214 = tpu.matmul %209, %191, %cst_117 {dimension_numbers = #tpu.dot_dimension_numbers<[2], [1], [1], [2], [0, 0, 0, 1, 1, 2], [0], [0]>} : vector<4x8x32xbf16>, vector<4x32x8xbf16>, vector<4x8x8xf32> -> vector<4x8x8xf32>
    "tpu.trace_stop"() : () -> ()
    %215 = vector.broadcast %197 : vector<4x1x8xf32> to vector<4x8x8xf32>
    %216 = arith.addf %214, %215 : vector<4x8x8xf32>
    "tpu.trace_start"() <{level = 10 : i32, message = "hsd,hde->hse"}> : () -> ()
    %cst_118 = arith.constant dense<0.000000e+00> : vector<4x8x8xf32>
    %217 = tpu.matmul %213, %193, %cst_118 {dimension_numbers = #tpu.dot_dimension_numbers<[2], [1], [1], [2], [0, 0, 0, 1, 1, 2], [0], [0]>} : vector<4x8x32xbf16>, vector<4x32x8xbf16>, vector<4x8x8xf32> -> vector<4x8x8xf32>
    "tpu.trace_stop"() : () -> ()
    %218 = vector.broadcast %199 : vector<4x1x8xf32> to vector<4x8x8xf32>
    %219 = arith.addf %217, %218 : vector<4x8x8xf32>
    "tpu.trace_start"() <{level = 10 : i32, message = "hsd,hde->hse"}> : () -> ()
    %cst_119 = arith.constant dense<0.000000e+00> : vector<4x8x8xf32>
    %220 = tpu.matmul %213, %195, %cst_119 {dimension_numbers = #tpu.dot_dimension_numbers<[2], [1], [1], [2], [0, 0, 0, 1, 1, 2], [0], [0]>} : vector<4x8x32xbf16>, vector<4x32x8xbf16>, vector<4x8x8xf32> -> vector<4x8x8xf32>
    "tpu.trace_stop"() : () -> ()
    %221 = vector.broadcast %201 : vector<4x1x8xf32> to vector<4x8x8xf32>
    %222 = arith.addf %220, %221 : vector<4x8x8xf32>
    %223 = arith.truncf %216 : vector<4x8x8xf32> to vector<4x8x8xbf16>
    %224 = arith.truncf %219 : vector<4x8x8xf32> to vector<4x8x8xbf16>
    "tpu.trace_start"() <{level = 10 : i32, message = "hqe,hke->hqk"}> : () -> ()
    %cst_120 = arith.constant dense<0.000000e+00> : vector<4x8x8xf32>
    %225 = tpu.matmul %223, %224, %cst_120 {dimension_numbers = #tpu.dot_dimension_numbers<[2], [2], [1], [1], [0, 0, 0, 1, 1, 1], [0], [0]>} : vector<4x8x8xbf16>, vector<4x8x8xbf16>, vector<4x8x8xf32> -> vector<4x8x8xf32>
    "tpu.trace_stop"() : () -> ()
    %cst_121 = arith.constant dense<0xFF800000> : vector<4x8xf32>
    %226 = vector.multi_reduction <maximumf>, %225, %cst_121 [2] : vector<4x8x8xf32> to vector<4x8xf32>
    %227 = vector.shape_cast %226 : vector<4x8xf32> to vector<4x8x1xf32>
    %228 = vector.broadcast %227 : vector<4x8x1xf32> to vector<4x8x8xf32>
    %229 = arith.subf %225, %228 : vector<4x8x8xf32>
    %230 = math.exp %229 : vector<4x8x8xf32>
    %cst_122 = arith.constant dense<0.000000e+00> : vector<4x8xf32>
    %231 = vector.multi_reduction <add>, %230, %cst_122 [2] : vector<4x8x8xf32> to vector<4x8xf32>
    %232 = vector.shape_cast %231 : vector<4x8xf32> to vector<4x8x1xf32>
    %233 = tpu.reciprocal %232 {approx = true} : vector<4x8x1xf32> -> vector<4x8x1xf32>
    %234 = vector.broadcast %233 : vector<4x8x1xf32> to vector<4x8x8xf32>
    %235 = arith.mulf %230, %234 : vector<4x8x8xf32>
    %236 = arith.truncf %235 : vector<4x8x8xf32> to vector<4x8x8xbf16>
    %237 = arith.truncf %222 : vector<4x8x8xf32> to vector<4x8x8xbf16>
    "tpu.trace_start"() <{level = 10 : i32, message = "hqk,hke->hqe"}> : () -> ()
    %cst_123 = arith.constant dense<0.000000e+00> : vector<4x8x8xf32>
    %238 = tpu.matmul %236, %237, %cst_123 {dimension_numbers = #tpu.dot_dimension_numbers<[2], [1], [1], [2], [0, 0, 0, 1, 1, 2], [0], [0]>} : vector<4x8x8xbf16>, vector<4x8x8xbf16>, vector<4x8x8xf32> -> vector<4x8x8xf32>
    "tpu.trace_stop"() : () -> ()
    %239 = arith.truncf %238 : vector<4x8x8xf32> to vector<4x8x8xbf16>
    "tpu.trace_start"() <{level = 10 : i32, message = "hse,hef->hsf"}> : () -> ()
    %cst_124 = arith.constant dense<0.000000e+00> : vector<4x8x32xf32>
    %240 = tpu.matmul %239, %203, %cst_124 {dimension_numbers = #tpu.dot_dimension_numbers<[2], [1], [1], [2], [0, 0, 0, 1, 1, 2], [0], [0]>} : vector<4x8x8xbf16>, vector<4x8x32xbf16>, vector<4x8x32xf32> -> vector<4x8x32xf32>
    "tpu.trace_stop"() : () -> ()
    %241 = vector.extract_strided_slice %240 {offsets = [0, 0, 0], sizes = [1, 8, 32], strides = [1, 1, 1]} : vector<4x8x32xf32> to vector<1x8x32xf32>
    %242 = vector.shape_cast %241 : vector<1x8x32xf32> to vector<8x32xf32>
    %243 = vector.extract_strided_slice %240 {offsets = [1, 0, 0], sizes = [1, 8, 32], strides = [1, 1, 1]} : vector<4x8x32xf32> to vector<1x8x32xf32>
    %244 = vector.shape_cast %243 : vector<1x8x32xf32> to vector<8x32xf32>
    %245 = arith.addf %242, %244 : vector<8x32xf32>
    %246 = vector.extract_strided_slice %240 {offsets = [2, 0, 0], sizes = [1, 8, 32], strides = [1, 1, 1]} : vector<4x8x32xf32> to vector<1x8x32xf32>
    %247 = vector.shape_cast %246 : vector<1x8x32xf32> to vector<8x32xf32>
    %248 = arith.addf %245, %247 : vector<8x32xf32>
    %249 = vector.extract_strided_slice %240 {offsets = [3, 0, 0], sizes = [1, 8, 32], strides = [1, 1, 1]} : vector<4x8x32xf32> to vector<1x8x32xf32>
    %250 = vector.shape_cast %249 : vector<1x8x32xf32> to vector<8x32xf32>
    %251 = arith.addf %248, %250 : vector<8x32xf32>
    %252 = vector.broadcast %205 : vector<1x32xf32> to vector<8x32xf32>
    %253 = arith.addf %251, %252 : vector<8x32xf32>
    %254 = vector.extract_strided_slice %189 {offsets = [8, 0], sizes = [8, 32], strides = [1, 1]} : vector<16x32xf32> to vector<8x32xf32>
    %255 = arith.truncf %254 : vector<8x32xf32> to vector<8x32xbf16>
    %256 = vector.shape_cast %255 : vector<8x32xbf16> to vector<1x8x32xbf16>
    %257 = vector.broadcast %256 : vector<1x8x32xbf16> to vector<4x8x32xbf16>
    %258 = vector.extract_strided_slice %189 {offsets = [8, 0], sizes = [8, 32], strides = [1, 1]} : vector<16x32xf32> to vector<8x32xf32>
    %259 = arith.truncf %258 : vector<8x32xf32> to vector<8x32xbf16>
    %260 = vector.shape_cast %259 : vector<8x32xbf16> to vector<1x8x32xbf16>
    %261 = vector.broadcast %260 : vector<1x8x32xbf16> to vector<4x8x32xbf16>
    "tpu.trace_start"() <{level = 10 : i32, message = "hsd,hde->hse"}> : () -> ()
    %cst_125 = arith.constant dense<0.000000e+00> : vector<4x8x8xf32>
    %262 = tpu.matmul %257, %191, %cst_125 {dimension_numbers = #tpu.dot_dimension_numbers<[2], [1], [1], [2], [0, 0, 0, 1, 1, 2], [0], [0]>} : vector<4x8x32xbf16>, vector<4x32x8xbf16>, vector<4x8x8xf32> -> vector<4x8x8xf32>
    "tpu.trace_stop"() : () -> ()
    %263 = vector.broadcast %197 : vector<4x1x8xf32> to vector<4x8x8xf32>
    %264 = arith.addf %262, %263 : vector<4x8x8xf32>
    "tpu.trace_start"() <{level = 10 : i32, message = "hsd,hde->hse"}> : () -> ()
    %cst_126 = arith.constant dense<0.000000e+00> : vector<4x8x8xf32>
    %265 = tpu.matmul %261, %193, %cst_126 {dimension_numbers = #tpu.dot_dimension_numbers<[2], [1], [1], [2], [0, 0, 0, 1, 1, 2], [0], [0]>} : vector<4x8x32xbf16>, vector<4x32x8xbf16>, vector<4x8x8xf32> -> vector<4x8x8xf32>
    "tpu.trace_stop"() : () -> ()
    %266 = vector.broadcast %199 : vector<4x1x8xf32> to vector<4x8x8xf32>
    %267 = arith.addf %265, %266 : vector<4x8x8xf32>
    "tpu.trace_start"() <{level = 10 : i32, message = "hsd,hde->hse"}> : () -> ()
    %cst_127 = arith.constant dense<0.000000e+00> : vector<4x8x8xf32>
    %268 = tpu.matmul %261, %195, %cst_127 {dimension_numbers = #tpu.dot_dimension_numbers<[2], [1], [1], [2], [0, 0, 0, 1, 1, 2], [0], [0]>} : vector<4x8x32xbf16>, vector<4x32x8xbf16>, vector<4x8x8xf32> -> vector<4x8x8xf32>
    "tpu.trace_stop"() : () -> ()
    %269 = vector.broadcast %201 : vector<4x1x8xf32> to vector<4x8x8xf32>
    %270 = arith.addf %268, %269 : vector<4x8x8xf32>
    %271 = arith.truncf %264 : vector<4x8x8xf32> to vector<4x8x8xbf16>
    %272 = arith.truncf %267 : vector<4x8x8xf32> to vector<4x8x8xbf16>
    "tpu.trace_start"() <{level = 10 : i32, message = "hqe,hke->hqk"}> : () -> ()
    %cst_128 = arith.constant dense<0.000000e+00> : vector<4x8x8xf32>
    %273 = tpu.matmul %271, %272, %cst_128 {dimension_numbers = #tpu.dot_dimension_numbers<[2], [2], [1], [1], [0, 0, 0, 1, 1, 1], [0], [0]>} : vector<4x8x8xbf16>, vector<4x8x8xbf16>, vector<4x8x8xf32> -> vector<4x8x8xf32>
    "tpu.trace_stop"() : () -> ()
    %cst_129 = arith.constant dense<0xFF800000> : vector<4x8xf32>
    %274 = vector.multi_reduction <maximumf>, %273, %cst_129 [2] : vector<4x8x8xf32> to vector<4x8xf32>
    %275 = vector.shape_cast %274 : vector<4x8xf32> to vector<4x8x1xf32>
    %276 = vector.broadcast %275 : vector<4x8x1xf32> to vector<4x8x8xf32>
    %277 = arith.subf %273, %276 : vector<4x8x8xf32>
    %278 = math.exp %277 : vector<4x8x8xf32>
    %cst_130 = arith.constant dense<0.000000e+00> : vector<4x8xf32>
    %279 = vector.multi_reduction <add>, %278, %cst_130 [2] : vector<4x8x8xf32> to vector<4x8xf32>
    %280 = vector.shape_cast %279 : vector<4x8xf32> to vector<4x8x1xf32>
    %281 = tpu.reciprocal %280 {approx = true} : vector<4x8x1xf32> -> vector<4x8x1xf32>
    %282 = vector.broadcast %281 : vector<4x8x1xf32> to vector<4x8x8xf32>
    %283 = arith.mulf %278, %282 : vector<4x8x8xf32>
    %284 = arith.truncf %283 : vector<4x8x8xf32> to vector<4x8x8xbf16>
    %285 = arith.truncf %270 : vector<4x8x8xf32> to vector<4x8x8xbf16>
    "tpu.trace_start"() <{level = 10 : i32, message = "hqk,hke->hqe"}> : () -> ()
    %cst_131 = arith.constant dense<0.000000e+00> : vector<4x8x8xf32>
    %286 = tpu.matmul %284, %285, %cst_131 {dimension_numbers = #tpu.dot_dimension_numbers<[2], [1], [1], [2], [0, 0, 0, 1, 1, 2], [0], [0]>} : vector<4x8x8xbf16>, vector<4x8x8xbf16>, vector<4x8x8xf32> -> vector<4x8x8xf32>
    "tpu.trace_stop"() : () -> ()
    %287 = arith.truncf %286 : vector<4x8x8xf32> to vector<4x8x8xbf16>
    "tpu.trace_start"() <{level = 10 : i32, message = "hse,hef->hsf"}> : () -> ()
    %cst_132 = arith.constant dense<0.000000e+00> : vector<4x8x32xf32>
    %288 = tpu.matmul %287, %203, %cst_132 {dimension_numbers = #tpu.dot_dimension_numbers<[2], [1], [1], [2], [0, 0, 0, 1, 1, 2], [0], [0]>} : vector<4x8x8xbf16>, vector<4x8x32xbf16>, vector<4x8x32xf32> -> vector<4x8x32xf32>
    "tpu.trace_stop"() : () -> ()
    %289 = vector.extract_strided_slice %288 {offsets = [0, 0, 0], sizes = [1, 8, 32], strides = [1, 1, 1]} : vector<4x8x32xf32> to vector<1x8x32xf32>
    %290 = vector.shape_cast %289 : vector<1x8x32xf32> to vector<8x32xf32>
    %291 = vector.extract_strided_slice %288 {offsets = [1, 0, 0], sizes = [1, 8, 32], strides = [1, 1, 1]} : vector<4x8x32xf32> to vector<1x8x32xf32>
    %292 = vector.shape_cast %291 : vector<1x8x32xf32> to vector<8x32xf32>
    %293 = arith.addf %290, %292 : vector<8x32xf32>
    %294 = vector.extract_strided_slice %288 {offsets = [2, 0, 0], sizes = [1, 8, 32], strides = [1, 1, 1]} : vector<4x8x32xf32> to vector<1x8x32xf32>
    %295 = vector.shape_cast %294 : vector<1x8x32xf32> to vector<8x32xf32>
    %296 = arith.addf %293, %295 : vector<8x32xf32>
    %297 = vector.extract_strided_slice %288 {offsets = [3, 0, 0], sizes = [1, 8, 32], strides = [1, 1, 1]} : vector<4x8x32xf32> to vector<1x8x32xf32>
    %298 = vector.shape_cast %297 : vector<1x8x32xf32> to vector<8x32xf32>
    %299 = arith.addf %296, %298 : vector<8x32xf32>
    %300 = vector.broadcast %205 : vector<1x32xf32> to vector<8x32xf32>
    %301 = arith.addf %299, %300 : vector<8x32xf32>
    %302 = tpu.concatenate %253, %301 in 0 : vector<8x32xf32>, vector<8x32xf32> -> vector<16x32xf32>
    %303 = arith.addf %189, %302 : vector<16x32xf32>
    %c1_133 = arith.constant 1 : index
    %c0_134 = arith.constant 0 : index
    %c0_135 = arith.constant 0 : index
    %304 = vector.load %arg10[%c1_133, %c0_134, %c0_135] : memref<2x1x32xf32, #tpu.memory_space<vmem>>, vector<1x1x32xf32>
    %305 = vector.shape_cast %304 : vector<1x1x32xf32> to vector<1x32xf32>
    %c1_136 = arith.constant 1 : index
    %c0_137 = arith.constant 0 : index
    %c0_138 = arith.constant 0 : index
    %306 = vector.load %arg11[%c1_136, %c0_137, %c0_138] : memref<2x1x32xf32, #tpu.memory_space<vmem>>, vector<1x1x32xf32>
    %307 = vector.shape_cast %306 : vector<1x1x32xf32> to vector<1x32xf32>
    %cst_139 = arith.constant dense<0.000000e+00> : vector<16xf32>
    %308 = vector.multi_reduction <add>, %303, %cst_139 [1] : vector<16x32xf32> to vector<16xf32>
    %309 = vector.shape_cast %308 : vector<16xf32> to vector<16x1xf32>
    %cst_140 = arith.constant 3.200000e+01 : f32
    %310 = vector.broadcast %cst_140 : f32 to vector<16x1xf32>
    %311 = arith.divf %309, %310 : vector<16x1xf32>
    %312 = vector.broadcast %311 : vector<16x1xf32> to vector<16x32xf32>
    %313 = arith.subf %303, %312 : vector<16x32xf32>
    %314 = arith.mulf %313, %313 : vector<16x32xf32>
    %cst_141 = arith.constant dense<0.000000e+00> : vector<16xf32>
    %315 = vector.multi_reduction <add>, %314, %cst_141 [1] : vector<16x32xf32> to vector<16xf32>
    %316 = vector.shape_cast %315 : vector<16xf32> to vector<16x1xf32>
    %cst_142 = arith.constant 3.200000e+01 : f32
    %317 = vector.broadcast %cst_142 : f32 to vector<16x1xf32>
    %318 = arith.divf %316, %317 : vector<16x1xf32>
    %319 = vector.broadcast %311 : vector<16x1xf32> to vector<16x32xf32>
    %320 = arith.subf %303, %319 : vector<16x32xf32>
    %cst_143 = arith.constant 9.99999974E-6 : f32
    %321 = vector.broadcast %cst_143 : f32 to vector<16x1xf32>
    %322 = arith.addf %318, %321 : vector<16x1xf32>
    %323 = math.rsqrt %322 : vector<16x1xf32>
    %324 = vector.broadcast %323 : vector<16x1xf32> to vector<16x32xf32>
    %325 = arith.mulf %320, %324 : vector<16x32xf32>
    %326 = vector.broadcast %305 : vector<1x32xf32> to vector<16x32xf32>
    %327 = arith.mulf %325, %326 : vector<16x32xf32>
    %328 = vector.broadcast %307 : vector<1x32xf32> to vector<16x32xf32>
    %329 = arith.addf %327, %328 : vector<16x32xf32>
    %c1_144 = arith.constant 1 : index
    %c0_145 = arith.constant 0 : index
    %c0_146 = arith.constant 0 : index
    %330 = vector.load %arg12[%c1_144, %c0_145, %c0_146] : memref<2x32x64xbf16, #tpu.memory_space<vmem>>, vector<1x32x64xbf16>
    %331 = vector.shape_cast %330 : vector<1x32x64xbf16> to vector<32x64xbf16>
    %c1_147 = arith.constant 1 : index
    %c0_148 = arith.constant 0 : index
    %c0_149 = arith.constant 0 : index
    %332 = vector.load %arg13[%c1_147, %c0_148, %c0_149] : memref<2x1x64xf32, #tpu.memory_space<vmem>>, vector<1x1x64xf32>
    %333 = vector.shape_cast %332 : vector<1x1x64xf32> to vector<1x64xf32>
    %334 = arith.truncf %329 : vector<16x32xf32> to vector<16x32xbf16>
    %cst_150 = arith.constant dense<0.000000e+00> : vector<16x64xf32>
    %335 = tpu.matmul %334, %331, %cst_150 {dimension_numbers = #tpu.dot_dimension_numbers<[1], [0], [0], [1], [0, 0, 1, 1], [], []>} : vector<16x32xbf16>, vector<32x64xbf16>, vector<16x64xf32> -> vector<16x64xf32>
    %336 = vector.broadcast %333 : vector<1x64xf32> to vector<16x64xf32>
    %337 = arith.addf %335, %336 : vector<16x64xf32>
    %cst_151 = arith.constant 0.000000e+00 : f32
    %338 = vector.broadcast %cst_151 : f32 to vector<16x64xf32>
    %339 = arith.maximumf %337, %338 : vector<16x64xf32>
    %c1_152 = arith.constant 1 : index
    %c0_153 = arith.constant 0 : index
    %c0_154 = arith.constant 0 : index
    %340 = vector.load %arg14[%c1_152, %c0_153, %c0_154] : memref<2x64x32xbf16, #tpu.memory_space<vmem>>, vector<1x64x32xbf16>
    %341 = vector.shape_cast %340 : vector<1x64x32xbf16> to vector<64x32xbf16>
    %c1_155 = arith.constant 1 : index
    %c0_156 = arith.constant 0 : index
    %c0_157 = arith.constant 0 : index
    %342 = vector.load %arg15[%c1_155, %c0_156, %c0_157] : memref<2x1x32xf32, #tpu.memory_space<vmem>>, vector<1x1x32xf32>
    %343 = vector.shape_cast %342 : vector<1x1x32xf32> to vector<1x32xf32>
    %344 = arith.truncf %339 : vector<16x64xf32> to vector<16x64xbf16>
    %cst_158 = arith.constant dense<0.000000e+00> : vector<16x32xf32>
    %345 = tpu.matmul %344, %341, %cst_158 {dimension_numbers = #tpu.dot_dimension_numbers<[1], [0], [0], [1], [0, 0, 1, 1], [], []>} : vector<16x64xbf16>, vector<64x32xbf16>, vector<16x32xf32> -> vector<16x32xf32>
    %346 = vector.broadcast %343 : vector<1x32xf32> to vector<16x32xf32>
    %347 = arith.addf %345, %346 : vector<16x32xf32>
    %348 = arith.addf %329, %347 : vector<16x32xf32>
    %c1_159 = arith.constant 1 : index
    %c0_160 = arith.constant 0 : index
    %c0_161 = arith.constant 0 : index
    %349 = vector.load %arg16[%c1_159, %c0_160, %c0_161] : memref<2x1x32xf32, #tpu.memory_space<vmem>>, vector<1x1x32xf32>
    %350 = vector.shape_cast %349 : vector<1x1x32xf32> to vector<1x32xf32>
    %c1_162 = arith.constant 1 : index
    %c0_163 = arith.constant 0 : index
    %c0_164 = arith.constant 0 : index
    %351 = vector.load %arg17[%c1_162, %c0_163, %c0_164] : memref<2x1x32xf32, #tpu.memory_space<vmem>>, vector<1x1x32xf32>
    %352 = vector.shape_cast %351 : vector<1x1x32xf32> to vector<1x32xf32>
    %cst_165 = arith.constant dense<0.000000e+00> : vector<16xf32>
    %353 = vector.multi_reduction <add>, %348, %cst_165 [1] : vector<16x32xf32> to vector<16xf32>
    %354 = vector.shape_cast %353 : vector<16xf32> to vector<16x1xf32>
    %cst_166 = arith.constant 3.200000e+01 : f32
    %355 = vector.broadcast %cst_166 : f32 to vector<16x1xf32>
    %356 = arith.divf %354, %355 : vector<16x1xf32>
    %357 = vector.broadcast %356 : vector<16x1xf32> to vector<16x32xf32>
    %358 = arith.subf %348, %357 : vector<16x32xf32>
    %359 = arith.mulf %358, %358 : vector<16x32xf32>
    %cst_167 = arith.constant dense<0.000000e+00> : vector<16xf32>
    %360 = vector.multi_reduction <add>, %359, %cst_167 [1] : vector<16x32xf32> to vector<16xf32>
    %361 = vector.shape_cast %360 : vector<16xf32> to vector<16x1xf32>
    %cst_168 = arith.constant 3.200000e+01 : f32
    %362 = vector.broadcast %cst_168 : f32 to vector<16x1xf32>
    %363 = arith.divf %361, %362 : vector<16x1xf32>
    %364 = vector.broadcast %356 : vector<16x1xf32> to vector<16x32xf32>
    %365 = arith.subf %348, %364 : vector<16x32xf32>
    %cst_169 = arith.constant 9.99999974E-6 : f32
    %366 = vector.broadcast %cst_169 : f32 to vector<16x1xf32>
    %367 = arith.addf %363, %366 : vector<16x1xf32>
    %368 = math.rsqrt %367 : vector<16x1xf32>
    %369 = vector.broadcast %368 : vector<16x1xf32> to vector<16x32xf32>
    %370 = arith.mulf %365, %369 : vector<16x32xf32>
    %371 = vector.broadcast %350 : vector<1x32xf32> to vector<16x32xf32>
    %372 = arith.mulf %370, %371 : vector<16x32xf32>
    %373 = vector.broadcast %352 : vector<1x32xf32> to vector<16x32xf32>
    %374 = arith.addf %372, %373 : vector<16x32xf32>
    %c0_170 = arith.constant 0 : index
    %c0_171 = arith.constant 0 : index
    %375 = vector.load %arg18[%c0_170, %c0_171] : memref<1x32xf32, #tpu.memory_space<vmem>>, vector<1x32xf32>
    %c0_172 = arith.constant 0 : index
    %c0_173 = arith.constant 0 : index
    %376 = vector.load %arg19[%c0_172, %c0_173] : memref<1x32xf32, #tpu.memory_space<vmem>>, vector<1x32xf32>
    %cst_174 = arith.constant dense<0.000000e+00> : vector<16xf32>
    %377 = vector.multi_reduction <add>, %374, %cst_174 [1] : vector<16x32xf32> to vector<16xf32>
    %378 = vector.shape_cast %377 : vector<16xf32> to vector<16x1xf32>
    %cst_175 = arith.constant 3.200000e+01 : f32
    %379 = vector.broadcast %cst_175 : f32 to vector<16x1xf32>
    %380 = arith.divf %378, %379 : vector<16x1xf32>
    %381 = vector.broadcast %380 : vector<16x1xf32> to vector<16x32xf32>
    %382 = arith.subf %374, %381 : vector<16x32xf32>
    %383 = arith.mulf %382, %382 : vector<16x32xf32>
    %cst_176 = arith.constant dense<0.000000e+00> : vector<16xf32>
    %384 = vector.multi_reduction <add>, %383, %cst_176 [1] : vector<16x32xf32> to vector<16xf32>
    %385 = vector.shape_cast %384 : vector<16xf32> to vector<16x1xf32>
    %cst_177 = arith.constant 3.200000e+01 : f32
    %386 = vector.broadcast %cst_177 : f32 to vector<16x1xf32>
    %387 = arith.divf %385, %386 : vector<16x1xf32>
    %388 = vector.broadcast %380 : vector<16x1xf32> to vector<16x32xf32>
    %389 = arith.subf %374, %388 : vector<16x32xf32>
    %cst_178 = arith.constant 9.99999974E-6 : f32
    %390 = vector.broadcast %cst_178 : f32 to vector<16x1xf32>
    %391 = arith.addf %387, %390 : vector<16x1xf32>
    %392 = math.rsqrt %391 : vector<16x1xf32>
    %393 = vector.broadcast %392 : vector<16x1xf32> to vector<16x32xf32>
    %394 = arith.mulf %389, %393 : vector<16x32xf32>
    %395 = vector.broadcast %375 : vector<1x32xf32> to vector<16x32xf32>
    %396 = arith.mulf %394, %395 : vector<16x32xf32>
    %397 = vector.broadcast %376 : vector<1x32xf32> to vector<16x32xf32>
    %398 = arith.addf %396, %397 : vector<16x32xf32>
    %399 = arith.truncf %398 : vector<16x32xf32> to vector<16x32xbf16>
    %c0_179 = arith.constant 0 : index
    %c0_180 = arith.constant 0 : index
    %400 = vector.load %arg20[%c0_179, %c0_180] : memref<16x32xbf16, #tpu.memory_space<vmem>>, vector<16x32xbf16>
    tpu.vector_store %arg20[%c0_179, %c0_180], %399 {strides = array<i32>} : memref<16x32xbf16, #tpu.memory_space<vmem>>, vector<16x32xbf16>,
    return
  }
}

module attributes {stable_mosaic.version = 11 : i64} {
  func.func @_decoder_kernel(%arg0: memref<16x32xf32, #tpu.memory_space<vmem>>, %arg1: memref<16x32xf32, #tpu.memory_space<vmem>>, %arg2: memref<16x32xbf16, #tpu.memory_space<vmem>>, %arg3: memref<2x4x32x8xbf16, #tpu.memory_space<vmem>>, %arg4: memref<2x4x32x8xbf16, #tpu.memory_space<vmem>>, %arg5: memref<2x4x32x8xbf16, #tpu.memory_space<vmem>>, %arg6: memref<2x4x1x8xf32, #tpu.memory_space<vmem>>, %arg7: memref<2x4x1x8xf32, #tpu.memory_space<vmem>>, %arg8: memref<2x4x1x8xf32, #tpu.memory_space<vmem>>, %arg9: memref<2x4x8x32xbf16, #tpu.memory_space<vmem>>, %arg10: memref<2x1x32xf32, #tpu.memory_space<vmem>>, %arg11: memref<2x1x32xf32, #tpu.memory_space<vmem>>, %arg12: memref<2x1x32xf32, #tpu.memory_space<vmem>>, %arg13: memref<2x4x32x8xbf16, #tpu.memory_space<vmem>>, %arg14: memref<2x4x32x8xbf16, #tpu.memory_space<vmem>>, %arg15: memref<2x4x32x8xbf16, #tpu.memory_space<vmem>>, %arg16: memref<2x4x1x8xf32, #tpu.memory_space<vmem>>, %arg17: memref<2x4x1x8xf32, #tpu.memory_space<vmem>>, %arg18: memref<2x4x1x8xf32, #tpu.memory_space<vmem>>, %arg19: memref<2x4x8x32xbf16, #tpu.memory_space<vmem>>, %arg20: memref<2x1x32xf32, #tpu.memory_space<vmem>>, %arg21: memref<2x1x32xf32, #tpu.memory_space<vmem>>, %arg22: memref<2x1x32xf32, #tpu.memory_space<vmem>>, %arg23: memref<2x32x64xbf16, #tpu.memory_space<vmem>>, %arg24: memref<2x1x64xf32, #tpu.memory_space<vmem>>, %arg25: memref<2x64x32xbf16, #tpu.memory_space<vmem>>, %arg26: memref<2x1x32xf32, #tpu.memory_space<vmem>>, %arg27: memref<2x1x32xf32, #tpu.memory_space<vmem>>, %arg28: memref<2x1x32xf32, #tpu.memory_space<vmem>>, %arg29: memref<1x32xf32, #tpu.memory_space<vmem>>, %arg30: memref<1x32xf32, #tpu.memory_space<vmem>>, %arg31: memref<32x16xbf16, #tpu.memory_space<vmem>>, %arg32: memref<1x16xf32, #tpu.memory_space<vmem>>, %arg33: memref<16x16xf32, #tpu.memory_space<vmem>>) attributes {dimension_semantics = [], scalar_prefetch = 0 : i64, scratch_operands = 0 : i64, tpu.core_type = #tpu.core_type<tc>} {
    %c0 = arith.constant 0 : index
    %c0_0 = arith.constant 0 : index
    %0 = vector.load %arg0[%c0, %c0_0] : memref<16x32xf32, #tpu.memory_space<vmem>>, vector<16x32xf32>
    %cst = arith.constant 5.65685415 : f32
    %1 = vector.broadcast %cst : f32 to vector<16x32xf32>
    %2 = arith.mulf %0, %1 : vector<16x32xf32>
    %c0_1 = arith.constant 0 : index
    %c0_2 = arith.constant 0 : index
    %3 = vector.load %arg1[%c0_1, %c0_2] : memref<16x32xf32, #tpu.memory_space<vmem>>, vector<16x32xf32>
    %4 = arith.addf %2, %3 : vector<16x32xf32>
    %c0_3 = arith.constant 0 : index
    %c0_4 = arith.constant 0 : index
    %5 = vector.load %arg2[%c0_3, %c0_4] : memref<16x32xbf16, #tpu.memory_space<vmem>>, vector<16x32xbf16>
    %6 = arith.extf %5 : vector<16x32xbf16> to vector<16x32xf32>
    %7 = tpu.iota {dimensions = array<i32: 1>} : vector<4x8x8xi32>
    %8 = tpu.iota {dimensions = array<i32: 2>} : vector<4x8x8xi32>
    %9 = arith.cmpi sgt, %8, %7 : vector<4x8x8xi32>
    %cst_5 = arith.constant -1.000000e+09 : f32
    %cst_6 = arith.constant 0.000000e+00 : f32
    %10 = vector.broadcast %cst_5 : f32 to vector<4x8x8xf32>
    %11 = vector.broadcast %cst_6 : f32 to vector<4x8x8xf32>
    %12 = arith.select %9, %10, %11 : vector<4x8x8xi1>, vector<4x8x8xf32>
    %c0_7 = arith.constant 0 : index
    %c0_8 = arith.constant 0 : index
    %c0_9 = arith.constant 0 : index
    %c0_10 = arith.constant 0 : index
    %13 = vector.load %arg3[%c0_7, %c0_8, %c0_9, %c0_10] : memref<2x4x32x8xbf16, #tpu.memory_space<vmem>>, vector<1x4x32x8xbf16>
    %14 = vector.shape_cast %13 : vector<1x4x32x8xbf16> to vector<4x32x8xbf16>
    %c0_11 = arith.constant 0 : index
    %c0_12 = arith.constant 0 : index
    %c0_13 = arith.constant 0 : index
    %c0_14 = arith.constant 0 : index
    %15 = vector.load %arg4[%c0_11, %c0_12, %c0_13, %c0_14] : memref<2x4x32x8xbf16, #tpu.memory_space<vmem>>, vector<1x4x32x8xbf16>
    %16 = vector.shape_cast %15 : vector<1x4x32x8xbf16> to vector<4x32x8xbf16>
    %c0_15 = arith.constant 0 : index
    %c0_16 = arith.constant 0 : index
    %c0_17 = arith.constant 0 : index
    %c0_18 = arith.constant 0 : index
    %17 = vector.load %arg5[%c0_15, %c0_16, %c0_17, %c0_18] : memref<2x4x32x8xbf16, #tpu.memory_space<vmem>>, vector<1x4x32x8xbf16>
    %18 = vector.shape_cast %17 : vector<1x4x32x8xbf16> to vector<4x32x8xbf16>
    %c0_19 = arith.constant 0 : index
    %c0_20 = arith.constant 0 : index
    %c0_21 = arith.constant 0 : index
    %c0_22 = arith.constant 0 : index
    %19 = vector.load %arg6[%c0_19, %c0_20, %c0_21, %c0_22] : memref<2x4x1x8xf32, #tpu.memory_space<vmem>>, vector<1x4x1x8xf32>
    %20 = vector.shape_cast %19 : vector<1x4x1x8xf32> to vector<4x1x8xf32>
    %c0_23 = arith.constant 0 : index
    %c0_24 = arith.constant 0 : index
    %c0_25 = arith.constant 0 : index
    %c0_26 = arith.constant 0 : index
    %21 = vector.load %arg7[%c0_23, %c0_24, %c0_25, %c0_26] : memref<2x4x1x8xf32, #tpu.memory_space<vmem>>, vector<1x4x1x8xf32>
    %22 = vector.shape_cast %21 : vector<1x4x1x8xf32> to vector<4x1x8xf32>
    %c0_27 = arith.constant 0 : index
    %c0_28 = arith.constant 0 : index
    %c0_29 = arith.constant 0 : index
    %c0_30 = arith.constant 0 : index
    %23 = vector.load %arg8[%c0_27, %c0_28, %c0_29, %c0_30] : memref<2x4x1x8xf32, #tpu.memory_space<vmem>>, vector<1x4x1x8xf32>
    %24 = vector.shape_cast %23 : vector<1x4x1x8xf32> to vector<4x1x8xf32>
    %c0_31 = arith.constant 0 : index
    %c0_32 = arith.constant 0 : index
    %c0_33 = arith.constant 0 : index
    %c0_34 = arith.constant 0 : index
    %25 = vector.load %arg9[%c0_31, %c0_32, %c0_33, %c0_34] : memref<2x4x8x32xbf16, #tpu.memory_space<vmem>>, vector<1x4x8x32xbf16>
    %26 = vector.shape_cast %25 : vector<1x4x8x32xbf16> to vector<4x8x32xbf16>
    %c0_35 = arith.constant 0 : index
    %c0_36 = arith.constant 0 : index
    %c0_37 = arith.constant 0 : index
    %27 = vector.load %arg10[%c0_35, %c0_36, %c0_37] : memref<2x1x32xf32, #tpu.memory_space<vmem>>, vector<1x1x32xf32>
    %28 = vector.shape_cast %27 : vector<1x1x32xf32> to vector<1x32xf32>
    %29 = vector.extract_strided_slice %4 {offsets = [0, 0], sizes = [8, 32], strides = [1, 1]} : vector<16x32xf32> to vector<8x32xf32>
    %30 = arith.truncf %29 : vector<8x32xf32> to vector<8x32xbf16>
    %31 = vector.shape_cast %30 : vector<8x32xbf16> to vector<1x8x32xbf16>
    %32 = vector.broadcast %31 : vector<1x8x32xbf16> to vector<4x8x32xbf16>
    %33 = vector.extract_strided_slice %4 {offsets = [0, 0], sizes = [8, 32], strides = [1, 1]} : vector<16x32xf32> to vector<8x32xf32>
    %34 = arith.truncf %33 : vector<8x32xf32> to vector<8x32xbf16>
    %35 = vector.shape_cast %34 : vector<8x32xbf16> to vector<1x8x32xbf16>
    %36 = vector.broadcast %35 : vector<1x8x32xbf16> to vector<4x8x32xbf16>
    "tpu.trace_start"() <{level = 10 : i32, message = "hsd,hde->hse"}> : () -> ()
    %cst_38 = arith.constant dense<0.000000e+00> : vector<4x8x8xf32>
    %37 = tpu.matmul %32, %14, %cst_38 {dimension_numbers = #tpu.dot_dimension_numbers<[2], [1], [1], [2], [0, 0, 0, 1, 1, 2], [0], [0]>} : vector<4x8x32xbf16>, vector<4x32x8xbf16>, vector<4x8x8xf32> -> vector<4x8x8xf32>
    "tpu.trace_stop"() : () -> ()
    %38 = vector.broadcast %20 : vector<4x1x8xf32> to vector<4x8x8xf32>
    %39 = arith.addf %37, %38 : vector<4x8x8xf32>
    "tpu.trace_start"() <{level = 10 : i32, message = "hsd,hde->hse"}> : () -> ()
    %cst_39 = arith.constant dense<0.000000e+00> : vector<4x8x8xf32>
    %40 = tpu.matmul %36, %16, %cst_39 {dimension_numbers = #tpu.dot_dimension_numbers<[2], [1], [1], [2], [0, 0, 0, 1, 1, 2], [0], [0]>} : vector<4x8x32xbf16>, vector<4x32x8xbf16>, vector<4x8x8xf32> -> vector<4x8x8xf32>
    "tpu.trace_stop"() : () -> ()
    %41 = vector.broadcast %22 : vector<4x1x8xf32> to vector<4x8x8xf32>
    %42 = arith.addf %40, %41 : vector<4x8x8xf32>
    "tpu.trace_start"() <{level = 10 : i32, message = "hsd,hde->hse"}> : () -> ()
    %cst_40 = arith.constant dense<0.000000e+00> : vector<4x8x8xf32>
    %43 = tpu.matmul %36, %18, %cst_40 {dimension_numbers = #tpu.dot_dimension_numbers<[2], [1], [1], [2], [0, 0, 0, 1, 1, 2], [0], [0]>} : vector<4x8x32xbf16>, vector<4x32x8xbf16>, vector<4x8x8xf32> -> vector<4x8x8xf32>
    "tpu.trace_stop"() : () -> ()
    %44 = vector.broadcast %24 : vector<4x1x8xf32> to vector<4x8x8xf32>
    %45 = arith.addf %43, %44 : vector<4x8x8xf32>
    %46 = arith.truncf %39 : vector<4x8x8xf32> to vector<4x8x8xbf16>
    %47 = arith.truncf %42 : vector<4x8x8xf32> to vector<4x8x8xbf16>
    "tpu.trace_start"() <{level = 10 : i32, message = "hqe,hke->hqk"}> : () -> ()
    %cst_41 = arith.constant dense<0.000000e+00> : vector<4x8x8xf32>
    %48 = tpu.matmul %46, %47, %cst_41 {dimension_numbers = #tpu.dot_dimension_numbers<[2], [2], [1], [1], [0, 0, 0, 1, 1, 1], [0], [0]>} : vector<4x8x8xbf16>, vector<4x8x8xbf16>, vector<4x8x8xf32> -> vector<4x8x8xf32>
    "tpu.trace_stop"() : () -> ()
    %49 = arith.addf %48, %12 : vector<4x8x8xf32>
    %cst_42 = arith.constant dense<0xFF800000> : vector<4x8xf32>
    %50 = vector.multi_reduction <maximumf>, %49, %cst_42 [2] : vector<4x8x8xf32> to vector<4x8xf32>
    %51 = vector.shape_cast %50 : vector<4x8xf32> to vector<4x8x1xf32>
    %52 = vector.broadcast %51 : vector<4x8x1xf32> to vector<4x8x8xf32>
    %53 = arith.subf %49, %52 : vector<4x8x8xf32>
    %54 = math.exp %53 : vector<4x8x8xf32>
    %cst_43 = arith.constant dense<0.000000e+00> : vector<4x8xf32>
    %55 = vector.multi_reduction <add>, %54, %cst_43 [2] : vector<4x8x8xf32> to vector<4x8xf32>
    %56 = vector.shape_cast %55 : vector<4x8xf32> to vector<4x8x1xf32>
    %57 = tpu.reciprocal %56 {approx = true} : vector<4x8x1xf32> -> vector<4x8x1xf32>
    %58 = vector.broadcast %57 : vector<4x8x1xf32> to vector<4x8x8xf32>
    %59 = arith.mulf %54, %58 : vector<4x8x8xf32>
    %60 = arith.truncf %59 : vector<4x8x8xf32> to vector<4x8x8xbf16>
    %61 = arith.truncf %45 : vector<4x8x8xf32> to vector<4x8x8xbf16>
    "tpu.trace_start"() <{level = 10 : i32, message = "hqk,hke->hqe"}> : () -> ()
    %cst_44 = arith.constant dense<0.000000e+00> : vector<4x8x8xf32>
    %62 = tpu.matmul %60, %61, %cst_44 {dimension_numbers = #tpu.dot_dimension_numbers<[2], [1], [1], [2], [0, 0, 0, 1, 1, 2], [0], [0]>} : vector<4x8x8xbf16>, vector<4x8x8xbf16>, vector<4x8x8xf32> -> vector<4x8x8xf32>
    "tpu.trace_stop"() : () -> ()
    %63 = arith.truncf %62 : vector<4x8x8xf32> to vector<4x8x8xbf16>
    "tpu.trace_start"() <{level = 10 : i32, message = "hse,hef->hsf"}> : () -> ()
    %cst_45 = arith.constant dense<0.000000e+00> : vector<4x8x32xf32>
    %64 = tpu.matmul %63, %26, %cst_45 {dimension_numbers = #tpu.dot_dimension_numbers<[2], [1], [1], [2], [0, 0, 0, 1, 1, 2], [0], [0]>} : vector<4x8x8xbf16>, vector<4x8x32xbf16>, vector<4x8x32xf32> -> vector<4x8x32xf32>
    "tpu.trace_stop"() : () -> ()
    %65 = vector.extract_strided_slice %64 {offsets = [0, 0, 0], sizes = [1, 8, 32], strides = [1, 1, 1]} : vector<4x8x32xf32> to vector<1x8x32xf32>
    %66 = vector.shape_cast %65 : vector<1x8x32xf32> to vector<8x32xf32>
    %67 = vector.extract_strided_slice %64 {offsets = [1, 0, 0], sizes = [1, 8, 32], strides = [1, 1, 1]} : vector<4x8x32xf32> to vector<1x8x32xf32>
    %68 = vector.shape_cast %67 : vector<1x8x32xf32> to vector<8x32xf32>
    %69 = arith.addf %66, %68 : vector<8x32xf32>
    %70 = vector.extract_strided_slice %64 {offsets = [2, 0, 0], sizes = [1, 8, 32], strides = [1, 1, 1]} : vector<4x8x32xf32> to vector<1x8x32xf32>
    %71 = vector.shape_cast %70 : vector<1x8x32xf32> to vector<8x32xf32>
    %72 = arith.addf %69, %71 : vector<8x32xf32>
    %73 = vector.extract_strided_slice %64 {offsets = [3, 0, 0], sizes = [1, 8, 32], strides = [1, 1, 1]} : vector<4x8x32xf32> to vector<1x8x32xf32>
    %74 = vector.shape_cast %73 : vector<1x8x32xf32> to vector<8x32xf32>
    %75 = arith.addf %72, %74 : vector<8x32xf32>
    %76 = vector.broadcast %28 : vector<1x32xf32> to vector<8x32xf32>
    %77 = arith.addf %75, %76 : vector<8x32xf32>
    %78 = vector.extract_strided_slice %4 {offsets = [8, 0], sizes = [8, 32], strides = [1, 1]} : vector<16x32xf32> to vector<8x32xf32>
    %79 = arith.truncf %78 : vector<8x32xf32> to vector<8x32xbf16>
    %80 = vector.shape_cast %79 : vector<8x32xbf16> to vector<1x8x32xbf16>
    %81 = vector.broadcast %80 : vector<1x8x32xbf16> to vector<4x8x32xbf16>
    %82 = vector.extract_strided_slice %4 {offsets = [8, 0], sizes = [8, 32], strides = [1, 1]} : vector<16x32xf32> to vector<8x32xf32>
    %83 = arith.truncf %82 : vector<8x32xf32> to vector<8x32xbf16>
    %84 = vector.shape_cast %83 : vector<8x32xbf16> to vector<1x8x32xbf16>
    %85 = vector.broadcast %84 : vector<1x8x32xbf16> to vector<4x8x32xbf16>
    "tpu.trace_start"() <{level = 10 : i32, message = "hsd,hde->hse"}> : () -> ()
    %cst_46 = arith.constant dense<0.000000e+00> : vector<4x8x8xf32>
    %86 = tpu.matmul %81, %14, %cst_46 {dimension_numbers = #tpu.dot_dimension_numbers<[2], [1], [1], [2], [0, 0, 0, 1, 1, 2], [0], [0]>} : vector<4x8x32xbf16>, vector<4x32x8xbf16>, vector<4x8x8xf32> -> vector<4x8x8xf32>
    "tpu.trace_stop"() : () -> ()
    %87 = vector.broadcast %20 : vector<4x1x8xf32> to vector<4x8x8xf32>
    %88 = arith.addf %86, %87 : vector<4x8x8xf32>
    "tpu.trace_start"() <{level = 10 : i32, message = "hsd,hde->hse"}> : () -> ()
    %cst_47 = arith.constant dense<0.000000e+00> : vector<4x8x8xf32>
    %89 = tpu.matmul %85, %16, %cst_47 {dimension_numbers = #tpu.dot_dimension_numbers<[2], [1], [1], [2], [0, 0, 0, 1, 1, 2], [0], [0]>} : vector<4x8x32xbf16>, vector<4x32x8xbf16>, vector<4x8x8xf32> -> vector<4x8x8xf32>
    "tpu.trace_stop"() : () -> ()
    %90 = vector.broadcast %22 : vector<4x1x8xf32> to vector<4x8x8xf32>
    %91 = arith.addf %89, %90 : vector<4x8x8xf32>
    "tpu.trace_start"() <{level = 10 : i32, message = "hsd,hde->hse"}> : () -> ()
    %cst_48 = arith.constant dense<0.000000e+00> : vector<4x8x8xf32>
    %92 = tpu.matmul %85, %18, %cst_48 {dimension_numbers = #tpu.dot_dimension_numbers<[2], [1], [1], [2], [0, 0, 0, 1, 1, 2], [0], [0]>} : vector<4x8x32xbf16>, vector<4x32x8xbf16>, vector<4x8x8xf32> -> vector<4x8x8xf32>
    "tpu.trace_stop"() : () -> ()
    %93 = vector.broadcast %24 : vector<4x1x8xf32> to vector<4x8x8xf32>
    %94 = arith.addf %92, %93 : vector<4x8x8xf32>
    %95 = arith.truncf %88 : vector<4x8x8xf32> to vector<4x8x8xbf16>
    %96 = arith.truncf %91 : vector<4x8x8xf32> to vector<4x8x8xbf16>
    "tpu.trace_start"() <{level = 10 : i32, message = "hqe,hke->hqk"}> : () -> ()
    %cst_49 = arith.constant dense<0.000000e+00> : vector<4x8x8xf32>
    %97 = tpu.matmul %95, %96, %cst_49 {dimension_numbers = #tpu.dot_dimension_numbers<[2], [2], [1], [1], [0, 0, 0, 1, 1, 1], [0], [0]>} : vector<4x8x8xbf16>, vector<4x8x8xbf16>, vector<4x8x8xf32> -> vector<4x8x8xf32>
    "tpu.trace_stop"() : () -> ()
    %98 = arith.addf %97, %12 : vector<4x8x8xf32>
    %cst_50 = arith.constant dense<0xFF800000> : vector<4x8xf32>
    %99 = vector.multi_reduction <maximumf>, %98, %cst_50 [2] : vector<4x8x8xf32> to vector<4x8xf32>
    %100 = vector.shape_cast %99 : vector<4x8xf32> to vector<4x8x1xf32>
    %101 = vector.broadcast %100 : vector<4x8x1xf32> to vector<4x8x8xf32>
    %102 = arith.subf %98, %101 : vector<4x8x8xf32>
    %103 = math.exp %102 : vector<4x8x8xf32>
    %cst_51 = arith.constant dense<0.000000e+00> : vector<4x8xf32>
    %104 = vector.multi_reduction <add>, %103, %cst_51 [2] : vector<4x8x8xf32> to vector<4x8xf32>
    %105 = vector.shape_cast %104 : vector<4x8xf32> to vector<4x8x1xf32>
    %106 = tpu.reciprocal %105 {approx = true} : vector<4x8x1xf32> -> vector<4x8x1xf32>
    %107 = vector.broadcast %106 : vector<4x8x1xf32> to vector<4x8x8xf32>
    %108 = arith.mulf %103, %107 : vector<4x8x8xf32>
    %109 = arith.truncf %108 : vector<4x8x8xf32> to vector<4x8x8xbf16>
    %110 = arith.truncf %94 : vector<4x8x8xf32> to vector<4x8x8xbf16>
    "tpu.trace_start"() <{level = 10 : i32, message = "hqk,hke->hqe"}> : () -> ()
    %cst_52 = arith.constant dense<0.000000e+00> : vector<4x8x8xf32>
    %111 = tpu.matmul %109, %110, %cst_52 {dimension_numbers = #tpu.dot_dimension_numbers<[2], [1], [1], [2], [0, 0, 0, 1, 1, 2], [0], [0]>} : vector<4x8x8xbf16>, vector<4x8x8xbf16>, vector<4x8x8xf32> -> vector<4x8x8xf32>
    "tpu.trace_stop"() : () -> ()
    %112 = arith.truncf %111 : vector<4x8x8xf32> to vector<4x8x8xbf16>
    "tpu.trace_start"() <{level = 10 : i32, message = "hse,hef->hsf"}> : () -> ()
    %cst_53 = arith.constant dense<0.000000e+00> : vector<4x8x32xf32>
    %113 = tpu.matmul %112, %26, %cst_53 {dimension_numbers = #tpu.dot_dimension_numbers<[2], [1], [1], [2], [0, 0, 0, 1, 1, 2], [0], [0]>} : vector<4x8x8xbf16>, vector<4x8x32xbf16>, vector<4x8x32xf32> -> vector<4x8x32xf32>
    "tpu.trace_stop"() : () -> ()
    %114 = vector.extract_strided_slice %113 {offsets = [0, 0, 0], sizes = [1, 8, 32], strides = [1, 1, 1]} : vector<4x8x32xf32> to vector<1x8x32xf32>
    %115 = vector.shape_cast %114 : vector<1x8x32xf32> to vector<8x32xf32>
    %116 = vector.extract_strided_slice %113 {offsets = [1, 0, 0], sizes = [1, 8, 32], strides = [1, 1, 1]} : vector<4x8x32xf32> to vector<1x8x32xf32>
    %117 = vector.shape_cast %116 : vector<1x8x32xf32> to vector<8x32xf32>
    %118 = arith.addf %115, %117 : vector<8x32xf32>
    %119 = vector.extract_strided_slice %113 {offsets = [2, 0, 0], sizes = [1, 8, 32], strides = [1, 1, 1]} : vector<4x8x32xf32> to vector<1x8x32xf32>
    %120 = vector.shape_cast %119 : vector<1x8x32xf32> to vector<8x32xf32>
    %121 = arith.addf %118, %120 : vector<8x32xf32>
    %122 = vector.extract_strided_slice %113 {offsets = [3, 0, 0], sizes = [1, 8, 32], strides = [1, 1, 1]} : vector<4x8x32xf32> to vector<1x8x32xf32>
    %123 = vector.shape_cast %122 : vector<1x8x32xf32> to vector<8x32xf32>
    %124 = arith.addf %121, %123 : vector<8x32xf32>
    %125 = vector.broadcast %28 : vector<1x32xf32> to vector<8x32xf32>
    %126 = arith.addf %124, %125 : vector<8x32xf32>
    %127 = tpu.concatenate %77, %126 in 0 : vector<8x32xf32>, vector<8x32xf32> -> vector<16x32xf32>
    %128 = arith.addf %4, %127 : vector<16x32xf32>
    %c0_54 = arith.constant 0 : index
    %c0_55 = arith.constant 0 : index
    %c0_56 = arith.constant 0 : index
    %129 = vector.load %arg11[%c0_54, %c0_55, %c0_56] : memref<2x1x32xf32, #tpu.memory_space<vmem>>, vector<1x1x32xf32>
    %130 = vector.shape_cast %129 : vector<1x1x32xf32> to vector<1x32xf32>
    %c0_57 = arith.constant 0 : index
    %c0_58 = arith.constant 0 : index
    %c0_59 = arith.constant 0 : index
    %131 = vector.load %arg12[%c0_57, %c0_58, %c0_59] : memref<2x1x32xf32, #tpu.memory_space<vmem>>, vector<1x1x32xf32>
    %132 = vector.shape_cast %131 : vector<1x1x32xf32> to vector<1x32xf32>
    %cst_60 = arith.constant dense<0.000000e+00> : vector<16xf32>
    %133 = vector.multi_reduction <add>, %128, %cst_60 [1] : vector<16x32xf32> to vector<16xf32>
    %134 = vector.shape_cast %133 : vector<16xf32> to vector<16x1xf32>
    %cst_61 = arith.constant 3.200000e+01 : f32
    %135 = vector.broadcast %cst_61 : f32 to vector<16x1xf32>
    %136 = arith.divf %134, %135 : vector<16x1xf32>
    %137 = vector.broadcast %136 : vector<16x1xf32> to vector<16x32xf32>
    %138 = arith.subf %128, %137 : vector<16x32xf32>
    %139 = arith.mulf %138, %138 : vector<16x32xf32>
    %cst_62 = arith.constant dense<0.000000e+00> : vector<16xf32>
    %140 = vector.multi_reduction <add>, %139, %cst_62 [1] : vector<16x32xf32> to vector<16xf32>
    %141 = vector.shape_cast %140 : vector<16xf32> to vector<16x1xf32>
    %cst_63 = arith.constant 3.200000e+01 : f32
    %142 = vector.broadcast %cst_63 : f32 to vector<16x1xf32>
    %143 = arith.divf %141, %142 : vector<16x1xf32>
    %144 = vector.broadcast %136 : vector<16x1xf32> to vector<16x32xf32>
    %145 = arith.subf %128, %144 : vector<16x32xf32>
    %cst_64 = arith.constant 9.99999974E-6 : f32
    %146 = vector.broadcast %cst_64 : f32 to vector<16x1xf32>
    %147 = arith.addf %143, %146 : vector<16x1xf32>
    %148 = math.rsqrt %147 : vector<16x1xf32>
    %149 = vector.broadcast %148 : vector<16x1xf32> to vector<16x32xf32>
    %150 = arith.mulf %145, %149 : vector<16x32xf32>
    %151 = vector.broadcast %130 : vector<1x32xf32> to vector<16x32xf32>
    %152 = arith.mulf %150, %151 : vector<16x32xf32>
    %153 = vector.broadcast %132 : vector<1x32xf32> to vector<16x32xf32>
    %154 = arith.addf %152, %153 : vector<16x32xf32>
    %c0_65 = arith.constant 0 : index
    %c0_66 = arith.constant 0 : index
    %c0_67 = arith.constant 0 : index
    %c0_68 = arith.constant 0 : index
    %155 = vector.load %arg13[%c0_65, %c0_66, %c0_67, %c0_68] : memref<2x4x32x8xbf16, #tpu.memory_space<vmem>>, vector<1x4x32x8xbf16>
    %156 = vector.shape_cast %155 : vector<1x4x32x8xbf16> to vector<4x32x8xbf16>
    %c0_69 = arith.constant 0 : index
    %c0_70 = arith.constant 0 : index
    %c0_71 = arith.constant 0 : index
    %c0_72 = arith.constant 0 : index
    %157 = vector.load %arg14[%c0_69, %c0_70, %c0_71, %c0_72] : memref<2x4x32x8xbf16, #tpu.memory_space<vmem>>, vector<1x4x32x8xbf16>
    %158 = vector.shape_cast %157 : vector<1x4x32x8xbf16> to vector<4x32x8xbf16>
    %c0_73 = arith.constant 0 : index
    %c0_74 = arith.constant 0 : index
    %c0_75 = arith.constant 0 : index
    %c0_76 = arith.constant 0 : index
    %159 = vector.load %arg15[%c0_73, %c0_74, %c0_75, %c0_76] : memref<2x4x32x8xbf16, #tpu.memory_space<vmem>>, vector<1x4x32x8xbf16>
    %160 = vector.shape_cast %159 : vector<1x4x32x8xbf16> to vector<4x32x8xbf16>
    %c0_77 = arith.constant 0 : index
    %c0_78 = arith.constant 0 : index
    %c0_79 = arith.constant 0 : index
    %c0_80 = arith.constant 0 : index
    %161 = vector.load %arg16[%c0_77, %c0_78, %c0_79, %c0_80] : memref<2x4x1x8xf32, #tpu.memory_space<vmem>>, vector<1x4x1x8xf32>
    %162 = vector.shape_cast %161 : vector<1x4x1x8xf32> to vector<4x1x8xf32>
    %c0_81 = arith.constant 0 : index
    %c0_82 = arith.constant 0 : index
    %c0_83 = arith.constant 0 : index
    %c0_84 = arith.constant 0 : index
    %163 = vector.load %arg17[%c0_81, %c0_82, %c0_83, %c0_84] : memref<2x4x1x8xf32, #tpu.memory_space<vmem>>, vector<1x4x1x8xf32>
    %164 = vector.shape_cast %163 : vector<1x4x1x8xf32> to vector<4x1x8xf32>
    %c0_85 = arith.constant 0 : index
    %c0_86 = arith.constant 0 : index
    %c0_87 = arith.constant 0 : index
    %c0_88 = arith.constant 0 : index
    %165 = vector.load %arg18[%c0_85, %c0_86, %c0_87, %c0_88] : memref<2x4x1x8xf32, #tpu.memory_space<vmem>>, vector<1x4x1x8xf32>
    %166 = vector.shape_cast %165 : vector<1x4x1x8xf32> to vector<4x1x8xf32>
    %c0_89 = arith.constant 0 : index
    %c0_90 = arith.constant 0 : index
    %c0_91 = arith.constant 0 : index
    %c0_92 = arith.constant 0 : index
    %167 = vector.load %arg19[%c0_89, %c0_90, %c0_91, %c0_92] : memref<2x4x8x32xbf16, #tpu.memory_space<vmem>>, vector<1x4x8x32xbf16>
    %168 = vector.shape_cast %167 : vector<1x4x8x32xbf16> to vector<4x8x32xbf16>
    %c0_93 = arith.constant 0 : index
    %c0_94 = arith.constant 0 : index
    %c0_95 = arith.constant 0 : index
    %169 = vector.load %arg20[%c0_93, %c0_94, %c0_95] : memref<2x1x32xf32, #tpu.memory_space<vmem>>, vector<1x1x32xf32>
    %170 = vector.shape_cast %169 : vector<1x1x32xf32> to vector<1x32xf32>
    %171 = vector.extract_strided_slice %154 {offsets = [0, 0], sizes = [8, 32], strides = [1, 1]} : vector<16x32xf32> to vector<8x32xf32>
    %172 = arith.truncf %171 : vector<8x32xf32> to vector<8x32xbf16>
    %173 = vector.shape_cast %172 : vector<8x32xbf16> to vector<1x8x32xbf16>
    %174 = vector.broadcast %173 : vector<1x8x32xbf16> to vector<4x8x32xbf16>
    %175 = vector.extract_strided_slice %6 {offsets = [0, 0], sizes = [8, 32], strides = [1, 1]} : vector<16x32xf32> to vector<8x32xf32>
    %176 = arith.truncf %175 : vector<8x32xf32> to vector<8x32xbf16>
    %177 = vector.shape_cast %176 : vector<8x32xbf16> to vector<1x8x32xbf16>
    %178 = vector.broadcast %177 : vector<1x8x32xbf16> to vector<4x8x32xbf16>
    "tpu.trace_start"() <{level = 10 : i32, message = "hsd,hde->hse"}> : () -> ()
    %cst_96 = arith.constant dense<0.000000e+00> : vector<4x8x8xf32>
    %179 = tpu.matmul %174, %156, %cst_96 {dimension_numbers = #tpu.dot_dimension_numbers<[2], [1], [1], [2], [0, 0, 0, 1, 1, 2], [0], [0]>} : vector<4x8x32xbf16>, vector<4x32x8xbf16>, vector<4x8x8xf32> -> vector<4x8x8xf32>
    "tpu.trace_stop"() : () -> ()
    %180 = vector.broadcast %162 : vector<4x1x8xf32> to vector<4x8x8xf32>
    %181 = arith.addf %179, %180 : vector<4x8x8xf32>
    "tpu.trace_start"() <{level = 10 : i32, message = "hsd,hde->hse"}> : () -> ()
    %cst_97 = arith.constant dense<0.000000e+00> : vector<4x8x8xf32>
    %182 = tpu.matmul %178, %158, %cst_97 {dimension_numbers = #tpu.dot_dimension_numbers<[2], [1], [1], [2], [0, 0, 0, 1, 1, 2], [0], [0]>} : vector<4x8x32xbf16>, vector<4x32x8xbf16>, vector<4x8x8xf32> -> vector<4x8x8xf32>
    "tpu.trace_stop"() : () -> ()
    %183 = vector.broadcast %164 : vector<4x1x8xf32> to vector<4x8x8xf32>
    %184 = arith.addf %182, %183 : vector<4x8x8xf32>
    "tpu.trace_start"() <{level = 10 : i32, message = "hsd,hde->hse"}> : () -> ()
    %cst_98 = arith.constant dense<0.000000e+00> : vector<4x8x8xf32>
    %185 = tpu.matmul %178, %160, %cst_98 {dimension_numbers = #tpu.dot_dimension_numbers<[2], [1], [1], [2], [0, 0, 0, 1, 1, 2], [0], [0]>} : vector<4x8x32xbf16>, vector<4x32x8xbf16>, vector<4x8x8xf32> -> vector<4x8x8xf32>
    "tpu.trace_stop"() : () -> ()
    %186 = vector.broadcast %166 : vector<4x1x8xf32> to vector<4x8x8xf32>
    %187 = arith.addf %185, %186 : vector<4x8x8xf32>
    %188 = arith.truncf %181 : vector<4x8x8xf32> to vector<4x8x8xbf16>
    %189 = arith.truncf %184 : vector<4x8x8xf32> to vector<4x8x8xbf16>
    "tpu.trace_start"() <{level = 10 : i32, message = "hqe,hke->hqk"}> : () -> ()
    %cst_99 = arith.constant dense<0.000000e+00> : vector<4x8x8xf32>
    %190 = tpu.matmul %188, %189, %cst_99 {dimension_numbers = #tpu.dot_dimension_numbers<[2], [2], [1], [1], [0, 0, 0, 1, 1, 1], [0], [0]>} : vector<4x8x8xbf16>, vector<4x8x8xbf16>, vector<4x8x8xf32> -> vector<4x8x8xf32>
    "tpu.trace_stop"() : () -> ()
    %cst_100 = arith.constant dense<0xFF800000> : vector<4x8xf32>
    %191 = vector.multi_reduction <maximumf>, %190, %cst_100 [2] : vector<4x8x8xf32> to vector<4x8xf32>
    %192 = vector.shape_cast %191 : vector<4x8xf32> to vector<4x8x1xf32>
    %193 = vector.broadcast %192 : vector<4x8x1xf32> to vector<4x8x8xf32>
    %194 = arith.subf %190, %193 : vector<4x8x8xf32>
    %195 = math.exp %194 : vector<4x8x8xf32>
    %cst_101 = arith.constant dense<0.000000e+00> : vector<4x8xf32>
    %196 = vector.multi_reduction <add>, %195, %cst_101 [2] : vector<4x8x8xf32> to vector<4x8xf32>
    %197 = vector.shape_cast %196 : vector<4x8xf32> to vector<4x8x1xf32>
    %198 = tpu.reciprocal %197 {approx = true} : vector<4x8x1xf32> -> vector<4x8x1xf32>
    %199 = vector.broadcast %198 : vector<4x8x1xf32> to vector<4x8x8xf32>
    %200 = arith.mulf %195, %199 : vector<4x8x8xf32>
    %201 = arith.truncf %200 : vector<4x8x8xf32> to vector<4x8x8xbf16>
    %202 = arith.truncf %187 : vector<4x8x8xf32> to vector<4x8x8xbf16>
    "tpu.trace_start"() <{level = 10 : i32, message = "hqk,hke->hqe"}> : () -> ()
    %cst_102 = arith.constant dense<0.000000e+00> : vector<4x8x8xf32>
    %203 = tpu.matmul %201, %202, %cst_102 {dimension_numbers = #tpu.dot_dimension_numbers<[2], [1], [1], [2], [0, 0, 0, 1, 1, 2], [0], [0]>} : vector<4x8x8xbf16>, vector<4x8x8xbf16>, vector<4x8x8xf32> -> vector<4x8x8xf32>
    "tpu.trace_stop"() : () -> ()
    %204 = arith.truncf %203 : vector<4x8x8xf32> to vector<4x8x8xbf16>
    "tpu.trace_start"() <{level = 10 : i32, message = "hse,hef->hsf"}> : () -> ()
    %cst_103 = arith.constant dense<0.000000e+00> : vector<4x8x32xf32>
    %205 = tpu.matmul %204, %168, %cst_103 {dimension_numbers = #tpu.dot_dimension_numbers<[2], [1], [1], [2], [0, 0, 0, 1, 1, 2], [0], [0]>} : vector<4x8x8xbf16>, vector<4x8x32xbf16>, vector<4x8x32xf32> -> vector<4x8x32xf32>
    "tpu.trace_stop"() : () -> ()
    %206 = vector.extract_strided_slice %205 {offsets = [0, 0, 0], sizes = [1, 8, 32], strides = [1, 1, 1]} : vector<4x8x32xf32> to vector<1x8x32xf32>
    %207 = vector.shape_cast %206 : vector<1x8x32xf32> to vector<8x32xf32>
    %208 = vector.extract_strided_slice %205 {offsets = [1, 0, 0], sizes = [1, 8, 32], strides = [1, 1, 1]} : vector<4x8x32xf32> to vector<1x8x32xf32>
    %209 = vector.shape_cast %208 : vector<1x8x32xf32> to vector<8x32xf32>
    %210 = arith.addf %207, %209 : vector<8x32xf32>
    %211 = vector.extract_strided_slice %205 {offsets = [2, 0, 0], sizes = [1, 8, 32], strides = [1, 1, 1]} : vector<4x8x32xf32> to vector<1x8x32xf32>
    %212 = vector.shape_cast %211 : vector<1x8x32xf32> to vector<8x32xf32>
    %213 = arith.addf %210, %212 : vector<8x32xf32>
    %214 = vector.extract_strided_slice %205 {offsets = [3, 0, 0], sizes = [1, 8, 32], strides = [1, 1, 1]} : vector<4x8x32xf32> to vector<1x8x32xf32>
    %215 = vector.shape_cast %214 : vector<1x8x32xf32> to vector<8x32xf32>
    %216 = arith.addf %213, %215 : vector<8x32xf32>
    %217 = vector.broadcast %170 : vector<1x32xf32> to vector<8x32xf32>
    %218 = arith.addf %216, %217 : vector<8x32xf32>
    %219 = vector.extract_strided_slice %154 {offsets = [8, 0], sizes = [8, 32], strides = [1, 1]} : vector<16x32xf32> to vector<8x32xf32>
    %220 = arith.truncf %219 : vector<8x32xf32> to vector<8x32xbf16>
    %221 = vector.shape_cast %220 : vector<8x32xbf16> to vector<1x8x32xbf16>
    %222 = vector.broadcast %221 : vector<1x8x32xbf16> to vector<4x8x32xbf16>
    %223 = vector.extract_strided_slice %6 {offsets = [8, 0], sizes = [8, 32], strides = [1, 1]} : vector<16x32xf32> to vector<8x32xf32>
    %224 = arith.truncf %223 : vector<8x32xf32> to vector<8x32xbf16>
    %225 = vector.shape_cast %224 : vector<8x32xbf16> to vector<1x8x32xbf16>
    %226 = vector.broadcast %225 : vector<1x8x32xbf16> to vector<4x8x32xbf16>
    "tpu.trace_start"() <{level = 10 : i32, message = "hsd,hde->hse"}> : () -> ()
    %cst_104 = arith.constant dense<0.000000e+00> : vector<4x8x8xf32>
    %227 = tpu.matmul %222, %156, %cst_104 {dimension_numbers = #tpu.dot_dimension_numbers<[2], [1], [1], [2], [0, 0, 0, 1, 1, 2], [0], [0]>} : vector<4x8x32xbf16>, vector<4x32x8xbf16>, vector<4x8x8xf32> -> vector<4x8x8xf32>
    "tpu.trace_stop"() : () -> ()
    %228 = vector.broadcast %162 : vector<4x1x8xf32> to vector<4x8x8xf32>
    %229 = arith.addf %227, %228 : vector<4x8x8xf32>
    "tpu.trace_start"() <{level = 10 : i32, message = "hsd,hde->hse"}> : () -> ()
    %cst_105 = arith.constant dense<0.000000e+00> : vector<4x8x8xf32>
    %230 = tpu.matmul %226, %158, %cst_105 {dimension_numbers = #tpu.dot_dimension_numbers<[2], [1], [1], [2], [0, 0, 0, 1, 1, 2], [0], [0]>} : vector<4x8x32xbf16>, vector<4x32x8xbf16>, vector<4x8x8xf32> -> vector<4x8x8xf32>
    "tpu.trace_stop"() : () -> ()
    %231 = vector.broadcast %164 : vector<4x1x8xf32> to vector<4x8x8xf32>
    %232 = arith.addf %230, %231 : vector<4x8x8xf32>
    "tpu.trace_start"() <{level = 10 : i32, message = "hsd,hde->hse"}> : () -> ()
    %cst_106 = arith.constant dense<0.000000e+00> : vector<4x8x8xf32>
    %233 = tpu.matmul %226, %160, %cst_106 {dimension_numbers = #tpu.dot_dimension_numbers<[2], [1], [1], [2], [0, 0, 0, 1, 1, 2], [0], [0]>} : vector<4x8x32xbf16>, vector<4x32x8xbf16>, vector<4x8x8xf32> -> vector<4x8x8xf32>
    "tpu.trace_stop"() : () -> ()
    %234 = vector.broadcast %166 : vector<4x1x8xf32> to vector<4x8x8xf32>
    %235 = arith.addf %233, %234 : vector<4x8x8xf32>
    %236 = arith.truncf %229 : vector<4x8x8xf32> to vector<4x8x8xbf16>
    %237 = arith.truncf %232 : vector<4x8x8xf32> to vector<4x8x8xbf16>
    "tpu.trace_start"() <{level = 10 : i32, message = "hqe,hke->hqk"}> : () -> ()
    %cst_107 = arith.constant dense<0.000000e+00> : vector<4x8x8xf32>
    %238 = tpu.matmul %236, %237, %cst_107 {dimension_numbers = #tpu.dot_dimension_numbers<[2], [2], [1], [1], [0, 0, 0, 1, 1, 1], [0], [0]>} : vector<4x8x8xbf16>, vector<4x8x8xbf16>, vector<4x8x8xf32> -> vector<4x8x8xf32>
    "tpu.trace_stop"() : () -> ()
    %cst_108 = arith.constant dense<0xFF800000> : vector<4x8xf32>
    %239 = vector.multi_reduction <maximumf>, %238, %cst_108 [2] : vector<4x8x8xf32> to vector<4x8xf32>
    %240 = vector.shape_cast %239 : vector<4x8xf32> to vector<4x8x1xf32>
    %241 = vector.broadcast %240 : vector<4x8x1xf32> to vector<4x8x8xf32>
    %242 = arith.subf %238, %241 : vector<4x8x8xf32>
    %243 = math.exp %242 : vector<4x8x8xf32>
    %cst_109 = arith.constant dense<0.000000e+00> : vector<4x8xf32>
    %244 = vector.multi_reduction <add>, %243, %cst_109 [2] : vector<4x8x8xf32> to vector<4x8xf32>
    %245 = vector.shape_cast %244 : vector<4x8xf32> to vector<4x8x1xf32>
    %246 = tpu.reciprocal %245 {approx = true} : vector<4x8x1xf32> -> vector<4x8x1xf32>
    %247 = vector.broadcast %246 : vector<4x8x1xf32> to vector<4x8x8xf32>
    %248 = arith.mulf %243, %247 : vector<4x8x8xf32>
    %249 = arith.truncf %248 : vector<4x8x8xf32> to vector<4x8x8xbf16>
    %250 = arith.truncf %235 : vector<4x8x8xf32> to vector<4x8x8xbf16>
    "tpu.trace_start"() <{level = 10 : i32, message = "hqk,hke->hqe"}> : () -> ()
    %cst_110 = arith.constant dense<0.000000e+00> : vector<4x8x8xf32>
    %251 = tpu.matmul %249, %250, %cst_110 {dimension_numbers = #tpu.dot_dimension_numbers<[2], [1], [1], [2], [0, 0, 0, 1, 1, 2], [0], [0]>} : vector<4x8x8xbf16>, vector<4x8x8xbf16>, vector<4x8x8xf32> -> vector<4x8x8xf32>
    "tpu.trace_stop"() : () -> ()
    %252 = arith.truncf %251 : vector<4x8x8xf32> to vector<4x8x8xbf16>
    "tpu.trace_start"() <{level = 10 : i32, message = "hse,hef->hsf"}> : () -> ()
    %cst_111 = arith.constant dense<0.000000e+00> : vector<4x8x32xf32>
    %253 = tpu.matmul %252, %168, %cst_111 {dimension_numbers = #tpu.dot_dimension_numbers<[2], [1], [1], [2], [0, 0, 0, 1, 1, 2], [0], [0]>} : vector<4x8x8xbf16>, vector<4x8x32xbf16>, vector<4x8x32xf32> -> vector<4x8x32xf32>
    "tpu.trace_stop"() : () -> ()
    %254 = vector.extract_strided_slice %253 {offsets = [0, 0, 0], sizes = [1, 8, 32], strides = [1, 1, 1]} : vector<4x8x32xf32> to vector<1x8x32xf32>
    %255 = vector.shape_cast %254 : vector<1x8x32xf32> to vector<8x32xf32>
    %256 = vector.extract_strided_slice %253 {offsets = [1, 0, 0], sizes = [1, 8, 32], strides = [1, 1, 1]} : vector<4x8x32xf32> to vector<1x8x32xf32>
    %257 = vector.shape_cast %256 : vector<1x8x32xf32> to vector<8x32xf32>
    %258 = arith.addf %255, %257 : vector<8x32xf32>
    %259 = vector.extract_strided_slice %253 {offsets = [2, 0, 0], sizes = [1, 8, 32], strides = [1, 1, 1]} : vector<4x8x32xf32> to vector<1x8x32xf32>
    %260 = vector.shape_cast %259 : vector<1x8x32xf32> to vector<8x32xf32>
    %261 = arith.addf %258, %260 : vector<8x32xf32>
    %262 = vector.extract_strided_slice %253 {offsets = [3, 0, 0], sizes = [1, 8, 32], strides = [1, 1, 1]} : vector<4x8x32xf32> to vector<1x8x32xf32>
    %263 = vector.shape_cast %262 : vector<1x8x32xf32> to vector<8x32xf32>
    %264 = arith.addf %261, %263 : vector<8x32xf32>
    %265 = vector.broadcast %170 : vector<1x32xf32> to vector<8x32xf32>
    %266 = arith.addf %264, %265 : vector<8x32xf32>
    %267 = tpu.concatenate %218, %266 in 0 : vector<8x32xf32>, vector<8x32xf32> -> vector<16x32xf32>
    %268 = arith.addf %154, %267 : vector<16x32xf32>
    %c0_112 = arith.constant 0 : index
    %c0_113 = arith.constant 0 : index
    %c0_114 = arith.constant 0 : index
    %269 = vector.load %arg21[%c0_112, %c0_113, %c0_114] : memref<2x1x32xf32, #tpu.memory_space<vmem>>, vector<1x1x32xf32>
    %270 = vector.shape_cast %269 : vector<1x1x32xf32> to vector<1x32xf32>
    %c0_115 = arith.constant 0 : index
    %c0_116 = arith.constant 0 : index
    %c0_117 = arith.constant 0 : index
    %271 = vector.load %arg22[%c0_115, %c0_116, %c0_117] : memref<2x1x32xf32, #tpu.memory_space<vmem>>, vector<1x1x32xf32>
    %272 = vector.shape_cast %271 : vector<1x1x32xf32> to vector<1x32xf32>
    %cst_118 = arith.constant dense<0.000000e+00> : vector<16xf32>
    %273 = vector.multi_reduction <add>, %268, %cst_118 [1] : vector<16x32xf32> to vector<16xf32>
    %274 = vector.shape_cast %273 : vector<16xf32> to vector<16x1xf32>
    %cst_119 = arith.constant 3.200000e+01 : f32
    %275 = vector.broadcast %cst_119 : f32 to vector<16x1xf32>
    %276 = arith.divf %274, %275 : vector<16x1xf32>
    %277 = vector.broadcast %276 : vector<16x1xf32> to vector<16x32xf32>
    %278 = arith.subf %268, %277 : vector<16x32xf32>
    %279 = arith.mulf %278, %278 : vector<16x32xf32>
    %cst_120 = arith.constant dense<0.000000e+00> : vector<16xf32>
    %280 = vector.multi_reduction <add>, %279, %cst_120 [1] : vector<16x32xf32> to vector<16xf32>
    %281 = vector.shape_cast %280 : vector<16xf32> to vector<16x1xf32>
    %cst_121 = arith.constant 3.200000e+01 : f32
    %282 = vector.broadcast %cst_121 : f32 to vector<16x1xf32>
    %283 = arith.divf %281, %282 : vector<16x1xf32>
    %284 = vector.broadcast %276 : vector<16x1xf32> to vector<16x32xf32>
    %285 = arith.subf %268, %284 : vector<16x32xf32>
    %cst_122 = arith.constant 9.99999974E-6 : f32
    %286 = vector.broadcast %cst_122 : f32 to vector<16x1xf32>
    %287 = arith.addf %283, %286 : vector<16x1xf32>
    %288 = math.rsqrt %287 : vector<16x1xf32>
    %289 = vector.broadcast %288 : vector<16x1xf32> to vector<16x32xf32>
    %290 = arith.mulf %285, %289 : vector<16x32xf32>
    %291 = vector.broadcast %270 : vector<1x32xf32> to vector<16x32xf32>
    %292 = arith.mulf %290, %291 : vector<16x32xf32>
    %293 = vector.broadcast %272 : vector<1x32xf32> to vector<16x32xf32>
    %294 = arith.addf %292, %293 : vector<16x32xf32>
    %c0_123 = arith.constant 0 : index
    %c0_124 = arith.constant 0 : index
    %c0_125 = arith.constant 0 : index
    %295 = vector.load %arg23[%c0_123, %c0_124, %c0_125] : memref<2x32x64xbf16, #tpu.memory_space<vmem>>, vector<1x32x64xbf16>
    %296 = vector.shape_cast %295 : vector<1x32x64xbf16> to vector<32x64xbf16>
    %c0_126 = arith.constant 0 : index
    %c0_127 = arith.constant 0 : index
    %c0_128 = arith.constant 0 : index
    %297 = vector.load %arg24[%c0_126, %c0_127, %c0_128] : memref<2x1x64xf32, #tpu.memory_space<vmem>>, vector<1x1x64xf32>
    %298 = vector.shape_cast %297 : vector<1x1x64xf32> to vector<1x64xf32>
    %299 = arith.truncf %294 : vector<16x32xf32> to vector<16x32xbf16>
    %cst_129 = arith.constant dense<0.000000e+00> : vector<16x64xf32>
    %300 = tpu.matmul %299, %296, %cst_129 {dimension_numbers = #tpu.dot_dimension_numbers<[1], [0], [0], [1], [0, 0, 1, 1], [], []>} : vector<16x32xbf16>, vector<32x64xbf16>, vector<16x64xf32> -> vector<16x64xf32>
    %301 = vector.broadcast %298 : vector<1x64xf32> to vector<16x64xf32>
    %302 = arith.addf %300, %301 : vector<16x64xf32>
    %cst_130 = arith.constant 0.000000e+00 : f32
    %303 = vector.broadcast %cst_130 : f32 to vector<16x64xf32>
    %304 = arith.maximumf %302, %303 : vector<16x64xf32>
    %c0_131 = arith.constant 0 : index
    %c0_132 = arith.constant 0 : index
    %c0_133 = arith.constant 0 : index
    %305 = vector.load %arg25[%c0_131, %c0_132, %c0_133] : memref<2x64x32xbf16, #tpu.memory_space<vmem>>, vector<1x64x32xbf16>
    %306 = vector.shape_cast %305 : vector<1x64x32xbf16> to vector<64x32xbf16>
    %c0_134 = arith.constant 0 : index
    %c0_135 = arith.constant 0 : index
    %c0_136 = arith.constant 0 : index
    %307 = vector.load %arg26[%c0_134, %c0_135, %c0_136] : memref<2x1x32xf32, #tpu.memory_space<vmem>>, vector<1x1x32xf32>
    %308 = vector.shape_cast %307 : vector<1x1x32xf32> to vector<1x32xf32>
    %309 = arith.truncf %304 : vector<16x64xf32> to vector<16x64xbf16>
    %cst_137 = arith.constant dense<0.000000e+00> : vector<16x32xf32>
    %310 = tpu.matmul %309, %306, %cst_137 {dimension_numbers = #tpu.dot_dimension_numbers<[1], [0], [0], [1], [0, 0, 1, 1], [], []>} : vector<16x64xbf16>, vector<64x32xbf16>, vector<16x32xf32> -> vector<16x32xf32>
    %311 = vector.broadcast %308 : vector<1x32xf32> to vector<16x32xf32>
    %312 = arith.addf %310, %311 : vector<16x32xf32>
    %313 = arith.addf %294, %312 : vector<16x32xf32>
    %c0_138 = arith.constant 0 : index
    %c0_139 = arith.constant 0 : index
    %c0_140 = arith.constant 0 : index
    %314 = vector.load %arg27[%c0_138, %c0_139, %c0_140] : memref<2x1x32xf32, #tpu.memory_space<vmem>>, vector<1x1x32xf32>
    %315 = vector.shape_cast %314 : vector<1x1x32xf32> to vector<1x32xf32>
    %c0_141 = arith.constant 0 : index
    %c0_142 = arith.constant 0 : index
    %c0_143 = arith.constant 0 : index
    %316 = vector.load %arg28[%c0_141, %c0_142, %c0_143] : memref<2x1x32xf32, #tpu.memory_space<vmem>>, vector<1x1x32xf32>
    %317 = vector.shape_cast %316 : vector<1x1x32xf32> to vector<1x32xf32>
    %cst_144 = arith.constant dense<0.000000e+00> : vector<16xf32>
    %318 = vector.multi_reduction <add>, %313, %cst_144 [1] : vector<16x32xf32> to vector<16xf32>
    %319 = vector.shape_cast %318 : vector<16xf32> to vector<16x1xf32>
    %cst_145 = arith.constant 3.200000e+01 : f32
    %320 = vector.broadcast %cst_145 : f32 to vector<16x1xf32>
    %321 = arith.divf %319, %320 : vector<16x1xf32>
    %322 = vector.broadcast %321 : vector<16x1xf32> to vector<16x32xf32>
    %323 = arith.subf %313, %322 : vector<16x32xf32>
    %324 = arith.mulf %323, %323 : vector<16x32xf32>
    %cst_146 = arith.constant dense<0.000000e+00> : vector<16xf32>
    %325 = vector.multi_reduction <add>, %324, %cst_146 [1] : vector<16x32xf32> to vector<16xf32>
    %326 = vector.shape_cast %325 : vector<16xf32> to vector<16x1xf32>
    %cst_147 = arith.constant 3.200000e+01 : f32
    %327 = vector.broadcast %cst_147 : f32 to vector<16x1xf32>
    %328 = arith.divf %326, %327 : vector<16x1xf32>
    %329 = vector.broadcast %321 : vector<16x1xf32> to vector<16x32xf32>
    %330 = arith.subf %313, %329 : vector<16x32xf32>
    %cst_148 = arith.constant 9.99999974E-6 : f32
    %331 = vector.broadcast %cst_148 : f32 to vector<16x1xf32>
    %332 = arith.addf %328, %331 : vector<16x1xf32>
    %333 = math.rsqrt %332 : vector<16x1xf32>
    %334 = vector.broadcast %333 : vector<16x1xf32> to vector<16x32xf32>
    %335 = arith.mulf %330, %334 : vector<16x32xf32>
    %336 = vector.broadcast %315 : vector<1x32xf32> to vector<16x32xf32>
    %337 = arith.mulf %335, %336 : vector<16x32xf32>
    %338 = vector.broadcast %317 : vector<1x32xf32> to vector<16x32xf32>
    %339 = arith.addf %337, %338 : vector<16x32xf32>
    %c1 = arith.constant 1 : index
    %c0_149 = arith.constant 0 : index
    %c0_150 = arith.constant 0 : index
    %c0_151 = arith.constant 0 : index
    %340 = vector.load %arg3[%c1, %c0_149, %c0_150, %c0_151] : memref<2x4x32x8xbf16, #tpu.memory_space<vmem>>, vector<1x4x32x8xbf16>
    %341 = vector.shape_cast %340 : vector<1x4x32x8xbf16> to vector<4x32x8xbf16>
    %c1_152 = arith.constant 1 : index
    %c0_153 = arith.constant 0 : index
    %c0_154 = arith.constant 0 : index
    %c0_155 = arith.constant 0 : index
    %342 = vector.load %arg4[%c1_152, %c0_153, %c0_154, %c0_155] : memref<2x4x32x8xbf16, #tpu.memory_space<vmem>>, vector<1x4x32x8xbf16>
    %343 = vector.shape_cast %342 : vector<1x4x32x8xbf16> to vector<4x32x8xbf16>
    %c1_156 = arith.constant 1 : index
    %c0_157 = arith.constant 0 : index
    %c0_158 = arith.constant 0 : index
    %c0_159 = arith.constant 0 : index
    %344 = vector.load %arg5[%c1_156, %c0_157, %c0_158, %c0_159] : memref<2x4x32x8xbf16, #tpu.memory_space<vmem>>, vector<1x4x32x8xbf16>
    %345 = vector.shape_cast %344 : vector<1x4x32x8xbf16> to vector<4x32x8xbf16>
    %c1_160 = arith.constant 1 : index
    %c0_161 = arith.constant 0 : index
    %c0_162 = arith.constant 0 : index
    %c0_163 = arith.constant 0 : index
    %346 = vector.load %arg6[%c1_160, %c0_161, %c0_162, %c0_163] : memref<2x4x1x8xf32, #tpu.memory_space<vmem>>, vector<1x4x1x8xf32>
    %347 = vector.shape_cast %346 : vector<1x4x1x8xf32> to vector<4x1x8xf32>
    %c1_164 = arith.constant 1 : index
    %c0_165 = arith.constant 0 : index
    %c0_166 = arith.constant 0 : index
    %c0_167 = arith.constant 0 : index
    %348 = vector.load %arg7[%c1_164, %c0_165, %c0_166, %c0_167] : memref<2x4x1x8xf32, #tpu.memory_space<vmem>>, vector<1x4x1x8xf32>
    %349 = vector.shape_cast %348 : vector<1x4x1x8xf32> to vector<4x1x8xf32>
    %c1_168 = arith.constant 1 : index
    %c0_169 = arith.constant 0 : index
    %c0_170 = arith.constant 0 : index
    %c0_171 = arith.constant 0 : index
    %350 = vector.load %arg8[%c1_168, %c0_169, %c0_170, %c0_171] : memref<2x4x1x8xf32, #tpu.memory_space<vmem>>, vector<1x4x1x8xf32>
    %351 = vector.shape_cast %350 : vector<1x4x1x8xf32> to vector<4x1x8xf32>
    %c1_172 = arith.constant 1 : index
    %c0_173 = arith.constant 0 : index
    %c0_174 = arith.constant 0 : index
    %c0_175 = arith.constant 0 : index
    %352 = vector.load %arg9[%c1_172, %c0_173, %c0_174, %c0_175] : memref<2x4x8x32xbf16, #tpu.memory_space<vmem>>, vector<1x4x8x32xbf16>
    %353 = vector.shape_cast %352 : vector<1x4x8x32xbf16> to vector<4x8x32xbf16>
    %c1_176 = arith.constant 1 : index
    %c0_177 = arith.constant 0 : index
    %c0_178 = arith.constant 0 : index
    %354 = vector.load %arg10[%c1_176, %c0_177, %c0_178] : memref<2x1x32xf32, #tpu.memory_space<vmem>>, vector<1x1x32xf32>
    %355 = vector.shape_cast %354 : vector<1x1x32xf32> to vector<1x32xf32>
    %356 = vector.extract_strided_slice %339 {offsets = [0, 0], sizes = [8, 32], strides = [1, 1]} : vector<16x32xf32> to vector<8x32xf32>
    %357 = arith.truncf %356 : vector<8x32xf32> to vector<8x32xbf16>
    %358 = vector.shape_cast %357 : vector<8x32xbf16> to vector<1x8x32xbf16>
    %359 = vector.broadcast %358 : vector<1x8x32xbf16> to vector<4x8x32xbf16>
    %360 = vector.extract_strided_slice %339 {offsets = [0, 0], sizes = [8, 32], strides = [1, 1]} : vector<16x32xf32> to vector<8x32xf32>
    %361 = arith.truncf %360 : vector<8x32xf32> to vector<8x32xbf16>
    %362 = vector.shape_cast %361 : vector<8x32xbf16> to vector<1x8x32xbf16>
    %363 = vector.broadcast %362 : vector<1x8x32xbf16> to vector<4x8x32xbf16>
    "tpu.trace_start"() <{level = 10 : i32, message = "hsd,hde->hse"}> : () -> ()
    %cst_179 = arith.constant dense<0.000000e+00> : vector<4x8x8xf32>
    %364 = tpu.matmul %359, %341, %cst_179 {dimension_numbers = #tpu.dot_dimension_numbers<[2], [1], [1], [2], [0, 0, 0, 1, 1, 2], [0], [0]>} : vector<4x8x32xbf16>, vector<4x32x8xbf16>, vector<4x8x8xf32> -> vector<4x8x8xf32>
    "tpu.trace_stop"() : () -> ()
    %365 = vector.broadcast %347 : vector<4x1x8xf32> to vector<4x8x8xf32>
    %366 = arith.addf %364, %365 : vector<4x8x8xf32>
    "tpu.trace_start"() <{level = 10 : i32, message = "hsd,hde->hse"}> : () -> ()
    %cst_180 = arith.constant dense<0.000000e+00> : vector<4x8x8xf32>
    %367 = tpu.matmul %363, %343, %cst_180 {dimension_numbers = #tpu.dot_dimension_numbers<[2], [1], [1], [2], [0, 0, 0, 1, 1, 2], [0], [0]>} : vector<4x8x32xbf16>, vector<4x32x8xbf16>, vector<4x8x8xf32> -> vector<4x8x8xf32>
    "tpu.trace_stop"() : () -> ()
    %368 = vector.broadcast %349 : vector<4x1x8xf32> to vector<4x8x8xf32>
    %369 = arith.addf %367, %368 : vector<4x8x8xf32>
    "tpu.trace_start"() <{level = 10 : i32, message = "hsd,hde->hse"}> : () -> ()
    %cst_181 = arith.constant dense<0.000000e+00> : vector<4x8x8xf32>
    %370 = tpu.matmul %363, %345, %cst_181 {dimension_numbers = #tpu.dot_dimension_numbers<[2], [1], [1], [2], [0, 0, 0, 1, 1, 2], [0], [0]>} : vector<4x8x32xbf16>, vector<4x32x8xbf16>, vector<4x8x8xf32> -> vector<4x8x8xf32>
    "tpu.trace_stop"() : () -> ()
    %371 = vector.broadcast %351 : vector<4x1x8xf32> to vector<4x8x8xf32>
    %372 = arith.addf %370, %371 : vector<4x8x8xf32>
    %373 = arith.truncf %366 : vector<4x8x8xf32> to vector<4x8x8xbf16>
    %374 = arith.truncf %369 : vector<4x8x8xf32> to vector<4x8x8xbf16>
    "tpu.trace_start"() <{level = 10 : i32, message = "hqe,hke->hqk"}> : () -> ()
    %cst_182 = arith.constant dense<0.000000e+00> : vector<4x8x8xf32>
    %375 = tpu.matmul %373, %374, %cst_182 {dimension_numbers = #tpu.dot_dimension_numbers<[2], [2], [1], [1], [0, 0, 0, 1, 1, 1], [0], [0]>} : vector<4x8x8xbf16>, vector<4x8x8xbf16>, vector<4x8x8xf32> -> vector<4x8x8xf32>
    "tpu.trace_stop"() : () -> ()
    %376 = arith.addf %375, %12 : vector<4x8x8xf32>
    %cst_183 = arith.constant dense<0xFF800000> : vector<4x8xf32>
    %377 = vector.multi_reduction <maximumf>, %376, %cst_183 [2] : vector<4x8x8xf32> to vector<4x8xf32>
    %378 = vector.shape_cast %377 : vector<4x8xf32> to vector<4x8x1xf32>
    %379 = vector.broadcast %378 : vector<4x8x1xf32> to vector<4x8x8xf32>
    %380 = arith.subf %376, %379 : vector<4x8x8xf32>
    %381 = math.exp %380 : vector<4x8x8xf32>
    %cst_184 = arith.constant dense<0.000000e+00> : vector<4x8xf32>
    %382 = vector.multi_reduction <add>, %381, %cst_184 [2] : vector<4x8x8xf32> to vector<4x8xf32>
    %383 = vector.shape_cast %382 : vector<4x8xf32> to vector<4x8x1xf32>
    %384 = tpu.reciprocal %383 {approx = true} : vector<4x8x1xf32> -> vector<4x8x1xf32>
    %385 = vector.broadcast %384 : vector<4x8x1xf32> to vector<4x8x8xf32>
    %386 = arith.mulf %381, %385 : vector<4x8x8xf32>
    %387 = arith.truncf %386 : vector<4x8x8xf32> to vector<4x8x8xbf16>
    %388 = arith.truncf %372 : vector<4x8x8xf32> to vector<4x8x8xbf16>
    "tpu.trace_start"() <{level = 10 : i32, message = "hqk,hke->hqe"}> : () -> ()
    %cst_185 = arith.constant dense<0.000000e+00> : vector<4x8x8xf32>
    %389 = tpu.matmul %387, %388, %cst_185 {dimension_numbers = #tpu.dot_dimension_numbers<[2], [1], [1], [2], [0, 0, 0, 1, 1, 2], [0], [0]>} : vector<4x8x8xbf16>, vector<4x8x8xbf16>, vector<4x8x8xf32> -> vector<4x8x8xf32>
    "tpu.trace_stop"() : () -> ()
    %390 = arith.truncf %389 : vector<4x8x8xf32> to vector<4x8x8xbf16>
    "tpu.trace_start"() <{level = 10 : i32, message = "hse,hef->hsf"}> : () -> ()
    %cst_186 = arith.constant dense<0.000000e+00> : vector<4x8x32xf32>
    %391 = tpu.matmul %390, %353, %cst_186 {dimension_numbers = #tpu.dot_dimension_numbers<[2], [1], [1], [2], [0, 0, 0, 1, 1, 2], [0], [0]>} : vector<4x8x8xbf16>, vector<4x8x32xbf16>, vector<4x8x32xf32> -> vector<4x8x32xf32>
    "tpu.trace_stop"() : () -> ()
    %392 = vector.extract_strided_slice %391 {offsets = [0, 0, 0], sizes = [1, 8, 32], strides = [1, 1, 1]} : vector<4x8x32xf32> to vector<1x8x32xf32>
    %393 = vector.shape_cast %392 : vector<1x8x32xf32> to vector<8x32xf32>
    %394 = vector.extract_strided_slice %391 {offsets = [1, 0, 0], sizes = [1, 8, 32], strides = [1, 1, 1]} : vector<4x8x32xf32> to vector<1x8x32xf32>
    %395 = vector.shape_cast %394 : vector<1x8x32xf32> to vector<8x32xf32>
    %396 = arith.addf %393, %395 : vector<8x32xf32>
    %397 = vector.extract_strided_slice %391 {offsets = [2, 0, 0], sizes = [1, 8, 32], strides = [1, 1, 1]} : vector<4x8x32xf32> to vector<1x8x32xf32>
    %398 = vector.shape_cast %397 : vector<1x8x32xf32> to vector<8x32xf32>
    %399 = arith.addf %396, %398 : vector<8x32xf32>
    %400 = vector.extract_strided_slice %391 {offsets = [3, 0, 0], sizes = [1, 8, 32], strides = [1, 1, 1]} : vector<4x8x32xf32> to vector<1x8x32xf32>
    %401 = vector.shape_cast %400 : vector<1x8x32xf32> to vector<8x32xf32>
    %402 = arith.addf %399, %401 : vector<8x32xf32>
    %403 = vector.broadcast %355 : vector<1x32xf32> to vector<8x32xf32>
    %404 = arith.addf %402, %403 : vector<8x32xf32>
    %405 = vector.extract_strided_slice %339 {offsets = [8, 0], sizes = [8, 32], strides = [1, 1]} : vector<16x32xf32> to vector<8x32xf32>
    %406 = arith.truncf %405 : vector<8x32xf32> to vector<8x32xbf16>
    %407 = vector.shape_cast %406 : vector<8x32xbf16> to vector<1x8x32xbf16>
    %408 = vector.broadcast %407 : vector<1x8x32xbf16> to vector<4x8x32xbf16>
    %409 = vector.extract_strided_slice %339 {offsets = [8, 0], sizes = [8, 32], strides = [1, 1]} : vector<16x32xf32> to vector<8x32xf32>
    %410 = arith.truncf %409 : vector<8x32xf32> to vector<8x32xbf16>
    %411 = vector.shape_cast %410 : vector<8x32xbf16> to vector<1x8x32xbf16>
    %412 = vector.broadcast %411 : vector<1x8x32xbf16> to vector<4x8x32xbf16>
    "tpu.trace_start"() <{level = 10 : i32, message = "hsd,hde->hse"}> : () -> ()
    %cst_187 = arith.constant dense<0.000000e+00> : vector<4x8x8xf32>
    %413 = tpu.matmul %408, %341, %cst_187 {dimension_numbers = #tpu.dot_dimension_numbers<[2], [1], [1], [2], [0, 0, 0, 1, 1, 2], [0], [0]>} : vector<4x8x32xbf16>, vector<4x32x8xbf16>, vector<4x8x8xf32> -> vector<4x8x8xf32>
    "tpu.trace_stop"() : () -> ()
    %414 = vector.broadcast %347 : vector<4x1x8xf32> to vector<4x8x8xf32>
    %415 = arith.addf %413, %414 : vector<4x8x8xf32>
    "tpu.trace_start"() <{level = 10 : i32, message = "hsd,hde->hse"}> : () -> ()
    %cst_188 = arith.constant dense<0.000000e+00> : vector<4x8x8xf32>
    %416 = tpu.matmul %412, %343, %cst_188 {dimension_numbers = #tpu.dot_dimension_numbers<[2], [1], [1], [2], [0, 0, 0, 1, 1, 2], [0], [0]>} : vector<4x8x32xbf16>, vector<4x32x8xbf16>, vector<4x8x8xf32> -> vector<4x8x8xf32>
    "tpu.trace_stop"() : () -> ()
    %417 = vector.broadcast %349 : vector<4x1x8xf32> to vector<4x8x8xf32>
    %418 = arith.addf %416, %417 : vector<4x8x8xf32>
    "tpu.trace_start"() <{level = 10 : i32, message = "hsd,hde->hse"}> : () -> ()
    %cst_189 = arith.constant dense<0.000000e+00> : vector<4x8x8xf32>
    %419 = tpu.matmul %412, %345, %cst_189 {dimension_numbers = #tpu.dot_dimension_numbers<[2], [1], [1], [2], [0, 0, 0, 1, 1, 2], [0], [0]>} : vector<4x8x32xbf16>, vector<4x32x8xbf16>, vector<4x8x8xf32> -> vector<4x8x8xf32>
    "tpu.trace_stop"() : () -> ()
    %420 = vector.broadcast %351 : vector<4x1x8xf32> to vector<4x8x8xf32>
    %421 = arith.addf %419, %420 : vector<4x8x8xf32>
    %422 = arith.truncf %415 : vector<4x8x8xf32> to vector<4x8x8xbf16>
    %423 = arith.truncf %418 : vector<4x8x8xf32> to vector<4x8x8xbf16>
    "tpu.trace_start"() <{level = 10 : i32, message = "hqe,hke->hqk"}> : () -> ()
    %cst_190 = arith.constant dense<0.000000e+00> : vector<4x8x8xf32>
    %424 = tpu.matmul %422, %423, %cst_190 {dimension_numbers = #tpu.dot_dimension_numbers<[2], [2], [1], [1], [0, 0, 0, 1, 1, 1], [0], [0]>} : vector<4x8x8xbf16>, vector<4x8x8xbf16>, vector<4x8x8xf32> -> vector<4x8x8xf32>
    "tpu.trace_stop"() : () -> ()
    %425 = arith.addf %424, %12 : vector<4x8x8xf32>
    %cst_191 = arith.constant dense<0xFF800000> : vector<4x8xf32>
    %426 = vector.multi_reduction <maximumf>, %425, %cst_191 [2] : vector<4x8x8xf32> to vector<4x8xf32>
    %427 = vector.shape_cast %426 : vector<4x8xf32> to vector<4x8x1xf32>
    %428 = vector.broadcast %427 : vector<4x8x1xf32> to vector<4x8x8xf32>
    %429 = arith.subf %425, %428 : vector<4x8x8xf32>
    %430 = math.exp %429 : vector<4x8x8xf32>
    %cst_192 = arith.constant dense<0.000000e+00> : vector<4x8xf32>
    %431 = vector.multi_reduction <add>, %430, %cst_192 [2] : vector<4x8x8xf32> to vector<4x8xf32>
    %432 = vector.shape_cast %431 : vector<4x8xf32> to vector<4x8x1xf32>
    %433 = tpu.reciprocal %432 {approx = true} : vector<4x8x1xf32> -> vector<4x8x1xf32>
    %434 = vector.broadcast %433 : vector<4x8x1xf32> to vector<4x8x8xf32>
    %435 = arith.mulf %430, %434 : vector<4x8x8xf32>
    %436 = arith.truncf %435 : vector<4x8x8xf32> to vector<4x8x8xbf16>
    %437 = arith.truncf %421 : vector<4x8x8xf32> to vector<4x8x8xbf16>
    "tpu.trace_start"() <{level = 10 : i32, message = "hqk,hke->hqe"}> : () -> ()
    %cst_193 = arith.constant dense<0.000000e+00> : vector<4x8x8xf32>
    %438 = tpu.matmul %436, %437, %cst_193 {dimension_numbers = #tpu.dot_dimension_numbers<[2], [1], [1], [2], [0, 0, 0, 1, 1, 2], [0], [0]>} : vector<4x8x8xbf16>, vector<4x8x8xbf16>, vector<4x8x8xf32> -> vector<4x8x8xf32>
    "tpu.trace_stop"() : () -> ()
    %439 = arith.truncf %438 : vector<4x8x8xf32> to vector<4x8x8xbf16>
    "tpu.trace_start"() <{level = 10 : i32, message = "hse,hef->hsf"}> : () -> ()
    %cst_194 = arith.constant dense<0.000000e+00> : vector<4x8x32xf32>
    %440 = tpu.matmul %439, %353, %cst_194 {dimension_numbers = #tpu.dot_dimension_numbers<[2], [1], [1], [2], [0, 0, 0, 1, 1, 2], [0], [0]>} : vector<4x8x8xbf16>, vector<4x8x32xbf16>, vector<4x8x32xf32> -> vector<4x8x32xf32>
    "tpu.trace_stop"() : () -> ()
    %441 = vector.extract_strided_slice %440 {offsets = [0, 0, 0], sizes = [1, 8, 32], strides = [1, 1, 1]} : vector<4x8x32xf32> to vector<1x8x32xf32>
    %442 = vector.shape_cast %441 : vector<1x8x32xf32> to vector<8x32xf32>
    %443 = vector.extract_strided_slice %440 {offsets = [1, 0, 0], sizes = [1, 8, 32], strides = [1, 1, 1]} : vector<4x8x32xf32> to vector<1x8x32xf32>
    %444 = vector.shape_cast %443 : vector<1x8x32xf32> to vector<8x32xf32>
    %445 = arith.addf %442, %444 : vector<8x32xf32>
    %446 = vector.extract_strided_slice %440 {offsets = [2, 0, 0], sizes = [1, 8, 32], strides = [1, 1, 1]} : vector<4x8x32xf32> to vector<1x8x32xf32>
    %447 = vector.shape_cast %446 : vector<1x8x32xf32> to vector<8x32xf32>
    %448 = arith.addf %445, %447 : vector<8x32xf32>
    %449 = vector.extract_strided_slice %440 {offsets = [3, 0, 0], sizes = [1, 8, 32], strides = [1, 1, 1]} : vector<4x8x32xf32> to vector<1x8x32xf32>
    %450 = vector.shape_cast %449 : vector<1x8x32xf32> to vector<8x32xf32>
    %451 = arith.addf %448, %450 : vector<8x32xf32>
    %452 = vector.broadcast %355 : vector<1x32xf32> to vector<8x32xf32>
    %453 = arith.addf %451, %452 : vector<8x32xf32>
    %454 = tpu.concatenate %404, %453 in 0 : vector<8x32xf32>, vector<8x32xf32> -> vector<16x32xf32>
    %455 = arith.addf %339, %454 : vector<16x32xf32>
    %c1_195 = arith.constant 1 : index
    %c0_196 = arith.constant 0 : index
    %c0_197 = arith.constant 0 : index
    %456 = vector.load %arg11[%c1_195, %c0_196, %c0_197] : memref<2x1x32xf32, #tpu.memory_space<vmem>>, vector<1x1x32xf32>
    %457 = vector.shape_cast %456 : vector<1x1x32xf32> to vector<1x32xf32>
    %c1_198 = arith.constant 1 : index
    %c0_199 = arith.constant 0 : index
    %c0_200 = arith.constant 0 : index
    %458 = vector.load %arg12[%c1_198, %c0_199, %c0_200] : memref<2x1x32xf32, #tpu.memory_space<vmem>>, vector<1x1x32xf32>
    %459 = vector.shape_cast %458 : vector<1x1x32xf32> to vector<1x32xf32>
    %cst_201 = arith.constant dense<0.000000e+00> : vector<16xf32>
    %460 = vector.multi_reduction <add>, %455, %cst_201 [1] : vector<16x32xf32> to vector<16xf32>
    %461 = vector.shape_cast %460 : vector<16xf32> to vector<16x1xf32>
    %cst_202 = arith.constant 3.200000e+01 : f32
    %462 = vector.broadcast %cst_202 : f32 to vector<16x1xf32>
    %463 = arith.divf %461, %462 : vector<16x1xf32>
    %464 = vector.broadcast %463 : vector<16x1xf32> to vector<16x32xf32>
    %465 = arith.subf %455, %464 : vector<16x32xf32>
    %466 = arith.mulf %465, %465 : vector<16x32xf32>
    %cst_203 = arith.constant dense<0.000000e+00> : vector<16xf32>
    %467 = vector.multi_reduction <add>, %466, %cst_203 [1] : vector<16x32xf32> to vector<16xf32>
    %468 = vector.shape_cast %467 : vector<16xf32> to vector<16x1xf32>
    %cst_204 = arith.constant 3.200000e+01 : f32
    %469 = vector.broadcast %cst_204 : f32 to vector<16x1xf32>
    %470 = arith.divf %468, %469 : vector<16x1xf32>
    %471 = vector.broadcast %463 : vector<16x1xf32> to vector<16x32xf32>
    %472 = arith.subf %455, %471 : vector<16x32xf32>
    %cst_205 = arith.constant 9.99999974E-6 : f32
    %473 = vector.broadcast %cst_205 : f32 to vector<16x1xf32>
    %474 = arith.addf %470, %473 : vector<16x1xf32>
    %475 = math.rsqrt %474 : vector<16x1xf32>
    %476 = vector.broadcast %475 : vector<16x1xf32> to vector<16x32xf32>
    %477 = arith.mulf %472, %476 : vector<16x32xf32>
    %478 = vector.broadcast %457 : vector<1x32xf32> to vector<16x32xf32>
    %479 = arith.mulf %477, %478 : vector<16x32xf32>
    %480 = vector.broadcast %459 : vector<1x32xf32> to vector<16x32xf32>
    %481 = arith.addf %479, %480 : vector<16x32xf32>
    %c1_206 = arith.constant 1 : index
    %c0_207 = arith.constant 0 : index
    %c0_208 = arith.constant 0 : index
    %c0_209 = arith.constant 0 : index
    %482 = vector.load %arg13[%c1_206, %c0_207, %c0_208, %c0_209] : memref<2x4x32x8xbf16, #tpu.memory_space<vmem>>, vector<1x4x32x8xbf16>
    %483 = vector.shape_cast %482 : vector<1x4x32x8xbf16> to vector<4x32x8xbf16>
    %c1_210 = arith.constant 1 : index
    %c0_211 = arith.constant 0 : index
    %c0_212 = arith.constant 0 : index
    %c0_213 = arith.constant 0 : index
    %484 = vector.load %arg14[%c1_210, %c0_211, %c0_212, %c0_213] : memref<2x4x32x8xbf16, #tpu.memory_space<vmem>>, vector<1x4x32x8xbf16>
    %485 = vector.shape_cast %484 : vector<1x4x32x8xbf16> to vector<4x32x8xbf16>
    %c1_214 = arith.constant 1 : index
    %c0_215 = arith.constant 0 : index
    %c0_216 = arith.constant 0 : index
    %c0_217 = arith.constant 0 : index
    %486 = vector.load %arg15[%c1_214, %c0_215, %c0_216, %c0_217] : memref<2x4x32x8xbf16, #tpu.memory_space<vmem>>, vector<1x4x32x8xbf16>
    %487 = vector.shape_cast %486 : vector<1x4x32x8xbf16> to vector<4x32x8xbf16>
    %c1_218 = arith.constant 1 : index
    %c0_219 = arith.constant 0 : index
    %c0_220 = arith.constant 0 : index
    %c0_221 = arith.constant 0 : index
    %488 = vector.load %arg16[%c1_218, %c0_219, %c0_220, %c0_221] : memref<2x4x1x8xf32, #tpu.memory_space<vmem>>, vector<1x4x1x8xf32>
    %489 = vector.shape_cast %488 : vector<1x4x1x8xf32> to vector<4x1x8xf32>
    %c1_222 = arith.constant 1 : index
    %c0_223 = arith.constant 0 : index
    %c0_224 = arith.constant 0 : index
    %c0_225 = arith.constant 0 : index
    %490 = vector.load %arg17[%c1_222, %c0_223, %c0_224, %c0_225] : memref<2x4x1x8xf32, #tpu.memory_space<vmem>>, vector<1x4x1x8xf32>
    %491 = vector.shape_cast %490 : vector<1x4x1x8xf32> to vector<4x1x8xf32>
    %c1_226 = arith.constant 1 : index
    %c0_227 = arith.constant 0 : index
    %c0_228 = arith.constant 0 : index
    %c0_229 = arith.constant 0 : index
    %492 = vector.load %arg18[%c1_226, %c0_227, %c0_228, %c0_229] : memref<2x4x1x8xf32, #tpu.memory_space<vmem>>, vector<1x4x1x8xf32>
    %493 = vector.shape_cast %492 : vector<1x4x1x8xf32> to vector<4x1x8xf32>
    %c1_230 = arith.constant 1 : index
    %c0_231 = arith.constant 0 : index
    %c0_232 = arith.constant 0 : index
    %c0_233 = arith.constant 0 : index
    %494 = vector.load %arg19[%c1_230, %c0_231, %c0_232, %c0_233] : memref<2x4x8x32xbf16, #tpu.memory_space<vmem>>, vector<1x4x8x32xbf16>
    %495 = vector.shape_cast %494 : vector<1x4x8x32xbf16> to vector<4x8x32xbf16>
    %c1_234 = arith.constant 1 : index
    %c0_235 = arith.constant 0 : index
    %c0_236 = arith.constant 0 : index
    %496 = vector.load %arg20[%c1_234, %c0_235, %c0_236] : memref<2x1x32xf32, #tpu.memory_space<vmem>>, vector<1x1x32xf32>
    %497 = vector.shape_cast %496 : vector<1x1x32xf32> to vector<1x32xf32>
    %498 = vector.extract_strided_slice %481 {offsets = [0, 0], sizes = [8, 32], strides = [1, 1]} : vector<16x32xf32> to vector<8x32xf32>
    %499 = arith.truncf %498 : vector<8x32xf32> to vector<8x32xbf16>
    %500 = vector.shape_cast %499 : vector<8x32xbf16> to vector<1x8x32xbf16>
    %501 = vector.broadcast %500 : vector<1x8x32xbf16> to vector<4x8x32xbf16>
    %502 = vector.extract_strided_slice %6 {offsets = [0, 0], sizes = [8, 32], strides = [1, 1]} : vector<16x32xf32> to vector<8x32xf32>
    %503 = arith.truncf %502 : vector<8x32xf32> to vector<8x32xbf16>
    %504 = vector.shape_cast %503 : vector<8x32xbf16> to vector<1x8x32xbf16>
    %505 = vector.broadcast %504 : vector<1x8x32xbf16> to vector<4x8x32xbf16>
    "tpu.trace_start"() <{level = 10 : i32, message = "hsd,hde->hse"}> : () -> ()
    %cst_237 = arith.constant dense<0.000000e+00> : vector<4x8x8xf32>
    %506 = tpu.matmul %501, %483, %cst_237 {dimension_numbers = #tpu.dot_dimension_numbers<[2], [1], [1], [2], [0, 0, 0, 1, 1, 2], [0], [0]>} : vector<4x8x32xbf16>, vector<4x32x8xbf16>, vector<4x8x8xf32> -> vector<4x8x8xf32>
    "tpu.trace_stop"() : () -> ()
    %507 = vector.broadcast %489 : vector<4x1x8xf32> to vector<4x8x8xf32>
    %508 = arith.addf %506, %507 : vector<4x8x8xf32>
    "tpu.trace_start"() <{level = 10 : i32, message = "hsd,hde->hse"}> : () -> ()
    %cst_238 = arith.constant dense<0.000000e+00> : vector<4x8x8xf32>
    %509 = tpu.matmul %505, %485, %cst_238 {dimension_numbers = #tpu.dot_dimension_numbers<[2], [1], [1], [2], [0, 0, 0, 1, 1, 2], [0], [0]>} : vector<4x8x32xbf16>, vector<4x32x8xbf16>, vector<4x8x8xf32> -> vector<4x8x8xf32>
    "tpu.trace_stop"() : () -> ()
    %510 = vector.broadcast %491 : vector<4x1x8xf32> to vector<4x8x8xf32>
    %511 = arith.addf %509, %510 : vector<4x8x8xf32>
    "tpu.trace_start"() <{level = 10 : i32, message = "hsd,hde->hse"}> : () -> ()
    %cst_239 = arith.constant dense<0.000000e+00> : vector<4x8x8xf32>
    %512 = tpu.matmul %505, %487, %cst_239 {dimension_numbers = #tpu.dot_dimension_numbers<[2], [1], [1], [2], [0, 0, 0, 1, 1, 2], [0], [0]>} : vector<4x8x32xbf16>, vector<4x32x8xbf16>, vector<4x8x8xf32> -> vector<4x8x8xf32>
    "tpu.trace_stop"() : () -> ()
    %513 = vector.broadcast %493 : vector<4x1x8xf32> to vector<4x8x8xf32>
    %514 = arith.addf %512, %513 : vector<4x8x8xf32>
    %515 = arith.truncf %508 : vector<4x8x8xf32> to vector<4x8x8xbf16>
    %516 = arith.truncf %511 : vector<4x8x8xf32> to vector<4x8x8xbf16>
    "tpu.trace_start"() <{level = 10 : i32, message = "hqe,hke->hqk"}> : () -> ()
    %cst_240 = arith.constant dense<0.000000e+00> : vector<4x8x8xf32>
    %517 = tpu.matmul %515, %516, %cst_240 {dimension_numbers = #tpu.dot_dimension_numbers<[2], [2], [1], [1], [0, 0, 0, 1, 1, 1], [0], [0]>} : vector<4x8x8xbf16>, vector<4x8x8xbf16>, vector<4x8x8xf32> -> vector<4x8x8xf32>
    "tpu.trace_stop"() : () -> ()
    %cst_241 = arith.constant dense<0xFF800000> : vector<4x8xf32>
    %518 = vector.multi_reduction <maximumf>, %517, %cst_241 [2] : vector<4x8x8xf32> to vector<4x8xf32>
    %519 = vector.shape_cast %518 : vector<4x8xf32> to vector<4x8x1xf32>
    %520 = vector.broadcast %519 : vector<4x8x1xf32> to vector<4x8x8xf32>
    %521 = arith.subf %517, %520 : vector<4x8x8xf32>
    %522 = math.exp %521 : vector<4x8x8xf32>
    %cst_242 = arith.constant dense<0.000000e+00> : vector<4x8xf32>
    %523 = vector.multi_reduction <add>, %522, %cst_242 [2] : vector<4x8x8xf32> to vector<4x8xf32>
    %524 = vector.shape_cast %523 : vector<4x8xf32> to vector<4x8x1xf32>
    %525 = tpu.reciprocal %524 {approx = true} : vector<4x8x1xf32> -> vector<4x8x1xf32>
    %526 = vector.broadcast %525 : vector<4x8x1xf32> to vector<4x8x8xf32>
    %527 = arith.mulf %522, %526 : vector<4x8x8xf32>
    %528 = arith.truncf %527 : vector<4x8x8xf32> to vector<4x8x8xbf16>
    %529 = arith.truncf %514 : vector<4x8x8xf32> to vector<4x8x8xbf16>
    "tpu.trace_start"() <{level = 10 : i32, message = "hqk,hke->hqe"}> : () -> ()
    %cst_243 = arith.constant dense<0.000000e+00> : vector<4x8x8xf32>
    %530 = tpu.matmul %528, %529, %cst_243 {dimension_numbers = #tpu.dot_dimension_numbers<[2], [1], [1], [2], [0, 0, 0, 1, 1, 2], [0], [0]>} : vector<4x8x8xbf16>, vector<4x8x8xbf16>, vector<4x8x8xf32> -> vector<4x8x8xf32>
    "tpu.trace_stop"() : () -> ()
    %531 = arith.truncf %530 : vector<4x8x8xf32> to vector<4x8x8xbf16>
    "tpu.trace_start"() <{level = 10 : i32, message = "hse,hef->hsf"}> : () -> ()
    %cst_244 = arith.constant dense<0.000000e+00> : vector<4x8x32xf32>
    %532 = tpu.matmul %531, %495, %cst_244 {dimension_numbers = #tpu.dot_dimension_numbers<[2], [1], [1], [2], [0, 0, 0, 1, 1, 2], [0], [0]>} : vector<4x8x8xbf16>, vector<4x8x32xbf16>, vector<4x8x32xf32> -> vector<4x8x32xf32>
    "tpu.trace_stop"() : () -> ()
    %533 = vector.extract_strided_slice %532 {offsets = [0, 0, 0], sizes = [1, 8, 32], strides = [1, 1, 1]} : vector<4x8x32xf32> to vector<1x8x32xf32>
    %534 = vector.shape_cast %533 : vector<1x8x32xf32> to vector<8x32xf32>
    %535 = vector.extract_strided_slice %532 {offsets = [1, 0, 0], sizes = [1, 8, 32], strides = [1, 1, 1]} : vector<4x8x32xf32> to vector<1x8x32xf32>
    %536 = vector.shape_cast %535 : vector<1x8x32xf32> to vector<8x32xf32>
    %537 = arith.addf %534, %536 : vector<8x32xf32>
    %538 = vector.extract_strided_slice %532 {offsets = [2, 0, 0], sizes = [1, 8, 32], strides = [1, 1, 1]} : vector<4x8x32xf32> to vector<1x8x32xf32>
    %539 = vector.shape_cast %538 : vector<1x8x32xf32> to vector<8x32xf32>
    %540 = arith.addf %537, %539 : vector<8x32xf32>
    %541 = vector.extract_strided_slice %532 {offsets = [3, 0, 0], sizes = [1, 8, 32], strides = [1, 1, 1]} : vector<4x8x32xf32> to vector<1x8x32xf32>
    %542 = vector.shape_cast %541 : vector<1x8x32xf32> to vector<8x32xf32>
    %543 = arith.addf %540, %542 : vector<8x32xf32>
    %544 = vector.broadcast %497 : vector<1x32xf32> to vector<8x32xf32>
    %545 = arith.addf %543, %544 : vector<8x32xf32>
    %546 = vector.extract_strided_slice %481 {offsets = [8, 0], sizes = [8, 32], strides = [1, 1]} : vector<16x32xf32> to vector<8x32xf32>
    %547 = arith.truncf %546 : vector<8x32xf32> to vector<8x32xbf16>
    %548 = vector.shape_cast %547 : vector<8x32xbf16> to vector<1x8x32xbf16>
    %549 = vector.broadcast %548 : vector<1x8x32xbf16> to vector<4x8x32xbf16>
    %550 = vector.extract_strided_slice %6 {offsets = [8, 0], sizes = [8, 32], strides = [1, 1]} : vector<16x32xf32> to vector<8x32xf32>
    %551 = arith.truncf %550 : vector<8x32xf32> to vector<8x32xbf16>
    %552 = vector.shape_cast %551 : vector<8x32xbf16> to vector<1x8x32xbf16>
    %553 = vector.broadcast %552 : vector<1x8x32xbf16> to vector<4x8x32xbf16>
    "tpu.trace_start"() <{level = 10 : i32, message = "hsd,hde->hse"}> : () -> ()
    %cst_245 = arith.constant dense<0.000000e+00> : vector<4x8x8xf32>
    %554 = tpu.matmul %549, %483, %cst_245 {dimension_numbers = #tpu.dot_dimension_numbers<[2], [1], [1], [2], [0, 0, 0, 1, 1, 2], [0], [0]>} : vector<4x8x32xbf16>, vector<4x32x8xbf16>, vector<4x8x8xf32> -> vector<4x8x8xf32>
    "tpu.trace_stop"() : () -> ()
    %555 = vector.broadcast %489 : vector<4x1x8xf32> to vector<4x8x8xf32>
    %556 = arith.addf %554, %555 : vector<4x8x8xf32>
    "tpu.trace_start"() <{level = 10 : i32, message = "hsd,hde->hse"}> : () -> ()
    %cst_246 = arith.constant dense<0.000000e+00> : vector<4x8x8xf32>
    %557 = tpu.matmul %553, %485, %cst_246 {dimension_numbers = #tpu.dot_dimension_numbers<[2], [1], [1], [2], [0, 0, 0, 1, 1, 2], [0], [0]>} : vector<4x8x32xbf16>, vector<4x32x8xbf16>, vector<4x8x8xf32> -> vector<4x8x8xf32>
    "tpu.trace_stop"() : () -> ()
    %558 = vector.broadcast %491 : vector<4x1x8xf32> to vector<4x8x8xf32>
    %559 = arith.addf %557, %558 : vector<4x8x8xf32>
    "tpu.trace_start"() <{level = 10 : i32, message = "hsd,hde->hse"}> : () -> ()
    %cst_247 = arith.constant dense<0.000000e+00> : vector<4x8x8xf32>
    %560 = tpu.matmul %553, %487, %cst_247 {dimension_numbers = #tpu.dot_dimension_numbers<[2], [1], [1], [2], [0, 0, 0, 1, 1, 2], [0], [0]>} : vector<4x8x32xbf16>, vector<4x32x8xbf16>, vector<4x8x8xf32> -> vector<4x8x8xf32>
    "tpu.trace_stop"() : () -> ()
    %561 = vector.broadcast %493 : vector<4x1x8xf32> to vector<4x8x8xf32>
    %562 = arith.addf %560, %561 : vector<4x8x8xf32>
    %563 = arith.truncf %556 : vector<4x8x8xf32> to vector<4x8x8xbf16>
    %564 = arith.truncf %559 : vector<4x8x8xf32> to vector<4x8x8xbf16>
    "tpu.trace_start"() <{level = 10 : i32, message = "hqe,hke->hqk"}> : () -> ()
    %cst_248 = arith.constant dense<0.000000e+00> : vector<4x8x8xf32>
    %565 = tpu.matmul %563, %564, %cst_248 {dimension_numbers = #tpu.dot_dimension_numbers<[2], [2], [1], [1], [0, 0, 0, 1, 1, 1], [0], [0]>} : vector<4x8x8xbf16>, vector<4x8x8xbf16>, vector<4x8x8xf32> -> vector<4x8x8xf32>
    "tpu.trace_stop"() : () -> ()
    %cst_249 = arith.constant dense<0xFF800000> : vector<4x8xf32>
    %566 = vector.multi_reduction <maximumf>, %565, %cst_249 [2] : vector<4x8x8xf32> to vector<4x8xf32>
    %567 = vector.shape_cast %566 : vector<4x8xf32> to vector<4x8x1xf32>
    %568 = vector.broadcast %567 : vector<4x8x1xf32> to vector<4x8x8xf32>
    %569 = arith.subf %565, %568 : vector<4x8x8xf32>
    %570 = math.exp %569 : vector<4x8x8xf32>
    %cst_250 = arith.constant dense<0.000000e+00> : vector<4x8xf32>
    %571 = vector.multi_reduction <add>, %570, %cst_250 [2] : vector<4x8x8xf32> to vector<4x8xf32>
    %572 = vector.shape_cast %571 : vector<4x8xf32> to vector<4x8x1xf32>
    %573 = tpu.reciprocal %572 {approx = true} : vector<4x8x1xf32> -> vector<4x8x1xf32>
    %574 = vector.broadcast %573 : vector<4x8x1xf32> to vector<4x8x8xf32>
    %575 = arith.mulf %570, %574 : vector<4x8x8xf32>
    %576 = arith.truncf %575 : vector<4x8x8xf32> to vector<4x8x8xbf16>
    %577 = arith.truncf %562 : vector<4x8x8xf32> to vector<4x8x8xbf16>
    "tpu.trace_start"() <{level = 10 : i32, message = "hqk,hke->hqe"}> : () -> ()
    %cst_251 = arith.constant dense<0.000000e+00> : vector<4x8x8xf32>
    %578 = tpu.matmul %576, %577, %cst_251 {dimension_numbers = #tpu.dot_dimension_numbers<[2], [1], [1], [2], [0, 0, 0, 1, 1, 2], [0], [0]>} : vector<4x8x8xbf16>, vector<4x8x8xbf16>, vector<4x8x8xf32> -> vector<4x8x8xf32>
    "tpu.trace_stop"() : () -> ()
    %579 = arith.truncf %578 : vector<4x8x8xf32> to vector<4x8x8xbf16>
    "tpu.trace_start"() <{level = 10 : i32, message = "hse,hef->hsf"}> : () -> ()
    %cst_252 = arith.constant dense<0.000000e+00> : vector<4x8x32xf32>
    %580 = tpu.matmul %579, %495, %cst_252 {dimension_numbers = #tpu.dot_dimension_numbers<[2], [1], [1], [2], [0, 0, 0, 1, 1, 2], [0], [0]>} : vector<4x8x8xbf16>, vector<4x8x32xbf16>, vector<4x8x32xf32> -> vector<4x8x32xf32>
    "tpu.trace_stop"() : () -> ()
    %581 = vector.extract_strided_slice %580 {offsets = [0, 0, 0], sizes = [1, 8, 32], strides = [1, 1, 1]} : vector<4x8x32xf32> to vector<1x8x32xf32>
    %582 = vector.shape_cast %581 : vector<1x8x32xf32> to vector<8x32xf32>
    %583 = vector.extract_strided_slice %580 {offsets = [1, 0, 0], sizes = [1, 8, 32], strides = [1, 1, 1]} : vector<4x8x32xf32> to vector<1x8x32xf32>
    %584 = vector.shape_cast %583 : vector<1x8x32xf32> to vector<8x32xf32>
    %585 = arith.addf %582, %584 : vector<8x32xf32>
    %586 = vector.extract_strided_slice %580 {offsets = [2, 0, 0], sizes = [1, 8, 32], strides = [1, 1, 1]} : vector<4x8x32xf32> to vector<1x8x32xf32>
    %587 = vector.shape_cast %586 : vector<1x8x32xf32> to vector<8x32xf32>
    %588 = arith.addf %585, %587 : vector<8x32xf32>
    %589 = vector.extract_strided_slice %580 {offsets = [3, 0, 0], sizes = [1, 8, 32], strides = [1, 1, 1]} : vector<4x8x32xf32> to vector<1x8x32xf32>
    %590 = vector.shape_cast %589 : vector<1x8x32xf32> to vector<8x32xf32>
    %591 = arith.addf %588, %590 : vector<8x32xf32>
    %592 = vector.broadcast %497 : vector<1x32xf32> to vector<8x32xf32>
    %593 = arith.addf %591, %592 : vector<8x32xf32>
    %594 = tpu.concatenate %545, %593 in 0 : vector<8x32xf32>, vector<8x32xf32> -> vector<16x32xf32>
    %595 = arith.addf %481, %594 : vector<16x32xf32>
    %c1_253 = arith.constant 1 : index
    %c0_254 = arith.constant 0 : index
    %c0_255 = arith.constant 0 : index
    %596 = vector.load %arg21[%c1_253, %c0_254, %c0_255] : memref<2x1x32xf32, #tpu.memory_space<vmem>>, vector<1x1x32xf32>
    %597 = vector.shape_cast %596 : vector<1x1x32xf32> to vector<1x32xf32>
    %c1_256 = arith.constant 1 : index
    %c0_257 = arith.constant 0 : index
    %c0_258 = arith.constant 0 : index
    %598 = vector.load %arg22[%c1_256, %c0_257, %c0_258] : memref<2x1x32xf32, #tpu.memory_space<vmem>>, vector<1x1x32xf32>
    %599 = vector.shape_cast %598 : vector<1x1x32xf32> to vector<1x32xf32>
    %cst_259 = arith.constant dense<0.000000e+00> : vector<16xf32>
    %600 = vector.multi_reduction <add>, %595, %cst_259 [1] : vector<16x32xf32> to vector<16xf32>
    %601 = vector.shape_cast %600 : vector<16xf32> to vector<16x1xf32>
    %cst_260 = arith.constant 3.200000e+01 : f32
    %602 = vector.broadcast %cst_260 : f32 to vector<16x1xf32>
    %603 = arith.divf %601, %602 : vector<16x1xf32>
    %604 = vector.broadcast %603 : vector<16x1xf32> to vector<16x32xf32>
    %605 = arith.subf %595, %604 : vector<16x32xf32>
    %606 = arith.mulf %605, %605 : vector<16x32xf32>
    %cst_261 = arith.constant dense<0.000000e+00> : vector<16xf32>
    %607 = vector.multi_reduction <add>, %606, %cst_261 [1] : vector<16x32xf32> to vector<16xf32>
    %608 = vector.shape_cast %607 : vector<16xf32> to vector<16x1xf32>
    %cst_262 = arith.constant 3.200000e+01 : f32
    %609 = vector.broadcast %cst_262 : f32 to vector<16x1xf32>
    %610 = arith.divf %608, %609 : vector<16x1xf32>
    %611 = vector.broadcast %603 : vector<16x1xf32> to vector<16x32xf32>
    %612 = arith.subf %595, %611 : vector<16x32xf32>
    %cst_263 = arith.constant 9.99999974E-6 : f32
    %613 = vector.broadcast %cst_263 : f32 to vector<16x1xf32>
    %614 = arith.addf %610, %613 : vector<16x1xf32>
    %615 = math.rsqrt %614 : vector<16x1xf32>
    %616 = vector.broadcast %615 : vector<16x1xf32> to vector<16x32xf32>
    %617 = arith.mulf %612, %616 : vector<16x32xf32>
    %618 = vector.broadcast %597 : vector<1x32xf32> to vector<16x32xf32>
    %619 = arith.mulf %617, %618 : vector<16x32xf32>
    %620 = vector.broadcast %599 : vector<1x32xf32> to vector<16x32xf32>
    %621 = arith.addf %619, %620 : vector<16x32xf32>
    %c1_264 = arith.constant 1 : index
    %c0_265 = arith.constant 0 : index
    %c0_266 = arith.constant 0 : index
    %622 = vector.load %arg23[%c1_264, %c0_265, %c0_266] : memref<2x32x64xbf16, #tpu.memory_space<vmem>>, vector<1x32x64xbf16>
    %623 = vector.shape_cast %622 : vector<1x32x64xbf16> to vector<32x64xbf16>
    %c1_267 = arith.constant 1 : index
    %c0_268 = arith.constant 0 : index
    %c0_269 = arith.constant 0 : index
    %624 = vector.load %arg24[%c1_267, %c0_268, %c0_269] : memref<2x1x64xf32, #tpu.memory_space<vmem>>, vector<1x1x64xf32>
    %625 = vector.shape_cast %624 : vector<1x1x64xf32> to vector<1x64xf32>
    %626 = arith.truncf %621 : vector<16x32xf32> to vector<16x32xbf16>
    %cst_270 = arith.constant dense<0.000000e+00> : vector<16x64xf32>
    %627 = tpu.matmul %626, %623, %cst_270 {dimension_numbers = #tpu.dot_dimension_numbers<[1], [0], [0], [1], [0, 0, 1, 1], [], []>} : vector<16x32xbf16>, vector<32x64xbf16>, vector<16x64xf32> -> vector<16x64xf32>
    %628 = vector.broadcast %625 : vector<1x64xf32> to vector<16x64xf32>
    %629 = arith.addf %627, %628 : vector<16x64xf32>
    %cst_271 = arith.constant 0.000000e+00 : f32
    %630 = vector.broadcast %cst_271 : f32 to vector<16x64xf32>
    %631 = arith.maximumf %629, %630 : vector<16x64xf32>
    %c1_272 = arith.constant 1 : index
    %c0_273 = arith.constant 0 : index
    %c0_274 = arith.constant 0 : index
    %632 = vector.load %arg25[%c1_272, %c0_273, %c0_274] : memref<2x64x32xbf16, #tpu.memory_space<vmem>>, vector<1x64x32xbf16>
    %633 = vector.shape_cast %632 : vector<1x64x32xbf16> to vector<64x32xbf16>
    %c1_275 = arith.constant 1 : index
    %c0_276 = arith.constant 0 : index
    %c0_277 = arith.constant 0 : index
    %634 = vector.load %arg26[%c1_275, %c0_276, %c0_277] : memref<2x1x32xf32, #tpu.memory_space<vmem>>, vector<1x1x32xf32>
    %635 = vector.shape_cast %634 : vector<1x1x32xf32> to vector<1x32xf32>
    %636 = arith.truncf %631 : vector<16x64xf32> to vector<16x64xbf16>
    %cst_278 = arith.constant dense<0.000000e+00> : vector<16x32xf32>
    %637 = tpu.matmul %636, %633, %cst_278 {dimension_numbers = #tpu.dot_dimension_numbers<[1], [0], [0], [1], [0, 0, 1, 1], [], []>} : vector<16x64xbf16>, vector<64x32xbf16>, vector<16x32xf32> -> vector<16x32xf32>
    %638 = vector.broadcast %635 : vector<1x32xf32> to vector<16x32xf32>
    %639 = arith.addf %637, %638 : vector<16x32xf32>
    %640 = arith.addf %621, %639 : vector<16x32xf32>
    %c1_279 = arith.constant 1 : index
    %c0_280 = arith.constant 0 : index
    %c0_281 = arith.constant 0 : index
    %641 = vector.load %arg27[%c1_279, %c0_280, %c0_281] : memref<2x1x32xf32, #tpu.memory_space<vmem>>, vector<1x1x32xf32>
    %642 = vector.shape_cast %641 : vector<1x1x32xf32> to vector<1x32xf32>
    %c1_282 = arith.constant 1 : index
    %c0_283 = arith.constant 0 : index
    %c0_284 = arith.constant 0 : index
    %643 = vector.load %arg28[%c1_282, %c0_283, %c0_284] : memref<2x1x32xf32, #tpu.memory_space<vmem>>, vector<1x1x32xf32>
    %644 = vector.shape_cast %643 : vector<1x1x32xf32> to vector<1x32xf32>
    %cst_285 = arith.constant dense<0.000000e+00> : vector<16xf32>
    %645 = vector.multi_reduction <add>, %640, %cst_285 [1] : vector<16x32xf32> to vector<16xf32>
    %646 = vector.shape_cast %645 : vector<16xf32> to vector<16x1xf32>
    %cst_286 = arith.constant 3.200000e+01 : f32
    %647 = vector.broadcast %cst_286 : f32 to vector<16x1xf32>
    %648 = arith.divf %646, %647 : vector<16x1xf32>
    %649 = vector.broadcast %648 : vector<16x1xf32> to vector<16x32xf32>
    %650 = arith.subf %640, %649 : vector<16x32xf32>
    %651 = arith.mulf %650, %650 : vector<16x32xf32>
    %cst_287 = arith.constant dense<0.000000e+00> : vector<16xf32>
    %652 = vector.multi_reduction <add>, %651, %cst_287 [1] : vector<16x32xf32> to vector<16xf32>
    %653 = vector.shape_cast %652 : vector<16xf32> to vector<16x1xf32>
    %cst_288 = arith.constant 3.200000e+01 : f32
    %654 = vector.broadcast %cst_288 : f32 to vector<16x1xf32>
    %655 = arith.divf %653, %654 : vector<16x1xf32>
    %656 = vector.broadcast %648 : vector<16x1xf32> to vector<16x32xf32>
    %657 = arith.subf %640, %656 : vector<16x32xf32>
    %cst_289 = arith.constant 9.99999974E-6 : f32
    %658 = vector.broadcast %cst_289 : f32 to vector<16x1xf32>
    %659 = arith.addf %655, %658 : vector<16x1xf32>
    %660 = math.rsqrt %659 : vector<16x1xf32>
    %661 = vector.broadcast %660 : vector<16x1xf32> to vector<16x32xf32>
    %662 = arith.mulf %657, %661 : vector<16x32xf32>
    %663 = vector.broadcast %642 : vector<1x32xf32> to vector<16x32xf32>
    %664 = arith.mulf %662, %663 : vector<16x32xf32>
    %665 = vector.broadcast %644 : vector<1x32xf32> to vector<16x32xf32>
    %666 = arith.addf %664, %665 : vector<16x32xf32>
    %c0_290 = arith.constant 0 : index
    %c0_291 = arith.constant 0 : index
    %667 = vector.load %arg29[%c0_290, %c0_291] : memref<1x32xf32, #tpu.memory_space<vmem>>, vector<1x32xf32>
    %c0_292 = arith.constant 0 : index
    %c0_293 = arith.constant 0 : index
    %668 = vector.load %arg30[%c0_292, %c0_293] : memref<1x32xf32, #tpu.memory_space<vmem>>, vector<1x32xf32>
    %cst_294 = arith.constant dense<0.000000e+00> : vector<16xf32>
    %669 = vector.multi_reduction <add>, %666, %cst_294 [1] : vector<16x32xf32> to vector<16xf32>
    %670 = vector.shape_cast %669 : vector<16xf32> to vector<16x1xf32>
    %cst_295 = arith.constant 3.200000e+01 : f32
    %671 = vector.broadcast %cst_295 : f32 to vector<16x1xf32>
    %672 = arith.divf %670, %671 : vector<16x1xf32>
    %673 = vector.broadcast %672 : vector<16x1xf32> to vector<16x32xf32>
    %674 = arith.subf %666, %673 : vector<16x32xf32>
    %675 = arith.mulf %674, %674 : vector<16x32xf32>
    %cst_296 = arith.constant dense<0.000000e+00> : vector<16xf32>
    %676 = vector.multi_reduction <add>, %675, %cst_296 [1] : vector<16x32xf32> to vector<16xf32>
    %677 = vector.shape_cast %676 : vector<16xf32> to vector<16x1xf32>
    %cst_297 = arith.constant 3.200000e+01 : f32
    %678 = vector.broadcast %cst_297 : f32 to vector<16x1xf32>
    %679 = arith.divf %677, %678 : vector<16x1xf32>
    %680 = vector.broadcast %672 : vector<16x1xf32> to vector<16x32xf32>
    %681 = arith.subf %666, %680 : vector<16x32xf32>
    %cst_298 = arith.constant 9.99999974E-6 : f32
    %682 = vector.broadcast %cst_298 : f32 to vector<16x1xf32>
    %683 = arith.addf %679, %682 : vector<16x1xf32>
    %684 = math.rsqrt %683 : vector<16x1xf32>
    %685 = vector.broadcast %684 : vector<16x1xf32> to vector<16x32xf32>
    %686 = arith.mulf %681, %685 : vector<16x32xf32>
    %687 = vector.broadcast %667 : vector<1x32xf32> to vector<16x32xf32>
    %688 = arith.mulf %686, %687 : vector<16x32xf32>
    %689 = vector.broadcast %668 : vector<1x32xf32> to vector<16x32xf32>
    %690 = arith.addf %688, %689 : vector<16x32xf32>
    %c0_299 = arith.constant 0 : index
    %c0_300 = arith.constant 0 : index
    %691 = vector.load %arg31[%c0_299, %c0_300] : memref<32x16xbf16, #tpu.memory_space<vmem>>, vector<32x16xbf16>
    %c0_301 = arith.constant 0 : index
    %c0_302 = arith.constant 0 : index
    %692 = vector.load %arg32[%c0_301, %c0_302] : memref<1x16xf32, #tpu.memory_space<vmem>>, vector<1x16xf32>
    %693 = arith.truncf %690 : vector<16x32xf32> to vector<16x32xbf16>
    %cst_303 = arith.constant dense<0.000000e+00> : vector<16x16xf32>
    %694 = tpu.matmul %693, %691, %cst_303 {dimension_numbers = #tpu.dot_dimension_numbers<[1], [0], [0], [1], [0, 0, 1, 1], [], []>} : vector<16x32xbf16>, vector<32x16xbf16>, vector<16x16xf32> -> vector<16x16xf32>
    %695 = vector.broadcast %692 : vector<1x16xf32> to vector<16x16xf32>
    %696 = arith.addf %694, %695 : vector<16x16xf32>
    %c0_304 = arith.constant 0 : index
    %c0_305 = arith.constant 0 : index
    %697 = vector.load %arg33[%c0_304, %c0_305] : memref<16x16xf32, #tpu.memory_space<vmem>>, vector<16x16xf32>
    tpu.vector_store %arg33[%c0_304, %c0_305], %696 {strides = array<i32>} : memref<16x16xf32, #tpu.memory_space<vmem>>, vector<16x16xf32>,
    return
  }
}

</mosaic_0001>

<bundles_post_ra>
// kernel: transformer_forward.2
= control target key start
LH: loop header
LB: loop body
LE: loop exit
PB: predicated region body
PF: predicated region fallthrough
CT: control target
= control target key end

     0   :  { %v7013_v0 = vmov 0.0   ;;  %vm7014_vm0 = vmmov 0   ;;  %vm176_vm1 = vcmask 261120   ;;  %vm848_vm2 = vcmask 64512   ;;  %s8469_s2 = inlined_call_operand.vmem [shape: bf16[2,4,32,8], index: 2, kind: input, shape index: {}]   ;;  %s8470_s0 = inlined_call_operand.vmem [shape: f32[16,32], index: 0, kind: input, shape index: {}]   ;;  %s8471_s1 = inlined_call_operand.vmem [shape: f32[16,32], index: 1, kind: input, shape index: {}]   ;;  %s8472_s3 = inlined_call_operand.vmem [shape: bf16[2,4,32,8], index: 3, kind: input, shape index: {}]   ;;  %s8473_s4 = inlined_call_operand.vmem [shape: bf16[2,4,32,8], index: 4, kind: input, shape index: {}]   ;;  %s8474_s6 = inlined_call_operand.vmem [shape: f32[2,4,1,8], index: 6, kind: input, shape index: {}]   ;;  %s8475_s5 = inlined_call_operand.vmem [shape: f32[2,4,1,8], index: 5, kind: input, shape index: {}]   ;;  %s8476_s7 = inlined_call_operand.vmem [shape: f32[2,4,1,8], index: 7, kind: input, shape index: {}]   ;;  %s8477_s8 = inlined_call_operand.vmem [shape: bf16[2,4,8,32], index: 8, kind: input, shape index: {}]   ;;  %s8478_s9 = inlined_call_operand.vmem [shape: f32[2,1,32], index: 9, kind: input, shape index: {}]   ;;  %s8479_s12 = inlined_call_operand.vmem [shape: bf16[2,32,64], index: 12, kind: input, shape index: {}]   ;;  %s8480_s14 = inlined_call_operand.vmem [shape: bf16[2,64,32], index: 14, kind: input, shape index: {}]   ;;  %s8481_s10 = inlined_call_operand.vmem [shape: f32[2,1,32], index: 10, kind: input, shape index: {}]   ;;  %s8482_s11 = inlined_call_operand.vmem [shape: f32[2,1,32], index: 11, kind: input, shape index: {}]   ;;  %s8483_s13 = inlined_call_operand.vmem [shape: f32[2,1,64], index: 13, kind: input, shape index: {}]   ;;  %s8484_s15 = inlined_call_operand.vmem [shape: f32[2,1,32], index: 15, kind: input, shape index: {}]   ;;  %s8485_s16 = inlined_call_operand.vmem [shape: f32[2,1,32], index: 16, kind: input, shape index: {}]   ;;  %s8486_s17 = inlined_call_operand.vmem [shape: f32[2,1,32], index: 17, kind: input, shape index: {}]   ;;  %s8487_s18 = inlined_call_operand.vmem [shape: f32[1,32], index: 18, kind: input, shape index: {}]   ;;  %s8488_s19 = inlined_call_operand.vmem [shape: f32[1,32], index: 19, kind: input, shape index: {}]   ;;  %s8489_s20 = inlined_call_operand.vmem [shape: bf16[16,32], index: 20, kind: output, shape index: {}]  }
   0x1   :  { %8495 = sst [smem:[#allocation2_spill]] %s8469_s2  ;;  %6155 = vmatprep.subr.bf16.mxu1 %v7013_v0  ;;  %6171 = vmatprep.subr.bf16.mxu0 %v7013_v0  ;;  %v7357_v38 = vld [vmem:[%s8474_s6] ss:$0 sm:$0xff]  ;;  %v7369_v51 = vld [vmem:[%s8474_s6 + $0x2] ss:$0 sm:$0xff]  ;;  %vm1088_vm3 = vcmask 1043456  }
   0x2   :  { %8496 = sst [smem:[#allocation3_spill]] %s8470_s0  ;;  %6159 = vmatprep.mubr.msk.bf16.mxu1 %vm7014_vm0, %v7013_v0  ;;  %6175 = vmatprep.mubr.msk.bf16.mxu0 %vm7014_vm0, %v7013_v0  ;;  %v7363_v45 = vld [vmem:[%s8475_s5] ss:$0 sm:$0xff]  ;;  %v7377_v60 = vld [vmem:[%s8475_s5 + $0x2] ss:$0 sm:$0xff]  ;;  %vm2717_vm4 = vcmask 523264  }
   0x3   :  { %8497 = sst [smem:[#allocation4_spill]] %s8471_s1  ;;  %vm5605_vm5 = vcmask 257024  }
   0x4   :  { %8498 = sst [smem:[#allocation5_spill]] %s8472_s3 }
   0x5   :  { %8499 = sst [smem:[#allocation6_spill]] %s8473_s4 }
   0x6   :  { %s8500_s23 = sld [smem:[#allocation2_spill]] }
   0x7   :  { %s8501_s29 = sld [smem:[#allocation3_spill]] }
   0x8   :  { %s8502_s21 = sld [smem:[#allocation4_spill]] }
   0x9   :  { %s8503_s25 = sld [smem:[#allocation5_spill]] }
   0xa   :  { %s8504_s30 = sld [smem:[#allocation6_spill]] }
   0xc   :  { %v7125_v1 = vld [vmem:[%s8500_s23 + $0x8] sm:$0xff]   ;;  %v7140_v3 = vld [vmem:[%s8500_s23] sm:$0xff]   ;;  %v7164_v9 = vld [vmem:[%s8500_s23 + $0x18] sm:$0xff]  }
   0xd   :  { %v7130_v2 = vld [vmem:[%s8500_s23 + $0x28] sm:$0xff]   ;;  %6156 = vmatpush3.bf16.msra.mxu1 %v7125_v1  ;;  %v7147_v4 = vld [vmem:[%s8500_s23 + $0x20] sm:$0xff]   ;;  %v7183_v12 = vld [vmem:[%s8500_s23 + $0x10] sm:$0xff]  }
   0xe   :  { %6172 = vmatpush3.bf16.msra.mxu0 %v7130_v2  ;;  %6157 = vmatprep.subr.bf16.mxu1 %v7013_v0  ;;  %v66_v5 = vld [vmem:[%s8501_s29] sm:$0xff]  ;;  %v7201_v14 = vld [vmem:[%s8500_s23 + $0x38] sm:$0xff]   ;;  %v7215_v16 = vld [vmem:[%s8500_s23 + $0x30] sm:$0xff]  }
   0xf   :  { %6173 = vmatprep.subr.bf16.mxu0 %v7013_v0  ;;  %v70_v6 = vld [vmem:[%s8502_s21] sm:$0xff]  ;;  %v68_v7 = vmul.f32 5.656854, %v66_v5  ;;  %v7170_v10 = vld [vmem:[%s8503_s25 + $0x8] sm:$0xff]   ;;  %v7237_v18 = vld [vmem:[%s8503_s25 + $0x18] sm:$0xff]  }
  0x10   :  { %v7190_v13 = vld [vmem:[%s8503_s25] sm:$0xff]   ;;  %v7208_v15 = vld [vmem:[%s8503_s25 + $0x28] sm:$0xff]   ;;  %v7251_v20 = vld [vmem:[%s8503_s25 + $0x10] sm:$0xff]  }
  0x11   :  { %6158 = vmatpush3.bf16.msra.mxu1 %v7140_v3  ;;  %v7158_v8 = vadd.f32 %v70_v6, %v68_v7  ;;  %v7220_v17 = vld [vmem:[%s8503_s25 + $0x20] sm:$0xff]   ;;  %v7242_v19 = vld [vmem:[%s8504_s30 + $0x8] sm:$0xff]   ;;  %v7265_v21 = vld [vmem:[%s8503_s25 + $0x38] sm:$0xff]  }
  0x12   :  { %6174 = vmatpush3.bf16.msra.mxu0 %v7147_v4  ;;  %6163 = vmatprep.subr.bf16.mxu1 %v7013_v0  ;;  %v7275_v22 = vld [vmem:[%s8503_s25 + $0x30] sm:$0xff]   ;;  %v7292_v23 = vld [vmem:[%s8504_s30] sm:$0xff]   ;;  %v7299_v24 = vld [vmem:[%s8504_s30 + $0x28] sm:$0xff]  }
  0x13   :  { %6187 = vmatprep.subr.bf16.mxu0 %v7013_v0  ;;  %v7174_v11 = vpack.c.bf16 %v7158_v8, %v7158_v8  ;;  %v7307_v25 = vld [vmem:[%s8504_s30 + $0x18] sm:$0xff]   ;;  %v7316_v26 = vld [vmem:[%s8504_s30 + $0x20] sm:$0xff]   ;;  %v7323_v27 = vld [vmem:[%s8504_s30 + $0x10] sm:$0xff]  }
  0x14   :  { %v7333_v28 = vld [vmem:[%s8504_s30 + $0x38] sm:$0xff]   ;;  %v7346_v29 = vld [vmem:[%s8504_s30 + $0x30] sm:$0xff]   ;;  %v7384_v6 = vld [vmem:[%s8474_s6 + $0x1] ss:$0 sm:$0xff] }
  0x15   :  { %6160 = vmatmul.mubr.msk.bf16.vlgmr.msra.gmra.mxu1 %vm176_vm1, %v7174_v11  ;;  %6176 = vmatmul.mubr.msk.bf16.vlgmr.msra.gmra.mxu0 %vm176_vm1, %v7174_v11 }
  0x16   :  { %6164 = vmatpush3.bf16.msra.mxu1 %v7164_v9  ;;  %6188 = vmatpush3.bf16.msra.mxu0 %v7170_v10 }
  0x17   :  { %6165 = vmatprep.subr.bf16.mxu1 %v7013_v0  ;;  %6189 = vmatprep.subr.bf16.mxu0 %v7013_v0 }
  0x18   :  { %6167 = vmatprep.mubr.msk.bf16.mxu1 %vm7014_vm0, %v7013_v0  ;;  %6191 = vmatprep.mubr.msk.bf16.mxu0 %vm7014_vm0, %v7013_v0 }
  0x1a   :  { %6166 = vmatpush3.bf16.msra.mxu1 %v7183_v12  ;;  %6190 = vmatpush3.bf16.msra.mxu0 %v7190_v13 }
  0x1b   :  { %6179 = vmatprep.subr.bf16.mxu1 %v7013_v0  ;;  %6203 = vmatprep.subr.bf16.mxu0 %v7013_v0 }
  0x1d   :  { %6168 = vmatmul.mubr.msk.bf16.vlgmr.msra.gmra.mxu1 %vm176_vm1, %v7174_v11  ;;  %6192 = vmatmul.mubr.msk.bf16.vlgmr.msra.gmra.mxu0 %vm176_vm1, %v7174_v11 }
  0x1e   :  { %6180 = vmatpush3.bf16.msra.mxu1 %v7201_v14  ;;  %6204 = vmatpush3.bf16.msra.mxu0 %v7208_v15 }
  0x1f   :  { %6181 = vmatprep.subr.bf16.mxu1 %v7013_v0  ;;  %6205 = vmatprep.subr.bf16.mxu0 %v7013_v0 }
  0x20   :  { %6183 = vmatprep.mubr.msk.bf16.mxu1 %vm7014_vm0, %v7013_v0  ;;  %6207 = vmatprep.mubr.msk.bf16.mxu0 %vm7014_vm0, %v7013_v0 }
  0x22   :  { %6182 = vmatpush3.bf16.msra.mxu1 %v7215_v16  ;;  %6206 = vmatpush3.bf16.msra.mxu0 %v7220_v17 }
  0x23   :  { %6195 = vmatprep.subr.bf16.mxu1 %v7013_v0  ;;  %6219 = vmatprep.subr.bf16.mxu0 %v7013_v0 }
  0x25   :  { %6184 = vmatmul.mubr.msk.bf16.vlgmr.msra.gmra.mxu1 %vm176_vm1, %v7174_v11  ;;  %6208 = vmatmul.mubr.msk.bf16.vlgmr.msra.gmra.mxu0 %vm176_vm1, %v7174_v11 }
  0x26   :  { %6196 = vmatpush3.bf16.msra.mxu1 %v7237_v18  ;;  %6199 = vmatprep.mubr.msk.bf16.mxu1 %vm7014_vm0, %v7013_v0 }
  0x27   :  { %6197 = vmatprep.subr.bf16.mxu1 %v7013_v0  ;;  %6220 = vmatpush3.bf16.msra.mxu0 %v7242_v19 }
  0x28   :  { %6221 = vmatprep.subr.bf16.mxu0 %v7013_v0  ;;  %6223 = vmatprep.mubr.msk.bf16.mxu0 %vm7014_vm0, %v7013_v0 }
  0x2a   :  { %6198 = vmatpush3.bf16.msra.mxu1 %v7251_v20 }
  0x2b   :  { %6211 = vmatprep.subr.bf16.mxu1 %v7013_v0  ;;  %6222 = vmatpush3.bf16.msra.mxu0 %v7292_v23 }
  0x2c   :  { %6235 = vmatprep.subr.bf16.mxu0 %v7013_v0 }
  0x2d   :  { %6200 = vmatmul.mubr.msk.bf16.vlgmr.msra.gmra.mxu1 %vm176_vm1, %v7174_v11 }
  0x2e   :  { %6212 = vmatpush3.bf16.msra.mxu1 %v7265_v21  ;;  %6215 = vmatprep.mubr.msk.bf16.mxu1 %vm7014_vm0, %v7013_v0 }
  0x2f   :  { %6213 = vmatprep.subr.bf16.mxu1 %v7013_v0  ;;  %6224 = vmatmul.mubr.msk.bf16.vlgmr.msra.gmra.mxu0 %vm176_vm1, %v7174_v11 }
  0x30   :  { %6236 = vmatpush3.bf16.msra.mxu0 %v7299_v24  ;;  %6239 = vmatprep.mubr.msk.bf16.mxu0 %vm7014_vm0, %v7013_v0 }
  0x31   :  { %6237 = vmatprep.subr.bf16.mxu0 %v7013_v0 }
  0x32   :  { %6214 = vmatpush3.bf16.msra.mxu1 %v7275_v22 }
  0x33   :  { %6227 = vmatprep.subr.bf16.mxu1 %v7013_v0 }
  0x34   :  { %6238 = vmatpush3.bf16.msra.mxu0 %v7316_v26 }
  0x35   :  { %6216 = vmatmul.mubr.msk.bf16.vlgmr.msra.gmra.mxu1 %vm176_vm1, %v7174_v11  ;;  %6251 = vmatprep.subr.bf16.mxu0 %v7013_v0 }
  0x36   :  { %6231 = vmatprep.mubr.msk.bf16.mxu1 %vm7014_vm0, %v7013_v0  ;;  %6228 = vmatpush3.bf16.msra.mxu1 %v7307_v25 }
  0x37   :  { %6229 = vmatprep.subr.bf16.mxu1 %v7013_v0  ;;  %6240 = vmatmul.mubr.msk.bf16.vlgmr.msra.gmra.mxu0 %vm176_vm1, %v7174_v11 }
  0x38   :  { %6253 = vmatprep.mubr.msk.bf16.mxu0 %vm7014_vm0, %v7013_v0 }
  0x3a   :  { %6230 = vmatpush3.bf16.msra.mxu1 %v7323_v27 }
  0x3b   :  { %6243 = vmatprep.subr.bf16.mxu1 %v7013_v0 }
  0x3d   :  { %6232 = vmatmul.mubr.msk.bf16.vlgmr.msra.gmra.mxu1 %vm176_vm1, %v7174_v11 }
  0x3e   :  { %6244 = vmatpush3.bf16.msra.mxu1 %v7333_v28  ;;  %6247 = vmatprep.mubr.msk.bf16.mxu1 %vm7014_vm0, %v7013_v0 }
  0x3f   :  { %6245 = vmatprep.subr.bf16.mxu1 %v7013_v0 }
  0x42   :  { %6246 = vmatpush3.bf16.msra.mxu1 %v7346_v29 }
  0x43   :  { %6257 = vmatprep.subr.bf16.mxu1 %v7013_v0 }
  0x45   :  { %6248 = vmatmul.mubr.msk.bf16.vlgmr.msra.gmra.mxu1 %vm176_vm1, %v7174_v11 }
  0x46   :  { %6259 = vmatprep.mubr.msk.bf16.mxu1 %vm7014_vm0, %v7013_v0 }
  0xd5   :  { %v214_v30 = vpop.f32.mrf.mxu1  ;;  %v318_v31 = vpop.f32.mrf.mxu0 }
  0xd6   :  { %v215_v52 = vadd.f32 %v7363_v45, %v214_v30  ;;  %v319_v11 = vadd.f32 %v7377_v60, %v318_v31  ;;  %v7401_v31 = vld [vmem:[%s8474_s6 + $0x3] ss:$0 sm:$0xff] }
  0xd7   :  { %v6161_v32 = vpop.f32.mrf.mxu1  ;;  %v6177_v33 = vpop.f32.mrf.mxu0 }
  0xd8   :  { %v840_v58 = vpack.c.bf16 %v215_v52, %v215_v52 }
  0xd9   :  { %v217_v34 = vpop.f32.mrf.mxu1  ;;  %v321_v35 = vpop.f32.mrf.mxu0 }
  0xda   :  { %v842_v34 = vpack.c.bf16 %v319_v11, %v319_v11 }
  0xdb   :  { %v6162_v36 = vpop.f32.mrf.mxu1  ;;  %v6178_v37 = vpop.f32.mrf.mxu0 }
  0xdc   :  { %v7394_v36 = vld [vmem:[%s8475_s5 + $0x1] ss:$0 sm:$0xff] }
  0xdd   :  { %v266_v39 = vpop.f32.mrf.mxu1  ;;  %v446_v40 = vpop.f32.mrf.mxu0 }
  0xde   :  { %v447_v41 = vadd.f32 %v7357_v38, %v446_v40 }
  0xdf   :  { %v6169_v42 = vpop.f32.mrf.mxu1  ;;  %v6193_v43 = vpop.f32.mrf.mxu0 }
  0xe0   :  { %v844_v44 = vpack.c.bf16 %v447_v41, %v447_v41  ;;  %v267_v42 = vadd.f32 %v7394_v36, %v266_v39 }
  0xe1   :  { %v269_v46 = vpop.f32.mrf.mxu1  ;;  %v449_v47 = vpop.f32.mrf.mxu0 }
  0xe2   :  { %v853_v48 = vsel %vm848_vm2, %v844_v44, 0  ;;  %v841_v47 = vpack.c.bf16 %v267_v42, %v267_v42 }
  0xe3   :  { %v6170_v49 = vpop.f32.mrf.mxu1  ;;  %v6194_v50 = vpop.f32.mrf.mxu0  ;;  %6252 = vmatpush3.bf16.xpose.msra.mxu0 %v853_v48 }
  0xe4   :  { %6263 = vmatprep.subr.bf16.mxu0 %v7013_v0  ;;  %v7411_v49 = vld [vmem:[%s8475_s5 + $0x3] ss:$0 sm:$0xff] }
  0xe5   :  { %v370_v53 = vpop.f32.mrf.mxu1  ;;  %v550_v54 = vpop.f32.mrf.mxu0 }
  0xe6   :  { %v551_v55 = vadd.f32 %v7369_v51, %v550_v54  ;;  %v371_v39 = vadd.f32 %v7411_v49, %v370_v53 }
  0xe7   :  { %v6185_v56 = vpop.f32.mrf.mxu1  ;;  %v6209_v57 = vpop.f32.mrf.mxu0 }
  0xe8   :  { %v846_v59 = vpack.c.bf16 %v551_v55, %v551_v55  ;;  %v843_v55 = vpack.c.bf16 %v371_v39, %v371_v39  ;;  %v7425_v56 = vld [vmem:[%s8476_s7] ss:$0 sm:$0xff] }
  0xe9   :  { %v373_v61 = vpop.f32.mrf.mxu1  ;;  %v553_v62 = vpop.f32.mrf.mxu0 }
  0xea   :  { %v945_v63 = vsel %vm848_vm2, %v846_v59, 0  ;;  %6254 = vmatmul.mubr.msk.bf16.vlgmr.msra.gmra.mxu0 %vm848_vm2, %v840_v58 }
  0xeb   :  { %v6186_v5 = vpop.f32.mrf.mxu1  ;;  %6264 = vmatpush3.bf16.xpose.msra.mxu0 %v945_v63  ;;  %v6210_v7 = vpop.f32.mrf.mxu0  ;;  %6265 = vmatprep.mubr.msk.bf16.mxu0 %vm7014_vm0, %v7013_v0 }
  0xec   :  { %6275 = vmatprep.subr.bf16.mxu0 %v7013_v0  ;;  %v7435_v7 = vld [vmem:[%s8476_s7 + $0x1] ss:$0 sm:$0xff] }
  0xed   :  { %v498_v30 = vpop.f32.mrf.mxu1 }
  0xee   :  { %v499_v32 = vadd.f32 %v7384_v6, %v498_v30 }
  0xef   :  { %v6201_v33 = vpop.f32.mrf.mxu1  ;;  %v678_v57 = vpop.f32.mrf.mxu0 }
  0xf0   :  { %v845_v35 = vpack.c.bf16 %v499_v32, %v499_v32  ;;  %v679_v58 = vadd.f32 %v7425_v56, %v678_v57 }
  0xf1   :  { %v501_v37 = vpop.f32.mrf.mxu1  ;;  %v6225_v59 = vpop.f32.mrf.mxu0 }
  0xf2   :  { %v899_v40 = vsel %vm848_vm2, %v845_v35, 0  ;;  %6266 = vmatmul.mubr.msk.bf16.vlgmr.msra.gmra.mxu0 %vm848_vm2, %v842_v34  ;;  %v1081_v61 = vpack.c.bf16 %v679_v58, %v679_v58 }
  0xf3   :  { %v6202_v41 = vpop.f32.mrf.mxu1  ;;  %6258 = vmatpush3.bf16.xpose.msra.mxu1 %v899_v40  ;;  %6277 = vmatprep.mubr.msk.bf16.mxu0 %vm7014_vm0, %v7013_v0  ;;  %v681_v53 = vpop.f32.mrf.mxu0 }
  0xf4   :  { %6269 = vmatprep.subr.bf16.mxu1 %v7013_v0  ;;  %v1090_v62 = vsel %vm1088_vm3, %v1081_v61, 0 }
  0xf5   :  { %v602_v43 = vpop.f32.mrf.mxu1  ;;  %v6226_v63 = vpop.f32.mrf.mxu0  ;;  %6276 = vmatpush3.bf16.msra.mxu0 %v1090_v62 }
  0xf6   :  { %v603_v44 = vadd.f32 %v7401_v31, %v602_v43  ;;  %6287 = vmatprep.subr.bf16.mxu0 %v7013_v0 }
  0xf7   :  { %v6217_v46 = vpop.f32.mrf.mxu1  ;;  %v7430_v5 = vpop.f32.mrf.mxu0 }
  0xf8   :  { %v847_v48 = vpack.c.bf16 %v603_v44, %v603_v44 }
  0xf9   :  { %v605_v50 = vpop.f32.mrf.mxu1  ;;  %v6241_v30 = vpop.f32.mrf.mxu0 }
  0xfa   :  { %v991_v52 = vsel %vm848_vm2, %v847_v48, 0  ;;  %6260 = vmatmul.mubr.msk.bf16.vlgmr.msra.gmra.mxu1 %vm848_vm2, %v841_v47 }
  0xfb   :  { %v6218_v54 = vpop.f32.mrf.mxu1  ;;  %6270 = vmatpush3.bf16.xpose.msra.mxu1 %v991_v52  ;;  %6271 = vmatprep.mubr.msk.bf16.mxu1 %vm7014_vm0, %v7013_v0  ;;  %v785_v34 = vpop.f32.mrf.mxu0 }
  0xfc   :  { %6281 = vmatprep.subr.bf16.mxu1 %v7013_v0 }
  0xfd   :  { %v730_v11 = vpop.f32.mrf.mxu1  ;;  %v6242_v40 = vpop.f32.mrf.mxu0 }
  0xfe   :  { %v731_v32 = vadd.f32 %v7435_v7, %v730_v11 }
  0xff   :  { %v6233_v33 = vpop.f32.mrf.mxu1 }
 0x100   :  { %v1082_v35 = vpack.c.bf16 %v731_v32, %v731_v32 }
 0x101   :  { %v733_v37 = vpop.f32.mrf.mxu1 }
 0x102   :  { %6272 = vmatmul.mubr.msk.bf16.vlgmr.msra.gmra.mxu1 %vm848_vm2, %v843_v55  ;;  %v1136_v41 = vsel %vm1088_vm3, %v1082_v35, 0 }
 0x103   :  { %6283 = vmatprep.mubr.msk.bf16.mxu1 %vm7014_vm0, %v7013_v0  ;;  %v6234_v42 = vpop.f32.mrf.mxu1  ;;  %6282 = vmatpush3.bf16.msra.mxu1 %v1136_v41 }
 0x104   :  { %6293 = vmatprep.subr.bf16.mxu1 %v7013_v0 }
 0x105   :  { %v7440_v43 = vpop.f32.mrf.mxu1 }
 0x107   :  { %v6249_v44 = vpop.f32.mrf.mxu1 }
 0x109   :  { %v837_v46 = vpop.f32.mrf.mxu1 }
 0x10b   :  { %v6250_v47 = vpop.f32.mrf.mxu1 }
 0x1aa   :  { %v889_v48 = vpop.f32.mrf.mxu0 }
 0x1ab   :  { %v1033_v50 = vsel %vm848_vm2, %v889_v48, -inf }
 0x1ac   :  { %1034 = vmax.xlane.f32.xlu0 %v1033_v50  ;;  %v6255_v52 = vpop.f32.mrf.mxu0 }
 0x1ae   :  { %v892_v54 = vpop.f32.mrf.mxu0 }
 0x1b0   :  { %v6256_v39 = vpop.f32.mrf.mxu0 }
 0x1b2   :  { %v981_v55 = vpop.f32.mrf.mxu0 }
 0x1b3   :  { %v1039_v57 = vsel %vm848_vm2, %v981_v55, -inf }
 0x1b4   :  { %1040 = vmax.xlane.f32.xlu1 %v1039_v57  ;;  %v6267_v58 = vpop.f32.mrf.mxu0 }
 0x1b6   :  { %v984_v59 = vpop.f32.mrf.mxu0 }
 0x1b8   :  { %v6268_v61 = vpop.f32.mrf.mxu0 }
 0x1ba   :  { %v935_v53 = vpop.f32.mrf.mxu1 }
 0x1bb   :  { %v1036_v62 = vsel %vm848_vm2, %v935_v53, -inf }
 0x1bc   :  { %1037 = vmax.xlane.f32.xlu0 %v1036_v62  ;;  %v6261_v63 = vpop.f32.mrf.mxu1 }
 0x1be   :  { %v938_v11 = vpop.f32.mrf.mxu1 }
 0x1c0   :  { %v6262_v30 = vpop.f32.mrf.mxu1 }
 0x1c2   :  { %v1027_v32 = vpop.f32.mrf.mxu1 }
 0x1c3   :  { %v1042_v33 = vsel %vm848_vm2, %v1027_v32, -inf }
 0x1c4   :  { %1043 = vmax.xlane.f32.xlu1 %v1042_v33  ;;  %v6273_v34 = vpop.f32.mrf.mxu1 }
 0x1c6   :  { %v1030_v35 = vpop.f32.mrf.mxu1 }
 0x1c8   :  { %v6274_v37 = vpop.f32.mrf.mxu1 }
 0x235   :  { %v1035_v40 = vpop.xlane.xlu0 %1034 }
 0x236   :  { %v1045_v41 = vsub.f32 %v889_v48, %v1035_v40 }
 0x238   :  { %v1049_v42 = vmul.f32 1.442695, %v1045_v41 }
 0x23a   :  { %6929 = vpow2.f32 %v1049_v42 }
 0x23d   :  { %v1041_v44 = vpop.xlane.xlu1 %1040 }
 0x23e   :  { %v1047_v46 = vsub.f32 %v981_v55, %v1041_v44 }
 0x240   :  { %v1053_v47 = vmul.f32 1.442695, %v1047_v46 }
 0x242   :  { %6931 = vpow2.f32 %v1053_v47 }
 0x245   :  { %v1038_v50 = vpop.xlane.xlu0 %1037 }
 0x246   :  { %v1046_v52 = vsub.f32 %v935_v53, %v1038_v50 }
 0x247   :  { %v6930_v54 = vpop.eup %6929 }
 0x248   :  { %v1051_v39 = vmul.f32 1.442695, %v1046_v52  ;;  %v1057_v57 = vsel %vm848_vm2, %v6930_v54, 0.0 }
 0x249   :  { %1058 = vadd.xlane.f32.xlu0 %v1057_v57 }
 0x24a   :  { %6933 = vpow2.f32 %v1051_v39 }
 0x24d   :  { %v1044_v58 = vpop.xlane.xlu1 %1043 }
 0x24e   :  { %v1048_v59 = vsub.f32 %v1027_v32, %v1044_v58  ;;  %v7453_v32 = vld [vmem:[%s8476_s7 + $0x2] ss:$0 sm:$0xff] }
 0x24f   :  { %v6932_v61 = vpop.eup %6931  ;;  %v783_v34 = vadd.f32 %v7453_v32, %v7430_v5  ;;  %v7465_v5 = vld [vmem:[%s8476_s7 + $0x3] ss:$0 sm:$0xff] }
 0x250   :  { %v1055_v62 = vmul.f32 1.442695, %v1048_v59  ;;  %v1063_v48 = vsel %vm848_vm2, %v6932_v61, 0.0 }
 0x251   :  { %1064 = vadd.xlane.f32.xlu0 %v1063_v48  ;;  %v1083_v37 = vpack.c.bf16 %v783_v34, %v783_v34 }
 0x252   :  { %6935 = vpow2.f32 %v1055_v62 }
 0x253   :  { %v1182_v44 = vsel %vm1088_vm3, %v1083_v37, 0 }
 0x257   :  { %v6934_v63 = vpop.eup %6933 }
 0x258   :  { %v1060_v55 = vsel %vm848_vm2, %v6934_v63, 0.0 }
 0x259   :  { %1061 = vadd.xlane.f32.xlu1 %v1060_v55 }
 0x25f   :  { %v6936_v11 = vpop.eup %6935 }
 0x260   :  { %v1066_v53 = vsel %vm848_vm2, %v6936_v11, 0.0 }
 0x261   :  { %1067 = vadd.xlane.f32.xlu1 %v1066_v53 }
 0x2d2   :  { %v1059_v30 = vpop.xlane.xlu0 %1058 }
 0x2d3   :  { %6937 = vrcp.f32 %v1059_v30  ;;  %v136_v30 = vld [vmem:[%s8477_s8 + $0x8] sm:$0xf] }
 0x2da   :  { %v1065_v33 = vpop.xlane.xlu0 %1064 }
 0x2db   :  { %6939 = vrcp.f32 %v1065_v33 }
 0x2e0   :  { %v6938_v35 = vpop.eup %6937 }
 0x2e1   :  { %v1073_v40 = vmul.f32 %v6938_v35, %v6930_v54  ;;  %v835_v54 = vadd.f32 %v7465_v5, %v7440_v43  ;;  %v7500_v35 = vsel %vm1088_vm3, %v136_v30, 0 }
 0x2e2   :  { %v1062_v41 = vpop.xlane.xlu1 %1061 }
 0x2e3   :  { %6941 = vrcp.f32 %v1062_v41  ;;  %v1077_v42 = vpack.c.bf16 %v1073_v40, %v1073_v40  ;;  %v1084_v57 = vpack.c.bf16 %v835_v54, %v835_v54  ;;  %v67_v41 = vld [vmem:[%s8501_s29 + $0x8] sm:$0xff] }
 0x2e5   :  { %6278 = vmatmul.mubr.msk.bf16.vlgmr.msra.gmra.mxu0 %vm848_vm2, %v1077_v42 }
 0x2e6   :  { %6288 = vmatpush3.bf16.msra.mxu0 %v1182_v44  ;;  %6289 = vmatprep.mubr.msk.bf16.mxu0 %vm7014_vm0, %v7013_v0  ;;  %v69_v44 = vmul.f32 5.656854, %v67_v41 }
 0x2e7   :  { %6299 = vmatprep.subr.bf16.mxu0 %v7013_v0 }
 0x2e8   :  { %v6940_v46 = vpop.eup %6939 }
 0x2e9   :  { %v1075_v47 = vmul.f32 %v6940_v46, %v6932_v61  ;;  %v1228_v61 = vsel %vm1088_vm3, %v1084_v57, 0 }
 0x2ea   :  { %v1068_v50 = vpop.xlane.xlu1 %1067 }
 0x2eb   :  { %6943 = vrcp.f32 %v1068_v50  ;;  %v1079_v52 = vpack.c.bf16 %v1075_v47, %v1075_v47  ;;  %v71_v47 = vld [vmem:[%s8502_s21 + $0x8] sm:$0xff] }
 0x2ec   :  { %v7514_v54 = vadd.f32 %v71_v47, %v69_v44 }
 0x2ed   :  { %6290 = vmatmul.mubr.msk.bf16.vlgmr.msra.gmra.mxu0 %vm848_vm2, %v1079_v52 }
 0x2ee   :  { %6301 = vmatprep.mubr.msk.bf16.mxu0 %vm7014_vm0, %v7013_v0 }
 0x2f0   :  { %v6942_v39 = vpop.eup %6941 }
 0x2f1   :  { %v1074_v58 = vmul.f32 %v6942_v39, %v6934_v63  ;;  %v134_v63 = vld [vmem:[%s8477_s8] sm:$0xf] }
 0x2f2   :  { %v7484_v55 = vsel %vm1088_vm3, %v134_v63, 0 }
 0x2f3   :  { %v1078_v59 = vpack.c.bf16 %v1074_v58, %v1074_v58  ;;  %6300 = vmatpush3.bf16.msra.mxu0 %v7484_v55  ;;  %v137_v58 = vld [vmem:[%s8477_s8 + $0xc] sm:$0xf] }
 0x2f4   :  { %6311 = vmatprep.subr.bf16.mxu0 %v7013_v0 }
 0x2f5   :  { %6284 = vmatmul.mubr.msk.bf16.vlgmr.msra.gmra.mxu1 %vm848_vm2, %v1078_v59  ;;  %v7525_v59 = vpack.c.bf16 %v7514_v54, %v7514_v54 }
 0x2f6   :  { %6294 = vmatpush3.bf16.msra.mxu1 %v1228_v61  ;;  %6295 = vmatprep.mubr.msk.bf16.mxu1 %vm7014_vm0, %v7013_v0 }
 0x2f7   :  { %6305 = vmatprep.subr.bf16.mxu1 %v7013_v0 }
 0x2f8   :  { %v6944_v43 = vpop.eup %6943 }
 0x2f9   :  { %v1076_v62 = vmul.f32 %v6944_v43, %v6936_v11  ;;  %v135_v11 = vld [vmem:[%s8477_s8 + $0x4] sm:$0xf] }
 0x2fa   :  { %v7492_v53 = vsel %vm1088_vm3, %v135_v11, 0 }
 0x2fb   :  { %v1080_v48 = vpack.c.bf16 %v1076_v62, %v1076_v62 }
 0x2fd   :  { %6296 = vmatmul.mubr.msk.bf16.vlgmr.msra.gmra.mxu1 %vm848_vm2, %v1080_v48 }
 0x2fe   :  { %6307 = vmatprep.mubr.msk.bf16.mxu1 %vm7014_vm0, %v7013_v0  ;;  %6306 = vmatpush3.bf16.msra.mxu1 %v7492_v53 }
 0x2ff   :  { %6317 = vmatprep.subr.bf16.mxu1 %v7013_v0 }
 0x3a5   :  { %v1126_v33 = vpop.f32.mrf.mxu0 }
 0x3a6   :  { %v1270_v34 = vpack.c.bf16 %v1126_v33, %v1126_v33 }
 0x3a7   :  { %v6279_v37 = vpop.f32.mrf.mxu0 }
 0x3a8   :  { %6302 = vmatmul.mubr.msk.bf16.vlgmr.msra.gmra.mxu0 %vm848_vm2, %v1270_v34 }
 0x3a9   :  { %v1129_v40 = vpop.f32.mrf.mxu0  ;;  %6312 = vmatpush3.bf16.msra.mxu0 %v7500_v35  ;;  %6313 = vmatprep.mubr.msk.bf16.mxu0 %vm7014_vm0, %v7013_v0 }
 0x3aa   :  { %6323 = vmatprep.subr.bf16.mxu0 %v7013_v0 }
 0x3ab   :  { %v6280_v42 = vpop.f32.mrf.mxu0 }
 0x3ad   :  { %v1218_v46 = vpop.f32.mrf.mxu0 }
 0x3ae   :  { %v1272_v50 = vpack.c.bf16 %v1218_v46, %v1218_v46 }
 0x3af   :  { %v6291_v52 = vpop.f32.mrf.mxu0 }
 0x3b0   :  { %6314 = vmatmul.mubr.msk.bf16.vlgmr.msra.gmra.mxu0 %vm848_vm2, %v1272_v50 }
 0x3b1   :  { %v1221_v39 = vpop.f32.mrf.mxu0  ;;  %6324 = vmatpush3.bf16.msra.mxu0 %v7125_v1  ;;  %6327 = vmatprep.mubr.msk.bf16.mxu0 %vm7014_vm0, %v7013_v0  ;;  %v7530_v1 = vsel %vm1088_vm3, %v137_v58, 0 }
 0x3b2   :  { %6325 = vmatprep.subr.bf16.mxu0 %v7013_v0 }
 0x3b3   :  { %v6292_v57 = vpop.f32.mrf.mxu0 }
 0x3b5   :  { %v1172_v61 = vpop.f32.mrf.mxu1  ;;  %6326 = vmatpush3.bf16.msra.mxu0 %v7140_v3 }
 0x3b6   :  { %v1271_v43 = vpack.c.bf16 %v1172_v61, %v1172_v61  ;;  %6339 = vmatprep.subr.bf16.mxu0 %v7013_v0 }
 0x3b7   :  { %v6285_v62 = vpop.f32.mrf.mxu1 }
 0x3b8   :  { %6308 = vmatmul.mubr.msk.bf16.vlgmr.msra.gmra.mxu1 %vm848_vm2, %v1271_v43  ;;  %6328 = vmatmul.mubr.msk.bf16.vlgmr.msra.gmra.mxu0 %vm176_vm1, %v7525_v59 }
 0x3b9   :  { %v1175_v48 = vpop.f32.mrf.mxu1  ;;  %6318 = vmatpush3.bf16.msra.mxu1 %v7530_v1  ;;  %6340 = vmatpush3.bf16.msra.mxu0 %v7130_v2 }
 0x3ba   :  { %6341 = vmatprep.subr.bf16.mxu0 %v7013_v0  ;;  %6319 = vmatprep.mubr.msk.bf16.mxu1 %vm7014_vm0, %v7013_v0 }
 0x3bb   :  { %v6286_v3 = vpop.f32.mrf.mxu1  ;;  %6343 = vmatprep.mubr.msk.bf16.mxu0 %vm7014_vm0, %v7013_v0  ;;  %6331 = vmatprep.subr.bf16.mxu1 %v7013_v0 }
 0x3bd   :  { %v1264_v63 = vpop.f32.mrf.mxu1  ;;  %6342 = vmatpush3.bf16.msra.mxu0 %v7147_v4 }
 0x3be   :  { %v1273_v11 = vpack.c.bf16 %v1264_v63, %v1264_v63  ;;  %6355 = vmatprep.subr.bf16.mxu0 %v7013_v0 }
 0x3bf   :  { %v6297_v30 = vpop.f32.mrf.mxu1 }
 0x3c0   :  { %6320 = vmatmul.mubr.msk.bf16.vlgmr.msra.gmra.mxu1 %vm848_vm2, %v1273_v11  ;;  %6344 = vmatmul.mubr.msk.bf16.vlgmr.msra.gmra.mxu0 %vm176_vm1, %v7525_v59 }
 0x3c1   :  { %v1267_v2 = vpop.f32.mrf.mxu1  ;;  %6332 = vmatpush3.bf16.msra.mxu1 %v7164_v9  ;;  %6356 = vmatpush3.bf16.msra.mxu0 %v7170_v10 }
 0x3c2   :  { %6333 = vmatprep.subr.bf16.mxu1 %v7013_v0  ;;  %6357 = vmatprep.subr.bf16.mxu0 %v7013_v0 }
 0x3c3   :  { %v6298_v33 = vpop.f32.mrf.mxu1  ;;  %6335 = vmatprep.mubr.msk.bf16.mxu1 %vm7014_vm0, %v7013_v0  ;;  %6359 = vmatprep.mubr.msk.bf16.mxu0 %vm7014_vm0, %v7013_v0 }
 0x3c5   :  { %6334 = vmatpush3.bf16.msra.mxu1 %v7183_v12  ;;  %6358 = vmatpush3.bf16.msra.mxu0 %v7190_v13 }
 0x3c6   :  { %6347 = vmatprep.subr.bf16.mxu1 %v7013_v0  ;;  %6371 = vmatprep.subr.bf16.mxu0 %v7013_v0 }
 0x3c8   :  { %6336 = vmatmul.mubr.msk.bf16.vlgmr.msra.gmra.mxu1 %vm176_vm1, %v7525_v59  ;;  %6360 = vmatmul.mubr.msk.bf16.vlgmr.msra.gmra.mxu0 %vm176_vm1, %v7525_v59 }
 0x3c9   :  { %6348 = vmatpush3.bf16.msra.mxu1 %v7201_v14  ;;  %6372 = vmatpush3.bf16.msra.mxu0 %v7208_v15 }
 0x3ca   :  { %6349 = vmatprep.subr.bf16.mxu1 %v7013_v0  ;;  %6373 = vmatprep.subr.bf16.mxu0 %v7013_v0 }
 0x3cb   :  { %6351 = vmatprep.mubr.msk.bf16.mxu1 %vm7014_vm0, %v7013_v0  ;;  %6375 = vmatprep.mubr.msk.bf16.mxu0 %vm7014_vm0, %v7013_v0 }
 0x3cd   :  { %6350 = vmatpush3.bf16.msra.mxu1 %v7215_v16  ;;  %6374 = vmatpush3.bf16.msra.mxu0 %v7220_v17 }
 0x3ce   :  { %6363 = vmatprep.subr.bf16.mxu1 %v7013_v0  ;;  %6387 = vmatprep.subr.bf16.mxu0 %v7013_v0 }
 0x3d0   :  { %6352 = vmatmul.mubr.msk.bf16.vlgmr.msra.gmra.mxu1 %vm176_vm1, %v7525_v59  ;;  %6376 = vmatmul.mubr.msk.bf16.vlgmr.msra.gmra.mxu0 %vm176_vm1, %v7525_v59 }
 0x3d1   :  { %6364 = vmatpush3.bf16.msra.mxu1 %v7237_v18  ;;  %6367 = vmatprep.mubr.msk.bf16.mxu1 %vm7014_vm0, %v7013_v0 }
 0x3d2   :  { %6365 = vmatprep.subr.bf16.mxu1 %v7013_v0  ;;  %6388 = vmatpush3.bf16.msra.mxu0 %v7242_v19 }
 0x3d3   :  { %6389 = vmatprep.subr.bf16.mxu0 %v7013_v0  ;;  %6391 = vmatprep.mubr.msk.bf16.mxu0 %vm7014_vm0, %v7013_v0 }
 0x3d5   :  { %6366 = vmatpush3.bf16.msra.mxu1 %v7251_v20 }
 0x3d6   :  { %6379 = vmatprep.subr.bf16.mxu1 %v7013_v0  ;;  %6390 = vmatpush3.bf16.msra.mxu0 %v7292_v23 }
 0x3d7   :  { %6403 = vmatprep.subr.bf16.mxu0 %v7013_v0 }
 0x3d8   :  { %6368 = vmatmul.mubr.msk.bf16.vlgmr.msra.gmra.mxu1 %vm176_vm1, %v7525_v59 }
 0x3d9   :  { %6380 = vmatpush3.bf16.msra.mxu1 %v7265_v21  ;;  %6383 = vmatprep.mubr.msk.bf16.mxu1 %vm7014_vm0, %v7013_v0 }
 0x3da   :  { %6381 = vmatprep.subr.bf16.mxu1 %v7013_v0  ;;  %6392 = vmatmul.mubr.msk.bf16.vlgmr.msra.gmra.mxu0 %vm176_vm1, %v7525_v59 }
 0x3db   :  { %6404 = vmatpush3.bf16.msra.mxu0 %v7299_v24  ;;  %6407 = vmatprep.mubr.msk.bf16.mxu0 %vm7014_vm0, %v7013_v0 }
 0x3dc   :  { %6405 = vmatprep.subr.bf16.mxu0 %v7013_v0 }
 0x3dd   :  { %6382 = vmatpush3.bf16.msra.mxu1 %v7275_v22 }
 0x3de   :  { %6395 = vmatprep.subr.bf16.mxu1 %v7013_v0 }
 0x3df   :  { %6406 = vmatpush3.bf16.msra.mxu0 %v7316_v26 }
 0x3e0   :  { %6384 = vmatmul.mubr.msk.bf16.vlgmr.msra.gmra.mxu1 %vm176_vm1, %v7525_v59  ;;  %6419 = vmatprep.subr.bf16.mxu0 %v7013_v0 }
 0x3e1   :  { %6396 = vmatpush3.bf16.msra.mxu1 %v7307_v25  ;;  %6399 = vmatprep.mubr.msk.bf16.mxu1 %vm7014_vm0, %v7013_v0 }
 0x3e2   :  { %6397 = vmatprep.subr.bf16.mxu1 %v7013_v0  ;;  %6408 = vmatmul.mubr.msk.bf16.vlgmr.msra.gmra.mxu0 %vm176_vm1, %v7525_v59 }
 0x3e3   :  { %6421 = vmatprep.mubr.msk.bf16.mxu0 %vm7014_vm0, %v7013_v0 }
 0x3e5   :  { %6398 = vmatpush3.bf16.msra.mxu1 %v7323_v27 }
 0x3e6   :  { %6411 = vmatprep.subr.bf16.mxu1 %v7013_v0 }
 0x3e8   :  { %6400 = vmatmul.mubr.msk.bf16.vlgmr.msra.gmra.mxu1 %vm176_vm1, %v7525_v59 }
 0x3e9   :  { %6412 = vmatpush3.bf16.msra.mxu1 %v7333_v28  ;;  %6415 = vmatprep.mubr.msk.bf16.mxu1 %vm7014_vm0, %v7013_v0 }
 0x3ea   :  { %6413 = vmatprep.subr.bf16.mxu1 %v7013_v0 }
 0x3ed   :  { %6414 = vmatpush3.bf16.msra.mxu1 %v7346_v29 }
 0x3ee   :  { %6425 = vmatprep.subr.bf16.mxu1 %v7013_v0 }
 0x3f0   :  { %6416 = vmatmul.mubr.msk.bf16.vlgmr.msra.gmra.mxu1 %vm176_vm1, %v7525_v59 }
 0x3f1   :  { %6427 = vmatprep.mubr.msk.bf16.mxu1 %vm7014_vm0, %v7013_v0 }
 0x468   :  { %v1314_v4 = vpop.f32.mrf.mxu0 }
 0x46a   :  { %v6303_v9 = vpop.f32.mrf.mxu0 }
 0x46c   :  { %v1317_v10 = vpop.f32.mrf.mxu0 }
 0x46e   :  { %v6304_v12 = vpop.f32.mrf.mxu0 }
 0x470   :  { %v1406_v13 = vpop.f32.mrf.mxu0 }
 0x472   :  { %v6315_v14 = vpop.f32.mrf.mxu0 }
 0x474   :  { %v1409_v15 = vpop.f32.mrf.mxu0 }
 0x476   :  { %v6316_v16 = vpop.f32.mrf.mxu0 }
 0x478   :  { %v1360_v17 = vpop.f32.mrf.mxu1  ;;  %v1506_v18 = vpop.f32.mrf.mxu0 }
 0x479   :  { %v1458_v19 = vadd.f32 %v1360_v17, %v1314_v4  ;;  %v1507_v48 = vadd.f32 %v7363_v45, %v1506_v18 }
 0x47a   :  { %v6309_v20 = vpop.f32.mrf.mxu1  ;;  %v6329_v21 = vpop.f32.mrf.mxu0 }
 0x47b   :  { %v1459_v22 = vadd.f32 %v1458_v19, %v1406_v13  ;;  %v1952_v2 = vpack.c.bf16 %v1507_v48, %v1507_v48 }
 0x47c   :  { %v1363_v23 = vpop.f32.mrf.mxu1  ;;  %v1509_v24 = vpop.f32.mrf.mxu0 }
 0x47e   :  { %v6310_v25 = vpop.f32.mrf.mxu1  ;;  %v6330_v26 = vpop.f32.mrf.mxu0 }
 0x480   :  { %v1452_v27 = vpop.f32.mrf.mxu1  ;;  %v1586_v28 = vpop.f32.mrf.mxu0 }
 0x481   :  { %v7632_v29 = vadd.f32 %v1459_v22, %v1452_v27  ;;  %v1587_v13 = vadd.f32 %v7377_v60, %v1586_v28 }
 0x482   :  { %v6321_v34 = vpop.f32.mrf.mxu1  ;;  %v6345_v37 = vpop.f32.mrf.mxu0 }
 0x483   :  { %v1954_v17 = vpack.c.bf16 %v1587_v13, %v1587_v13 }
 0x484   :  { %v1455_v40 = vpop.f32.mrf.mxu1  ;;  %v1589_v41 = vpop.f32.mrf.mxu0 }
 0x486   :  { %v6322_v42 = vpop.f32.mrf.mxu1  ;;  %v6346_v44 = vpop.f32.mrf.mxu0 }
 0x488   :  { %v1546_v46 = vpop.f32.mrf.mxu1  ;;  %v1666_v47 = vpop.f32.mrf.mxu0 }
 0x489   :  { %v1667_v50 = vadd.f32 %v7357_v38, %v1666_v47 }
 0x48a   :  { %v6337_v52 = vpop.f32.mrf.mxu1  ;;  %v6361_v39 = vpop.f32.mrf.mxu0 }
 0x48b   :  { %v1956_v57 = vpack.c.bf16 %v1667_v50, %v1667_v50 }
 0x48c   :  { %v1549_v58 = vpop.f32.mrf.mxu1  ;;  %v1669_v59 = vpop.f32.mrf.mxu0 }
 0x48d   :  { %v1964_v61 = vsel %vm848_vm2, %v1956_v57, 0 }
 0x48e   :  { %v6338_v43 = vpop.f32.mrf.mxu1  ;;  %v6362_v62 = vpop.f32.mrf.mxu0  ;;  %6420 = vmatpush3.bf16.xpose.msra.mxu0 %v1964_v61 }
 0x48f   :  { %6431 = vmatprep.subr.bf16.mxu0 %v7013_v0 }
 0x490   :  { %v1626_v3 = vpop.f32.mrf.mxu1  ;;  %v1746_v63 = vpop.f32.mrf.mxu0 }
 0x491   :  { %v1747_v11 = vadd.f32 %v7369_v51, %v1746_v63 }
 0x492   :  { %v6353_v30 = vpop.f32.mrf.mxu1  ;;  %v6377_v38 = vpop.f32.mrf.mxu0 }
 0x493   :  { %v1958_v33 = vpack.c.bf16 %v1747_v11, %v1747_v11 }
 0x494   :  { %v1629_v4 = vpop.f32.mrf.mxu1  ;;  %v1749_v9 = vpop.f32.mrf.mxu0 }
 0x495   :  { %v2056_v10 = vsel %vm848_vm2, %v1958_v33, 0  ;;  %6422 = vmatmul.mubr.msk.bf16.vlgmr.msra.gmra.mxu0 %vm848_vm2, %v1952_v2 }
 0x496   :  { %v6354_v12 = vpop.f32.mrf.mxu1  ;;  %6432 = vmatpush3.bf16.xpose.msra.mxu0 %v2056_v10  ;;  %6433 = vmatprep.mubr.msk.bf16.mxu0 %vm7014_vm0, %v7013_v0  ;;  %v6378_v45 = vpop.f32.mrf.mxu0 }
 0x497   :  { %6443 = vmatprep.subr.bf16.mxu0 %v7013_v0 }
 0x498   :  { %v1706_v51 = vpop.f32.mrf.mxu1 }
 0x499   :  { %v1707_v14 = vadd.f32 %v7384_v6, %v1706_v51  ;;  %v1547_v6 = vadd.f32 %v7394_v36, %v1546_v46 }
 0x49a   :  { %v6369_v15 = vpop.f32.mrf.mxu1  ;;  %v1826_v16 = vpop.f32.mrf.mxu0 }
 0x49b   :  { %v1957_v18 = vpack.c.bf16 %v1707_v14, %v1707_v14  ;;  %v1827_v19 = vadd.f32 %v7425_v56, %v1826_v16  ;;  %v1953_v37 = vpack.c.bf16 %v1547_v6, %v1547_v6 }
 0x49c   :  { %v1709_v20 = vpop.f32.mrf.mxu1  ;;  %v6393_v21 = vpop.f32.mrf.mxu0 }
 0x49d   :  { %v2010_v22 = vsel %vm848_vm2, %v1957_v18, 0  ;;  %6434 = vmatmul.mubr.msk.bf16.vlgmr.msra.gmra.mxu0 %vm848_vm2, %v1954_v17  ;;  %v2192_v23 = vpack.c.bf16 %v1827_v19, %v1827_v19 }
 0x49e   :  { %v6370_v24 = vpop.f32.mrf.mxu1  ;;  %6426 = vmatpush3.bf16.xpose.msra.mxu1 %v2010_v22  ;;  %v1829_v60 = vpop.f32.mrf.mxu0  ;;  %6445 = vmatprep.mubr.msk.bf16.mxu0 %vm7014_vm0, %v7013_v0 }
 0x49f   :  { %6437 = vmatprep.subr.bf16.mxu1 %v7013_v0  ;;  %v2200_v25 = vsel %vm1088_vm3, %v2192_v23, 0 }
 0x4a0   :  { %v1786_v56 = vpop.f32.mrf.mxu1  ;;  %v6394_v26 = vpop.f32.mrf.mxu0  ;;  %6444 = vmatpush3.bf16.msra.mxu0 %v2200_v25 }
 0x4a1   :  { %v1787_v27 = vadd.f32 %v7401_v31, %v1786_v56  ;;  %6455 = vmatprep.subr.bf16.mxu0 %v7013_v0  ;;  %v1627_v31 = vadd.f32 %v7411_v49, %v1626_v3 }
 0x4a2   :  { %v6385_v28 = vpop.f32.mrf.mxu1  ;;  %v7656_v34 = vpop.f32.mrf.mxu0 }
 0x4a3   :  { %v1959_v40 = vpack.c.bf16 %v1787_v27, %v1787_v27  ;;  %v1955_v57 = vpack.c.bf16 %v1627_v31, %v1627_v31  ;;  %v7680_v28 = vld [vmem:[%s8478_s9] ss:$0 sm:$0xff] }
 0x4a4   :  { %v1789_v41 = vpop.f32.mrf.mxu1  ;;  %v6409_v42 = vpop.f32.mrf.mxu0 }
 0x4a5   :  { %v2102_v36 = vsel %vm848_vm2, %v1959_v40, 0  ;;  %6428 = vmatmul.mubr.msk.bf16.vlgmr.msra.gmra.mxu1 %vm848_vm2, %v1953_v37  ;;  %v1467_v37 = vadd.f32 %v7680_v28, %v7632_v29 }
 0x4a6   :  { %v6386_v44 = vpop.f32.mrf.mxu1  ;;  %6438 = vmatpush3.bf16.xpose.msra.mxu1 %v2102_v36  ;;  %6439 = vmatprep.mubr.msk.bf16.mxu1 %vm7014_vm0, %v7013_v0  ;;  %v1909_v46 = vpop.f32.mrf.mxu0 }
 0x4a7   :  { %6449 = vmatprep.subr.bf16.mxu1 %v7013_v0  ;;  %v2560_v46 = vadd.f32 %v1467_v37, %v7158_v8  ;;  %v1907_v8 = vadd.f32 %v7453_v32, %v7656_v34 }
 0x4a8   :  { %v1866_v47 = vpop.f32.mrf.mxu1  ;;  %v6410_v50 = vpop.f32.mrf.mxu0 }
 0x4a9   :  { %v1867_v52 = vadd.f32 %v7435_v7, %v1866_v47  ;;  %v2564_v31 = vsel %vm176_vm1, %v2560_v46, 0.0 }
 0x4aa   :  { %v6401_v39 = vpop.f32.mrf.mxu1 }
 0x4ab   :  { %v2193_v58 = vpack.c.bf16 %v1867_v52, %v1867_v52 }
 0x4ac   :  { %v1869_v59 = vpop.f32.mrf.mxu1 }
 0x4ad   :  { %6440 = vmatmul.mubr.msk.bf16.vlgmr.msra.gmra.mxu1 %vm848_vm2, %v1955_v57  ;;  %v2246_v61 = vsel %vm1088_vm3, %v2193_v58, 0 }
 0x4ae   :  { %v6402_v43 = vpop.f32.mrf.mxu1  ;;  %6450 = vmatpush3.bf16.msra.mxu1 %v2246_v61  ;;  %6451 = vmatprep.mubr.msk.bf16.mxu1 %vm7014_vm0, %v7013_v0 }
 0x4af   :  { %6461 = vmatprep.subr.bf16.mxu1 %v7013_v0  ;;  %v2194_v43 = vpack.c.bf16 %v1907_v8, %v1907_v8 }
 0x4b0   :  { %v7670_v49 = vpop.f32.mrf.mxu1 }
 0x4b2   :  { %v6417_v62 = vpop.f32.mrf.mxu1 }
 0x4b4   :  { %v1949_v48 = vpop.f32.mrf.mxu1 }
 0x4b6   :  { %v6418_v7 = vpop.f32.mrf.mxu1 }
 0x555   :  { %v2000_v3 = vpop.f32.mrf.mxu0 }
 0x556   :  { %v2144_v63 = vsel %vm848_vm2, %v2000_v3, -inf }
 0x557   :  { %2145 = vmax.xlane.f32.xlu0 %v2144_v63  ;;  %v6423_v11 = vpop.f32.mrf.mxu0 }
 0x558   :  { %v2292_v11 = vsel %vm1088_vm3, %v2194_v43, 0 }
 0x559   :  { %v2003_v30 = vpop.f32.mrf.mxu0 }
 0x55b   :  { %v6424_v38 = vpop.f32.mrf.mxu0 }
 0x55d   :  { %v2092_v2 = vpop.f32.mrf.mxu0 }
 0x55e   :  { %v2150_v33 = vsel %vm848_vm2, %v2092_v2, -inf }
 0x55f   :  { %2151 = vmax.xlane.f32.xlu0 %v2150_v33  ;;  %v6435_v4 = vpop.f32.mrf.mxu0  ;;  %v1947_v33 = vadd.f32 %v7465_v5, %v7670_v49 }
 0x561   :  { %v2095_v9 = vpop.f32.mrf.mxu0 }
 0x562   :  { %v2195_v9 = vpack.c.bf16 %v1947_v33, %v1947_v33 }
 0x563   :  { %v6436_v10 = vpop.f32.mrf.mxu0 }
 0x565   :  { %v2046_v12 = vpop.f32.mrf.mxu1 }
 0x566   :  { %v2147_v45 = vsel %vm848_vm2, %v2046_v12, -inf }
 0x567   :  { %2148 = vmax.xlane.f32.xlu1 %v2147_v45  ;;  %v6429_v13 = vpop.f32.mrf.mxu1  ;;  %v2338_v45 = vsel %vm1088_vm3, %v2195_v9, 0 }
 0x569   :  { %v2049_v51 = vpop.f32.mrf.mxu1 }
 0x56b   :  { %v6430_v14 = vpop.f32.mrf.mxu1 }
 0x56d   :  { %v2138_v15 = vpop.f32.mrf.mxu1 }
 0x56e   :  { %v2153_v16 = vsel %vm848_vm2, %v2138_v15, -inf }
 0x56f   :  { %2154 = vmax.xlane.f32.xlu1 %v2153_v16  ;;  %v6441_v17 = vpop.f32.mrf.mxu1 }
 0x571   :  { %v2141_v18 = vpop.f32.mrf.mxu1 }
 0x573   :  { %v6442_v19 = vpop.f32.mrf.mxu1 }
 0x5e0   :  { %v2146_v20 = vpop.xlane.xlu0 %2145 }
 0x5e1   :  { %v2156_v21 = vsub.f32 %v2000_v3, %v2146_v20 }
 0x5e3   :  { %v2160_v22 = vmul.f32 1.442695, %v2156_v21 }
 0x5e5   :  { %6945 = vpow2.f32 %v2160_v22 }
 0x5e8   :  { %v2152_v23 = vpop.xlane.xlu0 %2151 }
 0x5e9   :  { %v2158_v24 = vsub.f32 %v2092_v2, %v2152_v23 }
 0x5eb   :  { %v2164_v60 = vmul.f32 1.442695, %v2158_v24 }
 0x5ed   :  { %6947 = vpow2.f32 %v2164_v60 }
 0x5f0   :  { %v2149_v6 = vpop.xlane.xlu1 %2148 }
 0x5f1   :  { %v2157_v25 = vsub.f32 %v2046_v12, %v2149_v6 }
 0x5f2   :  { %v6946_v56 = vpop.eup %6945 }
 0x5f3   :  { %v2162_v26 = vmul.f32 1.442695, %v2157_v25  ;;  %v2168_v27 = vsel %vm848_vm2, %v6946_v56, 0.0 }
 0x5f4   :  { %2169 = vadd.xlane.f32.xlu0 %v2168_v27 }
 0x5f5   :  { %6949 = vpow2.f32 %v2162_v26 }
 0x5f8   :  { %v2155_v40 = vpop.xlane.xlu1 %2154 }
 0x5f9   :  { %v2159_v41 = vsub.f32 %v2138_v15, %v2155_v40 }
 0x5fa   :  { %v6948_v42 = vpop.eup %6947 }
 0x5fb   :  { %v2166_v36 = vmul.f32 1.442695, %v2159_v41  ;;  %v2174_v44 = vsel %vm848_vm2, %v6948_v42, 0.0 }
 0x5fc   :  { %2175 = vadd.xlane.f32.xlu0 %v2174_v44 }
 0x5fd   :  { %6951 = vpow2.f32 %v2166_v36 }
 0x600   :  { %2565 = vadd.xlane.f32.xlu0 %v2564_v31 }
 0x602   :  { %v6950_v47 = vpop.eup %6949 }
 0x603   :  { %v2171_v50 = vsel %vm848_vm2, %v6950_v47, 0.0 }
 0x604   :  { %2172 = vadd.xlane.f32.xlu1 %v2171_v50 }
 0x60a   :  { %v6952_v52 = vpop.eup %6951 }
 0x60b   :  { %v2177_v29 = vsel %vm848_vm2, %v6952_v52, 0.0 }
 0x60c   :  { %2178 = vadd.xlane.f32.xlu1 %v2177_v29 }
 0x67d   :  { %v2170_v39 = vpop.xlane.xlu0 %2169 }
 0x67e   :  { %6953 = vrcp.f32 %v2170_v39 }
 0x685   :  { %v2176_v57 = vpop.xlane.xlu0 %2175 }
 0x686   :  { %6955 = vrcp.f32 %v2176_v57 }
 0x689   :  { %v2566_v58 = vpop.xlane.xlu0 %2565 }
 0x68a   :  { %v2571_v59 = vmul.f32 0.03125, %v2566_v58 }
 0x68b   :  { %v6954_v61 = vpop.eup %6953 }
 0x68c   :  { %v7691_v62 = vsub.f32 %v2560_v46, %v2571_v59  ;;  %v2184_v48 = vmul.f32 %v6954_v61, %v6946_v56 }
 0x68d   :  { %v2173_v7 = vpop.xlane.xlu1 %2172 }
 0x68e   :  { %6957 = vrcp.f32 %v2173_v7  ;;  %v2188_v3 = vpack.c.bf16 %v2184_v48, %v2184_v48  ;;  %v2575_v63 = vmul.f32 %v7691_v62, %v7691_v62 }
 0x690   :  { %6446 = vmatmul.mubr.msk.bf16.vlgmr.msra.gmra.mxu0 %vm848_vm2, %v2188_v3  ;;  %v2577_v30 = vsel %vm176_vm1, %v2575_v63, 0.0 }
 0x691   :  { %6456 = vmatpush3.bf16.msra.mxu0 %v2292_v11  ;;  %2578 = vadd.xlane.f32.xlu0 %v2577_v30 }
 0x692   :  { %6457 = vmatprep.mubr.msk.bf16.mxu0 %vm7014_vm0, %v7013_v0  ;;  %6467 = vmatprep.subr.bf16.mxu0 %v7013_v0 }
 0x693   :  { %v6956_v32 = vpop.eup %6955 }
 0x694   :  { %v2186_v34 = vmul.f32 %v6956_v32, %v6948_v42  ;;  %v6893_v32 = vld [vmem:[%s8479_s12 + $0x8] sm:$0xff]  }
 0x695   :  { %v2179_v38 = vpop.xlane.xlu1 %2178 }
 0x696   :  { %6959 = vrcp.f32 %v2179_v38  ;;  %v2190_v2 = vpack.c.bf16 %v2186_v34, %v2186_v34 }
 0x698   :  { %6458 = vmatmul.mubr.msk.bf16.vlgmr.msra.gmra.mxu0 %vm848_vm2, %v2190_v2 }
 0x699   :  { %6468 = vmatpush3.bf16.msra.mxu0 %v7484_v55  ;;  %6469 = vmatprep.mubr.msk.bf16.mxu0 %vm7014_vm0, %v7013_v0 }
 0x69a   :  { %6479 = vmatprep.subr.bf16.mxu0 %v7013_v0 }
 0x69b   :  { %v6958_v4 = vpop.eup %6957 }
 0x69c   :  { %v2185_v10 = vmul.f32 %v6958_v4, %v6950_v47 }
 0x69e   :  { %v2189_v12 = vpack.c.bf16 %v2185_v10, %v2185_v10 }
 0x6a0   :  { %6452 = vmatmul.mubr.msk.bf16.vlgmr.msra.gmra.mxu1 %vm848_vm2, %v2189_v12 }
 0x6a1   :  { %6462 = vmatpush3.bf16.msra.mxu1 %v2338_v45  ;;  %6463 = vmatprep.mubr.msk.bf16.mxu1 %vm7014_vm0, %v7013_v0  ;;  %v5697_v45 = vld [vmem:[%s8481_s10] ss:$0 sm:$0xff] }
 0x6a2   :  { %6473 = vmatprep.subr.bf16.mxu1 %v7013_v0 }
 0x6a3   :  { %v6960_v5 = vpop.eup %6959 }
 0x6a4   :  { %v2187_v55 = vmul.f32 %v6960_v5, %v6952_v52 }
 0x6a6   :  { %v2191_v49 = vpack.c.bf16 %v2187_v55, %v2187_v55 }
 0x6a8   :  { %6464 = vmatmul.mubr.msk.bf16.vlgmr.msra.gmra.mxu1 %vm848_vm2, %v2191_v49 }
 0x6a9   :  { %6474 = vmatpush3.bf16.msra.mxu1 %v7492_v53  ;;  %6475 = vmatprep.mubr.msk.bf16.mxu1 %vm7014_vm0, %v7013_v0 }
 0x6aa   :  { %6485 = vmatprep.subr.bf16.mxu1 %v7013_v0 }
 0x71a   :  { %v2579_v34 = vpop.xlane.xlu0 %2578 }
 0x71b   :  { %v2583_v38 = vmul.f32 0.03125, %v2579_v34  ;;  %v7876_v34 = vld [vmem:[%s8503_s25 + $0x68] sm:$0xff]  }
 0x71d   :  { %v2585_v2 = vadd.f32 1e-05, %v2583_v38  ;;  %v7889_v38 = vld [vmem:[%s8500_s23 + $0x70] sm:$0xff]  }
 0x71f   :  { %6961 = vrsqrt.f32 %v2585_v2  ;;  %v7894_v2 = vld [vmem:[%s8503_s25 + $0x60] sm:$0xff]  }
 0x72c   :  { %v6962_v10 = vpop.eup %6961 }
 0x72d   :  { %v2589_v12 = vmul.f32 %v6962_v10, %v7691_v62  ;;  %v6896_v62 = vld [vmem:[%s8480_s14 + $0x10] sm:$0xff]   ;;  %v7930_v10 = vld [vmem:[%s8504_s30 + $0x40] sm:$0xff]  }
 0x72f   :  { %v2597_v49 = vmul.f32 %v5697_v45, %v2589_v12  ;;  %v7943_v12 = vld [vmem:[%s8503_s25 + $0x78] sm:$0xff]  }
 0x750   :  { %v2236_v13 = vpop.f32.mrf.mxu0 }
 0x751   :  { %v2380_v51 = vpack.c.bf16 %v2236_v13, %v2236_v13  ;;  %v5698_v13 = vld [vmem:[%s8482_s11] ss:$0 sm:$0xff] }
 0x752   :  { %v6447_v14 = vpop.f32.mrf.mxu0 }
 0x753   :  { %6470 = vmatmul.mubr.msk.bf16.vlgmr.msra.gmra.mxu0 %vm848_vm2, %v2380_v51  ;;  %v2605_v14 = vadd.f32 %v5698_v13, %v2597_v49  ;;  %v7979_v49 = vld [vmem:[%s8504_s30 + $0x58] sm:$0xff]  }
 0x754   :  { %v2239_v15 = vpop.f32.mrf.mxu0  ;;  %6480 = vmatpush3.bf16.msra.mxu0 %v7500_v35  ;;  %6481 = vmatprep.mubr.msk.bf16.mxu0 %vm7014_vm0, %v7013_v0 }
 0x755   :  { %6491 = vmatprep.subr.bf16.mxu0 %v7013_v0 }
 0x756   :  { %v6448_v16 = vpop.f32.mrf.mxu0 }
 0x758   :  { %v2328_v53 = vpop.f32.mrf.mxu0 }
 0x759   :  { %v2382_v17 = vpack.c.bf16 %v2328_v53, %v2328_v53  ;;  %v6897_v53 = vld [vmem:[%s8480_s14 + $0x8] sm:$0xff]  }
 0x75a   :  { %v6459_v18 = vpop.f32.mrf.mxu0 }
 0x75b   :  { %6482 = vmatmul.mubr.msk.bf16.vlgmr.msra.gmra.mxu0 %vm848_vm2, %v2382_v17  ;;  %v6898_v17 = vld [vmem:[%s8480_s14] sm:$0xff]  }
 0x75c   :  { %v2331_v19 = vpop.f32.mrf.mxu0  ;;  %6495 = vmatprep.mubr.msk.bf16.mxu0 %vm7014_vm0, %v7013_v0  ;;  %6492 = vmatpush3.bf16.msra.mxu0 %v6893_v32  ;;  %v5699_v18 = vld [vmem:[%s8483_s13] ss:$0 sm:$0xff]  ;;  %v7853_v32 = vld [vmem:[%s8500_s23 + $0x50] sm:$0xff]  }
 0x75d   :  { %6493 = vmatprep.subr.bf16.mxu0 %v7013_v0 }
 0x75e   :  { %v6460_v20 = vpop.f32.mrf.mxu0 }
 0x760   :  { %v2282_v21 = vpop.f32.mrf.mxu1 }
 0x761   :  { %v2381_v22 = vpack.c.bf16 %v2282_v21, %v2282_v21 }
 0x762   :  { %v6453_v23 = vpop.f32.mrf.mxu1 }
 0x763   :  { %6476 = vmatmul.mubr.msk.bf16.vlgmr.msra.gmra.mxu1 %vm848_vm2, %v2381_v22 }
 0x764   :  { %v2285_v35 = vpop.f32.mrf.mxu1  ;;  %6486 = vmatpush3.bf16.msra.mxu1 %v7530_v1  ;;  %6487 = vmatprep.mubr.msk.bf16.mxu1 %vm7014_vm0, %v7013_v0 }
 0x765   :  { %6499 = vmatprep.subr.bf16.mxu1 %v7013_v0 }
 0x766   :  { %v6454_v24 = vpop.f32.mrf.mxu1 }
 0x768   :  { %v2374_v60 = vpop.f32.mrf.mxu1 }
 0x769   :  { %v2383_v6 = vpack.c.bf16 %v2374_v60, %v2374_v60 }
 0x76a   :  { %v6465_v25 = vpop.f32.mrf.mxu1 }
 0x76b   :  { %6488 = vmatmul.mubr.msk.bf16.vlgmr.msra.gmra.mxu1 %vm848_vm2, %v2383_v6  ;;  %v5703_v25 = vld [vmem:[%s8484_s15] ss:$0 sm:$0xff] }
 0x76c   :  { %v2377_v56 = vpop.f32.mrf.mxu1  ;;  %6507 = vmatprep.mubr.msk.bf16.mxu1 %vm7014_vm0, %v7013_v0 }
 0x76e   :  { %v6466_v26 = vpop.f32.mrf.mxu1 }
 0x813   :  { %v2421_v27 = vpop.f32.mrf.mxu0 }
 0x815   :  { %v6471_v37 = vpop.f32.mrf.mxu0 }
 0x817   :  { %v2424_v40 = vpop.f32.mrf.mxu0 }
 0x819   :  { %v6472_v1 = vpop.f32.mrf.mxu0 }
 0x81b   :  { %v2507_v41 = vpop.f32.mrf.mxu0 }
 0x81d   :  { %v6483_v42 = vpop.f32.mrf.mxu0 }
 0x81f   :  { %v2510_v36 = vpop.f32.mrf.mxu0 }
 0x821   :  { %v6484_v44 = vpop.f32.mrf.mxu0 }
 0x823   :  { %v2464_v46 = vpop.f32.mrf.mxu1 }
 0x824   :  { %v2556_v47 = vadd.f32 %v2464_v46, %v2421_v27 }
 0x825   :  { %v6477_v31 = vpop.f32.mrf.mxu1 }
 0x826   :  { %v2557_v29 = vadd.f32 %v2556_v47, %v2507_v41 }
 0x827   :  { %v2467_v50 = vpop.f32.mrf.mxu1 }
 0x828   :  { %v7791_v50 = vld [vmem:[%s8500_s23 + $0x48] sm:$0xff]  }
 0x829   :  { %v6478_v52 = vpop.f32.mrf.mxu1 }
 0x82a   :  { %v7796_v52 = vld [vmem:[%s8500_s23 + $0x68] sm:$0xff]  }
 0x82b   :  { %v2550_v39 = vpop.f32.mrf.mxu1 }
 0x82c   :  { %v2558_v57 = vadd.f32 %v2557_v29, %v2550_v39  ;;  %v7805_v29 = vld [vmem:[%s8500_s23 + $0x40] sm:$0xff]  }
 0x82d   :  { %v6489_v8 = vpop.f32.mrf.mxu1  ;;  %v7810_v39 = vld [vmem:[%s8500_s23 + $0x60] sm:$0xff]  }
 0x82e   :  { %v2559_v58 = vadd.f32 %v7680_v28, %v2558_v57  ;;  %v6894_v28 = vld [vmem:[%s8479_s12] sm:$0xff]  }
 0x82f   :  { %v2553_v59 = vpop.f32.mrf.mxu1  ;;  %6494 = vmatpush3.bf16.msra.mxu0 %v6894_v28  ;;  %v7858_v28 = vld [vmem:[%s8503_s25 + $0x40] sm:$0xff]  }
 0x830   :  { %v2561_v61 = vadd.f32 %v2559_v58, %v7514_v54  ;;  %6511 = vmatprep.subr.bf16.mxu0 %v7013_v0  ;;  %v6895_v54 = vld [vmem:[%s8480_s14 + $0x18] sm:$0xff]  }
 0x831   :  { %v6490_v43 = vpop.f32.mrf.mxu1  ;;  %6500 = vmatpush3.bf16.msra.mxu1 %v6895_v54  ;;  %v7871_v54 = vld [vmem:[%s8500_s23 + $0x78] sm:$0xff]  }
 0x832   :  { %v2567_v48 = vsel %vm176_vm1, %v2561_v61, 0.0  ;;  %6501 = vmatprep.subr.bf16.mxu1 %v7013_v0 }
 0x833   :  { %2568 = vadd.xlane.f32.xlu1 %v2567_v48  ;;  %v7824_v48 = vld [vmem:[%s8486_s17] ss:$0 sm:$0xff] }
 0x835   :  { %6502 = vmatpush3.bf16.msra.mxu1 %v6896_v62 }
 0x836   :  { %6503 = vmatprep.subr.bf16.mxu1 %v7013_v0 }
 0x839   :  { %6504 = vmatpush3.bf16.msra.mxu1 %v6897_v53 }
 0x83a   :  { %6505 = vmatprep.subr.bf16.mxu1 %v7013_v0 }
 0x83d   :  { %6506 = vmatpush3.bf16.msra.mxu1 %v6898_v17 }
 0x83e   :  { %6527 = vmatprep.subr.bf16.mxu1 %v7013_v0 }
 0x8bc   :  { %v2569_v7 = vpop.xlane.xlu1 %2568 }
 0x8bd   :  { %v2572_v3 = vmul.f32 0.03125, %v2569_v7 }
 0x8bf   :  { %v2574_v63 = vsub.f32 %v2561_v61, %v2572_v3  ;;  %v7819_v61 = vld [vmem:[%s8485_s16] ss:$0 sm:$0xff] }
 0x8c1   :  { %v2576_v11 = vmul.f32 %v2574_v63, %v2574_v63 }
 0x8c3   :  { %v2580_v30 = vsel %vm176_vm1, %v2576_v11, 0.0  ;;  %v7838_v11 = vld [vmem:[%s8503_s25 + $0x48] sm:$0xff]  }
 0x8c4   :  { %2581 = vadd.xlane.f32.xlu1 %v2580_v30 }
 0x94d   :  { %v2582_v33 = vpop.xlane.xlu1 %2581 }
 0x94e   :  { %v2584_v4 = vmul.f32 0.03125, %v2582_v33  ;;  %v7907_v33 = vld [vmem:[%s8503_s25 + $0x58] sm:$0xff]  }
 0x950   :  { %v2586_v9 = vadd.f32 1e-05, %v2584_v4  ;;  %v7912_v4 = vld [vmem:[%s8504_s30 + $0x48] sm:$0xff]  }
 0x952   :  { %6963 = vrsqrt.f32 %v2586_v9  ;;  %v7925_v9 = vld [vmem:[%s8503_s25 + $0x50] sm:$0xff]  }
 0x95f   :  { %v6964_v5 = vpop.eup %6963 }
 0x960   :  { %v2590_v55 = vmul.f32 %v6964_v5, %v2574_v63  ;;  %v7833_v63 = vld [vmem:[%s8500_s23 + $0x58] sm:$0xff]   ;;  %v7961_v5 = vld [vmem:[%s8503_s25 + $0x70] sm:$0xff]  }
 0x962   :  { %v2598_v51 = vmul.f32 %v5697_v45, %v2590_v55  ;;  %v7948_v45 = vld [vmem:[%s8504_s30 + $0x68] sm:$0xff]   ;;  %v7966_v55 = vld [vmem:[%s8504_s30 + $0x60] sm:$0xff]  }
 0x964   :  { %v7757_v15 = vadd.f32 %v5698_v13, %v2598_v51  ;;  %v7991_v13 = vld [vmem:[%s8504_s30 + $0x50] sm:$0xff]   ;;  %v8002_v51 = vld [vmem:[%s8504_s30 + $0x78] sm:$0xff]  }
 0x966   :  { %v2612_v16 = vpack.c.bf16 %v7757_v15, %v2605_v14 }
 0x968   :  { %6496 = vmatmul.mubr.msk.bf16.vlgmr.msra.gmra.mxu0 %vm176_vm1, %v2612_v16 }
 0x969   :  { %6515 = vmatprep.mubr.msk.bf16.mxu0 %vm7014_vm0, %v7013_v0  ;;  %6512 = vmatpush3.bf16.msra.mxu0 %v7791_v50 }
 0x96a   :  { %6513 = vmatprep.subr.bf16.mxu0 %v7013_v0 }
 0x96d   :  { %6514 = vmatpush3.bf16.msra.mxu0 %v7805_v29 }
 0x96e   :  { %6519 = vmatprep.subr.bf16.mxu0 %v7013_v0 }
 0xa28   :  { %v2668_v19 = vpop.f32.mrf.mxu0 }
 0xa29   :  { %v2669_v21 = vadd.f32 %v5699_v18, %v2668_v19 }
 0xa2a   :  { %v6497_v20 = vpop.f32.mrf.mxu0 }
 0xa2b   :  { %v2675_v24 = vmax.f32 %v2669_v21, 0.0 }
 0xa2c   :  { %v2671_v22 = vpop.f32.mrf.mxu0 }
 0xa2d   :  { %v2672_v23 = vadd.f32 %v5699_v18, %v2671_v22  ;;  %v8025_v22 = vld [vmem:[%s8474_s6 + $0x4] ss:$0 sm:$0xff] }
 0xa2e   :  { %v6498_v35 = vpop.f32.mrf.mxu0 }
 0xa2f   :  { %v2676_v60 = vmax.f32 %v2672_v23, 0.0 }
 0xa31   :  { %v2686_v6 = vpack.c.bf16 %v2676_v60, %v2675_v24 }
 0xa33   :  { %6508 = vmatmul.mubr.msk.bf16.vlgmr.msra.gmra.mxu1 %vm2717_vm4, %v2686_v6 }
 0xa34   :  { %6531 = vmatprep.mubr.msk.bf16.mxu1 %vm7014_vm0, %v7013_v0  ;;  %6528 = vmatpush3.bf16.msra.mxu1 %v7796_v52 }
 0xa35   :  { %6529 = vmatprep.subr.bf16.mxu1 %v7013_v0 }
 0xa38   :  { %6530 = vmatpush3.bf16.msra.mxu1 %v7810_v39 }
 0xa39   :  { %6543 = vmatprep.subr.bf16.mxu1 %v7013_v0 }
 0xaf3   :  { %v2755_v56 = vpop.f32.mrf.mxu1 }
 0xaf4   :  { %v2756_v26 = vadd.f32 %v5703_v25, %v2755_v56  ;;  %v8031_v56 = vld [vmem:[%s8475_s5 + $0x4] ss:$0 sm:$0xff] }
 0xaf5   :  { %v6509_v27 = vpop.f32.mrf.mxu1 }
 0xaf6   :  { %v2762_v37 = vadd.f32 %v2756_v26, %v2605_v14  ;;  %v8011_v14 = vld [vmem:[%s8504_s30 + $0x70] sm:$0xff]  }
 0xaf7   :  { %v2758_v40 = vpop.f32.mrf.mxu1 }
 0xaf8   :  { %v7784_v1 = vadd.f32 %v5703_v25, %v2758_v40  ;;  %v2766_v41 = vsel %vm176_vm1, %v2762_v37, 0.0 }
 0xaf9   :  { %2767 = vadd.xlane.f32.xlu0 %v2766_v41  ;;  %v6510_v42 = vpop.f32.mrf.mxu1 }
 0xafa   :  { %v8037_v42 = vld [vmem:[%s8474_s6 + $0x6] ss:$0 sm:$0xff] }
 0xb82   :  { %v2768_v36 = vpop.xlane.xlu0 %2767 }
 0xb83   :  { %v2772_v44 = vmul.f32 0.03125, %v2768_v36 }
 0xb85   :  { %v2774_v46 = vsub.f32 %v2762_v37, %v2772_v44 }
 0xb87   :  { %v2776_v31 = vmul.f32 %v2774_v46, %v2774_v46 }
 0xb89   :  { %v2778_v47 = vsel %vm176_vm1, %v2776_v31, 0.0 }
 0xb8a   :  { %2779 = vadd.xlane.f32.xlu1 %v2778_v47 }
 0xc13   :  { %v2780_v57 = vpop.xlane.xlu1 %2779 }
 0xc14   :  { %v2784_v8 = vmul.f32 0.03125, %v2780_v57 }
 0xc16   :  { %v2786_v58 = vadd.f32 1e-05, %v2784_v8 }
 0xc18   :  { %6965 = vrsqrt.f32 %v2786_v58 }
 0xc25   :  { %v6966_v59 = vpop.eup %6965 }
 0xc26   :  { %v2790_v43 = vmul.f32 %v6966_v59, %v2774_v46  ;;  %v8045_v59 = vld [vmem:[%s8475_s5 + $0x6] ss:$0 sm:$0xff] }
 0xc28   :  { %v2798_v7 = vmul.f32 %v7819_v61, %v2790_v43 }
 0xc2a   :  { %v7828_v3 = vadd.f32 %v7824_v48, %v2798_v7 }
 0xc2c   :  { %v7842_v30 = vpack.c.bf16 %v7828_v3, %v7828_v3 }
 0xc2e   :  { %6516 = vmatmul.mubr.msk.bf16.vlgmr.msra.gmra.mxu0 %vm176_vm1, %v7842_v30  ;;  %6532 = vmatmul.mubr.msk.bf16.vlgmr.msra.gmra.mxu1 %vm176_vm1, %v7842_v30 }
 0xc2f   :  { %6520 = vmatpush3.bf16.msra.mxu0 %v7833_v63  ;;  %6544 = vmatpush3.bf16.msra.mxu1 %v7838_v11 }
 0xc30   :  { %6521 = vmatprep.subr.bf16.mxu0 %v7013_v0  ;;  %6545 = vmatprep.subr.bf16.mxu1 %v7013_v0 }
 0xc31   :  { %6523 = vmatprep.mubr.msk.bf16.mxu0 %vm7014_vm0, %v7013_v0  ;;  %6547 = vmatprep.mubr.msk.bf16.mxu1 %vm7014_vm0, %v7013_v0 }
 0xc33   :  { %6522 = vmatpush3.bf16.msra.mxu0 %v7853_v32  ;;  %6546 = vmatpush3.bf16.msra.mxu1 %v7858_v28 }
 0xc34   :  { %6535 = vmatprep.subr.bf16.mxu0 %v7013_v0  ;;  %6559 = vmatprep.subr.bf16.mxu1 %v7013_v0 }
 0xc36   :  { %6524 = vmatmul.mubr.msk.bf16.vlgmr.msra.gmra.mxu0 %vm176_vm1, %v7842_v30  ;;  %6548 = vmatmul.mubr.msk.bf16.vlgmr.msra.gmra.mxu1 %vm176_vm1, %v7842_v30 }
 0xc37   :  { %6536 = vmatpush3.bf16.msra.mxu0 %v7871_v54  ;;  %6560 = vmatpush3.bf16.msra.mxu1 %v7876_v34 }
 0xc38   :  { %6537 = vmatprep.subr.bf16.mxu0 %v7013_v0  ;;  %6561 = vmatprep.subr.bf16.mxu1 %v7013_v0 }
 0xc39   :  { %6539 = vmatprep.mubr.msk.bf16.mxu0 %vm7014_vm0, %v7013_v0  ;;  %6563 = vmatprep.mubr.msk.bf16.mxu1 %vm7014_vm0, %v7013_v0 }
 0xc3b   :  { %6538 = vmatpush3.bf16.msra.mxu0 %v7889_v38  ;;  %6562 = vmatpush3.bf16.msra.mxu1 %v7894_v2 }
 0xc3c   :  { %6551 = vmatprep.subr.bf16.mxu0 %v7013_v0  ;;  %6575 = vmatprep.subr.bf16.mxu1 %v7013_v0 }
 0xc3e   :  { %6540 = vmatmul.mubr.msk.bf16.vlgmr.msra.gmra.mxu0 %vm176_vm1, %v7842_v30  ;;  %6564 = vmatmul.mubr.msk.bf16.vlgmr.msra.gmra.mxu1 %vm176_vm1, %v7842_v30 }
 0xc3f   :  { %6552 = vmatpush3.bf16.msra.mxu0 %v7907_v33  ;;  %6576 = vmatpush3.bf16.msra.mxu1 %v7912_v4 }
 0xc40   :  { %6553 = vmatprep.subr.bf16.mxu0 %v7013_v0  ;;  %6577 = vmatprep.subr.bf16.mxu1 %v7013_v0 }
 0xc41   :  { %6555 = vmatprep.mubr.msk.bf16.mxu0 %vm7014_vm0, %v7013_v0  ;;  %6579 = vmatprep.mubr.msk.bf16.mxu1 %vm7014_vm0, %v7013_v0 }
 0xc43   :  { %6554 = vmatpush3.bf16.msra.mxu0 %v7925_v9  ;;  %6578 = vmatpush3.bf16.msra.mxu1 %v7930_v10 }
 0xc44   :  { %6567 = vmatprep.subr.bf16.mxu0 %v7013_v0  ;;  %6591 = vmatprep.subr.bf16.mxu1 %v7013_v0 }
 0xc46   :  { %6556 = vmatmul.mubr.msk.bf16.vlgmr.msra.gmra.mxu0 %vm176_vm1, %v7842_v30  ;;  %6580 = vmatmul.mubr.msk.bf16.vlgmr.msra.gmra.mxu1 %vm176_vm1, %v7842_v30 }
 0xc47   :  { %6568 = vmatpush3.bf16.msra.mxu0 %v7943_v12  ;;  %6592 = vmatpush3.bf16.msra.mxu1 %v7948_v45 }
 0xc48   :  { %6569 = vmatprep.subr.bf16.mxu0 %v7013_v0  ;;  %6593 = vmatprep.subr.bf16.mxu1 %v7013_v0 }
 0xc49   :  { %6571 = vmatprep.mubr.msk.bf16.mxu0 %vm7014_vm0, %v7013_v0  ;;  %6595 = vmatprep.mubr.msk.bf16.mxu1 %vm7014_vm0, %v7013_v0 }
 0xc4b   :  { %6570 = vmatpush3.bf16.msra.mxu0 %v7961_v5  ;;  %6594 = vmatpush3.bf16.msra.mxu1 %v7966_v55 }
 0xc4c   :  { %6583 = vmatprep.subr.bf16.mxu0 %v7013_v0  ;;  %6607 = vmatprep.subr.bf16.mxu1 %v7013_v0 }
 0xc4e   :  { %6572 = vmatmul.mubr.msk.bf16.vlgmr.msra.gmra.mxu0 %vm176_vm1, %v7842_v30  ;;  %6596 = vmatmul.mubr.msk.bf16.vlgmr.msra.gmra.mxu1 %vm176_vm1, %v7842_v30 }
 0xc4f   :  { %6584 = vmatpush3.bf16.msra.mxu0 %v7979_v49  ;;  %6587 = vmatprep.mubr.msk.bf16.mxu0 %vm7014_vm0, %v7013_v0 }
 0xc50   :  { %6585 = vmatprep.subr.bf16.mxu0 %v7013_v0  ;;  %6609 = vmatprep.mubr.msk.bf16.mxu1 %vm7014_vm0, %v7013_v0 }
 0xc53   :  { %6586 = vmatpush3.bf16.msra.mxu0 %v7991_v13 }
 0xc54   :  { %6599 = vmatprep.subr.bf16.mxu0 %v7013_v0 }
 0xc56   :  { %6588 = vmatmul.mubr.msk.bf16.vlgmr.msra.gmra.mxu0 %vm176_vm1, %v7842_v30 }
 0xc57   :  { %6600 = vmatpush3.bf16.msra.mxu0 %v8002_v51  ;;  %6603 = vmatprep.mubr.msk.bf16.mxu0 %vm7014_vm0, %v7013_v0 }
 0xc58   :  { %6601 = vmatprep.subr.bf16.mxu0 %v7013_v0 }
 0xc5b   :  { %6602 = vmatpush3.bf16.msra.mxu0 %v8011_v14 }
 0xc5c   :  { %6613 = vmatprep.subr.bf16.mxu0 %v7013_v0 }
 0xc5e   :  { %6604 = vmatmul.mubr.msk.bf16.vlgmr.msra.gmra.mxu0 %vm176_vm1, %v7842_v30 }
 0xc5f   :  { %6615 = vmatprep.mubr.msk.bf16.mxu0 %vm7014_vm0, %v7013_v0 }
 0xcee   :  { %v2955_v16 = vpop.f32.mrf.mxu0  ;;  %v3059_v62 = vpop.f32.mrf.mxu1 }
 0xcef   :  { %v2956_v36 = vadd.f32 %v8031_v56, %v2955_v16 }
 0xcf0   :  { %v6517_v53 = vpop.f32.mrf.mxu0  ;;  %v6533_v17 = vpop.f32.mrf.mxu1 }
 0xcf1   :  { %v3581_v8 = vpack.c.bf16 %v2956_v36, %v2956_v36  ;;  %v8052_v17 = vld [vmem:[%s8474_s6 + $0x5] ss:$0 sm:$0xff] }
 0xcf2   :  { %v2958_v18 = vpop.f32.mrf.mxu0  ;;  %v3062_v19 = vpop.f32.mrf.mxu1 }
 0xcf3   :  { %v8057_v18 = vld [vmem:[%s8476_s7 + $0x4] ss:$0 sm:$0xff]  ;;  %v3060_v19 = vadd.f32 %v8045_v59, %v3059_v62 }
 0xcf4   :  { %v6518_v20 = vpop.f32.mrf.mxu0  ;;  %v6534_v21 = vpop.f32.mrf.mxu1 }
 0xcf6   :  { %v3007_v23 = vpop.f32.mrf.mxu0  ;;  %v3187_v35 = vpop.f32.mrf.mxu1 }
 0xcf7   :  { %v3188_v24 = vadd.f32 %v8025_v22, %v3187_v35 }
 0xcf8   :  { %v6525_v60 = vpop.f32.mrf.mxu0  ;;  %v6549_v6 = vpop.f32.mrf.mxu1 }
 0xcf9   :  { %v3585_v25 = vpack.c.bf16 %v3188_v24, %v3188_v24 }
 0xcfa   :  { %v3010_v26 = vpop.f32.mrf.mxu0  ;;  %v3190_v27 = vpop.f32.mrf.mxu1 }
 0xcfb   :  { %v3593_v37 = vsel %vm848_vm2, %v3585_v25, 0  ;;  %v3583_v25 = vpack.c.bf16 %v3060_v19, %v3060_v19 }
 0xcfc   :  { %v6526_v40 = vpop.f32.mrf.mxu0  ;;  %v6550_v41 = vpop.f32.mrf.mxu1  ;;  %6608 = vmatpush3.bf16.xpose.msra.mxu1 %v3593_v37  ;;  %v8068_v37 = vld [vmem:[%s8475_s5 + $0x5] ss:$0 sm:$0xff] }
 0xcfd   :  { %6619 = vmatprep.subr.bf16.mxu1 %v7013_v0 }
 0xcfe   :  { %v3111_v44 = vpop.f32.mrf.mxu0  ;;  %v3291_v46 = vpop.f32.mrf.mxu1 }
 0xcff   :  { %v3292_v31 = vadd.f32 %v8037_v42, %v3291_v46 }
 0xd00   :  { %v6541_v47 = vpop.f32.mrf.mxu0  ;;  %v6565_v57 = vpop.f32.mrf.mxu1 }
 0xd01   :  { %v3587_v58 = vpack.c.bf16 %v3292_v31, %v3292_v31  ;;  %v8076_v47 = vld [vmem:[%s8474_s6 + $0x7] ss:$0 sm:$0xff]  ;;  %v3008_v57 = vadd.f32 %v8068_v37, %v3007_v23 }
 0xd02   :  { %v3114_v43 = vpop.f32.mrf.mxu0  ;;  %v3294_v7 = vpop.f32.mrf.mxu1  ;;  %v8089_v23 = vld [vmem:[%s8475_s5 + $0x7] ss:$0 sm:$0xff] }
 0xd03   :  { %v3685_v30 = vsel %vm848_vm2, %v3587_v58, 0  ;;  %6610 = vmatmul.mubr.msk.bf16.vlgmr.msra.gmra.mxu1 %vm848_vm2, %v3581_v8 }
 0xd04   :  { %v6542_v16 = vpop.f32.mrf.mxu0  ;;  %v6566_v53 = vpop.f32.mrf.mxu1  ;;  %6620 = vmatpush3.bf16.xpose.msra.mxu1 %v3685_v30  ;;  %6621 = vmatprep.mubr.msk.bf16.mxu1 %vm7014_vm0, %v7013_v0 }
 0xd05   :  { %6631 = vmatprep.subr.bf16.mxu1 %v7013_v0  ;;  %v3582_v16 = vpack.c.bf16 %v3008_v57, %v3008_v57 }
 0xd06   :  { %v3239_v20 = vpop.f32.mrf.mxu0  ;;  %v3419_v21 = vpop.f32.mrf.mxu1 }
 0xd07   :  { %v3240_v35 = vadd.f32 %v8052_v17, %v3239_v20  ;;  %v3420_v24 = vadd.f32 %v8057_v18, %v3419_v21 }
 0xd08   :  { %v6557_v60 = vpop.f32.mrf.mxu0  ;;  %v6581_v6 = vpop.f32.mrf.mxu1 }
 0xd09   :  { %v3586_v26 = vpack.c.bf16 %v3240_v35, %v3240_v35  ;;  %v3821_v27 = vpack.c.bf16 %v3420_v24, %v3420_v24  ;;  %v8096_v60 = vld [vmem:[%s8476_s7 + $0x5] ss:$0 sm:$0xff]  ;;  %v3112_v6 = vadd.f32 %v8089_v23, %v3111_v44 }
 0xd0a   :  { %v3242_v40 = vpop.f32.mrf.mxu0  ;;  %v3422_v62 = vpop.f32.mrf.mxu1 }
 0xd0b   :  { %v3639_v41 = vsel %vm848_vm2, %v3586_v26, 0  ;;  %v3829_v36 = vsel %vm1088_vm3, %v3821_v27, 0  ;;  %6622 = vmatmul.mubr.msk.bf16.vlgmr.msra.gmra.mxu1 %vm848_vm2, %v3583_v25  ;;  %v3584_v40 = vpack.c.bf16 %v3112_v6, %v3112_v6 }
 0xd0c   :  { %v6558_v46 = vpop.f32.mrf.mxu0  ;;  %v6582_v31 = vpop.f32.mrf.mxu1  ;;  %6614 = vmatpush3.bf16.xpose.msra.mxu0 %v3639_v41  ;;  %6632 = vmatpush3.bf16.msra.mxu1 %v3829_v36 }
 0xd0d   :  { %6625 = vmatprep.subr.bf16.mxu0 %v7013_v0  ;;  %6633 = vmatprep.mubr.msk.bf16.mxu1 %vm7014_vm0, %v7013_v0 }
 0xd0e   :  { %v3343_v8 = vpop.f32.mrf.mxu0  ;;  %v8082_v58 = vpop.f32.mrf.mxu1  ;;  %6643 = vmatprep.subr.bf16.mxu1 %v7013_v0 }
 0xd0f   :  { %v3344_v43 = vadd.f32 %v8076_v47, %v3343_v8 }
 0xd10   :  { %v6573_v7 = vpop.f32.mrf.mxu0  ;;  %v6597_v30 = vpop.f32.mrf.mxu1 }
 0xd11   :  { %v3588_v53 = vpack.c.bf16 %v3344_v43, %v3344_v43 }
 0xd12   :  { %v3346_v19 = vpop.f32.mrf.mxu0  ;;  %v3526_v20 = vpop.f32.mrf.mxu1 }
 0xd13   :  { %v3731_v21 = vsel %vm848_vm2, %v3588_v53, 0  ;;  %6616 = vmatmul.mubr.msk.bf16.vlgmr.msra.gmra.mxu0 %vm848_vm2, %v3582_v16 }
 0xd14   :  { %v6574_v35 = vpop.f32.mrf.mxu0  ;;  %v6598_v24 = vpop.f32.mrf.mxu1  ;;  %6626 = vmatpush3.bf16.xpose.msra.mxu0 %v3731_v21  ;;  %6627 = vmatprep.mubr.msk.bf16.mxu0 %vm7014_vm0, %v7013_v0 }
 0xd15   :  { %6637 = vmatprep.subr.bf16.mxu0 %v7013_v0 }
 0xd16   :  { %v3471_v25 = vpop.f32.mrf.mxu0 }
 0xd17   :  { %v3472_v26 = vadd.f32 %v8096_v60, %v3471_v25 }
 0xd18   :  { %v6589_v27 = vpop.f32.mrf.mxu0 }
 0xd19   :  { %v3822_v62 = vpack.c.bf16 %v3472_v26, %v3472_v26 }
 0xd1a   :  { %v3474_v41 = vpop.f32.mrf.mxu0 }
 0xd1b   :  { %v3875_v36 = vsel %vm1088_vm3, %v3822_v62, 0  ;;  %6628 = vmatmul.mubr.msk.bf16.vlgmr.msra.gmra.mxu0 %vm848_vm2, %v3584_v40 }
 0xd1c   :  { %v6590_v46 = vpop.f32.mrf.mxu0  ;;  %6638 = vmatpush3.bf16.msra.mxu0 %v3875_v36  ;;  %6639 = vmatprep.mubr.msk.bf16.mxu0 %vm7014_vm0, %v7013_v0 }
 0xd1d   :  { %6649 = vmatprep.subr.bf16.mxu0 %v7013_v0 }
 0xd1e   :  { %v8108_v44 = vpop.f32.mrf.mxu0 }
 0xd20   :  { %v6605_v31 = vpop.f32.mrf.mxu0 }
 0xd22   :  { %v3578_v57 = vpop.f32.mrf.mxu0 }
 0xd24   :  { %v6606_v8 = vpop.f32.mrf.mxu0 }
 0xdc3   :  { %v3629_v43 = vpop.f32.mrf.mxu1 }
 0xdc4   :  { %v3773_v7 = vsel %vm848_vm2, %v3629_v43, -inf }
 0xdc5   :  { %3774 = vmax.xlane.f32.xlu0 %v3773_v7  ;;  %v6611_v30 = vpop.f32.mrf.mxu1 }
 0xdc7   :  { %v3632_v16 = vpop.f32.mrf.mxu1 }
 0xdc9   :  { %v6612_v53 = vpop.f32.mrf.mxu1 }
 0xdcb   :  { %v3721_v19 = vpop.f32.mrf.mxu1 }
 0xdcc   :  { %v3779_v20 = vsel %vm848_vm2, %v3721_v19, -inf }
 0xdcd   :  { %3780 = vmax.xlane.f32.xlu0 %v3779_v20  ;;  %v6623_v21 = vpop.f32.mrf.mxu1 }
 0xdcf   :  { %v3724_v35 = vpop.f32.mrf.mxu1 }
 0xdd1   :  { %v6624_v24 = vpop.f32.mrf.mxu1 }
 0xdd3   :  { %v3675_v6 = vpop.f32.mrf.mxu0 }
 0xdd4   :  { %v3776_v25 = vsel %vm848_vm2, %v3675_v6, -inf }
 0xdd5   :  { %3777 = vmax.xlane.f32.xlu1 %v3776_v25  ;;  %v6617_v26 = vpop.f32.mrf.mxu0 }
 0xdd7   :  { %v3678_v27 = vpop.f32.mrf.mxu0 }
 0xdd9   :  { %v6618_v40 = vpop.f32.mrf.mxu0 }
 0xddb   :  { %v3767_v62 = vpop.f32.mrf.mxu0 }
 0xddc   :  { %v3782_v41 = vsel %vm848_vm2, %v3767_v62, -inf }
 0xddd   :  { %3783 = vmax.xlane.f32.xlu1 %v3782_v41  ;;  %v6629_v36 = vpop.f32.mrf.mxu0 }
 0xdde   :  { %v2763_v36 = vadd.f32 %v7784_v1, %v7757_v15 }
 0xddf   :  { %v3770_v46 = vpop.f32.mrf.mxu0 }
 0xde1   :  { %v6630_v31 = vpop.f32.mrf.mxu0 }
 0xe4e   :  { %v3775_v57 = vpop.xlane.xlu0 %3774 }
 0xe4f   :  { %v3785_v8 = vsub.f32 %v3629_v43, %v3775_v57 }
 0xe51   :  { %v3789_v7 = vmul.f32 1.442695, %v3785_v8  ;;  %v8124_v8 = vld [vmem:[%s8476_s7 + $0x6] ss:$0 sm:$0xff] }
 0xe52   :  { %v3524_v1 = vadd.f32 %v8124_v8, %v8082_v58 }
 0xe53   :  { %6967 = vpow2.f32 %v3789_v7 }
 0xe56   :  { %v3781_v30 = vpop.xlane.xlu0 %3780 }
 0xe57   :  { %v3787_v16 = vsub.f32 %v3721_v19, %v3781_v30  ;;  %v2769_v19 = vsel %vm176_vm1, %v2763_v36, 0.0 }
 0xe59   :  { %v3793_v53 = vmul.f32 1.442695, %v3787_v16 }
 0xe5b   :  { %6969 = vpow2.f32 %v3793_v53  ;;  %v3823_v53 = vpack.c.bf16 %v3524_v1, %v3524_v1 }
 0xe5e   :  { %v3778_v20 = vpop.xlane.xlu1 %3777 }
 0xe5f   :  { %v3786_v21 = vsub.f32 %v3675_v6, %v3778_v20 }
 0xe60   :  { %v6968_v35 = vpop.eup %6967 }
 0xe61   :  { %v3791_v24 = vmul.f32 1.442695, %v3786_v21  ;;  %v3797_v25 = vsel %vm848_vm2, %v6968_v35, 0.0 }
 0xe62   :  { %3798 = vadd.xlane.f32.xlu0 %v3797_v25 }
 0xe63   :  { %6971 = vpow2.f32 %v3791_v24 }
 0xe66   :  { %v3784_v26 = vpop.xlane.xlu1 %3783 }
 0xe67   :  { %v3788_v27 = vsub.f32 %v3767_v62, %v3784_v26 }
 0xe68   :  { %v6970_v40 = vpop.eup %6969 }
 0xe69   :  { %v3795_v41 = vmul.f32 1.442695, %v3788_v27  ;;  %v3803_v43 = vsel %vm848_vm2, %v6970_v40, 0.0  ;;  %v3921_v27 = vsel %vm1088_vm3, %v3823_v53, 0 }
 0xe6a   :  { %3804 = vadd.xlane.f32.xlu0 %v3803_v43  ;;  %v8137_v43 = vld [vmem:[%s8476_s7 + $0x7] ss:$0 sm:$0xff] }
 0xe6b   :  { %6973 = vpow2.f32 %v3795_v41 }
 0xe6e   :  { %2770 = vadd.xlane.f32.xlu0 %v2769_v19 }
 0xe70   :  { %v6972_v6 = vpop.eup %6971 }
 0xe71   :  { %v3800_v46 = vsel %vm848_vm2, %v6972_v6, 0.0 }
 0xe72   :  { %3801 = vadd.xlane.f32.xlu1 %v3800_v46  ;;  %v3576_v46 = vadd.f32 %v8137_v43, %v8108_v44 }
 0xe78   :  { %v6974_v31 = vpop.eup %6973 }
 0xe79   :  { %v3806_v57 = vsel %vm848_vm2, %v6974_v31, 0.0 }
 0xe7a   :  { %3807 = vadd.xlane.f32.xlu1 %v3806_v57 }
 0xeeb   :  { %v3799_v62 = vpop.xlane.xlu0 %3798 }
 0xeec   :  { %6975 = vrcp.f32 %v3799_v62  ;;  %v3824_v62 = vpack.c.bf16 %v3576_v46, %v3576_v46 }
 0xeee   :  { %v3967_v1 = vsel %vm1088_vm3, %v3824_v62, 0 }
 0xef3   :  { %v3805_v15 = vpop.xlane.xlu0 %3804 }
 0xef4   :  { %6977 = vrcp.f32 %v3805_v15 }
 0xef7   :  { %v2771_v7 = vpop.xlane.xlu0 %2770 }
 0xef8   :  { %v2773_v30 = vmul.f32 0.03125, %v2771_v7 }
 0xef9   :  { %v6976_v16 = vpop.eup %6975 }
 0xefa   :  { %v3813_v20 = vmul.f32 %v6976_v16, %v6968_v35  ;;  %v2775_v21 = vsub.f32 %v2763_v36, %v2773_v30 }
 0xefb   :  { %v3802_v24 = vpop.xlane.xlu1 %3801 }
 0xefc   :  { %v3817_v25 = vpack.c.bf16 %v3813_v20, %v3813_v20  ;;  %6979 = vrcp.f32 %v3802_v24  ;;  %v2777_v26 = vmul.f32 %v2775_v21, %v2775_v21 }
 0xefe   :  { %6634 = vmatmul.mubr.msk.bf16.vlgmr.msra.gmra.mxu1 %vm848_vm2, %v3817_v25  ;;  %v2781_v41 = vsel %vm176_vm1, %v2777_v26, 0.0  ;;  %v5773_v26 = vld [vmem:[%s8477_s8 + $0x18] sm:$0xf] }
 0xeff   :  { %6644 = vmatpush3.bf16.msra.mxu1 %v3921_v27  ;;  %2782 = vadd.xlane.f32.xlu1 %v2781_v41 }
 0xf00   :  { %6645 = vmatprep.mubr.msk.bf16.mxu1 %vm7014_vm0, %v7013_v0  ;;  %6655 = vmatprep.subr.bf16.mxu1 %v7013_v0 }
 0xf01   :  { %v6978_v58 = vpop.eup %6977 }
 0xf02   :  { %v3815_v35 = vmul.f32 %v6978_v58, %v6970_v40  ;;  %v8172_v58 = vsel %vm1088_vm3, %v5773_v26, 0 }
 0xf03   :  { %v3808_v36 = vpop.xlane.xlu1 %3807 }
 0xf04   :  { %v3819_v19 = vpack.c.bf16 %v3815_v35, %v3815_v35  ;;  %6981 = vrcp.f32 %v3808_v36 }
 0xf06   :  { %6646 = vmatmul.mubr.msk.bf16.vlgmr.msra.gmra.mxu1 %vm848_vm2, %v3819_v19 }
 0xf07   :  { %6657 = vmatprep.mubr.msk.bf16.mxu1 %vm7014_vm0, %v7013_v0 }
 0xf09   :  { %v6980_v57 = vpop.eup %6979 }
 0xf0a   :  { %v3814_v15 = vmul.f32 %v6980_v57, %v6972_v6  ;;  %v5771_v6 = vld [vmem:[%s8477_s8 + $0x10] sm:$0xf] }
 0xf0b   :  { %v8156_v16 = vsel %vm1088_vm3, %v5771_v6, 0 }
 0xf0c   :  { %v3818_v40 = vpack.c.bf16 %v3814_v15, %v3814_v15  ;;  %6656 = vmatpush3.bf16.msra.mxu1 %v8156_v16 }
 0xf0d   :  { %6667 = vmatprep.subr.bf16.mxu1 %v7013_v0 }
 0xf0e   :  { %6640 = vmatmul.mubr.msk.bf16.vlgmr.msra.gmra.mxu0 %vm848_vm2, %v3818_v40 }
 0xf0f   :  { %6650 = vmatpush3.bf16.msra.mxu0 %v3967_v1  ;;  %6651 = vmatprep.mubr.msk.bf16.mxu0 %vm7014_vm0, %v7013_v0 }
 0xf10   :  { %6661 = vmatprep.subr.bf16.mxu0 %v7013_v0 }
 0xf11   :  { %v6982_v44 = vpop.eup %6981 }
 0xf12   :  { %v3816_v7 = vmul.f32 %v6982_v44, %v6974_v31  ;;  %v5772_v31 = vld [vmem:[%s8477_s8 + $0x14] sm:$0xf] }
 0xf13   :  { %v8164_v53 = vsel %vm1088_vm3, %v5772_v31, 0 }
 0xf14   :  { %v3820_v30 = vpack.c.bf16 %v3816_v7, %v3816_v7 }
 0xf16   :  { %6652 = vmatmul.mubr.msk.bf16.vlgmr.msra.gmra.mxu0 %vm848_vm2, %v3820_v30 }
 0xf17   :  { %6663 = vmatprep.mubr.msk.bf16.mxu0 %vm7014_vm0, %v7013_v0  ;;  %6662 = vmatpush3.bf16.msra.mxu0 %v8164_v53 }
 0xf18   :  { %6673 = vmatprep.subr.bf16.mxu0 %v7013_v0 }
 0xf88   :  { %v2783_v20 = vpop.xlane.xlu1 %2782 }
 0xf89   :  { %v2785_v24 = vmul.f32 0.03125, %v2783_v20 }
 0xf8b   :  { %v2787_v25 = vadd.f32 1e-05, %v2785_v24 }
 0xf8d   :  { %6983 = vrsqrt.f32 %v2787_v25 }
 0xf9a   :  { %v6984_v35 = vpop.eup %6983 }
 0xf9b   :  { %v2791_v46 = vmul.f32 %v6984_v35, %v2775_v21 }
 0xf9d   :  { %v2799_v15 = vmul.f32 %v7819_v61, %v2791_v46  ;;  %v5774_v61 = vld [vmem:[%s8477_s8 + $0x1c] sm:$0xf] }
 0xf9f   :  { %v8185_v7 = vadd.f32 %v7824_v48, %v2799_v15  ;;  %v8198_v48 = vsel %vm1088_vm3, %v5774_v61, 0 }
 0xfa1   :  { %v8194_v6 = vpack.c.bf16 %v8185_v7, %v8185_v7 }
 0xfbe   :  { %v3865_v27 = vpop.f32.mrf.mxu1 }
 0xfbf   :  { %v4009_v41 = vpack.c.bf16 %v3865_v27, %v3865_v27 }
 0xfc0   :  { %v6635_v36 = vpop.f32.mrf.mxu1 }
 0xfc1   :  { %6658 = vmatmul.mubr.msk.bf16.vlgmr.msra.gmra.mxu1 %vm848_vm2, %v4009_v41 }
 0xfc2   :  { %v3868_v19 = vpop.f32.mrf.mxu1  ;;  %6668 = vmatpush3.bf16.msra.mxu1 %v8172_v58  ;;  %6669 = vmatprep.mubr.msk.bf16.mxu1 %vm7014_vm0, %v7013_v0 }
 0xfc3   :  { %6679 = vmatprep.subr.bf16.mxu1 %v7013_v0 }
 0xfc4   :  { %v6636_v57 = vpop.f32.mrf.mxu1 }
 0xfc6   :  { %v3957_v62 = vpop.f32.mrf.mxu1 }
 0xfc7   :  { %v4011_v40 = vpack.c.bf16 %v3957_v62, %v3957_v62 }
 0xfc8   :  { %v6647_v1 = vpop.f32.mrf.mxu1 }
 0xfc9   :  { %6670 = vmatmul.mubr.msk.bf16.vlgmr.msra.gmra.mxu1 %vm848_vm2, %v4011_v40 }
 0xfca   :  { %v3960_v44 = vpop.f32.mrf.mxu1  ;;  %6680 = vmatpush3.bf16.msra.mxu1 %v7791_v50  ;;  %6683 = vmatprep.mubr.msk.bf16.mxu1 %vm7014_vm0, %v7013_v0 }
 0xfcb   :  { %6681 = vmatprep.subr.bf16.mxu1 %v7013_v0 }
 0xfcc   :  { %v6648_v21 = vpop.f32.mrf.mxu1 }
 0xfce   :  { %v3911_v30 = vpop.f32.mrf.mxu0  ;;  %6682 = vmatpush3.bf16.msra.mxu1 %v7805_v29 }
 0xfcf   :  { %v4010_v50 = vpack.c.bf16 %v3911_v30, %v3911_v30  ;;  %6695 = vmatprep.subr.bf16.mxu1 %v7013_v0 }
 0xfd0   :  { %v6641_v31 = vpop.f32.mrf.mxu0 }
 0xfd1   :  { %6664 = vmatmul.mubr.msk.bf16.vlgmr.msra.gmra.mxu0 %vm848_vm2, %v4010_v50  ;;  %6684 = vmatmul.mubr.msk.bf16.vlgmr.msra.gmra.mxu1 %vm176_vm1, %v8194_v6 }
 0xfd2   :  { %v3914_v20 = vpop.f32.mrf.mxu0  ;;  %6674 = vmatpush3.bf16.msra.mxu0 %v8198_v48  ;;  %6696 = vmatpush3.bf16.msra.mxu1 %v7796_v52 }
 0xfd3   :  { %6697 = vmatprep.subr.bf16.mxu1 %v7013_v0  ;;  %6675 = vmatprep.mubr.msk.bf16.mxu0 %vm7014_vm0, %v7013_v0 }
 0xfd4   :  { %v6642_v29 = vpop.f32.mrf.mxu0  ;;  %6699 = vmatprep.mubr.msk.bf16.mxu1 %vm7014_vm0, %v7013_v0  ;;  %6687 = vmatprep.subr.bf16.mxu0 %v7013_v0 }
 0xfd6   :  { %v4003_v24 = vpop.f32.mrf.mxu0  ;;  %6698 = vmatpush3.bf16.msra.mxu1 %v7810_v39 }
 0xfd7   :  { %v4012_v25 = vpack.c.bf16 %v4003_v24, %v4003_v24  ;;  %6711 = vmatprep.subr.bf16.mxu1 %v7013_v0 }
 0xfd8   :  { %v6653_v26 = vpop.f32.mrf.mxu0 }
 0xfd9   :  { %6676 = vmatmul.mubr.msk.bf16.vlgmr.msra.gmra.mxu0 %vm848_vm2, %v4012_v25  ;;  %6700 = vmatmul.mubr.msk.bf16.vlgmr.msra.gmra.mxu1 %vm176_vm1, %v8194_v6 }
 0xfda   :  { %v4006_v52 = vpop.f32.mrf.mxu0  ;;  %6688 = vmatpush3.bf16.msra.mxu0 %v7833_v63  ;;  %6712 = vmatpush3.bf16.msra.mxu1 %v7838_v11 }
 0xfdb   :  { %6689 = vmatprep.subr.bf16.mxu0 %v7013_v0  ;;  %6713 = vmatprep.subr.bf16.mxu1 %v7013_v0 }
 0xfdc   :  { %v6654_v27 = vpop.f32.mrf.mxu0  ;;  %6691 = vmatprep.mubr.msk.bf16.mxu0 %vm7014_vm0, %v7013_v0  ;;  %6715 = vmatprep.mubr.msk.bf16.mxu1 %vm7014_vm0, %v7013_v0 }
 0xfde   :  { %6690 = vmatpush3.bf16.msra.mxu0 %v7853_v32  ;;  %6714 = vmatpush3.bf16.msra.mxu1 %v7858_v28 }
 0xfdf   :  { %6703 = vmatprep.subr.bf16.mxu0 %v7013_v0  ;;  %6727 = vmatprep.subr.bf16.mxu1 %v7013_v0 }
 0xfe1   :  { %6692 = vmatmul.mubr.msk.bf16.vlgmr.msra.gmra.mxu0 %vm176_vm1, %v8194_v6  ;;  %6716 = vmatmul.mubr.msk.bf16.vlgmr.msra.gmra.mxu1 %vm176_vm1, %v8194_v6 }
 0xfe2   :  { %6704 = vmatpush3.bf16.msra.mxu0 %v7871_v54  ;;  %6728 = vmatpush3.bf16.msra.mxu1 %v7876_v34 }
 0xfe3   :  { %6705 = vmatprep.subr.bf16.mxu0 %v7013_v0  ;;  %6729 = vmatprep.subr.bf16.mxu1 %v7013_v0 }
 0xfe4   :  { %6707 = vmatprep.mubr.msk.bf16.mxu0 %vm7014_vm0, %v7013_v0  ;;  %6731 = vmatprep.mubr.msk.bf16.mxu1 %vm7014_vm0, %v7013_v0 }
 0xfe6   :  { %6706 = vmatpush3.bf16.msra.mxu0 %v7889_v38  ;;  %6730 = vmatpush3.bf16.msra.mxu1 %v7894_v2 }
 0xfe7   :  { %6719 = vmatprep.subr.bf16.mxu0 %v7013_v0  ;;  %6743 = vmatprep.subr.bf16.mxu1 %v7013_v0 }
 0xfe9   :  { %6708 = vmatmul.mubr.msk.bf16.vlgmr.msra.gmra.mxu0 %vm176_vm1, %v8194_v6  ;;  %6732 = vmatmul.mubr.msk.bf16.vlgmr.msra.gmra.mxu1 %vm176_vm1, %v8194_v6 }
 0xfea   :  { %6720 = vmatpush3.bf16.msra.mxu0 %v7907_v33  ;;  %6744 = vmatpush3.bf16.msra.mxu1 %v7912_v4 }
 0xfeb   :  { %6721 = vmatprep.subr.bf16.mxu0 %v7013_v0  ;;  %6745 = vmatprep.subr.bf16.mxu1 %v7013_v0 }
 0xfec   :  { %6723 = vmatprep.mubr.msk.bf16.mxu0 %vm7014_vm0, %v7013_v0  ;;  %6747 = vmatprep.mubr.msk.bf16.mxu1 %vm7014_vm0, %v7013_v0 }
 0xfee   :  { %6722 = vmatpush3.bf16.msra.mxu0 %v7925_v9  ;;  %6746 = vmatpush3.bf16.msra.mxu1 %v7930_v10 }
 0xfef   :  { %6735 = vmatprep.subr.bf16.mxu0 %v7013_v0  ;;  %6759 = vmatprep.subr.bf16.mxu1 %v7013_v0 }
 0xff1   :  { %6724 = vmatmul.mubr.msk.bf16.vlgmr.msra.gmra.mxu0 %vm176_vm1, %v8194_v6  ;;  %6748 = vmatmul.mubr.msk.bf16.vlgmr.msra.gmra.mxu1 %vm176_vm1, %v8194_v6 }
 0xff2   :  { %6736 = vmatpush3.bf16.msra.mxu0 %v7943_v12  ;;  %6760 = vmatpush3.bf16.msra.mxu1 %v7948_v45 }
 0xff3   :  { %6737 = vmatprep.subr.bf16.mxu0 %v7013_v0  ;;  %6761 = vmatprep.subr.bf16.mxu1 %v7013_v0 }
 0xff4   :  { %6739 = vmatprep.mubr.msk.bf16.mxu0 %vm7014_vm0, %v7013_v0  ;;  %6763 = vmatprep.mubr.msk.bf16.mxu1 %vm7014_vm0, %v7013_v0 }
 0xff6   :  { %6738 = vmatpush3.bf16.msra.mxu0 %v7961_v5  ;;  %6762 = vmatpush3.bf16.msra.mxu1 %v7966_v55 }
 0xff7   :  { %6751 = vmatprep.subr.bf16.mxu0 %v7013_v0  ;;  %6775 = vmatprep.subr.bf16.mxu1 %v7013_v0 }
 0xff9   :  { %6740 = vmatmul.mubr.msk.bf16.vlgmr.msra.gmra.mxu0 %vm176_vm1, %v8194_v6  ;;  %6764 = vmatmul.mubr.msk.bf16.vlgmr.msra.gmra.mxu1 %vm176_vm1, %v8194_v6 }
 0xffa   :  { %6752 = vmatpush3.bf16.msra.mxu0 %v7979_v49  ;;  %6755 = vmatprep.mubr.msk.bf16.mxu0 %vm7014_vm0, %v7013_v0 }
 0xffb   :  { %6753 = vmatprep.subr.bf16.mxu0 %v7013_v0  ;;  %6777 = vmatprep.mubr.msk.bf16.mxu1 %vm7014_vm0, %v7013_v0 }
 0xffe   :  { %6754 = vmatpush3.bf16.msra.mxu0 %v7991_v13 }
 0xfff   :  { %6767 = vmatprep.subr.bf16.mxu0 %v7013_v0 }
0x1001   :  { %6756 = vmatmul.mubr.msk.bf16.vlgmr.msra.gmra.mxu0 %vm176_vm1, %v8194_v6 }
0x1002   :  { %6768 = vmatpush3.bf16.msra.mxu0 %v8002_v51  ;;  %6771 = vmatprep.mubr.msk.bf16.mxu0 %vm7014_vm0, %v7013_v0 }
0x1003   :  { %6769 = vmatprep.subr.bf16.mxu0 %v7013_v0 }
0x1006   :  { %6770 = vmatpush3.bf16.msra.mxu0 %v8011_v14 }
0x1007   :  { %6781 = vmatprep.subr.bf16.mxu0 %v7013_v0 }
0x1009   :  { %6772 = vmatmul.mubr.msk.bf16.vlgmr.msra.gmra.mxu0 %vm176_vm1, %v8194_v6 }
0x100a   :  { %6783 = vmatprep.mubr.msk.bf16.mxu0 %vm7014_vm0, %v7013_v0 }
0x1081   :  { %v4053_v39 = vpop.f32.mrf.mxu1 }
0x1083   :  { %v6659_v63 = vpop.f32.mrf.mxu1 }
0x1085   :  { %v4056_v11 = vpop.f32.mrf.mxu1 }
0x1087   :  { %v6660_v32 = vpop.f32.mrf.mxu1 }
0x1089   :  { %v4145_v28 = vpop.f32.mrf.mxu1 }
0x108b   :  { %v6671_v54 = vpop.f32.mrf.mxu1 }
0x108d   :  { %v4148_v34 = vpop.f32.mrf.mxu1 }
0x108f   :  { %v6672_v38 = vpop.f32.mrf.mxu1 }
0x1091   :  { %v4099_v2 = vpop.f32.mrf.mxu0  ;;  %v4245_v33 = vpop.f32.mrf.mxu1 }
0x1092   :  { %v4197_v4 = vadd.f32 %v4099_v2, %v4053_v39  ;;  %v4246_v20 = vadd.f32 %v8031_v56, %v4245_v33 }
0x1093   :  { %v6665_v9 = vpop.f32.mrf.mxu0  ;;  %v6685_v10 = vpop.f32.mrf.mxu1 }
0x1094   :  { %v4198_v12 = vadd.f32 %v4197_v4, %v4145_v28  ;;  %v4691_v52 = vpack.c.bf16 %v4246_v20, %v4246_v20 }
0x1095   :  { %v4102_v45 = vpop.f32.mrf.mxu0  ;;  %v4248_v5 = vpop.f32.mrf.mxu1 }
0x1097   :  { %v6666_v55 = vpop.f32.mrf.mxu0  ;;  %v6686_v49 = vpop.f32.mrf.mxu1 }
0x1099   :  { %v4191_v13 = vpop.f32.mrf.mxu0  ;;  %v4325_v51 = vpop.f32.mrf.mxu1 }
0x109a   :  { %v8300_v14 = vadd.f32 %v4198_v12, %v4191_v13  ;;  %v4326_v56 = vadd.f32 %v8045_v59, %v4325_v51 }
0x109b   :  { %v6677_v41 = vpop.f32.mrf.mxu0  ;;  %v6701_v35 = vpop.f32.mrf.mxu1 }
0x109c   :  { %v4693_v4 = vpack.c.bf16 %v4326_v56, %v4326_v56 }
0x109d   :  { %v4194_v36 = vpop.f32.mrf.mxu0  ;;  %v4328_v19 = vpop.f32.mrf.mxu1 }
0x109f   :  { %v6678_v46 = vpop.f32.mrf.mxu0  ;;  %v6702_v57 = vpop.f32.mrf.mxu1 }
0x10a1   :  { %v4285_v62 = vpop.f32.mrf.mxu0  ;;  %v4405_v15 = vpop.f32.mrf.mxu1 }
0x10a2   :  { %v4406_v40 = vadd.f32 %v8025_v22, %v4405_v15 }
0x10a3   :  { %v6693_v1 = vpop.f32.mrf.mxu0  ;;  %v6717_v44 = vpop.f32.mrf.mxu1 }
0x10a4   :  { %v4695_v21 = vpack.c.bf16 %v4406_v40, %v4406_v40 }
0x10a5   :  { %v4288_v61 = vpop.f32.mrf.mxu0  ;;  %v4408_v30 = vpop.f32.mrf.mxu1 }
0x10a6   :  { %v4703_v6 = vsel %vm848_vm2, %v4695_v21, 0 }
0x10a7   :  { %v6694_v50 = vpop.f32.mrf.mxu0  ;;  %v6718_v31 = vpop.f32.mrf.mxu1  ;;  %6776 = vmatpush3.bf16.xpose.msra.mxu1 %v4703_v6 }
0x10a8   :  { %6787 = vmatprep.subr.bf16.mxu1 %v7013_v0 }
0x10a9   :  { %v4365_v29 = vpop.f32.mrf.mxu0  ;;  %v4485_v24 = vpop.f32.mrf.mxu1 }
0x10aa   :  { %v4486_v25 = vadd.f32 %v8037_v42, %v4485_v24  ;;  %v4366_v40 = vadd.f32 %v8089_v23, %v4365_v29 }
0x10ab   :  { %v6709_v26 = vpop.f32.mrf.mxu0  ;;  %v6733_v22 = vpop.f32.mrf.mxu1 }
0x10ac   :  { %v4697_v27 = vpack.c.bf16 %v4486_v25, %v4486_v25  ;;  %v4694_v21 = vpack.c.bf16 %v4366_v40, %v4366_v40 }
0x10ad   :  { %v4368_v39 = vpop.f32.mrf.mxu0  ;;  %v4488_v63 = vpop.f32.mrf.mxu1 }
0x10ae   :  { %v4795_v11 = vsel %vm848_vm2, %v4697_v27, 0  ;;  %6778 = vmatmul.mubr.msk.bf16.vlgmr.msra.gmra.mxu1 %vm848_vm2, %v4691_v52 }
0x10af   :  { %v6710_v32 = vpop.f32.mrf.mxu0  ;;  %v6734_v28 = vpop.f32.mrf.mxu1  ;;  %6788 = vmatpush3.bf16.xpose.msra.mxu1 %v4795_v11  ;;  %6789 = vmatprep.mubr.msk.bf16.mxu1 %vm7014_vm0, %v7013_v0 }
0x10b0   :  { %6799 = vmatprep.subr.bf16.mxu1 %v7013_v0 }
0x10b1   :  { %v4445_v42 = vpop.f32.mrf.mxu0  ;;  %v4565_v54 = vpop.f32.mrf.mxu1 }
0x10b2   :  { %v4446_v34 = vadd.f32 %v8052_v17, %v4445_v42  ;;  %v4566_v38 = vadd.f32 %v8057_v18, %v4565_v54  ;;  %v4286_v17 = vadd.f32 %v8068_v37, %v4285_v62 }
0x10b3   :  { %v6725_v2 = vpop.f32.mrf.mxu0  ;;  %v6749_v33 = vpop.f32.mrf.mxu1 }
0x10b4   :  { %v4696_v9 = vpack.c.bf16 %v4446_v34, %v4446_v34  ;;  %v4931_v10 = vpack.c.bf16 %v4566_v38, %v4566_v38  ;;  %v4692_v36 = vpack.c.bf16 %v4286_v17, %v4286_v17 }
0x10b5   :  { %v4448_v12 = vpop.f32.mrf.mxu0  ;;  %v4568_v45 = vpop.f32.mrf.mxu1 }
0x10b6   :  { %v4749_v5 = vsel %vm848_vm2, %v4696_v9, 0  ;;  %v4939_v55 = vsel %vm1088_vm3, %v4931_v10, 0  ;;  %6790 = vmatmul.mubr.msk.bf16.vlgmr.msra.gmra.mxu1 %vm848_vm2, %v4693_v4 }
0x10b7   :  { %v6726_v59 = vpop.f32.mrf.mxu0  ;;  %v6750_v49 = vpop.f32.mrf.mxu1  ;;  %6782 = vmatpush3.bf16.xpose.msra.mxu0 %v4749_v5  ;;  %6800 = vmatpush3.bf16.msra.mxu1 %v4939_v55 }
0x10b8   :  { %6793 = vmatprep.subr.bf16.mxu0 %v7013_v0  ;;  %6801 = vmatprep.mubr.msk.bf16.mxu1 %vm7014_vm0, %v7013_v0 }
0x10b9   :  { %v4525_v18 = vpop.f32.mrf.mxu0  ;;  %v8322_v13 = vpop.f32.mrf.mxu1  ;;  %6811 = vmatprep.subr.bf16.mxu1 %v7013_v0 }
0x10ba   :  { %v4526_v51 = vadd.f32 %v8076_v47, %v4525_v18 }
0x10bb   :  { %v6741_v41 = vpop.f32.mrf.mxu0  ;;  %v6765_v35 = vpop.f32.mrf.mxu1 }
0x10bc   :  { %v4698_v19 = vpack.c.bf16 %v4526_v51, %v4526_v51  ;;  %v8348_v41 = vld [vmem:[%s8478_s9 + $0x1] ss:$0 sm:$0xff] }
0x10bd   :  { %v4528_v46 = vpop.f32.mrf.mxu0  ;;  %v4648_v57 = vpop.f32.mrf.mxu1  ;;  %v4206_v35 = vadd.f32 %v8348_v41, %v8300_v14 }
0x10be   :  { %v4841_v37 = vsel %vm848_vm2, %v4698_v19, 0  ;;  %6784 = vmatmul.mubr.msk.bf16.vlgmr.msra.gmra.mxu0 %vm848_vm2, %v4692_v36 }
0x10bf   :  { %v6742_v62 = vpop.f32.mrf.mxu0  ;;  %v6766_v15 = vpop.f32.mrf.mxu1  ;;  %6794 = vmatpush3.bf16.xpose.msra.mxu0 %v4841_v37  ;;  %6795 = vmatprep.mubr.msk.bf16.mxu0 %vm7014_vm0, %v7013_v0 }
0x10c0   :  { %6805 = vmatprep.subr.bf16.mxu0 %v7013_v0  ;;  %v5299_v62 = vadd.f32 %v4206_v35, %v7828_v3  ;;  %v4646_v3 = vadd.f32 %v8124_v8, %v8322_v13 }
0x10c1   :  { %v4605_v47 = vpop.f32.mrf.mxu0 }
0x10c2   :  { %v4606_v1 = vadd.f32 %v8096_v60, %v4605_v47  ;;  %v5305_v15 = vsel %vm176_vm1, %v5299_v62, 0.0 }
0x10c3   :  { %v6757_v44 = vpop.f32.mrf.mxu0 }
0x10c4   :  { %v4932_v61 = vpack.c.bf16 %v4606_v1, %v4606_v1 }
0x10c5   :  { %v4608_v30 = vpop.f32.mrf.mxu0 }
0x10c6   :  { %v4985_v6 = vsel %vm1088_vm3, %v4932_v61, 0  ;;  %6796 = vmatmul.mubr.msk.bf16.vlgmr.msra.gmra.mxu0 %vm848_vm2, %v4694_v21 }
0x10c7   :  { %v6758_v50 = vpop.f32.mrf.mxu0  ;;  %6806 = vmatpush3.bf16.msra.mxu0 %v4985_v6  ;;  %6807 = vmatprep.mubr.msk.bf16.mxu0 %vm7014_vm0, %v7013_v0 }
0x10c8   :  { %6817 = vmatprep.subr.bf16.mxu0 %v7013_v0  ;;  %v4933_v50 = vpack.c.bf16 %v4646_v3, %v4646_v3 }
0x10c9   :  { %v8338_v23 = vpop.f32.mrf.mxu0 }
0x10cb   :  { %v6773_v31 = vpop.f32.mrf.mxu0 }
0x10cd   :  { %v4688_v20 = vpop.f32.mrf.mxu0 }
0x10cf   :  { %v6774_v60 = vpop.f32.mrf.mxu0 }
0x116e   :  { %v4739_v29 = vpop.f32.mrf.mxu1 }
0x116f   :  { %v4883_v24 = vsel %vm848_vm2, %v4739_v29, -inf }
0x1170   :  { %4884 = vmax.xlane.f32.xlu0 %v4883_v24  ;;  %v6779_v25 = vpop.f32.mrf.mxu1 }
0x1171   :  { %v5031_v25 = vsel %vm1088_vm3, %v4933_v50, 0 }
0x1172   :  { %v4742_v26 = vpop.f32.mrf.mxu1 }
0x1174   :  { %v6780_v22 = vpop.f32.mrf.mxu1 }
0x1176   :  { %v4831_v52 = vpop.f32.mrf.mxu1 }
0x1177   :  { %v4889_v27 = vsel %vm848_vm2, %v4831_v52, -inf }
0x1178   :  { %4890 = vmax.xlane.f32.xlu0 %v4889_v27  ;;  %v6791_v39 = vpop.f32.mrf.mxu1  ;;  %v4686_v27 = vadd.f32 %v8137_v43, %v8338_v23 }
0x117a   :  { %v4834_v63 = vpop.f32.mrf.mxu1 }
0x117b   :  { %v4934_v63 = vpack.c.bf16 %v4686_v27, %v4686_v27 }
0x117c   :  { %v6792_v11 = vpop.f32.mrf.mxu1 }
0x117e   :  { %v4785_v32 = vpop.f32.mrf.mxu0 }
0x117f   :  { %v4886_v28 = vsel %vm848_vm2, %v4785_v32, -inf }
0x1180   :  { %4887 = vmax.xlane.f32.xlu1 %v4886_v28  ;;  %v6785_v56 = vpop.f32.mrf.mxu0  ;;  %v5077_v28 = vsel %vm1088_vm3, %v4934_v63, 0 }
0x1182   :  { %v4788_v42 = vpop.f32.mrf.mxu0 }
0x1184   :  { %v6786_v54 = vpop.f32.mrf.mxu0 }
0x1186   :  { %v4877_v34 = vpop.f32.mrf.mxu0 }
0x1187   :  { %v4892_v38 = vsel %vm848_vm2, %v4877_v34, -inf }
0x1188   :  { %4893 = vmax.xlane.f32.xlu1 %v4892_v38  ;;  %v6797_v2 = vpop.f32.mrf.mxu0 }
0x118a   :  { %v4880_v33 = vpop.f32.mrf.mxu0 }
0x118c   :  { %v6798_v4 = vpop.f32.mrf.mxu0 }
0x11f9   :  { %v4885_v9 = vpop.xlane.xlu0 %4884 }
0x11fa   :  { %v4895_v10 = vsub.f32 %v4739_v29, %v4885_v9 }
0x11fc   :  { %v4899_v12 = vmul.f32 1.442695, %v4895_v10 }
0x11fe   :  { %6985 = vpow2.f32 %v4899_v12 }
0x1201   :  { %v4891_v45 = vpop.xlane.xlu0 %4890 }
0x1202   :  { %v4897_v5 = vsub.f32 %v4831_v52, %v4891_v45 }
0x1204   :  { %v4903_v55 = vmul.f32 1.442695, %v4897_v5 }
0x1206   :  { %6987 = vpow2.f32 %v4903_v55 }
0x1209   :  { %v4888_v59 = vpop.xlane.xlu1 %4887 }
0x120a   :  { %v4896_v49 = vsub.f32 %v4785_v32, %v4888_v59 }
0x120b   :  { %v6986_v17 = vpop.eup %6985 }
0x120c   :  { %v4901_v18 = vmul.f32 1.442695, %v4896_v49  ;;  %v4907_v51 = vsel %vm848_vm2, %v6986_v17, 0.0 }
0x120d   :  { %4908 = vadd.xlane.f32.xlu0 %v4907_v51 }
0x120e   :  { %6989 = vpow2.f32 %v4901_v18 }
0x1211   :  { %v4894_v36 = vpop.xlane.xlu1 %4893 }
0x1212   :  { %v4898_v19 = vsub.f32 %v4877_v34, %v4894_v36 }
0x1213   :  { %v6988_v46 = vpop.eup %6987 }
0x1214   :  { %v4905_v57 = vmul.f32 1.442695, %v4898_v19  ;;  %v4913_v37 = vsel %vm848_vm2, %v6988_v46, 0.0 }
0x1215   :  { %4914 = vadd.xlane.f32.xlu0 %v4913_v37 }
0x1216   :  { %6991 = vpow2.f32 %v4905_v57 }
0x1219   :  { %5306 = vadd.xlane.f32.xlu0 %v5305_v15 }
0x121b   :  { %v6990_v40 = vpop.eup %6989 }
0x121c   :  { %v4910_v47 = vsel %vm848_vm2, %v6990_v40, 0.0 }
0x121d   :  { %4911 = vadd.xlane.f32.xlu1 %v4910_v47 }
0x1223   :  { %v6992_v1 = vpop.eup %6991 }
0x1224   :  { %v4916_v14 = vsel %vm848_vm2, %v6992_v1, 0.0 }
0x1225   :  { %4917 = vadd.xlane.f32.xlu1 %v4916_v14 }
0x1296   :  { %v4909_v44 = vpop.xlane.xlu0 %4908 }
0x1297   :  { %6993 = vrcp.f32 %v4909_v44 }
0x129e   :  { %v4915_v21 = vpop.xlane.xlu0 %4914 }
0x129f   :  { %6995 = vrcp.f32 %v4915_v21 }
0x12a2   :  { %v5307_v61 = vpop.xlane.xlu0 %5306 }
0x12a3   :  { %v5311_v30 = vmul.f32 0.03125, %v5307_v61 }
0x12a4   :  { %v6994_v6 = vpop.eup %6993 }
0x12a5   :  { %v4923_v31 = vmul.f32 %v6994_v6, %v6986_v17  ;;  %v8359_v20 = vsub.f32 %v5299_v62, %v5311_v30 }
0x12a6   :  { %v4912_v60 = vpop.xlane.xlu1 %4911 }
0x12a7   :  { %v4927_v29 = vpack.c.bf16 %v4923_v31, %v4923_v31  ;;  %6997 = vrcp.f32 %v4912_v60  ;;  %v5315_v24 = vmul.f32 %v8359_v20, %v8359_v20 }
0x12a9   :  { %6802 = vmatmul.mubr.msk.bf16.vlgmr.msra.gmra.mxu1 %vm848_vm2, %v4927_v29  ;;  %v5317_v26 = vsel %vm176_vm1, %v5315_v24, 0.0 }
0x12aa   :  { %6812 = vmatpush3.bf16.msra.mxu1 %v5031_v25  ;;  %5318 = vadd.xlane.f32.xlu0 %v5317_v26 }
0x12ab   :  { %6813 = vmatprep.mubr.msk.bf16.mxu1 %vm7014_vm0, %v7013_v0  ;;  %6823 = vmatprep.subr.bf16.mxu1 %v7013_v0 }
0x12ac   :  { %v6996_v8 = vpop.eup %6995 }
0x12ad   :  { %v4925_v13 = vmul.f32 %v6996_v8, %v6988_v46  ;;  %v6923_v8 = vld [vmem:[%s8479_s12 + $0x18] sm:$0xff]  }
0x12ae   :  { %v4918_v22 = vpop.xlane.xlu1 %4917 }
0x12af   :  { %v4929_v52 = vpack.c.bf16 %v4925_v13, %v4925_v13  ;;  %6999 = vrcp.f32 %v4918_v22 }
0x12b1   :  { %6814 = vmatmul.mubr.msk.bf16.vlgmr.msra.gmra.mxu1 %vm848_vm2, %v4929_v52 }
0x12b2   :  { %6824 = vmatpush3.bf16.msra.mxu1 %v8156_v16  ;;  %6825 = vmatprep.mubr.msk.bf16.mxu1 %vm7014_vm0, %v7013_v0 }
0x12b3   :  { %6835 = vmatprep.subr.bf16.mxu1 %v7013_v0 }
0x12b4   :  { %v6998_v39 = vpop.eup %6997 }
0x12b5   :  { %v4924_v11 = vmul.f32 %v6998_v39, %v6990_v40 }
0x12b7   :  { %v4928_v32 = vpack.c.bf16 %v4924_v11, %v4924_v11 }
0x12b9   :  { %6808 = vmatmul.mubr.msk.bf16.vlgmr.msra.gmra.mxu0 %vm848_vm2, %v4928_v32 }
0x12ba   :  { %6818 = vmatpush3.bf16.msra.mxu0 %v5077_v28  ;;  %6819 = vmatprep.mubr.msk.bf16.mxu0 %vm7014_vm0, %v7013_v0  ;;  %v5863_v28 = vld [vmem:[%s8481_s10 + $0x1] ss:$0 sm:$0xff] }
0x12bb   :  { %6829 = vmatprep.subr.bf16.mxu0 %v7013_v0 }
0x12bc   :  { %v7000_v43 = vpop.eup %6999 }
0x12bd   :  { %v4926_v16 = vmul.f32 %v7000_v43, %v6992_v1 }
0x12bf   :  { %v4930_v23 = vpack.c.bf16 %v4926_v16, %v4926_v16 }
0x12c1   :  { %6820 = vmatmul.mubr.msk.bf16.vlgmr.msra.gmra.mxu0 %vm848_vm2, %v4930_v23 }
0x12c2   :  { %6830 = vmatpush3.bf16.msra.mxu0 %v8164_v53  ;;  %6831 = vmatprep.mubr.msk.bf16.mxu0 %vm7014_vm0, %v7013_v0 }
0x12c3   :  { %6841 = vmatprep.subr.bf16.mxu0 %v7013_v0 }
0x1333   :  { %v5319_v13 = vpop.xlane.xlu0 %5318 }
0x1334   :  { %v5323_v22 = vmul.f32 0.03125, %v5319_v13 }
0x1336   :  { %v5325_v52 = vadd.f32 1e-05, %v5323_v22 }
0x1338   :  { %7001 = vrsqrt.f32 %v5325_v52 }
0x1345   :  { %v7002_v11 = vpop.eup %7001 }
0x1346   :  { %v5329_v32 = vmul.f32 %v7002_v11, %v8359_v20  ;;  %v6926_v20 = vld [vmem:[%s8480_s14 + $0x30] sm:$0xff]  }
0x1348   :  { %v5337_v16 = vmul.f32 %v5863_v28, %v5329_v32 }
0x1369   :  { %v4975_v56 = vpop.f32.mrf.mxu1 }
0x136a   :  { %v5119_v42 = vpack.c.bf16 %v4975_v56, %v4975_v56  ;;  %v5864_v56 = vld [vmem:[%s8482_s11 + $0x1] ss:$0 sm:$0xff] }
0x136b   :  { %v6803_v54 = vpop.f32.mrf.mxu1 }
0x136c   :  { %6826 = vmatmul.mubr.msk.bf16.vlgmr.msra.gmra.mxu1 %vm848_vm2, %v5119_v42  ;;  %v5345_v54 = vadd.f32 %v5864_v56, %v5337_v16 }
0x136d   :  { %v4978_v34 = vpop.f32.mrf.mxu1  ;;  %6836 = vmatpush3.bf16.msra.mxu1 %v8172_v58  ;;  %6837 = vmatprep.mubr.msk.bf16.mxu1 %vm7014_vm0, %v7013_v0 }
0x136e   :  { %6847 = vmatprep.subr.bf16.mxu1 %v7013_v0 }
0x136f   :  { %v6804_v38 = vpop.f32.mrf.mxu1 }
0x1371   :  { %v5067_v53 = vpop.f32.mrf.mxu1 }
0x1372   :  { %v5121_v2 = vpack.c.bf16 %v5067_v53, %v5067_v53  ;;  %v6927_v53 = vld [vmem:[%s8480_s14 + $0x28] sm:$0xff]  }
0x1373   :  { %v6815_v33 = vpop.f32.mrf.mxu1 }
0x1374   :  { %6838 = vmatmul.mubr.msk.bf16.vlgmr.msra.gmra.mxu1 %vm848_vm2, %v5121_v2  ;;  %v6928_v2 = vld [vmem:[%s8480_s14 + $0x20] sm:$0xff]  }
0x1375   :  { %v5070_v4 = vpop.f32.mrf.mxu1  ;;  %6851 = vmatprep.mubr.msk.bf16.mxu1 %vm7014_vm0, %v7013_v0  ;;  %6848 = vmatpush3.bf16.msra.mxu1 %v6923_v8  ;;  %v5870_v33 = vld [vmem:[%s8483_s13 + $0x1] ss:$0 sm:$0xff] }
0x1376   :  { %6849 = vmatprep.subr.bf16.mxu1 %v7013_v0 }
0x1377   :  { %v6816_v9 = vpop.f32.mrf.mxu1 }
0x1379   :  { %v5021_v10 = vpop.f32.mrf.mxu0 }
0x137a   :  { %v5120_v12 = vpack.c.bf16 %v5021_v10, %v5021_v10 }
0x137b   :  { %v6809_v45 = vpop.f32.mrf.mxu0 }
0x137c   :  { %6832 = vmatmul.mubr.msk.bf16.vlgmr.msra.gmra.mxu0 %vm848_vm2, %v5120_v12 }
0x137d   :  { %v5024_v58 = vpop.f32.mrf.mxu0  ;;  %6842 = vmatpush3.bf16.msra.mxu0 %v8198_v48  ;;  %6843 = vmatprep.mubr.msk.bf16.mxu0 %vm7014_vm0, %v7013_v0 }
0x137e   :  { %6855 = vmatprep.subr.bf16.mxu0 %v7013_v0 }
0x137f   :  { %v6810_v5 = vpop.f32.mrf.mxu0 }
0x1381   :  { %v5113_v55 = vpop.f32.mrf.mxu0 }
0x1382   :  { %v5122_v59 = vpack.c.bf16 %v5113_v55, %v5113_v55 }
0x1383   :  { %v6821_v49 = vpop.f32.mrf.mxu0 }
0x1384   :  { %6844 = vmatmul.mubr.msk.bf16.vlgmr.msra.gmra.mxu0 %vm848_vm2, %v5122_v59 }
0x1385   :  { %v5116_v17 = vpop.f32.mrf.mxu0  ;;  %6863 = vmatprep.mubr.msk.bf16.mxu0 %vm7014_vm0, %v7013_v0 }
0x1387   :  { %v6822_v18 = vpop.f32.mrf.mxu0 }
0x142c   :  { %v5160_v51 = vpop.f32.mrf.mxu1 }
0x142e   :  { %v6827_v35 = vpop.f32.mrf.mxu1 }
0x1430   :  { %v5163_v36 = vpop.f32.mrf.mxu1 }
0x1432   :  { %v6828_v48 = vpop.f32.mrf.mxu1 }
0x1434   :  { %v5246_v19 = vpop.f32.mrf.mxu1 }
0x1436   :  { %v6839_v46 = vpop.f32.mrf.mxu1 }
0x1438   :  { %v5249_v57 = vpop.f32.mrf.mxu1 }
0x143a   :  { %v6840_v37 = vpop.f32.mrf.mxu1 }
0x143c   :  { %v5203_v62 = vpop.f32.mrf.mxu0 }
0x143d   :  { %v5295_v40 = vadd.f32 %v5203_v62, %v5160_v51 }
0x143e   :  { %v6833_v15 = vpop.f32.mrf.mxu0 }
0x143f   :  { %v5296_v14 = vadd.f32 %v5295_v40, %v5246_v19 }
0x1440   :  { %v5206_v47 = vpop.f32.mrf.mxu0 }
0x1442   :  { %v6834_v1 = vpop.f32.mrf.mxu0 }
0x1444   :  { %v5289_v44 = vpop.f32.mrf.mxu0 }
0x1445   :  { %v5297_v21 = vadd.f32 %v5296_v14, %v5289_v44 }
0x1446   :  { %v6845_v3 = vpop.f32.mrf.mxu0 }
0x1447   :  { %v5298_v61 = vadd.f32 %v8348_v41, %v5297_v21  ;;  %v6925_v41 = vld [vmem:[%s8480_s14 + $0x38] sm:$0xff]  }
0x1448   :  { %v5292_v30 = vpop.f32.mrf.mxu0  ;;  %6856 = vmatpush3.bf16.msra.mxu0 %v6925_v41 }
0x1449   :  { %v5300_v6 = vadd.f32 %v5298_v61, %v8185_v7  ;;  %v6924_v7 = vld [vmem:[%s8479_s12 + $0x10] sm:$0xff]   ;;  %6857 = vmatprep.subr.bf16.mxu0 %v7013_v0 }
0x144a   :  { %v6846_v50 = vpop.f32.mrf.mxu0  ;;  %6850 = vmatpush3.bf16.msra.mxu1 %v6924_v7 }
0x144b   :  { %v5308_v31 = vsel %vm176_vm1, %v5300_v6, 0.0 }
0x144c   :  { %5309 = vadd.xlane.f32.xlu1 %v5308_v31  ;;  %6858 = vmatpush3.bf16.msra.mxu0 %v6926_v20 }
0x144d   :  { %6859 = vmatprep.subr.bf16.mxu0 %v7013_v0 }
0x1450   :  { %6860 = vmatpush3.bf16.msra.mxu0 %v6927_v53 }
0x1451   :  { %6861 = vmatprep.subr.bf16.mxu0 %v7013_v0  ;;  %v5883_v0 = vld [vmem:[%s8484_s15 + $0x1] ss:$0 sm:$0xff] }
0x1454   :  { %6862 = vmatpush3.bf16.msra.mxu0 %v6928_v2 }
0x14d5   :  { %v5310_v60 = vpop.xlane.xlu1 %5309 }
0x14d6   :  { %v5312_v29 = vmul.f32 0.03125, %v5310_v60 }
0x14d8   :  { %v5314_v24 = vsub.f32 %v5300_v6, %v5312_v29 }
0x14da   :  { %v5316_v25 = vmul.f32 %v5314_v24, %v5314_v24 }
0x14dc   :  { %v5320_v26 = vsel %vm176_vm1, %v5316_v25, 0.0 }
0x14dd   :  { %5321 = vadd.xlane.f32.xlu1 %v5320_v26  ;;  %v5892_v26 = vld [vmem:[%s8486_s17 + $0x1] ss:$0 sm:$0xff] }
0x1566   :  { %v5322_v27 = vpop.xlane.xlu1 %5321 }
0x1567   :  { %v5324_v39 = vmul.f32 0.03125, %v5322_v27 }
0x1569   :  { %v5326_v63 = vadd.f32 1e-05, %v5324_v39 }
0x156b   :  { %7003 = vrsqrt.f32 %v5326_v63 }
0x1578   :  { %v7004_v43 = vpop.eup %7003 }
0x1579   :  { %v5330_v23 = vmul.f32 %v7004_v43, %v5314_v24  ;;  %v5891_v24 = vld [vmem:[%s8485_s16 + $0x1] ss:$0 sm:$0xff] }
0x157b   :  { %v5338_v42 = vmul.f32 %v5863_v28, %v5330_v23 }
0x157d   :  { %v5346_v34 = vadd.f32 %v5864_v56, %v5338_v42 }
0x157f   :  { %v5354_v38 = vpack.c.bf16 %v5346_v34, %v5345_v54 }
0x1581   :  { %6852 = vmatmul.mubr.msk.bf16.vlgmr.msra.gmra.mxu1 %vm176_vm1, %v5354_v38 }
0x1641   :  { %v5410_v4 = vpop.f32.mrf.mxu1 }
0x1642   :  { %v5411_v10 = vadd.f32 %v5870_v33, %v5410_v4 }
0x1643   :  { %v6853_v9 = vpop.f32.mrf.mxu1 }
0x1644   :  { %v5417_v5 = vmax.f32 %v5411_v10, 0.0  ;;  %v5893_v9 = vld [vmem:[%s8487_s18] ss:$0 sm:$0xff] }
0x1645   :  { %v5413_v12 = vpop.f32.mrf.mxu1 }
0x1646   :  { %v5414_v45 = vadd.f32 %v5870_v33, %v5413_v12  ;;  %v5894_v12 = vld [vmem:[%s8488_s19] ss:$0 sm:$0xff] }
0x1647   :  { %v6854_v58 = vpop.f32.mrf.mxu1 }
0x1648   :  { %v5418_v55 = vmax.f32 %v5414_v45, 0.0 }
0x164a   :  { %v5430_v59 = vpack.c.bf16 %v5418_v55, %v5417_v5 }
0x164c   :  { %6864 = vmatmul.mubr.msk.bf16.vlgmr.msra.gmra.mxu0 %vm2717_vm4, %v5430_v59 }
0x170c   :  { %v5498_v49 = vpop.f32.mrf.mxu0 }
0x170d   :  { %v5499_v17 = vadd.f32 %v5883_v0, %v5498_v49 }
0x170e   :  { %v6865_v18 = vpop.f32.mrf.mxu0 }
0x170f   :  { %v5505_v51 = vadd.f32 %v5499_v17, %v5345_v54 }
0x1710   :  { %v5501_v35 = vpop.f32.mrf.mxu0 }
0x1711   :  { %v5502_v36 = vadd.f32 %v5883_v0, %v5501_v35  ;;  %v5511_v48 = vsel %vm176_vm1, %v5505_v51, 0.0 }
0x1712   :  { %5512 = vadd.xlane.f32.xlu0 %v5511_v48  ;;  %v6866_v19 = vpop.f32.mrf.mxu0 }
0x1713   :  { %v5506_v46 = vadd.f32 %v5502_v36, %v5346_v34 }
0x1715   :  { %v5514_v57 = vsel %vm176_vm1, %v5506_v46, 0.0 }
0x1716   :  { %5515 = vadd.xlane.f32.xlu1 %v5514_v57 }
0x179b   :  { %v5513_v37 = vpop.xlane.xlu0 %5512 }
0x179c   :  { %v5517_v62 = vmul.f32 0.03125, %v5513_v37 }
0x179e   :  { %v5519_v15 = vsub.f32 %v5505_v51, %v5517_v62 }
0x179f   :  { %v5516_v40 = vpop.xlane.xlu1 %5515 }
0x17a0   :  { %v5518_v47 = vmul.f32 0.03125, %v5516_v40  ;;  %v5521_v1 = vmul.f32 %v5519_v15, %v5519_v15 }
0x17a2   :  { %v5520_v14 = vsub.f32 %v5506_v46, %v5518_v47  ;;  %v5523_v44 = vsel %vm176_vm1, %v5521_v1, 0.0 }
0x17a3   :  { %5524 = vadd.xlane.f32.xlu0 %v5523_v44 }
0x17a4   :  { %v5522_v21 = vmul.f32 %v5520_v14, %v5520_v14 }
0x17a6   :  { %v5526_v3 = vsel %vm176_vm1, %v5522_v21, 0.0 }
0x17a7   :  { %5527 = vadd.xlane.f32.xlu1 %v5526_v3 }
0x182c   :  { %v5525_v61 = vpop.xlane.xlu0 %5524 }
0x182d   :  { %v5529_v30 = vmul.f32 0.03125, %v5525_v61 }
0x182f   :  { %v5531_v6 = vadd.f32 1e-05, %v5529_v30 }
0x1830   :  { %v5528_v50 = vpop.xlane.xlu1 %5527 }
0x1831   :  { %7005 = vrsqrt.f32 %v5531_v6  ;;  %v5530_v31 = vmul.f32 0.03125, %v5528_v50 }
0x1833   :  { %v5532_v60 = vadd.f32 1e-05, %v5530_v31 }
0x1835   :  { %7007 = vrsqrt.f32 %v5532_v60 }
0x183e   :  { %v7006_v29 = vpop.eup %7005 }
0x183f   :  { %v5535_v25 = vmul.f32 %v7006_v29, %v5519_v15 }
0x1841   :  { %v5543_v8 = vmul.f32 %v5891_v24, %v5535_v25 }
0x1842   :  { %v7008_v7 = vpop.eup %7007 }
0x1843   :  { %v5551_v41 = vadd.f32 %v5892_v26, %v5543_v8  ;;  %v5536_v13 = vmul.f32 %v7008_v7, %v5520_v14 }
0x1845   :  { %v5555_v22 = vsel %vm176_vm1, %v5551_v41, 0.0  ;;  %v5544_v52 = vmul.f32 %v5891_v24, %v5536_v13 }
0x1846   :  { %5556 = vadd.xlane.f32.xlu0 %v5555_v22 }
0x1847   :  { %v5552_v27 = vadd.f32 %v5892_v26, %v5544_v52 }
0x1849   :  { %v5558_v39 = vsel %vm176_vm1, %v5552_v27, 0.0 }
0x184a   :  { %5559 = vadd.xlane.f32.xlu1 %v5558_v39 }
0x18cf   :  { %v5557_v63 = vpop.xlane.xlu0 %5556 }
0x18d0   :  { %v5561_v11 = vmul.f32 0.03125, %v5557_v63 }
0x18d2   :  { %v5563_v32 = vsub.f32 %v5551_v41, %v5561_v11 }
0x18d3   :  { %v5560_v28 = vpop.xlane.xlu1 %5559 }
0x18d4   :  { %v5562_v43 = vmul.f32 0.03125, %v5560_v28  ;;  %v5565_v16 = vmul.f32 %v5563_v32, %v5563_v32 }
0x18d6   :  { %v5564_v23 = vsub.f32 %v5552_v27, %v5562_v43  ;;  %v5567_v56 = vsel %vm176_vm1, %v5565_v16, 0.0 }
0x18d7   :  { %5568 = vadd.xlane.f32.xlu0 %v5567_v56 }
0x18d8   :  { %v5566_v42 = vmul.f32 %v5564_v23, %v5564_v23 }
0x18da   :  { %v5570_v54 = vsel %vm176_vm1, %v5566_v42, 0.0 }
0x18db   :  { %5571 = vadd.xlane.f32.xlu1 %v5570_v54 }
0x1960   :  { %v5569_v34 = vpop.xlane.xlu0 %5568 }
0x1961   :  { %v5573_v38 = vmul.f32 0.03125, %v5569_v34 }
0x1963   :  { %v5575_v20 = vadd.f32 1e-05, %v5573_v38 }
0x1964   :  { %v5572_v53 = vpop.xlane.xlu1 %5571 }
0x1965   :  { %7009 = vrsqrt.f32 %v5575_v20  ;;  %v5574_v2 = vmul.f32 0.03125, %v5572_v53 }
0x1967   :  { %v5576_v33 = vadd.f32 1e-05, %v5574_v2 }
0x1969   :  { %7011 = vrsqrt.f32 %v5576_v33 }
0x1972   :  { %v7010_v4 = vpop.eup %7009 }
0x1973   :  { %v5579_v10 = vmul.f32 %v7010_v4, %v5563_v32 }
0x1975   :  { %v5587_v45 = vmul.f32 %v5893_v9, %v5579_v10 }
0x1976   :  { %v7012_v58 = vpop.eup %7011 }
0x1977   :  { %v5595_v5 = vadd.f32 %v5894_v12, %v5587_v45  ;;  %v5580_v55 = vmul.f32 %v7012_v58, %v5564_v23 }
0x1979   :  { %v5897_v59 = vpack.c.bf16 %v5595_v5, %v5595_v5  ;;  %v5588_v0 = vmul.f32 %v5893_v9, %v5580_v55 }
0x197b   :  { %5606 = vst.msk [vmem:[%s8489_s20] sm:$0xf] %vm5605_vm5, %v5897_v59  ;;  %v5596_v49 = vadd.f32 %v5894_v12, %v5588_v0 }
0x197d   :  { %v5898_v17 = vpack.c.bf16 %v5596_v49, %v5596_v49 }
0x197f   :  { %5607 = vst.msk [vmem:[%s8489_s20 + $0x4] sm:$0xf] %vm5605_vm5, %v5898_v17 }

// kernel: transformer_forward.3
= control target key start
LH: loop header
LB: loop body
LE: loop exit
PB: predicated region body
PF: predicated region fallthrough
CT: control target
= control target key end

     0   :  { %v15944_v0 = vmov 0.0   ;;  %s13591_s3 = smov 3   ;;  %vm13592_vm0 = vmmov 0   ;;  %s13593_s10 = smov 1   ;;  %vm259_vm1 = vcmask 261120   ;;  %vm931_vm2 = vcmask 64512   ;;  %s15943_s0 = inlined_call_operand.smem [shape: u32[34], index: -1, kind: input, shape index: {}] }
   0x1   :  { %11893 = vmatprep.subr.bf16.mxu0 %v15944_v0  ;;  %11901 = vmatprep.subr.bf16.mxu1 %v15944_v0  ;;  %s13635_s6 = sld [smem:[%s15943_s0 + %s13591_s3]]   ;;  %s13594_s14 = smov 4   ;;  %vm1171_vm3 = vcmask 1043456   ;;  %vm5337_vm5 = vcmask 523264   ;;  %vm10824_vm6 = vcmask 130048  }
   0x2   :  { %11897 = vmatprep.mubr.msk.bf16.mxu0 %vm13592_vm0, %v15944_v0  ;;  %11905 = vmatprep.mubr.msk.bf16.mxu1 %vm13592_vm0, %v15944_v0  ;;  %s13644_s9 = sld [smem:[%s15943_s0]]   ;;  %s13595_s18 = smov 5  }
   0x3   :  { %s13649_s13 = sld [smem:[%s15943_s0 + %s13593_s10]]   ;;  %s13596_s22 = smov 7  }
   0x4   :  { %s13664_s17 = sld [smem:[%s15943_s0 + %s13594_s14]]   ;;  %s13597_s26 = smov 6  }
   0x5   :  { %s13779_s21 = sld [smem:[%s15943_s0 + %s13595_s18]]   ;;  %s13598_s30 = smov 8  }
   0x6   :  { %s13840_s25 = sld [smem:[%s15943_s0 + %s13596_s22]]   ;;  %s13599_s4 = smov 9  }
   0x7   :  { %v13652_v1 = vld [vmem:[%s13635_s6 + $0x8] sm:$0xff]   ;;  %v13655_v2 = vld [vmem:[%s13635_s6 + $0x18] sm:$0xff]   ;;  %v13659_v3 = vld [vmem:[%s13635_s6] sm:$0xff]   ;;  %s13845_s29 = sld [smem:[%s15943_s0 + %s13597_s26]]   ;;  %s13602_s18 = smov 14  }
   0x8   :  { %11894 = vmatpush3.bf16.msra.mxu0 %v13652_v1  ;;  %11902 = vmatpush3.bf16.msra.mxu1 %v13655_v2  ;;  %v13669_v4 = vld [vmem:[%s13635_s6 + $0x10] sm:$0xff]   ;;  %v139_v5 = vld [vmem:[%s13644_s9] sm:$0xff]  ;;  %v13680_v9 = vld [vmem:[%s13635_s6 + $0x28] sm:$0xff]   ;;  %s13902_s3 = sld [smem:[%s15943_s0 + %s13598_s30]]   ;;  %s13603_s23 = smov 2  }
   0x9   :  { %11895 = vmatprep.subr.bf16.mxu0 %v15944_v0  ;;  %11903 = vmatprep.subr.bf16.mxu1 %v15944_v0  ;;  %v143_v6 = vld [vmem:[%s13649_s13] sm:$0xff]  ;;  %v141_v7 = vmul.f32 5.656854, %v139_v5  ;;  %v13684_v10 = vld [vmem:[%s13635_s6 + $0x38] sm:$0xff]   ;;  %v13700_v13 = vld [vmem:[%s13635_s6 + $0x30] sm:$0xff]   ;;  %s13946_s8 = sld [smem:[%s15943_s0 + %s13599_s4]]   ;;  %s13604_s28 = smov 11  }
   0xa   :  { %v13695_v12 = vld [vmem:[%s13635_s6 + $0x20] sm:$0xff]   ;;  %v13711_v14 = vld [vmem:[%s13664_s17 + $0x8] sm:$0xff]   ;;  %v13714_v15 = vld [vmem:[%s13664_s17 + $0x18] sm:$0xff]   ;;  %s14203_s22 = sld [smem:[%s15943_s0 + %s13602_s18]]   ;;  %s13605_s4 = smov 12  }
   0xb   :  { %v13676_v8 = vadd.f32 %v143_v6, %v141_v7  ;;  %v13719_v16 = vld [vmem:[%s13664_s17] sm:$0xff]   ;;  %v13722_v17 = vld [vmem:[%s13664_s17 + $0x10] sm:$0xff]   ;;  %v13737_v18 = vld [vmem:[%s13664_s17 + $0x28] sm:$0xff]   ;;  %s14208_s27 = sld [smem:[%s15943_s0 + %s13603_s23]]   ;;  %s13606_s10 = smov 15  }
   0xc   :  { %11896 = vmatpush3.bf16.msra.mxu0 %v13659_v3  ;;  %11904 = vmatpush3.bf16.msra.mxu1 %v13669_v4  ;;  %v13740_v19 = vld [vmem:[%s13664_s17 + $0x38] sm:$0xff]   ;;  %v13753_v20 = vld [vmem:[%s13664_s17 + $0x20] sm:$0xff]   ;;  %v13756_v21 = vld [vmem:[%s13664_s17 + $0x30] sm:$0xff]   ;;  %s14213_s2 = sld [smem:[%s15943_s0 + %s13604_s28]]   ;;  %s13607_s15 = smov 17  }
   0xd   :  { %11909 = vmatprep.subr.bf16.mxu0 %v15944_v0  ;;  %11917 = vmatprep.subr.bf16.mxu1 %v15944_v0  ;;  %v13688_v11 = vpack.c.bf16 %v13676_v8, %v13676_v8  ;;  %v13782_v22 = vld [vmem:[%s13779_s21 + $0x8] sm:$0xff]   ;;  %v13787_v23 = vld [vmem:[%s13779_s21] sm:$0xff]   ;;  %v13790_v24 = vld [vmem:[%s13779_s21 + $0x18] sm:$0xff]   ;;  %s14356_s14 = sld [smem:[%s15943_s0 + %s13606_s10]]   ;;  %s13608_s23 = smov 16  }
   0xe   :  { %v13797_v25 = vld [vmem:[%s13779_s21 + $0x10] sm:$0xff]   ;;  %v13800_v26 = vld [vmem:[%s13779_s21 + $0x28] sm:$0xff]   ;;  %v13809_v27 = vld [vmem:[%s13779_s21 + $0x20] sm:$0xff]   ;;  %s14415_s20 = sld [smem:[%s15943_s0 + %s13607_s15]]   ;;  %s13609_s30 = smov 18  }
   0xf   :  { %11898 = vmatmul.mubr.msk.bf16.vlgmr.msra.gmra.mxu0 %vm259_vm1, %v13688_v11  ;;  %11906 = vmatmul.mubr.msk.bf16.vlgmr.msra.gmra.mxu1 %vm259_vm1, %v13688_v11  ;;  %v13812_v28 = vld [vmem:[%s13779_s21 + $0x38] sm:$0xff]   ;;  %v13824_v29 = vld [vmem:[%s13779_s21 + $0x30] sm:$0xff]   ;;  %v13848_v46 = vld [vmem:[%s13840_s25] ss:$0 sm:$0xff]  ;;  %s14420_s28 = sld [smem:[%s15943_s0 + %s13608_s23]]   ;;  %s13610_s7 = smov 19  }
  0x10   :  { %11910 = vmatpush3.bf16.msra.mxu0 %v13680_v9  ;;  %11918 = vmatpush3.bf16.msra.mxu1 %v13684_v10  ;;  %v13851_v47 = vld [vmem:[%s13840_s25 + $0x1] ss:$0 sm:$0xff]  ;;  %v13856_v56 = vld [vmem:[%s13845_s29] ss:$0 sm:$0xff]  ;;  %v13864_v5 = vld [vmem:[%s13840_s25 + $0x2] ss:$0 sm:$0xff]  ;;  %s14477_s5 = sld [smem:[%s15943_s0 + %s13609_s30]]  }
  0x11   :  { %11911 = vmatprep.subr.bf16.mxu0 %v15944_v0  ;;  %11919 = vmatprep.subr.bf16.mxu1 %v15944_v0  ;;  %v13859_v57 = vld [vmem:[%s13845_s29 + $0x1] ss:$0 sm:$0xff]  ;;  %v13867_v6 = vld [vmem:[%s13840_s25 + $0x3] ss:$0 sm:$0xff]  ;;  %s13611_s15 = smov 20   ;;  %s13612_s24 = smov 23  }
  0x12   :  { %11913 = vmatprep.mubr.msk.bf16.mxu0 %vm13592_vm0, %v15944_v0  ;;  %11921 = vmatprep.mubr.msk.bf16.mxu1 %vm13592_vm0, %v15944_v0  ;;  %s14713_s23 = sld [smem:[%s15943_s0 + %s13611_s15]]   ;;  %s13614_s15 = smov 21  }
  0x13   :  { %s14778_s1 = sld [smem:[%s15943_s0 + %s13612_s24]]   ;;  %s13615_s26 = smov 22  }
  0x14   :  { %11912 = vmatpush3.bf16.msra.mxu0 %v13695_v12  ;;  %11920 = vmatpush3.bf16.msra.mxu1 %v13700_v13  ;;  %s14794_s24 = sld [smem:[%s15943_s0 + %s13614_s15]]   ;;  %s13616_s10 = smov 24  }
  0x15   :  { %11925 = vmatprep.subr.bf16.mxu0 %v15944_v0  ;;  %11933 = vmatprep.subr.bf16.mxu1 %v15944_v0  ;;  %s14819_s19 = sld [smem:[%s15943_s0 + %s13616_s10]]   ;;  %s13618_s15 = smov 27  }
  0x16   :  { %s14858_s30 = sld [smem:[%s15943_s0 + %s13618_s15]]  }
  0x17   :  { %11914 = vmatmul.mubr.msk.bf16.vlgmr.msra.gmra.mxu0 %vm259_vm1, %v13688_v11  ;;  %11922 = vmatmul.mubr.msk.bf16.vlgmr.msra.gmra.mxu1 %vm259_vm1, %v13688_v11 }
  0x18   :  { %11926 = vmatpush3.bf16.msra.mxu0 %v13711_v14  ;;  %11934 = vmatpush3.bf16.msra.mxu1 %v13714_v15 }
  0x19   :  { %11927 = vmatprep.subr.bf16.mxu0 %v15944_v0  ;;  %11935 = vmatprep.subr.bf16.mxu1 %v15944_v0 }
  0x1a   :  { %11929 = vmatprep.mubr.msk.bf16.mxu0 %vm13592_vm0, %v15944_v0  ;;  %11937 = vmatprep.mubr.msk.bf16.mxu1 %vm13592_vm0, %v15944_v0 }
  0x1b   :  { %15951 = sst [smem:[#allocation3_spill]] %s14819_s19 }
  0x1c   :  { %11928 = vmatpush3.bf16.msra.mxu0 %v13719_v16  ;;  %11936 = vmatpush3.bf16.msra.mxu1 %v13722_v17 }
  0x1d   :  { %11941 = vmatprep.subr.bf16.mxu0 %v15944_v0  ;;  %11949 = vmatprep.subr.bf16.mxu1 %v15944_v0 }
  0x1f   :  { %11930 = vmatmul.mubr.msk.bf16.vlgmr.msra.gmra.mxu0 %vm259_vm1, %v13688_v11  ;;  %11938 = vmatmul.mubr.msk.bf16.vlgmr.msra.gmra.mxu1 %vm259_vm1, %v13688_v11 }
  0x20   :  { %11942 = vmatpush3.bf16.msra.mxu0 %v13737_v18  ;;  %11950 = vmatpush3.bf16.msra.mxu1 %v13740_v19 }
  0x21   :  { %11943 = vmatprep.subr.bf16.mxu0 %v15944_v0  ;;  %11951 = vmatprep.subr.bf16.mxu1 %v15944_v0 }
  0x22   :  { %11945 = vmatprep.mubr.msk.bf16.mxu0 %vm13592_vm0, %v15944_v0  ;;  %11953 = vmatprep.mubr.msk.bf16.mxu1 %vm13592_vm0, %v15944_v0 }
  0x24   :  { %11944 = vmatpush3.bf16.msra.mxu0 %v13753_v20  ;;  %11952 = vmatpush3.bf16.msra.mxu1 %v13756_v21 }
  0x25   :  { %11957 = vmatprep.subr.bf16.mxu0 %v15944_v0  ;;  %11965 = vmatprep.subr.bf16.mxu1 %v15944_v0 }
  0x27   :  { %11946 = vmatmul.mubr.msk.bf16.vlgmr.msra.gmra.mxu0 %vm259_vm1, %v13688_v11  ;;  %11954 = vmatmul.mubr.msk.bf16.vlgmr.msra.gmra.mxu1 %vm259_vm1, %v13688_v11 }
  0x28   :  { %11961 = vmatprep.mubr.msk.bf16.mxu0 %vm13592_vm0, %v15944_v0  ;;  %11969 = vmatprep.mubr.msk.bf16.mxu1 %vm13592_vm0, %v15944_v0 }
  0x29   :  { %11958 = vmatpush3.bf16.msra.mxu0 %v13782_v22  ;;  %11966 = vmatpush3.bf16.msra.mxu1 %v13790_v24 }
  0x2a   :  { %11959 = vmatprep.subr.bf16.mxu0 %v15944_v0  ;;  %11967 = vmatprep.subr.bf16.mxu1 %v15944_v0 }
  0x2d   :  { %11960 = vmatpush3.bf16.msra.mxu0 %v13787_v23  ;;  %11968 = vmatpush3.bf16.msra.mxu1 %v13797_v25 }
  0x2e   :  { %11973 = vmatprep.subr.bf16.mxu0 %v15944_v0  ;;  %11981 = vmatprep.subr.bf16.mxu1 %v15944_v0 }
  0x30   :  { %11962 = vmatmul.mubr.msk.bf16.vlgmr.msra.gmra.mxu0 %vm259_vm1, %v13688_v11  ;;  %11970 = vmatmul.mubr.msk.bf16.vlgmr.msra.gmra.mxu1 %vm259_vm1, %v13688_v11 }
  0x31   :  { %11974 = vmatpush3.bf16.msra.mxu0 %v13800_v26  ;;  %11977 = vmatprep.mubr.msk.bf16.mxu0 %vm13592_vm0, %v15944_v0 }
  0x32   :  { %11975 = vmatprep.subr.bf16.mxu0 %v15944_v0  ;;  %11982 = vmatpush3.bf16.msra.mxu1 %v13812_v28 }
  0x33   :  { %11983 = vmatprep.subr.bf16.mxu1 %v15944_v0  ;;  %11985 = vmatprep.mubr.msk.bf16.mxu1 %vm13592_vm0, %v15944_v0 }
  0x35   :  { %11976 = vmatpush3.bf16.msra.mxu0 %v13809_v27 }
  0x36   :  { %11989 = vmatprep.subr.bf16.mxu0 %v15944_v0  ;;  %11984 = vmatpush3.bf16.msra.mxu1 %v13824_v29 }
  0x37   :  { %11995 = vmatprep.subr.bf16.mxu1 %v15944_v0 }
  0x38   :  { %11978 = vmatmul.mubr.msk.bf16.vlgmr.msra.gmra.mxu0 %vm259_vm1, %v13688_v11 }
  0x39   :  { %11991 = vmatprep.mubr.msk.bf16.mxu0 %vm13592_vm0, %v15944_v0  ;;  %11986 = vmatmul.mubr.msk.bf16.vlgmr.msra.gmra.mxu1 %vm259_vm1, %v13688_v11 }
  0x3a   :  { %11997 = vmatprep.mubr.msk.bf16.mxu1 %vm13592_vm0, %v15944_v0 }
  0xcf   :  { %v297_v30 = vpop.f32.mrf.mxu0  ;;  %v349_v31 = vpop.f32.mrf.mxu1 }
  0xd0   :  { %v298_v7 = vadd.f32 %v13856_v56, %v297_v30  ;;  %v350_v11 = vadd.f32 %v13859_v57, %v349_v31  ;;  %v13879_v30 = vld [vmem:[%s13845_s29 + $0x3] ss:$0 sm:$0xff] }
  0xd1   :  { %v11899_v32 = vpop.f32.mrf.mxu0  ;;  %v11907_v33 = vpop.f32.mrf.mxu1 }
  0xd3   :  { %v300_v34 = vpop.f32.mrf.mxu0  ;;  %v352_v35 = vpop.f32.mrf.mxu1 }
  0xd5   :  { %v11900_v36 = vpop.f32.mrf.mxu0  ;;  %v11908_v37 = vpop.f32.mrf.mxu1 }
  0xd7   :  { %v401_v38 = vpop.f32.mrf.mxu0  ;;  %v453_v39 = vpop.f32.mrf.mxu1 }
  0xd9   :  { %v11915_v40 = vpop.f32.mrf.mxu0  ;;  %v11923_v41 = vpop.f32.mrf.mxu1 }
  0xda   :  { %v923_v40 = vpack.c.bf16 %v298_v7, %v298_v7  ;;  %v924_v41 = vpack.c.bf16 %v350_v11, %v350_v11 }
  0xdb   :  { %v404_v42 = vpop.f32.mrf.mxu0  ;;  %v456_v43 = vpop.f32.mrf.mxu1 }
  0xdd   :  { %v11916_v44 = vpop.f32.mrf.mxu0  ;;  %v11924_v45 = vpop.f32.mrf.mxu1 }
  0xde   :  { %v13876_v44 = vld [vmem:[%s13845_s29 + $0x2] ss:$0 sm:$0xff] }
  0xdf   :  { %v529_v48 = vpop.f32.mrf.mxu0  ;;  %v581_v49 = vpop.f32.mrf.mxu1 }
  0xe0   :  { %v530_v50 = vadd.f32 %v13848_v46, %v529_v48  ;;  %v582_v51 = vadd.f32 %v13851_v47, %v581_v49 }
  0xe1   :  { %v11931_v52 = vpop.f32.mrf.mxu0  ;;  %v11939_v53 = vpop.f32.mrf.mxu1 }
  0xe2   :  { %v927_v54 = vpack.c.bf16 %v530_v50, %v530_v50  ;;  %v928_v55 = vpack.c.bf16 %v582_v51, %v582_v51  ;;  %v402_v52 = vadd.f32 %v13876_v44, %v401_v38  ;;  %v454_v53 = vadd.f32 %v13879_v30, %v453_v39  ;;  %v13905_v38 = vld [vmem:[%s13902_s3] ss:$0 sm:$0xff] }
  0xe3   :  { %v532_v58 = vpop.f32.mrf.mxu0  ;;  %v584_v59 = vpop.f32.mrf.mxu1 }
  0xe4   :  { %v936_v60 = vsel %vm931_vm2, %v927_v54, 0  ;;  %v982_v61 = vsel %vm931_vm2, %v928_v55, 0  ;;  %v925_v54 = vpack.c.bf16 %v402_v52, %v402_v52  ;;  %v926_v55 = vpack.c.bf16 %v454_v53, %v454_v53 }
  0xe5   :  { %v11932_v62 = vpop.f32.mrf.mxu0  ;;  %v11940_v63 = vpop.f32.mrf.mxu1  ;;  %11990 = vmatpush3.bf16.xpose.msra.mxu0 %v936_v60  ;;  %11996 = vmatpush3.bf16.xpose.msra.mxu1 %v982_v61  ;;  %v13909_v60 = vld [vmem:[%s13902_s3 + $0x1] ss:$0 sm:$0xff] }
  0xe6   :  { %12001 = vmatprep.subr.bf16.mxu0 %v15944_v0  ;;  %12007 = vmatprep.subr.bf16.mxu1 %v15944_v0 }
  0xe7   :  { %v633_v32 = vpop.f32.mrf.mxu0  ;;  %v685_v33 = vpop.f32.mrf.mxu1 }
  0xe8   :  { %v634_v34 = vadd.f32 %v13864_v5, %v633_v32  ;;  %v686_v35 = vadd.f32 %v13867_v6, %v685_v33 }
  0xe9   :  { %v11947_v36 = vpop.f32.mrf.mxu0  ;;  %v11955_v37 = vpop.f32.mrf.mxu1 }
  0xea   :  { %v929_v42 = vpack.c.bf16 %v634_v34, %v634_v34  ;;  %v930_v43 = vpack.c.bf16 %v686_v35, %v686_v35 }
  0xeb   :  { %v636_v31 = vpop.f32.mrf.mxu0  ;;  %v688_v45 = vpop.f32.mrf.mxu1 }
  0xec   :  { %v1028_v48 = vsel %vm931_vm2, %v929_v42, 0  ;;  %v1074_v49 = vsel %vm931_vm2, %v930_v43, 0  ;;  %11992 = vmatmul.mubr.msk.bf16.vlgmr.msra.gmra.mxu0 %vm931_vm2, %v923_v40  ;;  %11998 = vmatmul.mubr.msk.bf16.vlgmr.msra.gmra.mxu1 %vm931_vm2, %v924_v41 }
  0xed   :  { %v11948_v50 = vpop.f32.mrf.mxu0  ;;  %v11956_v51 = vpop.f32.mrf.mxu1  ;;  %12002 = vmatpush3.bf16.xpose.msra.mxu0 %v1028_v48  ;;  %12008 = vmatpush3.bf16.xpose.msra.mxu1 %v1074_v49 }
  0xee   :  { %12003 = vmatprep.mubr.msk.bf16.mxu0 %vm13592_vm0, %v15944_v0  ;;  %12009 = vmatprep.mubr.msk.bf16.mxu1 %vm13592_vm0, %v15944_v0  ;;  %v151_v50 = vlaneseq }
  0xef   :  { %12013 = vmatprep.subr.bf16.mxu0 %v15944_v0  ;;  %12019 = vmatprep.subr.bf16.mxu1 %v15944_v0 }
  0xf0   :  { %v761_v39 = vpop.f32.mrf.mxu0  ;;  %v813_v63 = vpop.f32.mrf.mxu1  ;;  %v152_v51 = vshrl.u32 %v151_v50, 7  ;;  %v154_v52 = vand.u32 127, %v151_v50 }
  0xf1   :  { %v762_v58 = vadd.f32 %v13905_v38, %v761_v39  ;;  %v814_v11 = vadd.f32 %v13909_v60, %v813_v63 }
  0xf2   :  { %v11963_v59 = vpop.f32.mrf.mxu0  ;;  %v11971_v33 = vpop.f32.mrf.mxu1  ;;  %vm155_vm4 = vcmp.gt.s32.totalorder %v154_v52, %v152_v51 }
  0xf3   :  { %v1164_v61 = vpack.c.bf16 %v762_v58, %v762_v58  ;;  %v1165_v34 = vpack.c.bf16 %v814_v11, %v814_v11  ;;  %v13921_v53 = vsel %vm155_vm4, -1e+09, %v15944_v0 }
  0xf4   :  { %12004 = vmatmul.mubr.msk.bf16.vlgmr.msra.gmra.mxu0 %vm931_vm2, %v925_v54  ;;  %12010 = vmatmul.mubr.msk.bf16.vlgmr.msra.gmra.mxu1 %vm931_vm2, %v926_v55  ;;  %v764_v62 = vpop.f32.mrf.mxu0  ;;  %v816_v35 = vpop.f32.mrf.mxu1 }
  0xf5   :  { %12015 = vmatprep.mubr.msk.bf16.mxu0 %vm13592_vm0, %v15944_v0  ;;  %12021 = vmatprep.mubr.msk.bf16.mxu1 %vm13592_vm0, %v15944_v0  ;;  %v1173_v7 = vsel %vm1171_vm3, %v1164_v61, 0  ;;  %v1219_v37 = vsel %vm1171_vm3, %v1165_v34, 0 }
  0xf6   :  { %v11964_v32 = vpop.f32.mrf.mxu0  ;;  %12014 = vmatpush3.bf16.msra.mxu0 %v1173_v7  ;;  %v11972_v40 = vpop.f32.mrf.mxu1  ;;  %12020 = vmatpush3.bf16.msra.mxu1 %v1219_v37 }
  0xf7   :  { %12025 = vmatprep.subr.bf16.mxu0 %v15944_v0  ;;  %12031 = vmatprep.subr.bf16.mxu1 %v15944_v0 }
  0xf8   :  { %v13914_v36 = vpop.f32.mrf.mxu0 }
  0xf9   :  { %v13918_v43 = vpop.f32.mrf.mxu1 }
  0xfa   :  { %v11979_v41 = vpop.f32.mrf.mxu0 }
  0xfb   :  { %v11987_v45 = vpop.f32.mrf.mxu1 }
  0xfc   :  { %v868_v42 = vpop.f32.mrf.mxu0 }
  0xfd   :  { %v920_v48 = vpop.f32.mrf.mxu1 }
  0xfe   :  { %v11980_v31 = vpop.f32.mrf.mxu0 }
  0xff   :  { %v11988_v49 = vpop.f32.mrf.mxu1 }
 0x1ac   :  { %v972_v54 = vpop.f32.mrf.mxu0  ;;  %v1018_v55 = vpop.f32.mrf.mxu1 }
 0x1ad   :  { %v973_v39 = vadd.f32 %v972_v54, %v13921_v53  ;;  %v1019_v61 = vadd.f32 %v1018_v55, %v13921_v53 }
 0x1ae   :  { %v11993_v58 = vpop.f32.mrf.mxu0  ;;  %v11999_v59 = vpop.f32.mrf.mxu1 }
 0x1af   :  { %v1116_v62 = vsel %vm931_vm2, %v973_v39, -inf  ;;  %v1119_v33 = vsel %vm931_vm2, %v1019_v61, -inf }
 0x1b0   :  { %v1021_v63 = vpop.f32.mrf.mxu1  ;;  %1117 = vmax.xlane.f32.xlu0 %v1116_v62  ;;  %v975_v7 = vpop.f32.mrf.mxu0 }
 0x1b2   :  { %v11994_v11 = vpop.f32.mrf.mxu0  ;;  %v12000_v32 = vpop.f32.mrf.mxu1 }
 0x1b4   :  { %v1110_v34 = vpop.f32.mrf.mxu1  ;;  %1120 = vmax.xlane.f32.xlu0 %v1119_v33  ;;  %v1064_v35 = vpop.f32.mrf.mxu0 }
 0x1b5   :  { %v1065_v37 = vadd.f32 %v1064_v35, %v13921_v53  ;;  %v1111_v42 = vadd.f32 %v1110_v34, %v13921_v53 }
 0x1b6   :  { %v12005_v40 = vpop.f32.mrf.mxu0  ;;  %v12011_v41 = vpop.f32.mrf.mxu1 }
 0x1b7   :  { %v1122_v31 = vsel %vm931_vm2, %v1065_v37, -inf  ;;  %v1125_v51 = vsel %vm931_vm2, %v1111_v42, -inf }
 0x1b8   :  { %v1113_v45 = vpop.f32.mrf.mxu1  ;;  %1123 = vmax.xlane.f32.xlu1 %v1122_v31  ;;  %v1067_v48 = vpop.f32.mrf.mxu0 }
 0x1ba   :  { %v12006_v49 = vpop.f32.mrf.mxu0  ;;  %v12012_v50 = vpop.f32.mrf.mxu1 }
 0x1bb   :  { %v13936_v49 = vld [vmem:[%s13902_s3 + $0x2] ss:$0 sm:$0xff] }
 0x1bc   :  { %1126 = vmax.xlane.f32.xlu1 %v1125_v51  ;;  %v866_v51 = vadd.f32 %v13936_v49, %v13914_v36 }
 0x239   :  { %v1118_v52 = vpop.xlane.xlu0 %1117 }
 0x23a   :  { %v1128_v54 = vsub.f32 %v973_v39, %v1118_v52  ;;  %v13941_v52 = vld [vmem:[%s13902_s3 + $0x3] ss:$0 sm:$0xff] }
 0x23c   :  { %v1132_v55 = vmul.f32 1.442695, %v1128_v54 }
 0x23d   :  { %v1121_v58 = vpop.xlane.xlu0 %1120 }
 0x23e   :  { %13432 = vpow2.f32 %v1132_v55  ;;  %v1129_v59 = vsub.f32 %v1019_v61, %v1121_v58  ;;  %v1166_v58 = vpack.c.bf16 %v866_v51, %v866_v51 }
 0x240   :  { %v1134_v62 = vmul.f32 1.442695, %v1129_v59  ;;  %v918_v59 = vadd.f32 %v13941_v52, %v13918_v43  ;;  %v1265_v36 = vsel %vm1171_vm3, %v1166_v58, 0  ;;  %v220_v58 = vld [vmem:[%s13946_s8 + $0xc] sm:$0xf] }
 0x241   :  { %v1124_v63 = vpop.xlane.xlu1 %1123 }
 0x242   :  { %13434 = vpow2.f32 %v1134_v62  ;;  %v1130_v7 = vsub.f32 %v1065_v37, %v1124_v63 }
 0x244   :  { %v1136_v11 = vmul.f32 1.442695, %v1130_v7 }
 0x245   :  { %v1127_v32 = vpop.xlane.xlu1 %1126 }
 0x246   :  { %13436 = vpow2.f32 %v1136_v11  ;;  %v1131_v33 = vsub.f32 %v1111_v42, %v1127_v32  ;;  %v1167_v11 = vpack.c.bf16 %v918_v59, %v918_v59 }
 0x248   :  { %v1138_v34 = vmul.f32 1.442695, %v1131_v33  ;;  %v1311_v43 = vsel %vm1171_vm3, %v1167_v11, 0 }
 0x24a   :  { %13438 = vpow2.f32 %v1138_v34 }
 0x24b   :  { %v13433_v35 = vpop.eup %13432 }
 0x24c   :  { %v1140_v40 = vsel %vm931_vm2, %v13433_v35, 0.0 }
 0x24d   :  { %1141 = vadd.xlane.f32.xlu0 %v1140_v40  ;;  %v217_v40 = vld [vmem:[%s13946_s8] sm:$0xf] }
 0x24f   :  { %v13435_v39 = vpop.eup %13434 }
 0x250   :  { %v1143_v41 = vsel %vm931_vm2, %v13435_v39, 0.0 }
 0x251   :  { %1144 = vadd.xlane.f32.xlu1 %v1143_v41  ;;  %v13961_v41 = vsel %vm1171_vm3, %v217_v40, 0 }
 0x253   :  { %v13437_v61 = vpop.eup %13436 }
 0x254   :  { %v1146_v31 = vsel %vm931_vm2, %v13437_v61, 0.0 }
 0x255   :  { %1147 = vadd.xlane.f32.xlu0 %v1146_v31 }
 0x257   :  { %v13439_v37 = vpop.eup %13438 }
 0x258   :  { %v1149_v45 = vsel %vm931_vm2, %v13439_v37, 0.0 }
 0x259   :  { %1150 = vadd.xlane.f32.xlu1 %v1149_v45 }
 0x2d6   :  { %v1142_v42 = vpop.xlane.xlu0 %1141 }
 0x2d7   :  { %13440 = vrcp.f32 %v1142_v42  ;;  %v218_v42 = vld [vmem:[%s13946_s8 + $0x4] sm:$0xf] }
 0x2da   :  { %v1145_v48 = vpop.xlane.xlu1 %1144 }
 0x2db   :  { %13442 = vrcp.f32 %v1145_v48  ;;  %v13974_v48 = vsel %vm1171_vm3, %v218_v42, 0 }
 0x2de   :  { %v1148_v50 = vpop.xlane.xlu0 %1147 }
 0x2df   :  { %13444 = vrcp.f32 %v1148_v50 }
 0x2e2   :  { %v1151_v54 = vpop.xlane.xlu1 %1150 }
 0x2e3   :  { %13446 = vrcp.f32 %v1151_v54 }
 0x2e4   :  { %v13441_v55 = vpop.eup %13440 }
 0x2e5   :  { %v1156_v62 = vmul.f32 %v13441_v55, %v13433_v35 }
 0x2e7   :  { %v1160_v63 = vpack.c.bf16 %v1156_v62, %v1156_v62 }
 0x2e8   :  { %v13443_v7 = vpop.eup %13442 }
 0x2e9   :  { %12016 = vmatmul.mubr.msk.bf16.vlgmr.msra.gmra.mxu0 %vm931_vm2, %v1160_v63  ;;  %v1157_v32 = vmul.f32 %v13443_v7, %v13435_v39  ;;  %v140_v63 = vld [vmem:[%s13644_s9 + $0x8] sm:$0xff]  ;;  %s13600_s9 = smov 10  }
 0x2ea   :  { %12026 = vmatpush3.bf16.msra.mxu0 %v1265_v36  ;;  %12027 = vmatprep.mubr.msk.bf16.mxu0 %vm13592_vm0, %v15944_v0  ;;  %v13989_v36 = vsel %vm1171_vm3, %v220_v58, 0  ;;  %s14157_s12 = sld [smem:[%s15943_s0 + %s13600_s9]]  }
 0x2eb   :  { %v1161_v33 = vpack.c.bf16 %v1157_v32, %v1157_v32  ;;  %12037 = vmatprep.subr.bf16.mxu0 %v15944_v0  ;;  %s14218_s9 = sld [smem:[%s15943_s0 + %s13605_s4]]   ;;  %s13613_s4 = smov 25  }
 0x2ec   :  { %v13445_v34 = vpop.eup %13444  ;;  %s14787_s11 = sld [smem:[%s15943_s0 + %s13613_s4]]   ;;  %s13619_s4 = smov 28  }
 0x2ed   :  { %12022 = vmatmul.mubr.msk.bf16.vlgmr.msra.gmra.mxu1 %vm931_vm2, %v1161_v33  ;;  %v1158_v35 = vmul.f32 %v13445_v34, %v13437_v61  ;;  %v142_v33 = vmul.f32 5.656854, %v140_v63 }
 0x2ee   :  { %12032 = vmatpush3.bf16.msra.mxu1 %v1311_v43  ;;  %12033 = vmatprep.mubr.msk.bf16.mxu1 %vm13592_vm0, %v15944_v0  ;;  %v144_v43 = vld [vmem:[%s13649_s13 + $0x8] sm:$0xff]  ;;  %s13601_s13 = smov 13  }
 0x2ef   :  { %v1162_v39 = vpack.c.bf16 %v1158_v35, %v1158_v35  ;;  %12043 = vmatprep.subr.bf16.mxu1 %v15944_v0  ;;  %s14198_s16 = sld [smem:[%s15943_s0 + %s13601_s13]]  }
 0x2f0   :  { %v13447_v31 = vpop.eup %13446  ;;  %s14537_s13 = sld [smem:[%s15943_s0 + %s13610_s7]]  }
 0x2f1   :  { %12028 = vmatmul.mubr.msk.bf16.vlgmr.msra.gmra.mxu0 %vm931_vm2, %v1162_v39  ;;  %v1159_v45 = vmul.f32 %v13447_v31, %v13439_v37  ;;  %v219_v37 = vld [vmem:[%s13946_s8 + $0x8] sm:$0xf]  ;;  %s14799_s7 = sld [smem:[%s15943_s0 + %s13615_s26]]   ;;  %s13617_s26 = smov 26  }
 0x2f2   :  { %12038 = vmatpush3.bf16.msra.mxu0 %v13961_v41  ;;  %12039 = vmatprep.mubr.msk.bf16.mxu0 %vm13592_vm0, %v15944_v0  ;;  %v13980_v54 = vsel %vm1171_vm3, %v219_v37, 0  ;;  %s14828_s10 = sld [smem:[%s15943_s0 + %s13617_s26]]  }
 0x2f3   :  { %v1163_v61 = vpack.c.bf16 %v1159_v45, %v1159_v45  ;;  %12049 = vmatprep.subr.bf16.mxu0 %v15944_v0  ;;  %v13999_v45 = vadd.f32 %v144_v43, %v142_v33 }
 0x2f5   :  { %12034 = vmatmul.mubr.msk.bf16.vlgmr.msra.gmra.mxu1 %vm931_vm2, %v1163_v61 }
 0x2f6   :  { %12045 = vmatprep.mubr.msk.bf16.mxu1 %vm13592_vm0, %v15944_v0  ;;  %12044 = vmatpush3.bf16.msra.mxu1 %v13974_v48 }
 0x2f7   :  { %12055 = vmatprep.subr.bf16.mxu1 %v15944_v0  ;;  %15950 = sst [smem:[#allocation2_spill]] %s14799_s7 }
 0x2f8   :  { %15952 = sst [smem:[#allocation4_spill]] %s14828_s10 }
 0x3a9   :  { %v1209_v50 = vpop.f32.mrf.mxu0 }
 0x3aa   :  { %v1353_v51 = vpack.c.bf16 %v1209_v50, %v1209_v50 }
 0x3ab   :  { %v12017_v55 = vpop.f32.mrf.mxu0 }
 0x3ac   :  { %12040 = vmatmul.mubr.msk.bf16.vlgmr.msra.gmra.mxu0 %vm931_vm2, %v1353_v51  ;;  %v14008_v55 = vpack.c.bf16 %v13999_v45, %v13999_v45 }
 0x3ad   :  { %v1212_v59 = vpop.f32.mrf.mxu0  ;;  %v1255_v62 = vpop.f32.mrf.mxu1  ;;  %12050 = vmatpush3.bf16.msra.mxu0 %v13980_v54  ;;  %12051 = vmatprep.mubr.msk.bf16.mxu0 %vm13592_vm0, %v15944_v0 }
 0x3ae   :  { %v1354_v7 = vpack.c.bf16 %v1255_v62, %v1255_v62  ;;  %12061 = vmatprep.subr.bf16.mxu0 %v15944_v0 }
 0x3af   :  { %v12018_v11 = vpop.f32.mrf.mxu0  ;;  %v12023_v32 = vpop.f32.mrf.mxu1 }
 0x3b0   :  { %12046 = vmatmul.mubr.msk.bf16.vlgmr.msra.gmra.mxu1 %vm931_vm2, %v1354_v7 }
 0x3b1   :  { %v1258_v34 = vpop.f32.mrf.mxu1  ;;  %v1301_v40 = vpop.f32.mrf.mxu0  ;;  %12056 = vmatpush3.bf16.msra.mxu1 %v13989_v36  ;;  %12057 = vmatprep.mubr.msk.bf16.mxu1 %vm13592_vm0, %v15944_v0 }
 0x3b2   :  { %v1355_v35 = vpack.c.bf16 %v1301_v40, %v1301_v40  ;;  %12069 = vmatprep.subr.bf16.mxu1 %v15944_v0 }
 0x3b3   :  { %v12024_v39 = vpop.f32.mrf.mxu1  ;;  %v12029_v31 = vpop.f32.mrf.mxu0 }
 0x3b4   :  { %12052 = vmatmul.mubr.msk.bf16.vlgmr.msra.gmra.mxu0 %vm931_vm2, %v1355_v35 }
 0x3b5   :  { %v1304_v61 = vpop.f32.mrf.mxu0  ;;  %v1347_v42 = vpop.f32.mrf.mxu1  ;;  %12062 = vmatpush3.bf16.msra.mxu0 %v13652_v1  ;;  %12065 = vmatprep.mubr.msk.bf16.mxu0 %vm13592_vm0, %v15944_v0 }
 0x3b6   :  { %v1356_v37 = vpack.c.bf16 %v1347_v42, %v1347_v42  ;;  %12063 = vmatprep.subr.bf16.mxu0 %v15944_v0 }
 0x3b7   :  { %v12030_v50 = vpop.f32.mrf.mxu0  ;;  %v12035_v51 = vpop.f32.mrf.mxu1 }
 0x3b8   :  { %12058 = vmatmul.mubr.msk.bf16.vlgmr.msra.gmra.mxu1 %vm931_vm2, %v1356_v37 }
 0x3b9   :  { %v1350_v58 = vpop.f32.mrf.mxu1  ;;  %12064 = vmatpush3.bf16.msra.mxu0 %v13659_v3  ;;  %12070 = vmatpush3.bf16.msra.mxu1 %v13655_v2 }
 0x3ba   :  { %12071 = vmatprep.subr.bf16.mxu1 %v15944_v0  ;;  %12077 = vmatprep.subr.bf16.mxu0 %v15944_v0 }
 0x3bb   :  { %v12036_v1 = vpop.f32.mrf.mxu1  ;;  %12073 = vmatprep.mubr.msk.bf16.mxu1 %vm13592_vm0, %v15944_v0 }
 0x3bc   :  { %12066 = vmatmul.mubr.msk.bf16.vlgmr.msra.gmra.mxu0 %vm259_vm1, %v14008_v55 }
 0x3bd   :  { %12072 = vmatpush3.bf16.msra.mxu1 %v13669_v4  ;;  %12078 = vmatpush3.bf16.msra.mxu0 %v13680_v9 }
 0x3be   :  { %12079 = vmatprep.subr.bf16.mxu0 %v15944_v0  ;;  %12085 = vmatprep.subr.bf16.mxu1 %v15944_v0 }
 0x3bf   :  { %12081 = vmatprep.mubr.msk.bf16.mxu0 %vm13592_vm0, %v15944_v0 }
 0x3c0   :  { %12074 = vmatmul.mubr.msk.bf16.vlgmr.msra.gmra.mxu1 %vm259_vm1, %v14008_v55 }
 0x3c1   :  { %12080 = vmatpush3.bf16.msra.mxu0 %v13695_v12  ;;  %12086 = vmatpush3.bf16.msra.mxu1 %v13684_v10 }
 0x3c2   :  { %12087 = vmatprep.subr.bf16.mxu1 %v15944_v0  ;;  %12093 = vmatprep.subr.bf16.mxu0 %v15944_v0 }
 0x3c3   :  { %12089 = vmatprep.mubr.msk.bf16.mxu1 %vm13592_vm0, %v15944_v0 }
 0x3c4   :  { %12082 = vmatmul.mubr.msk.bf16.vlgmr.msra.gmra.mxu0 %vm259_vm1, %v14008_v55 }
 0x3c5   :  { %12088 = vmatpush3.bf16.msra.mxu1 %v13700_v13  ;;  %12094 = vmatpush3.bf16.msra.mxu0 %v13711_v14 }
 0x3c6   :  { %12095 = vmatprep.subr.bf16.mxu0 %v15944_v0  ;;  %12101 = vmatprep.subr.bf16.mxu1 %v15944_v0 }
 0x3c7   :  { %12097 = vmatprep.mubr.msk.bf16.mxu0 %vm13592_vm0, %v15944_v0 }
 0x3c8   :  { %12090 = vmatmul.mubr.msk.bf16.vlgmr.msra.gmra.mxu1 %vm259_vm1, %v14008_v55 }
 0x3c9   :  { %12096 = vmatpush3.bf16.msra.mxu0 %v13719_v16  ;;  %12102 = vmatpush3.bf16.msra.mxu1 %v13714_v15 }
 0x3ca   :  { %12103 = vmatprep.subr.bf16.mxu1 %v15944_v0  ;;  %12109 = vmatprep.subr.bf16.mxu0 %v15944_v0 }
 0x3cb   :  { %12105 = vmatprep.mubr.msk.bf16.mxu1 %vm13592_vm0, %v15944_v0 }
 0x3cc   :  { %12098 = vmatmul.mubr.msk.bf16.vlgmr.msra.gmra.mxu0 %vm259_vm1, %v14008_v55 }
 0x3cd   :  { %12104 = vmatpush3.bf16.msra.mxu1 %v13722_v17  ;;  %12110 = vmatpush3.bf16.msra.mxu0 %v13737_v18 }
 0x3ce   :  { %12111 = vmatprep.subr.bf16.mxu0 %v15944_v0  ;;  %12117 = vmatprep.subr.bf16.mxu1 %v15944_v0 }
 0x3cf   :  { %12113 = vmatprep.mubr.msk.bf16.mxu0 %vm13592_vm0, %v15944_v0 }
 0x3d0   :  { %12106 = vmatmul.mubr.msk.bf16.vlgmr.msra.gmra.mxu1 %vm259_vm1, %v14008_v55 }
 0x3d1   :  { %12112 = vmatpush3.bf16.msra.mxu0 %v13753_v20  ;;  %12118 = vmatpush3.bf16.msra.mxu1 %v13740_v19 }
 0x3d2   :  { %12119 = vmatprep.subr.bf16.mxu1 %v15944_v0  ;;  %12121 = vmatprep.mubr.msk.bf16.mxu1 %vm13592_vm0, %v15944_v0 }
 0x3d3   :  { %12125 = vmatprep.subr.bf16.mxu0 %v15944_v0 }
 0x3d4   :  { %12114 = vmatmul.mubr.msk.bf16.vlgmr.msra.gmra.mxu0 %vm259_vm1, %v14008_v55 }
 0x3d5   :  { %12120 = vmatpush3.bf16.msra.mxu1 %v13756_v21  ;;  %12126 = vmatpush3.bf16.msra.mxu0 %v13782_v22 }
 0x3d6   :  { %12133 = vmatprep.subr.bf16.mxu1 %v15944_v0  ;;  %12127 = vmatprep.subr.bf16.mxu0 %v15944_v0 }
 0x3d7   :  { %12129 = vmatprep.mubr.msk.bf16.mxu0 %vm13592_vm0, %v15944_v0 }
 0x3d8   :  { %12122 = vmatmul.mubr.msk.bf16.vlgmr.msra.gmra.mxu1 %vm259_vm1, %v14008_v55 }
 0x3d9   :  { %12134 = vmatpush3.bf16.msra.mxu1 %v13790_v24  ;;  %12128 = vmatpush3.bf16.msra.mxu0 %v13787_v23 }
 0x3da   :  { %12135 = vmatprep.subr.bf16.mxu1 %v15944_v0  ;;  %12141 = vmatprep.subr.bf16.mxu0 %v15944_v0 }
 0x3db   :  { %12137 = vmatprep.mubr.msk.bf16.mxu1 %vm13592_vm0, %v15944_v0 }
 0x3dc   :  { %12130 = vmatmul.mubr.msk.bf16.vlgmr.msra.gmra.mxu0 %vm259_vm1, %v14008_v55 }
 0x3dd   :  { %12136 = vmatpush3.bf16.msra.mxu1 %v13797_v25  ;;  %12142 = vmatpush3.bf16.msra.mxu0 %v13800_v26 }
 0x3de   :  { %12149 = vmatprep.subr.bf16.mxu1 %v15944_v0  ;;  %12143 = vmatprep.subr.bf16.mxu0 %v15944_v0 }
 0x3df   :  { %12145 = vmatprep.mubr.msk.bf16.mxu0 %vm13592_vm0, %v15944_v0 }
 0x3e0   :  { %12138 = vmatmul.mubr.msk.bf16.vlgmr.msra.gmra.mxu1 %vm259_vm1, %v14008_v55 }
 0x3e1   :  { %12150 = vmatpush3.bf16.msra.mxu1 %v13812_v28  ;;  %12144 = vmatpush3.bf16.msra.mxu0 %v13809_v27 }
 0x3e2   :  { %12151 = vmatprep.subr.bf16.mxu1 %v15944_v0  ;;  %12153 = vmatprep.mubr.msk.bf16.mxu1 %vm13592_vm0, %v15944_v0 }
 0x3e3   :  { %12157 = vmatprep.subr.bf16.mxu0 %v15944_v0 }
 0x3e4   :  { %12146 = vmatmul.mubr.msk.bf16.vlgmr.msra.gmra.mxu0 %vm259_vm1, %v14008_v55 }
 0x3e5   :  { %12152 = vmatpush3.bf16.msra.mxu1 %v13824_v29  ;;  %12159 = vmatprep.mubr.msk.bf16.mxu0 %vm13592_vm0, %v15944_v0 }
 0x3e6   :  { %12163 = vmatprep.subr.bf16.mxu1 %v15944_v0 }
 0x3e8   :  { %12154 = vmatmul.mubr.msk.bf16.vlgmr.msra.gmra.mxu1 %vm259_vm1, %v14008_v55 }
 0x3e9   :  { %12165 = vmatprep.mubr.msk.bf16.mxu1 %vm13592_vm0, %v15944_v0 }
 0x46c   :  { %v1397_v2 = vpop.f32.mrf.mxu0 }
 0x46e   :  { %v12041_v3 = vpop.f32.mrf.mxu0 }
 0x470   :  { %v1400_v4 = vpop.f32.mrf.mxu0  ;;  %v1443_v9 = vpop.f32.mrf.mxu1 }
 0x471   :  { %v1541_v10 = vadd.f32 %v1443_v9, %v1397_v2 }
 0x472   :  { %v12042_v12 = vpop.f32.mrf.mxu0  ;;  %v12047_v13 = vpop.f32.mrf.mxu1 }
 0x474   :  { %v1446_v14 = vpop.f32.mrf.mxu1  ;;  %v1489_v15 = vpop.f32.mrf.mxu0 }
 0x475   :  { %v1542_v16 = vadd.f32 %v1541_v10, %v1489_v15 }
 0x476   :  { %v12048_v17 = vpop.f32.mrf.mxu1  ;;  %v12053_v18 = vpop.f32.mrf.mxu0 }
 0x478   :  { %v1492_v19 = vpop.f32.mrf.mxu0  ;;  %v1535_v20 = vpop.f32.mrf.mxu1 }
 0x479   :  { %v14106_v21 = vadd.f32 %v1542_v16, %v1535_v20 }
 0x47a   :  { %v12054_v22 = vpop.f32.mrf.mxu0  ;;  %v12059_v23 = vpop.f32.mrf.mxu1 }
 0x47c   :  { %v1538_v24 = vpop.f32.mrf.mxu1  ;;  %v1589_v25 = vpop.f32.mrf.mxu0 }
 0x47d   :  { %v1590_v3 = vadd.f32 %v13856_v56, %v1589_v25 }
 0x47e   :  { %v12060_v26 = vpop.f32.mrf.mxu1  ;;  %v12067_v27 = vpop.f32.mrf.mxu0 }
 0x47f   :  { %v2035_v15 = vpack.c.bf16 %v1590_v3, %v1590_v3 }
 0x480   :  { %v1592_v28 = vpop.f32.mrf.mxu0  ;;  %v1629_v29 = vpop.f32.mrf.mxu1 }
 0x482   :  { %v12068_v59 = vpop.f32.mrf.mxu0  ;;  %v12075_v62 = vpop.f32.mrf.mxu1 }
 0x484   :  { %v1632_v63 = vpop.f32.mrf.mxu1  ;;  %v1669_v7 = vpop.f32.mrf.mxu0 }
 0x486   :  { %v12076_v11 = vpop.f32.mrf.mxu1  ;;  %v12083_v32 = vpop.f32.mrf.mxu0 }
 0x488   :  { %v1672_v33 = vpop.f32.mrf.mxu0  ;;  %v1709_v34 = vpop.f32.mrf.mxu1 }
 0x48a   :  { %v12084_v40 = vpop.f32.mrf.mxu0  ;;  %v12091_v43 = vpop.f32.mrf.mxu1 }
 0x48c   :  { %v1712_v35 = vpop.f32.mrf.mxu1  ;;  %v1749_v39 = vpop.f32.mrf.mxu0 }
 0x48d   :  { %v1750_v31 = vadd.f32 %v13848_v46, %v1749_v39 }
 0x48e   :  { %v12092_v61 = vpop.f32.mrf.mxu1  ;;  %v12099_v42 = vpop.f32.mrf.mxu0 }
 0x48f   :  { %v2039_v37 = vpack.c.bf16 %v1750_v31, %v1750_v31 }
 0x490   :  { %v1752_v50 = vpop.f32.mrf.mxu0  ;;  %v1789_v51 = vpop.f32.mrf.mxu1 }
 0x491   :  { %v2047_v55 = vsel %vm931_vm2, %v2039_v37, 0  ;;  %v1790_v58 = vadd.f32 %v13851_v47, %v1789_v51  ;;  %v1630_v47 = vadd.f32 %v13859_v57, %v1629_v29  ;;  %v1670_v57 = vadd.f32 %v13876_v44, %v1669_v7 }
 0x492   :  { %v12100_v1 = vpop.f32.mrf.mxu0  ;;  %v12107_v2 = vpop.f32.mrf.mxu1  ;;  %12158 = vmatpush3.bf16.xpose.msra.mxu0 %v2047_v55  ;;  %v1710_v44 = vadd.f32 %v13879_v30, %v1709_v34 }
 0x493   :  { %v2040_v4 = vpack.c.bf16 %v1790_v58, %v1790_v58  ;;  %12169 = vmatprep.subr.bf16.mxu0 %v15944_v0  ;;  %v2037_v29 = vpack.c.bf16 %v1670_v57, %v1670_v57 }
 0x494   :  { %v1792_v9 = vpop.f32.mrf.mxu1  ;;  %v1829_v10 = vpop.f32.mrf.mxu0  ;;  %v2038_v33 = vpack.c.bf16 %v1710_v44, %v1710_v44 }
 0x495   :  { %v2093_v46 = vsel %vm931_vm2, %v2040_v4, 0  ;;  %v1830_v12 = vadd.f32 %v13864_v5, %v1829_v10  ;;  %v2036_v5 = vpack.c.bf16 %v1630_v47, %v1630_v47 }
 0x496   :  { %v12108_v13 = vpop.f32.mrf.mxu1  ;;  %v12115_v14 = vpop.f32.mrf.mxu0  ;;  %12164 = vmatpush3.bf16.xpose.msra.mxu1 %v2093_v46 }
 0x497   :  { %v2041_v16 = vpack.c.bf16 %v1830_v12, %v1830_v12  ;;  %12175 = vmatprep.subr.bf16.mxu1 %v15944_v0 }
 0x498   :  { %v1832_v17 = vpop.f32.mrf.mxu0  ;;  %v1869_v56 = vpop.f32.mrf.mxu1 }
 0x499   :  { %v2139_v18 = vsel %vm931_vm2, %v2041_v16, 0  ;;  %v1870_v19 = vadd.f32 %v13867_v6, %v1869_v56  ;;  %12160 = vmatmul.mubr.msk.bf16.vlgmr.msra.gmra.mxu0 %vm931_vm2, %v2035_v15 }
 0x49a   :  { %v12116_v20 = vpop.f32.mrf.mxu0  ;;  %v12123_v22 = vpop.f32.mrf.mxu1  ;;  %12170 = vmatpush3.bf16.xpose.msra.mxu0 %v2139_v18  ;;  %12171 = vmatprep.mubr.msk.bf16.mxu0 %vm13592_vm0, %v15944_v0 }
 0x49b   :  { %v2042_v23 = vpack.c.bf16 %v1870_v19, %v1870_v19  ;;  %12181 = vmatprep.subr.bf16.mxu0 %v15944_v0 }
 0x49c   :  { %v1872_v24 = vpop.f32.mrf.mxu1  ;;  %v1909_v25 = vpop.f32.mrf.mxu0 }
 0x49d   :  { %v2185_v26 = vsel %vm931_vm2, %v2042_v23, 0  ;;  %12166 = vmatmul.mubr.msk.bf16.vlgmr.msra.gmra.mxu1 %vm931_vm2, %v2036_v5  ;;  %v1910_v6 = vadd.f32 %v13905_v38, %v1909_v25 }
 0x49e   :  { %v12124_v27 = vpop.f32.mrf.mxu1  ;;  %12176 = vmatpush3.bf16.xpose.msra.mxu1 %v2185_v26  ;;  %12177 = vmatprep.mubr.msk.bf16.mxu1 %vm13592_vm0, %v15944_v0  ;;  %v12131_v28 = vpop.f32.mrf.mxu0 }
 0x49f   :  { %v2275_v59 = vpack.c.bf16 %v1910_v6, %v1910_v6  ;;  %12187 = vmatprep.subr.bf16.mxu1 %v15944_v0 }
 0x4a0   :  { %v1949_v62 = vpop.f32.mrf.mxu1  ;;  %v1912_v63 = vpop.f32.mrf.mxu0 }
 0x4a1   :  { %12172 = vmatmul.mubr.msk.bf16.vlgmr.msra.gmra.mxu0 %vm931_vm2, %v2037_v29  ;;  %v2283_v7 = vsel %vm1171_vm3, %v2275_v59, 0  ;;  %v1950_v38 = vadd.f32 %v13909_v60, %v1949_v62 }
 0x4a2   :  { %v12139_v11 = vpop.f32.mrf.mxu1  ;;  %v12132_v32 = vpop.f32.mrf.mxu0  ;;  %12182 = vmatpush3.bf16.msra.mxu0 %v2283_v7  ;;  %12183 = vmatprep.mubr.msk.bf16.mxu0 %vm13592_vm0, %v15944_v0 }
 0x4a3   :  { %v2276_v40 = vpack.c.bf16 %v1950_v38, %v1950_v38  ;;  %12193 = vmatprep.subr.bf16.mxu0 %v15944_v0  ;;  %v14161_v11 = vld [vmem:[%s14157_s12] ss:$0 sm:$0xff] }
 0x4a4   :  { %v1952_v30 = vpop.f32.mrf.mxu1  ;;  %v14137_v34 = vpop.f32.mrf.mxu0 }
 0x4a5   :  { %12178 = vmatmul.mubr.msk.bf16.vlgmr.msra.gmra.mxu1 %vm931_vm2, %v2038_v33  ;;  %v2329_v43 = vsel %vm1171_vm3, %v2276_v40, 0  ;;  %v1550_v33 = vadd.f32 %v14161_v11, %v14106_v21 }
 0x4a6   :  { %v12140_v35 = vpop.f32.mrf.mxu1  ;;  %v12147_v39 = vpop.f32.mrf.mxu0  ;;  %12188 = vmatpush3.bf16.msra.mxu1 %v2329_v43  ;;  %12189 = vmatprep.mubr.msk.bf16.mxu1 %vm13592_vm0, %v15944_v0 }
 0x4a7   :  { %12199 = vmatprep.subr.bf16.mxu1 %v15944_v0  ;;  %v2643_v35 = vadd.f32 %v1550_v33, %v13676_v8  ;;  %v14246_v33 = vld [vmem:[%s14198_s16 + $0x18] sm:$0xff]  }
 0x4a8   :  { %v14144_v60 = vpop.f32.mrf.mxu1  ;;  %v1992_v31 = vpop.f32.mrf.mxu0 }
 0x4aa   :  { %v12155_v61 = vpop.f32.mrf.mxu1  ;;  %v12148_v42 = vpop.f32.mrf.mxu0 }
 0x4ab   :  { %v2647_v61 = vsel %vm259_vm1, %v2643_v35, 0.0 }
 0x4ac   :  { %v2032_v37 = vpop.f32.mrf.mxu1 }
 0x4ae   :  { %v12156_v50 = vpop.f32.mrf.mxu1 }
 0x4af   :  { %v1990_v50 = vadd.f32 %v13936_v49, %v14137_v34 }
 0x559   :  { %v2083_v51 = vpop.f32.mrf.mxu0 }
 0x55a   :  { %v2084_v55 = vadd.f32 %v2083_v51, %v13921_v53 }
 0x55b   :  { %v12161_v58 = vpop.f32.mrf.mxu0 }
 0x55c   :  { %v2227_v1 = vsel %vm931_vm2, %v2084_v55, -inf }
 0x55d   :  { %v2129_v2 = vpop.f32.mrf.mxu1  ;;  %2228 = vmax.xlane.f32.xlu0 %v2227_v1  ;;  %v2086_v3 = vpop.f32.mrf.mxu0  ;;  %v2277_v1 = vpack.c.bf16 %v1990_v50, %v1990_v50  ;;  %v14276_v50 = vld [vmem:[%s14198_s16 + $0x38] sm:$0xff]  }
 0x55e   :  { %v2130_v4 = vadd.f32 %v2129_v2, %v13921_v53  ;;  %v2030_v2 = vadd.f32 %v13941_v52, %v14144_v60 }
 0x55f   :  { %v12162_v9 = vpop.f32.mrf.mxu0  ;;  %v12167_v10 = vpop.f32.mrf.mxu1 }
 0x560   :  { %v2230_v46 = vsel %vm931_vm2, %v2130_v4, -inf }
 0x561   :  { %2231 = vmax.xlane.f32.xlu1 %v2230_v46  ;;  %v2132_v12 = vpop.f32.mrf.mxu1  ;;  %v2175_v13 = vpop.f32.mrf.mxu0 }
 0x562   :  { %v2176_v14 = vadd.f32 %v2175_v13, %v13921_v53  ;;  %v2375_v12 = vsel %vm1171_vm3, %v2277_v1, 0  ;;  %v2278_v13 = vpack.c.bf16 %v2030_v2, %v2030_v2  ;;  %v13355_v1 = vld [vmem:[%s14208_s27] ss:$0 sps:$4 sm:$0xff]   ;;  %v14313_v2 = vld [vmem:[%s14203_s22 + $0x10] sm:$0xff]  }
 0x563   :  { %v12168_v15 = vpop.f32.mrf.mxu1  ;;  %v12173_v47 = vpop.f32.mrf.mxu0 }
 0x564   :  { %v2233_v16 = vsel %vm931_vm2, %v2176_v14, -inf  ;;  %v2421_v60 = vsel %vm1171_vm3, %v2278_v13, 0  ;;  %v14368_v13 = vld [vmem:[%s14356_s14] sm:$0xff]  }
 0x565   :  { %v2221_v17 = vpop.f32.mrf.mxu1  ;;  %2234 = vmax.xlane.f32.xlu0 %v2233_v16  ;;  %v2178_v56 = vpop.f32.mrf.mxu0 }
 0x566   :  { %v2222_v18 = vadd.f32 %v2221_v17, %v13921_v53 }
 0x567   :  { %v12174_v19 = vpop.f32.mrf.mxu0  ;;  %v12179_v20 = vpop.f32.mrf.mxu1 }
 0x568   :  { %v2236_v22 = vsel %vm931_vm2, %v2222_v18, -inf }
 0x569   :  { %2237 = vmax.xlane.f32.xlu1 %v2236_v22  ;;  %v2224_v5 = vpop.f32.mrf.mxu1 }
 0x56b   :  { %v12180_v57 = vpop.f32.mrf.mxu1 }
 0x5e6   :  { %v2229_v23 = vpop.xlane.xlu0 %2228 }
 0x5e7   :  { %v2239_v24 = vsub.f32 %v2084_v55, %v2229_v23 }
 0x5e9   :  { %v2243_v25 = vmul.f32 1.442695, %v2239_v24 }
 0x5ea   :  { %v2232_v26 = vpop.xlane.xlu1 %2231 }
 0x5eb   :  { %13448 = vpow2.f32 %v2243_v25  ;;  %v2240_v6 = vsub.f32 %v2130_v4, %v2232_v26 }
 0x5ed   :  { %v2245_v27 = vmul.f32 1.442695, %v2240_v6 }
 0x5ee   :  { %v2235_v28 = vpop.xlane.xlu0 %2234 }
 0x5ef   :  { %13450 = vpow2.f32 %v2245_v27  ;;  %v2241_v29 = vsub.f32 %v2176_v14, %v2235_v28  ;;  %v14226_v27 = vld [vmem:[%s14213_s2] ss:$0 sm:$0xff] }
 0x5f1   :  { %v2247_v44 = vmul.f32 1.442695, %v2241_v29 }
 0x5f2   :  { %v2238_v59 = vpop.xlane.xlu1 %2237 }
 0x5f3   :  { %13452 = vpow2.f32 %v2247_v44  ;;  %v2242_v62 = vsub.f32 %v2222_v18, %v2238_v59 }
 0x5f5   :  { %v2249_v63 = vmul.f32 1.442695, %v2242_v62 }
 0x5f7   :  { %13454 = vpow2.f32 %v2249_v63 }
 0x5f8   :  { %v13449_v7 = vpop.eup %13448 }
 0x5f9   :  { %v2251_v38 = vsel %vm931_vm2, %v13449_v7, 0.0 }
 0x5fa   :  { %2252 = vadd.xlane.f32.xlu0 %v2251_v38 }
 0x5fc   :  { %v13451_v32 = vpop.eup %13450 }
 0x5fd   :  { %v2254_v40 = vsel %vm931_vm2, %v13451_v32, 0.0 }
 0x5fe   :  { %2255 = vadd.xlane.f32.xlu1 %v2254_v40 }
 0x600   :  { %v13453_v30 = vpop.eup %13452 }
 0x601   :  { %v2257_v43 = vsel %vm931_vm2, %v13453_v30, 0.0 }
 0x602   :  { %2258 = vadd.xlane.f32.xlu0 %v2257_v43 }
 0x604   :  { %v13455_v39 = vpop.eup %13454 }
 0x605   :  { %v2260_v31 = vsel %vm931_vm2, %v13455_v39, 0.0 }
 0x606   :  { %2261 = vadd.xlane.f32.xlu1 %v2260_v31  ;;  %2648 = vadd.xlane.f32.xlu0 %v2647_v61  ;;  %v14258_v31 = vld [vmem:[%s14198_s16 + $0x10] sm:$0xff]   ;;  %v14261_v61 = vld [vmem:[%s14198_s16 + $0x28] sm:$0xff]  }
 0x683   :  { %v2253_v42 = vpop.xlane.xlu0 %2252 }
 0x684   :  { %13456 = vrcp.f32 %v2253_v42 }
 0x687   :  { %v2256_v37 = vpop.xlane.xlu1 %2255 }
 0x688   :  { %13458 = vrcp.f32 %v2256_v37 }
 0x68b   :  { %v2259_v21 = vpop.xlane.xlu0 %2258 }
 0x68c   :  { %13460 = vrcp.f32 %v2259_v21  ;;  %v14273_v21 = vld [vmem:[%s14198_s16 + $0x20] sm:$0xff]  }
 0x68f   :  { %v2262_v51 = vpop.xlane.xlu1 %2261  ;;  %v2649_v55 = vpop.xlane.xlu0 %2648 }
 0x690   :  { %13462 = vrcp.f32 %v2262_v51  ;;  %v2654_v8 = vmul.f32 0.03125, %v2649_v55  ;;  %v14286_v51 = vld [vmem:[%s14198_s16 + $0x30] sm:$0xff]   ;;  %v14289_v55 = vld [vmem:[%s14203_s22 + $0x8] sm:$0xff]  }
 0x691   :  { %v13457_v58 = vpop.eup %13456 }
 0x692   :  { %v2656_v3 = vsub.f32 %v2643_v35, %v2654_v8  ;;  %v2267_v4 = vmul.f32 %v13457_v58, %v13449_v7  ;;  %v14238_v7 = vld [vmem:[%s14218_s9] ss:$0 sm:$0xff]  ;;  %v14302_v58 = vld [vmem:[%s14203_s22 + $0x18] sm:$0xff]  }
 0x693   :  { %v14299_v8 = vld [vmem:[%s14203_s22] sm:$0xff]  }
 0x694   :  { %v2271_v9 = vpack.c.bf16 %v2267_v4, %v2267_v4  ;;  %v2658_v10 = vmul.f32 %v2656_v3, %v2656_v3  ;;  %v14326_v4 = vld [vmem:[%s14203_s22 + $0x20] sm:$0xff]  }
 0x695   :  { %v13459_v46 = vpop.eup %13458 }
 0x696   :  { %12184 = vmatmul.mubr.msk.bf16.vlgmr.msra.gmra.mxu0 %vm931_vm2, %v2271_v9  ;;  %v2660_v49 = vsel %vm259_vm1, %v2658_v10, 0.0  ;;  %v2268_v34 = vmul.f32 %v13459_v46, %v13451_v32  ;;  %v14243_v32 = vld [vmem:[%s14198_s16] sm:$0xff]   ;;  %v14329_v9 = vld [vmem:[%s14203_s22 + $0x38] sm:$0xff]   ;;  %v14339_v10 = vld [vmem:[%s14203_s22 + $0x30] sm:$0xff]  }
 0x697   :  { %12194 = vmatpush3.bf16.msra.mxu0 %v2375_v12  ;;  %2661 = vadd.xlane.f32.xlu1 %v2660_v49  ;;  %v14359_v46 = vld [vmem:[%s14356_s14 + $0x8] sm:$0xff]   ;;  %v14362_v12 = vld [vmem:[%s14356_s14 + $0x18] sm:$0xff]   ;;  %v14372_v49 = vld [vmem:[%s14356_s14 + $0x10] sm:$0xff]  }
 0x698   :  { %v2272_v14 = vpack.c.bf16 %v2268_v34, %v2268_v34  ;;  %12195 = vmatprep.mubr.msk.bf16.mxu0 %vm13592_vm0, %v15944_v0  ;;  %12205 = vmatprep.subr.bf16.mxu0 %v15944_v0  ;;  %v14378_v34 = vld [vmem:[%s14356_s14 + $0x28] sm:$0xff]  }
 0x699   :  { %v13461_v52 = vpop.eup %13460 }
 0x69a   :  { %12190 = vmatmul.mubr.msk.bf16.vlgmr.msra.gmra.mxu1 %vm931_vm2, %v2272_v14  ;;  %v2269_v15 = vmul.f32 %v13461_v52, %v13453_v30  ;;  %v14383_v14 = vld [vmem:[%s14356_s14 + $0x38] sm:$0xff]   ;;  %v14390_v52 = vld [vmem:[%s14356_s14 + $0x20] sm:$0xff]  }
 0x69b   :  { %12200 = vmatpush3.bf16.msra.mxu1 %v2421_v60  ;;  %12201 = vmatprep.mubr.msk.bf16.mxu1 %vm13592_vm0, %v15944_v0  ;;  %v14396_v60 = vld [vmem:[%s14356_s14 + $0x30] sm:$0xff]  }
 0x69c   :  { %v2273_v47 = vpack.c.bf16 %v2269_v15, %v2269_v15  ;;  %12211 = vmatprep.subr.bf16.mxu1 %v15944_v0 }
 0x69d   :  { %v13463_v16 = vpop.eup %13462 }
 0x69e   :  { %12196 = vmatmul.mubr.msk.bf16.vlgmr.msra.gmra.mxu0 %vm931_vm2, %v2273_v47  ;;  %v2270_v17 = vmul.f32 %v13463_v16, %v13455_v39 }
 0x69f   :  { %12206 = vmatpush3.bf16.msra.mxu0 %v13961_v41  ;;  %12207 = vmatprep.mubr.msk.bf16.mxu0 %vm13592_vm0, %v15944_v0 }
 0x6a0   :  { %v2274_v56 = vpack.c.bf16 %v2270_v17, %v2270_v17  ;;  %12217 = vmatprep.subr.bf16.mxu0 %v15944_v0 }
 0x6a2   :  { %12202 = vmatmul.mubr.msk.bf16.vlgmr.msra.gmra.mxu1 %vm931_vm2, %v2274_v56 }
 0x6a3   :  { %12212 = vmatpush3.bf16.msra.mxu1 %v13974_v48  ;;  %12213 = vmatprep.mubr.msk.bf16.mxu1 %vm13592_vm0, %v15944_v0 }
 0x6a4   :  { %12223 = vmatprep.subr.bf16.mxu1 %v15944_v0 }
 0x720   :  { %v2662_v41 = vpop.xlane.xlu1 %2661 }
 0x721   :  { %v2666_v48 = vmul.f32 0.03125, %v2662_v41 }
 0x723   :  { %v2668_v18 = vadd.f32 1e-05, %v2666_v48 }
 0x725   :  { %13464 = vrsqrt.f32 %v2668_v18 }
 0x732   :  { %v13465_v22 = vpop.eup %13464 }
 0x733   :  { %v2672_v24 = vmul.f32 %v13465_v22, %v2656_v3  ;;  %v14316_v3 = vld [vmem:[%s14203_s22 + $0x28] sm:$0xff]  }
 0x735   :  { %v2680_v59 = vmul.f32 %v14226_v27, %v2672_v24 }
 0x737   :  { %v14252_v30 = vadd.f32 %v14238_v7, %v2680_v59 }
 0x739   :  { %v2755_v42 = vpack.c.bf16 %v14252_v30, %v14252_v30 }
 0x756   :  { %v2319_v19 = vpop.f32.mrf.mxu0 }
 0x757   :  { %v2463_v20 = vpack.c.bf16 %v2319_v19, %v2319_v19 }
 0x758   :  { %v12185_v5 = vpop.f32.mrf.mxu0 }
 0x759   :  { %12208 = vmatmul.mubr.msk.bf16.vlgmr.msra.gmra.mxu0 %vm931_vm2, %v2463_v20 }
 0x75a   :  { %v2322_v57 = vpop.f32.mrf.mxu0  ;;  %v2365_v23 = vpop.f32.mrf.mxu1  ;;  %12218 = vmatpush3.bf16.msra.mxu0 %v13980_v54  ;;  %12219 = vmatprep.mubr.msk.bf16.mxu0 %vm13592_vm0, %v15944_v0  ;;  %v14231_v54 = vld [vmem:[%s14198_s16 + $0x8] sm:$0xff]  }
 0x75b   :  { %v2464_v25 = vpack.c.bf16 %v2365_v23, %v2365_v23  ;;  %12229 = vmatprep.subr.bf16.mxu0 %v15944_v0 }
 0x75c   :  { %v12186_v26 = vpop.f32.mrf.mxu0  ;;  %v12191_v6 = vpop.f32.mrf.mxu1 }
 0x75d   :  { %12214 = vmatmul.mubr.msk.bf16.vlgmr.msra.gmra.mxu1 %vm931_vm2, %v2464_v25 }
 0x75e   :  { %v2368_v28 = vpop.f32.mrf.mxu1  ;;  %v2411_v29 = vpop.f32.mrf.mxu0  ;;  %12224 = vmatpush3.bf16.msra.mxu1 %v13989_v36  ;;  %12225 = vmatprep.mubr.msk.bf16.mxu1 %vm13592_vm0, %v15944_v0 }
 0x75f   :  { %v2465_v44 = vpack.c.bf16 %v2411_v29, %v2411_v29  ;;  %12237 = vmatprep.subr.bf16.mxu1 %v15944_v0 }
 0x760   :  { %v12192_v62 = vpop.f32.mrf.mxu1  ;;  %v12197_v63 = vpop.f32.mrf.mxu0 }
 0x761   :  { %12220 = vmatmul.mubr.msk.bf16.vlgmr.msra.gmra.mxu0 %vm931_vm2, %v2465_v44 }
 0x762   :  { %v2414_v38 = vpop.f32.mrf.mxu0  ;;  %v2457_v36 = vpop.f32.mrf.mxu1  ;;  %12230 = vmatpush3.bf16.msra.mxu0 %v14231_v54  ;;  %12233 = vmatprep.mubr.msk.bf16.mxu0 %vm13592_vm0, %v15944_v0 }
 0x763   :  { %v2466_v40 = vpack.c.bf16 %v2457_v36, %v2457_v36  ;;  %12231 = vmatprep.subr.bf16.mxu0 %v15944_v0 }
 0x764   :  { %v12198_v43 = vpop.f32.mrf.mxu0  ;;  %v12203_v35 = vpop.f32.mrf.mxu1 }
 0x765   :  { %12226 = vmatmul.mubr.msk.bf16.vlgmr.msra.gmra.mxu1 %vm931_vm2, %v2466_v40 }
 0x766   :  { %v2460_v39 = vpop.f32.mrf.mxu1  ;;  %12232 = vmatpush3.bf16.msra.mxu0 %v14243_v32  ;;  %12238 = vmatpush3.bf16.msra.mxu1 %v14246_v33 }
 0x767   :  { %12239 = vmatprep.subr.bf16.mxu1 %v15944_v0  ;;  %12245 = vmatprep.subr.bf16.mxu0 %v15944_v0 }
 0x768   :  { %v12204_v37 = vpop.f32.mrf.mxu1  ;;  %12241 = vmatprep.mubr.msk.bf16.mxu1 %vm13592_vm0, %v15944_v0 }
 0x769   :  { %12234 = vmatmul.mubr.msk.bf16.vlgmr.msra.gmra.mxu0 %vm259_vm1, %v2755_v42 }
 0x76a   :  { %12240 = vmatpush3.bf16.msra.mxu1 %v14258_v31  ;;  %12246 = vmatpush3.bf16.msra.mxu0 %v14261_v61 }
 0x76b   :  { %12247 = vmatprep.subr.bf16.mxu0 %v15944_v0  ;;  %12253 = vmatprep.subr.bf16.mxu1 %v15944_v0 }
 0x76c   :  { %12249 = vmatprep.mubr.msk.bf16.mxu0 %vm13592_vm0, %v15944_v0 }
 0x76d   :  { %12242 = vmatmul.mubr.msk.bf16.vlgmr.msra.gmra.mxu1 %vm259_vm1, %v2755_v42 }
 0x76e   :  { %12248 = vmatpush3.bf16.msra.mxu0 %v14273_v21  ;;  %12254 = vmatpush3.bf16.msra.mxu1 %v14276_v50 }
 0x76f   :  { %12255 = vmatprep.subr.bf16.mxu1 %v15944_v0  ;;  %12261 = vmatprep.subr.bf16.mxu0 %v15944_v0 }
 0x770   :  { %12257 = vmatprep.mubr.msk.bf16.mxu1 %vm13592_vm0, %v15944_v0 }
 0x771   :  { %12250 = vmatmul.mubr.msk.bf16.vlgmr.msra.gmra.mxu0 %vm259_vm1, %v2755_v42 }
 0x772   :  { %12256 = vmatpush3.bf16.msra.mxu1 %v14286_v51  ;;  %12262 = vmatpush3.bf16.msra.mxu0 %v14289_v55 }
 0x773   :  { %12263 = vmatprep.subr.bf16.mxu0 %v15944_v0  ;;  %12269 = vmatprep.subr.bf16.mxu1 %v15944_v0 }
 0x774   :  { %12265 = vmatprep.mubr.msk.bf16.mxu0 %vm13592_vm0, %v15944_v0 }
 0x775   :  { %12258 = vmatmul.mubr.msk.bf16.vlgmr.msra.gmra.mxu1 %vm259_vm1, %v2755_v42 }
 0x776   :  { %12264 = vmatpush3.bf16.msra.mxu0 %v14299_v8  ;;  %12270 = vmatpush3.bf16.msra.mxu1 %v14302_v58 }
 0x777   :  { %12271 = vmatprep.subr.bf16.mxu1 %v15944_v0  ;;  %12277 = vmatprep.subr.bf16.mxu0 %v15944_v0 }
 0x778   :  { %12273 = vmatprep.mubr.msk.bf16.mxu1 %vm13592_vm0, %v15944_v0 }
 0x779   :  { %12266 = vmatmul.mubr.msk.bf16.vlgmr.msra.gmra.mxu0 %vm259_vm1, %v13355_v1 }
 0x77a   :  { %12272 = vmatpush3.bf16.msra.mxu1 %v14313_v2  ;;  %12278 = vmatpush3.bf16.msra.mxu0 %v14316_v3 }
 0x77b   :  { %12279 = vmatprep.subr.bf16.mxu0 %v15944_v0  ;;  %12285 = vmatprep.subr.bf16.mxu1 %v15944_v0 }
 0x77c   :  { %12281 = vmatprep.mubr.msk.bf16.mxu0 %vm13592_vm0, %v15944_v0 }
 0x77d   :  { %12274 = vmatmul.mubr.msk.bf16.vlgmr.msra.gmra.mxu1 %vm259_vm1, %v13355_v1 }
 0x77e   :  { %12280 = vmatpush3.bf16.msra.mxu0 %v14326_v4  ;;  %12286 = vmatpush3.bf16.msra.mxu1 %v14329_v9 }
 0x77f   :  { %12287 = vmatprep.subr.bf16.mxu1 %v15944_v0  ;;  %12289 = vmatprep.mubr.msk.bf16.mxu1 %vm13592_vm0, %v15944_v0 }
 0x780   :  { %12293 = vmatprep.subr.bf16.mxu0 %v15944_v0 }
 0x781   :  { %12282 = vmatmul.mubr.msk.bf16.vlgmr.msra.gmra.mxu0 %vm259_vm1, %v13355_v1 }
 0x782   :  { %12288 = vmatpush3.bf16.msra.mxu1 %v14339_v10  ;;  %12297 = vmatprep.mubr.msk.bf16.mxu0 %vm13592_vm0, %v15944_v0 }
 0x783   :  { %12301 = vmatprep.subr.bf16.mxu1 %v15944_v0  ;;  %12294 = vmatpush3.bf16.msra.mxu0 %v14359_v46 }
 0x784   :  { %12295 = vmatprep.subr.bf16.mxu0 %v15944_v0 }
 0x785   :  { %12290 = vmatmul.mubr.msk.bf16.vlgmr.msra.gmra.mxu1 %vm259_vm1, %v13355_v1 }
 0x786   :  { %12305 = vmatprep.mubr.msk.bf16.mxu1 %vm13592_vm0, %v15944_v0  ;;  %12302 = vmatpush3.bf16.msra.mxu1 %v14362_v12 }
 0x787   :  { %12303 = vmatprep.subr.bf16.mxu1 %v15944_v0  ;;  %12296 = vmatpush3.bf16.msra.mxu0 %v14368_v13 }
 0x788   :  { %12309 = vmatprep.subr.bf16.mxu0 %v15944_v0 }
 0x78a   :  { %12304 = vmatpush3.bf16.msra.mxu1 %v14372_v49  ;;  %12298 = vmatmul.mubr.msk.bf16.vlgmr.msra.gmra.mxu0 %vm259_vm1, %v13355_v1 }
 0x78b   :  { %12317 = vmatprep.subr.bf16.mxu1 %v15944_v0  ;;  %12310 = vmatpush3.bf16.msra.mxu0 %v14378_v34 }
 0x78c   :  { %12311 = vmatprep.subr.bf16.mxu0 %v15944_v0  ;;  %12313 = vmatprep.mubr.msk.bf16.mxu0 %vm13592_vm0, %v15944_v0 }
 0x78d   :  { %12306 = vmatmul.mubr.msk.bf16.vlgmr.msra.gmra.mxu1 %vm259_vm1, %v13355_v1 }
 0x78e   :  { %12318 = vmatpush3.bf16.msra.mxu1 %v14383_v14  ;;  %12321 = vmatprep.mubr.msk.bf16.mxu1 %vm13592_vm0, %v15944_v0 }
 0x78f   :  { %12319 = vmatprep.subr.bf16.mxu1 %v15944_v0  ;;  %12312 = vmatpush3.bf16.msra.mxu0 %v14390_v52 }
 0x790   :  { %12325 = vmatprep.subr.bf16.mxu0 %v15944_v0 }
 0x792   :  { %12320 = vmatpush3.bf16.msra.mxu1 %v14396_v60  ;;  %12314 = vmatmul.mubr.msk.bf16.vlgmr.msra.gmra.mxu0 %vm259_vm1, %v13355_v1 }
 0x793   :  { %12331 = vmatprep.subr.bf16.mxu1 %v15944_v0  ;;  %12327 = vmatprep.mubr.msk.bf16.mxu0 %vm13592_vm0, %v15944_v0 }
 0x795   :  { %12322 = vmatmul.mubr.msk.bf16.vlgmr.msra.gmra.mxu1 %vm259_vm1, %v13355_v1 }
 0x796   :  { %12333 = vmatprep.mubr.msk.bf16.mxu1 %vm13592_vm0, %v15944_v0 }
 0x819   :  { %v2504_v15 = vpop.f32.mrf.mxu0 }
 0x81b   :  { %v12209_v47 = vpop.f32.mrf.mxu0 }
 0x81d   :  { %v2507_v16 = vpop.f32.mrf.mxu0  ;;  %v2547_v17 = vpop.f32.mrf.mxu1 }
 0x81e   :  { %v2639_v56 = vadd.f32 %v2547_v17, %v2504_v15  ;;  %v14423_v15 = vld [vmem:[%s14415_s20] ss:$0 sm:$0xff] }
 0x81f   :  { %v12210_v41 = vpop.f32.mrf.mxu0  ;;  %v12215_v48 = vpop.f32.mrf.mxu1 }
 0x820   :  { %v14427_v48 = vld [vmem:[%s14415_s20 + $0x1] ss:$0 sm:$0xff] }
 0x821   :  { %v2550_v18 = vpop.f32.mrf.mxu1  ;;  %v2590_v19 = vpop.f32.mrf.mxu0 }
 0x822   :  { %v2640_v20 = vadd.f32 %v2639_v56, %v2590_v19  ;;  %v14430_v19 = vld [vmem:[%s14420_s28] ss:$0 sm:$0xff] }
 0x823   :  { %v12216_v22 = vpop.f32.mrf.mxu1  ;;  %v12221_v5 = vpop.f32.mrf.mxu0 }
 0x825   :  { %v2593_v57 = vpop.f32.mrf.mxu0  ;;  %v2633_v23 = vpop.f32.mrf.mxu1 }
 0x826   :  { %v14410_v24 = vadd.f32 %v2640_v20, %v2633_v23 }
 0x827   :  { %v12222_v25 = vpop.f32.mrf.mxu0  ;;  %v12227_v26 = vpop.f32.mrf.mxu1 }
 0x828   :  { %v14435_v26 = vld [vmem:[%s14415_s20 + $0x2] ss:$0 sm:$0xff] }
 0x829   :  { %v2636_v6 = vpop.f32.mrf.mxu1  ;;  %v2830_v28 = vpop.f32.mrf.mxu0 }
 0x82a   :  { %v2831_v6 = vadd.f32 %v14430_v19, %v2830_v28 }
 0x82b   :  { %v12228_v29 = vpop.f32.mrf.mxu1  ;;  %v12235_v44 = vpop.f32.mrf.mxu0 }
 0x82c   :  { %v14440_v44 = vld [vmem:[%s14420_s28 + $0x1] ss:$0 sm:$0xff] }
 0x82d   :  { %v2833_v59 = vpop.f32.mrf.mxu0  ;;  %v2882_v62 = vpop.f32.mrf.mxu1 }
 0x82e   :  { %v2883_v28 = vadd.f32 %v14440_v44, %v2882_v62 }
 0x82f   :  { %v12236_v63 = vpop.f32.mrf.mxu0  ;;  %v12243_v38 = vpop.f32.mrf.mxu1 }
 0x830   :  { %v3460_v62 = vpack.c.bf16 %v2883_v28, %v2883_v28 }
 0x831   :  { %v2885_v36 = vpop.f32.mrf.mxu1  ;;  %v2934_v40 = vpop.f32.mrf.mxu0 }
 0x833   :  { %v12244_v43 = vpop.f32.mrf.mxu1  ;;  %v12251_v35 = vpop.f32.mrf.mxu0 }
 0x835   :  { %v2937_v39 = vpop.f32.mrf.mxu0  ;;  %v2986_v42 = vpop.f32.mrf.mxu1 }
 0x836   :  { %v14445_v39 = vld [vmem:[%s14415_s20 + $0x3] ss:$0 sm:$0xff] }
 0x837   :  { %v12252_v37 = vpop.f32.mrf.mxu0  ;;  %v12259_v1 = vpop.f32.mrf.mxu1 }
 0x838   :  { %v3459_v37 = vpack.c.bf16 %v2831_v6, %v2831_v6 }
 0x839   :  { %v2989_v47 = vpop.f32.mrf.mxu1  ;;  %v3065_v16 = vpop.f32.mrf.mxu0 }
 0x83a   :  { %v3066_v17 = vadd.f32 %v14423_v15, %v3065_v16  ;;  %v14450_v47 = vld [vmem:[%s14420_s28 + $0x2] ss:$0 sm:$0xff] }
 0x83b   :  { %v12260_v56 = vpop.f32.mrf.mxu1  ;;  %v12267_v41 = vpop.f32.mrf.mxu0 }
 0x83c   :  { %v3463_v18 = vpack.c.bf16 %v3066_v17, %v3066_v17 }
 0x83d   :  { %v3068_v20 = vpop.f32.mrf.mxu0  ;;  %v3117_v22 = vpop.f32.mrf.mxu1 }
 0x83e   :  { %v3471_v5 = vsel %vm931_vm2, %v3463_v18, 0  ;;  %v3118_v57 = vadd.f32 %v14427_v48, %v3117_v22  ;;  %v2935_v22 = vadd.f32 %v14450_v47, %v2934_v40 }
 0x83f   :  { %v12268_v23 = vpop.f32.mrf.mxu0  ;;  %v12275_v25 = vpop.f32.mrf.mxu1  ;;  %12326 = vmatpush3.bf16.xpose.msra.mxu0 %v3471_v5 }
 0x840   :  { %v3464_v29 = vpack.c.bf16 %v3118_v57, %v3118_v57  ;;  %12337 = vmatprep.subr.bf16.mxu0 %v15944_v0  ;;  %v14460_v57 = vld [vmem:[%s14420_s28 + $0x3] ss:$0 sm:$0xff] }
 0x841   :  { %v3120_v59 = vpop.f32.mrf.mxu1  ;;  %v3169_v63 = vpop.f32.mrf.mxu0 }
 0x842   :  { %v3517_v38 = vsel %vm931_vm2, %v3464_v29, 0  ;;  %v3170_v36 = vadd.f32 %v14435_v26, %v3169_v63  ;;  %v3461_v29 = vpack.c.bf16 %v2935_v22, %v2935_v22  ;;  %v2987_v59 = vadd.f32 %v14460_v57, %v2986_v42  ;;  %v14480_v42 = vld [vmem:[%s14477_s5] ss:$0 sm:$0xff]  ;;  %v14483_v63 = vld [vmem:[%s14477_s5 + $0x1] ss:$0 sm:$0xff] }
 0x843   :  { %v12276_v43 = vpop.f32.mrf.mxu1  ;;  %v12283_v35 = vpop.f32.mrf.mxu0  ;;  %12332 = vmatpush3.bf16.xpose.msra.mxu1 %v3517_v38 }
 0x844   :  { %v3465_v1 = vpack.c.bf16 %v3170_v36, %v3170_v36  ;;  %12343 = vmatprep.subr.bf16.mxu1 %v15944_v0  ;;  %v3462_v40 = vpack.c.bf16 %v2987_v59, %v2987_v59 }
 0x845   :  { %v3172_v16 = vpop.f32.mrf.mxu0  ;;  %v3221_v17 = vpop.f32.mrf.mxu1 }
 0x846   :  { %v3563_v56 = vsel %vm931_vm2, %v3465_v1, 0  ;;  %v3222_v41 = vadd.f32 %v14445_v39, %v3221_v17  ;;  %12328 = vmatmul.mubr.msk.bf16.vlgmr.msra.gmra.mxu0 %vm931_vm2, %v3459_v37 }
 0x847   :  { %v12284_v18 = vpop.f32.mrf.mxu0  ;;  %v12291_v20 = vpop.f32.mrf.mxu1  ;;  %12338 = vmatpush3.bf16.xpose.msra.mxu0 %v3563_v56  ;;  %12339 = vmatprep.mubr.msk.bf16.mxu0 %vm13592_vm0, %v15944_v0 }
 0x848   :  { %v3466_v5 = vpack.c.bf16 %v3222_v41, %v3222_v41  ;;  %12349 = vmatprep.subr.bf16.mxu0 %v15944_v0 }
 0x849   :  { %v3224_v23 = vpop.f32.mrf.mxu1 }
 0x84a   :  { %v3609_v25 = vsel %vm931_vm2, %v3466_v5, 0  ;;  %12334 = vmatmul.mubr.msk.bf16.vlgmr.msra.gmra.mxu1 %vm931_vm2, %v3460_v62  ;;  %v3297_v38 = vpop.f32.mrf.mxu0 }
 0x84b   :  { %v12292_v6 = vpop.f32.mrf.mxu1  ;;  %12344 = vmatpush3.bf16.xpose.msra.mxu1 %v3609_v25  ;;  %12345 = vmatprep.mubr.msk.bf16.mxu1 %vm13592_vm0, %v15944_v0  ;;  %v3298_v36 = vadd.f32 %v14480_v42, %v3297_v38 }
 0x84c   :  { %12355 = vmatprep.subr.bf16.mxu1 %v15944_v0  ;;  %v12299_v35 = vpop.f32.mrf.mxu0 }
 0x84d   :  { %v3349_v43 = vpop.f32.mrf.mxu1  ;;  %v3699_v28 = vpack.c.bf16 %v3298_v36, %v3298_v36 }
 0x84e   :  { %12340 = vmatmul.mubr.msk.bf16.vlgmr.msra.gmra.mxu0 %vm931_vm2, %v3461_v29  ;;  %v3350_v37 = vadd.f32 %v14483_v63, %v3349_v43  ;;  %v3300_v17 = vpop.f32.mrf.mxu0 }
 0x84f   :  { %12351 = vmatprep.mubr.msk.bf16.mxu0 %vm13592_vm0, %v15944_v0  ;;  %v12307_v1 = vpop.f32.mrf.mxu1  ;;  %v3707_v56 = vsel %vm1171_vm3, %v3699_v28, 0 }
 0x850   :  { %v3700_v16 = vpack.c.bf16 %v3350_v37, %v3350_v37  ;;  %v12300_v20 = vpop.f32.mrf.mxu0  ;;  %12350 = vmatpush3.bf16.msra.mxu0 %v3707_v56 }
 0x851   :  { %v3352_v41 = vpop.f32.mrf.mxu1  ;;  %12361 = vmatprep.subr.bf16.mxu0 %v15944_v0 }
 0x852   :  { %12346 = vmatmul.mubr.msk.bf16.vlgmr.msra.gmra.mxu1 %vm931_vm2, %v3462_v40  ;;  %v3753_v18 = vsel %vm1171_vm3, %v3700_v16, 0  ;;  %v14490_v22 = vpop.f32.mrf.mxu0 }
 0x853   :  { %12357 = vmatprep.mubr.msk.bf16.mxu1 %vm13592_vm0, %v15944_v0  ;;  %v12308_v62 = vpop.f32.mrf.mxu1  ;;  %12356 = vmatpush3.bf16.msra.mxu1 %v3753_v18 }
 0x854   :  { %12367 = vmatprep.subr.bf16.mxu1 %v15944_v0  ;;  %v12315_v23 = vpop.f32.mrf.mxu0 }
 0x855   :  { %v14493_v5 = vpop.f32.mrf.mxu1 }
 0x856   :  { %v3404_v6 = vpop.f32.mrf.mxu0 }
 0x857   :  { %v12323_v25 = vpop.f32.mrf.mxu1 }
 0x858   :  { %v12316_v59 = vpop.f32.mrf.mxu0 }
 0x859   :  { %v3456_v29 = vpop.f32.mrf.mxu1 }
 0x85b   :  { %v12324_v40 = vpop.f32.mrf.mxu1 }
 0x906   :  { %v3507_v38 = vpop.f32.mrf.mxu0 }
 0x907   :  { %v3651_v36 = vsel %vm931_vm2, %v3507_v38, -inf }
 0x908   :  { %3652 = vmax.xlane.f32.xlu0 %v3651_v36  ;;  %v12329_v43 = vpop.f32.mrf.mxu0 }
 0x90a   :  { %v3510_v35 = vpop.f32.mrf.mxu0  ;;  %v3553_v37 = vpop.f32.mrf.mxu1 }
 0x90b   :  { %v3654_v28 = vsel %vm931_vm2, %v3553_v37, -inf }
 0x90c   :  { %3655 = vmax.xlane.f32.xlu1 %v3654_v28  ;;  %v12330_v1 = vpop.f32.mrf.mxu0  ;;  %v12335_v16 = vpop.f32.mrf.mxu1 }
 0x90e   :  { %v3556_v17 = vpop.f32.mrf.mxu1  ;;  %v3599_v56 = vpop.f32.mrf.mxu0 }
 0x90f   :  { %v3657_v41 = vsel %vm931_vm2, %v3599_v56, -inf }
 0x910   :  { %v12336_v18 = vpop.f32.mrf.mxu1  ;;  %3658 = vmax.xlane.f32.xlu0 %v3657_v41  ;;  %v12341_v20 = vpop.f32.mrf.mxu0 }
 0x912   :  { %v3602_v62 = vpop.f32.mrf.mxu0  ;;  %v3645_v23 = vpop.f32.mrf.mxu1 }
 0x913   :  { %v3660_v25 = vsel %vm931_vm2, %v3645_v23, -inf }
 0x914   :  { %3661 = vmax.xlane.f32.xlu1 %v3660_v25  ;;  %v12342_v6 = vpop.f32.mrf.mxu0  ;;  %v12347_v29 = vpop.f32.mrf.mxu1 }
 0x916   :  { %v3648_v59 = vpop.f32.mrf.mxu1 }
 0x918   :  { %v12348_v40 = vpop.f32.mrf.mxu1 }
 0x991   :  { %v3653_v36 = vpop.xlane.xlu0 %3652 }
 0x992   :  { %v3663_v43 = vsub.f32 %v3507_v38, %v3653_v36  ;;  %v2642_v38 = vadd.f32 %v14161_v11, %v14410_v24  ;;  %v14508_v24 = vld [vmem:[%s14477_s5 + $0x2] ss:$0 sm:$0xff] }
 0x994   :  { %v3667_v35 = vmul.f32 1.442695, %v3663_v43 }
 0x995   :  { %v3656_v28 = vpop.xlane.xlu1 %3655 }
 0x996   :  { %13466 = vpow2.f32 %v3667_v35  ;;  %v3664_v1 = vsub.f32 %v3553_v37, %v3656_v28  ;;  %v3402_v28 = vadd.f32 %v14508_v24, %v14490_v22 }
 0x998   :  { %v3669_v16 = vmul.f32 1.442695, %v3664_v1 }
 0x999   :  { %v3659_v17 = vpop.xlane.xlu0 %3658 }
 0x99a   :  { %13468 = vpow2.f32 %v3669_v16  ;;  %v3665_v41 = vsub.f32 %v3599_v56, %v3659_v17 }
 0x99c   :  { %v3671_v18 = vmul.f32 1.442695, %v3665_v41 }
 0x99d   :  { %v3662_v20 = vpop.xlane.xlu1 %3661 }
 0x99e   :  { %13470 = vpow2.f32 %v3671_v18  ;;  %v3666_v62 = vsub.f32 %v3645_v23, %v3662_v20  ;;  %v2644_v23 = vadd.f32 %v2642_v38, %v13999_v45  ;;  %v14513_v45 = vld [vmem:[%s14477_s5 + $0x3] ss:$0 sm:$0xff]  ;;  %v3701_v18 = vpack.c.bf16 %v3402_v28, %v3402_v28 }
 0x99f   :  { %v3454_v20 = vadd.f32 %v14513_v45, %v14493_v5 }
 0x9a0   :  { %v3673_v0 = vmul.f32 1.442695, %v3666_v62  ;;  %v2650_v36 = vsel %vm259_vm1, %v2644_v23, 0.0 }
 0x9a2   :  { %13472 = vpow2.f32 %v3673_v0 }
 0x9a3   :  { %v13467_v25 = vpop.eup %13466 }
 0x9a4   :  { %v3675_v6 = vsel %vm931_vm2, %v13467_v25, 0.0 }
 0x9a5   :  { %3676 = vadd.xlane.f32.xlu0 %v3675_v6 }
 0x9a7   :  { %v13469_v29 = vpop.eup %13468 }
 0x9a8   :  { %v3678_v37 = vsel %vm931_vm2, %v13469_v29, 0.0 }
 0x9a9   :  { %3679 = vadd.xlane.f32.xlu1 %v3678_v37 }
 0x9ab   :  { %v13471_v59 = vpop.eup %13470 }
 0x9ac   :  { %v3681_v56 = vsel %vm931_vm2, %v13471_v59, 0.0 }
 0x9ad   :  { %3682 = vadd.xlane.f32.xlu0 %v3681_v56 }
 0x9af   :  { %v13473_v0 = vpop.eup %13472 }
 0x9b0   :  { %v3684_v40 = vsel %vm931_vm2, %v13473_v0, 0.0 }
 0x9b1   :  { %3685 = vadd.xlane.f32.xlu1 %v3684_v40  ;;  %2651 = vadd.xlane.f32.xlu0 %v2650_v36  ;;  %v3799_v40 = vsel %vm1171_vm3, %v3701_v18, 0  ;;  %v3702_v36 = vpack.c.bf16 %v3454_v20, %v3454_v20 }
 0xa2e   :  { %v3677_v43 = vpop.xlane.xlu0 %3676 }
 0xa2f   :  { %13474 = vrcp.f32 %v3677_v43 }
 0xa32   :  { %v3680_v11 = vpop.xlane.xlu1 %3679 }
 0xa33   :  { %13476 = vrcp.f32 %v3680_v11 }
 0xa36   :  { %v3683_v35 = vpop.xlane.xlu0 %3682 }
 0xa37   :  { %13478 = vrcp.f32 %v3683_v35  ;;  %v15949_v35 = vmov 0.0  }
 0xa3a   :  { %v3686_v1 = vpop.xlane.xlu1 %3685  ;;  %v2652_v16 = vpop.xlane.xlu0 %2651 }
 0xa3b   :  { %13480 = vrcp.f32 %v3686_v1  ;;  %v2655_v17 = vmul.f32 0.03125, %v2652_v16 }
 0xa3c   :  { %v13475_v41 = vpop.eup %13474 }
 0xa3d   :  { %v3691_v62 = vmul.f32 %v13475_v41, %v13467_v25  ;;  %v2657_v6 = vsub.f32 %v2644_v23, %v2655_v17  ;;  %v3845_v25 = vsel %vm1171_vm3, %v3702_v36, 0  ;;  %v2751_v17 = vld [vmem:[%s14537_s13 + $0x4] sm:$0xf] }
 0xa3e   :  { %v14547_v41 = vsel %vm1171_vm3, %v2751_v17, 0 }
 0xa3f   :  { %v3695_v38 = vpack.c.bf16 %v3691_v62, %v3691_v62  ;;  %v2659_v37 = vmul.f32 %v2657_v6, %v2657_v6 }
 0xa40   :  { %v13477_v56 = vpop.eup %13476 }
 0xa41   :  { %v3692_v22 = vmul.f32 %v13477_v56, %v13469_v29  ;;  %12352 = vmatmul.mubr.msk.bf16.vlgmr.msra.gmra.mxu0 %vm931_vm2, %v3695_v38  ;;  %v2663_v43 = vsel %vm259_vm1, %v2659_v37, 0.0  ;;  %v2752_v38 = vld [vmem:[%s14537_s13 + $0x8] sm:$0xf] }
 0xa42   :  { %12362 = vmatpush3.bf16.msra.mxu0 %v3799_v40  ;;  %2664 = vadd.xlane.f32.xlu1 %v2663_v43  ;;  %v14553_v40 = vsel %vm1171_vm3, %v2752_v38, 0  ;;  %v2753_v43 = vld [vmem:[%s14537_s13 + $0xc] sm:$0xf] }
 0xa43   :  { %v3696_v11 = vpack.c.bf16 %v3692_v22, %v3692_v22  ;;  %12363 = vmatprep.mubr.msk.bf16.mxu0 %vm13592_vm0, %v15949_v35  ;;  %12373 = vmatprep.subr.bf16.mxu0 %v15949_v35 }
 0xa44   :  { %v13479_v5 = vpop.eup %13478 }
 0xa45   :  { %v3693_v23 = vmul.f32 %v13479_v5, %v13471_v59  ;;  %12358 = vmatmul.mubr.msk.bf16.vlgmr.msra.gmra.mxu1 %vm931_vm2, %v3696_v11  ;;  %v2750_v59 = vld [vmem:[%s14537_s13] sm:$0xf] }
 0xa46   :  { %12368 = vmatpush3.bf16.msra.mxu1 %v3845_v25  ;;  %12369 = vmatprep.mubr.msk.bf16.mxu1 %vm13592_vm0, %v15949_v35 }
 0xa47   :  { %v3697_v29 = vpack.c.bf16 %v3693_v23, %v3693_v23  ;;  %12379 = vmatprep.subr.bf16.mxu1 %v15949_v35 }
 0xa48   :  { %v13481_v28 = vpop.eup %13480 }
 0xa49   :  { %v3694_v1 = vmul.f32 %v13481_v28, %v13473_v0  ;;  %12364 = vmatmul.mubr.msk.bf16.vlgmr.msra.gmra.mxu0 %vm931_vm2, %v3697_v29  ;;  %v14541_v0 = vsel %vm1171_vm3, %v2750_v59, 0  ;;  %v14561_v29 = vsel %vm1171_vm3, %v2753_v43, 0 }
 0xa4a   :  { %12375 = vmatprep.mubr.msk.bf16.mxu0 %vm13592_vm0, %v15949_v35  ;;  %12374 = vmatpush3.bf16.msra.mxu0 %v14541_v0 }
 0xa4b   :  { %v3698_v16 = vpack.c.bf16 %v3694_v1, %v3694_v1  ;;  %12385 = vmatprep.subr.bf16.mxu0 %v15949_v35 }
 0xa4d   :  { %12370 = vmatmul.mubr.msk.bf16.vlgmr.msra.gmra.mxu1 %vm931_vm2, %v3698_v16 }
 0xa4e   :  { %12381 = vmatprep.mubr.msk.bf16.mxu1 %vm13592_vm0, %v15949_v35  ;;  %12380 = vmatpush3.bf16.msra.mxu1 %v14547_v41 }
 0xa4f   :  { %12391 = vmatprep.subr.bf16.mxu1 %v15949_v35 }
 0xacb   :  { %v2665_v18 = vpop.xlane.xlu1 %2664 }
 0xacc   :  { %v2667_v20 = vmul.f32 0.03125, %v2665_v18 }
 0xace   :  { %v2669_v62 = vadd.f32 1e-05, %v2667_v20 }
 0xad0   :  { %13482 = vrsqrt.f32 %v2669_v62 }
 0xadd   :  { %v13483_v36 = vpop.eup %13482 }
 0xade   :  { %v2673_v25 = vmul.f32 %v13483_v36, %v2657_v6 }
 0xae0   :  { %v2681_v17 = vmul.f32 %v14226_v27, %v2673_v25 }
 0xb01   :  { %v3743_v37 = vpop.f32.mrf.mxu0 }
 0xb02   :  { %v3887_v56 = vpack.c.bf16 %v3743_v37, %v3743_v37 }
 0xb03   :  { %v12353_v22 = vpop.f32.mrf.mxu0 }
 0xb04   :  { %12376 = vmatmul.mubr.msk.bf16.vlgmr.msra.gmra.mxu0 %vm931_vm2, %v3887_v56  ;;  %v14576_v56 = vadd.f32 %v14238_v7, %v2681_v17  ;;  %v13369_v7 = vld [vmem:[%s14208_s27 + $0x4] ss:$0 sps:$4 sm:$0xff]  }
 0xb05   :  { %v3746_v11 = vpop.f32.mrf.mxu0  ;;  %v3789_v5 = vpop.f32.mrf.mxu1  ;;  %12386 = vmatpush3.bf16.msra.mxu0 %v14553_v40  ;;  %12387 = vmatprep.mubr.msk.bf16.mxu0 %vm13592_vm0, %v15949_v35 }
 0xb06   :  { %v3888_v23 = vpack.c.bf16 %v3789_v5, %v3789_v5  ;;  %12397 = vmatprep.subr.bf16.mxu0 %v15949_v35 }
 0xb07   :  { %v12354_v28 = vpop.f32.mrf.mxu0  ;;  %v12359_v1 = vpop.f32.mrf.mxu1 }
 0xb08   :  { %12382 = vmatmul.mubr.msk.bf16.vlgmr.msra.gmra.mxu1 %vm931_vm2, %v3888_v23 }
 0xb09   :  { %v3792_v16 = vpop.f32.mrf.mxu1  ;;  %v3835_v59 = vpop.f32.mrf.mxu0  ;;  %12392 = vmatpush3.bf16.msra.mxu1 %v14561_v29  ;;  %12393 = vmatprep.mubr.msk.bf16.mxu1 %vm13592_vm0, %v15949_v35 }
 0xb0a   :  { %v3889_v6 = vpack.c.bf16 %v3835_v59, %v3835_v59  ;;  %12405 = vmatprep.subr.bf16.mxu1 %v15949_v35 }
 0xb0b   :  { %v12360_v18 = vpop.f32.mrf.mxu1  ;;  %v12365_v20 = vpop.f32.mrf.mxu0 }
 0xb0c   :  { %12388 = vmatmul.mubr.msk.bf16.vlgmr.msra.gmra.mxu0 %vm931_vm2, %v3889_v6 }
 0xb0d   :  { %v3838_v62 = vpop.f32.mrf.mxu0  ;;  %v3881_v38 = vpop.f32.mrf.mxu1  ;;  %12398 = vmatpush3.bf16.msra.mxu0 %v14231_v54  ;;  %12401 = vmatprep.mubr.msk.bf16.mxu0 %vm13592_vm0, %v15949_v35  ;;  %v4085_v54 = vpack.c.bf16 %v14576_v56, %v14576_v56 }
 0xb0e   :  { %v3890_v37 = vpack.c.bf16 %v3881_v38, %v3881_v38  ;;  %12399 = vmatprep.subr.bf16.mxu0 %v15949_v35 }
 0xb0f   :  { %v12366_v27 = vpop.f32.mrf.mxu0  ;;  %v12371_v36 = vpop.f32.mrf.mxu1 }
 0xb10   :  { %12394 = vmatmul.mubr.msk.bf16.vlgmr.msra.gmra.mxu1 %vm931_vm2, %v3890_v37 }
 0xb11   :  { %v3884_v22 = vpop.f32.mrf.mxu1  ;;  %12400 = vmatpush3.bf16.msra.mxu0 %v14243_v32  ;;  %12406 = vmatpush3.bf16.msra.mxu1 %v14246_v33 }
 0xb12   :  { %12407 = vmatprep.subr.bf16.mxu1 %v15949_v35  ;;  %12413 = vmatprep.subr.bf16.mxu0 %v15949_v35 }
 0xb13   :  { %v12372_v43 = vpop.f32.mrf.mxu1  ;;  %12409 = vmatprep.mubr.msk.bf16.mxu1 %vm13592_vm0, %v15949_v35 }
 0xb14   :  { %12402 = vmatmul.mubr.msk.bf16.vlgmr.msra.gmra.mxu0 %vm259_vm1, %v4085_v54 }
 0xb15   :  { %12408 = vmatpush3.bf16.msra.mxu1 %v14258_v31  ;;  %12414 = vmatpush3.bf16.msra.mxu0 %v14261_v61 }
 0xb16   :  { %12415 = vmatprep.subr.bf16.mxu0 %v15949_v35  ;;  %12421 = vmatprep.subr.bf16.mxu1 %v15949_v35 }
 0xb17   :  { %12417 = vmatprep.mubr.msk.bf16.mxu0 %vm13592_vm0, %v15949_v35 }
 0xb18   :  { %12410 = vmatmul.mubr.msk.bf16.vlgmr.msra.gmra.mxu1 %vm259_vm1, %v4085_v54 }
 0xb19   :  { %12416 = vmatpush3.bf16.msra.mxu0 %v14273_v21  ;;  %12422 = vmatpush3.bf16.msra.mxu1 %v14276_v50 }
 0xb1a   :  { %12423 = vmatprep.subr.bf16.mxu1 %v15949_v35  ;;  %12429 = vmatprep.subr.bf16.mxu0 %v15949_v35 }
 0xb1b   :  { %12425 = vmatprep.mubr.msk.bf16.mxu1 %vm13592_vm0, %v15949_v35 }
 0xb1c   :  { %12418 = vmatmul.mubr.msk.bf16.vlgmr.msra.gmra.mxu0 %vm259_vm1, %v4085_v54 }
 0xb1d   :  { %12424 = vmatpush3.bf16.msra.mxu1 %v14286_v51  ;;  %12430 = vmatpush3.bf16.msra.mxu0 %v14289_v55 }
 0xb1e   :  { %12431 = vmatprep.subr.bf16.mxu0 %v15949_v35  ;;  %12437 = vmatprep.subr.bf16.mxu1 %v15949_v35 }
 0xb1f   :  { %12433 = vmatprep.mubr.msk.bf16.mxu0 %vm13592_vm0, %v15949_v35 }
 0xb20   :  { %12426 = vmatmul.mubr.msk.bf16.vlgmr.msra.gmra.mxu1 %vm259_vm1, %v4085_v54 }
 0xb21   :  { %12432 = vmatpush3.bf16.msra.mxu0 %v14299_v8  ;;  %12438 = vmatpush3.bf16.msra.mxu1 %v14302_v58 }
 0xb22   :  { %12439 = vmatprep.subr.bf16.mxu1 %v15949_v35  ;;  %12445 = vmatprep.subr.bf16.mxu0 %v15949_v35 }
 0xb23   :  { %12441 = vmatprep.mubr.msk.bf16.mxu1 %vm13592_vm0, %v15949_v35 }
 0xb24   :  { %12434 = vmatmul.mubr.msk.bf16.vlgmr.msra.gmra.mxu0 %vm259_vm1, %v13369_v7 }
 0xb25   :  { %12440 = vmatpush3.bf16.msra.mxu1 %v14313_v2  ;;  %12446 = vmatpush3.bf16.msra.mxu0 %v14316_v3 }
 0xb26   :  { %12447 = vmatprep.subr.bf16.mxu0 %v15949_v35  ;;  %12453 = vmatprep.subr.bf16.mxu1 %v15949_v35 }
 0xb27   :  { %12449 = vmatprep.mubr.msk.bf16.mxu0 %vm13592_vm0, %v15949_v35 }
 0xb28   :  { %12442 = vmatmul.mubr.msk.bf16.vlgmr.msra.gmra.mxu1 %vm259_vm1, %v13369_v7 }
 0xb29   :  { %12448 = vmatpush3.bf16.msra.mxu0 %v14326_v4  ;;  %12454 = vmatpush3.bf16.msra.mxu1 %v14329_v9 }
 0xb2a   :  { %12455 = vmatprep.subr.bf16.mxu1 %v15949_v35  ;;  %12457 = vmatprep.mubr.msk.bf16.mxu1 %vm13592_vm0, %v15949_v35 }
 0xb2b   :  { %12461 = vmatprep.subr.bf16.mxu0 %v15949_v35 }
 0xb2c   :  { %12450 = vmatmul.mubr.msk.bf16.vlgmr.msra.gmra.mxu0 %vm259_vm1, %v13369_v7 }
 0xb2d   :  { %12456 = vmatpush3.bf16.msra.mxu1 %v14339_v10  ;;  %12462 = vmatpush3.bf16.msra.mxu0 %v14359_v46 }
 0xb2e   :  { %12469 = vmatprep.subr.bf16.mxu1 %v15949_v35  ;;  %12463 = vmatprep.subr.bf16.mxu0 %v15949_v35 }
 0xb2f   :  { %12465 = vmatprep.mubr.msk.bf16.mxu0 %vm13592_vm0, %v15949_v35 }
 0xb30   :  { %12458 = vmatmul.mubr.msk.bf16.vlgmr.msra.gmra.mxu1 %vm259_vm1, %v13369_v7 }
 0xb31   :  { %12470 = vmatpush3.bf16.msra.mxu1 %v14362_v12  ;;  %12464 = vmatpush3.bf16.msra.mxu0 %v14368_v13 }
 0xb32   :  { %12471 = vmatprep.subr.bf16.mxu1 %v15949_v35  ;;  %12477 = vmatprep.subr.bf16.mxu0 %v15949_v35 }
 0xb33   :  { %12473 = vmatprep.mubr.msk.bf16.mxu1 %vm13592_vm0, %v15949_v35 }
 0xb34   :  { %12466 = vmatmul.mubr.msk.bf16.vlgmr.msra.gmra.mxu0 %vm259_vm1, %v13369_v7 }
 0xb35   :  { %12472 = vmatpush3.bf16.msra.mxu1 %v14372_v49  ;;  %12478 = vmatpush3.bf16.msra.mxu0 %v14378_v34 }
 0xb36   :  { %12485 = vmatprep.subr.bf16.mxu1 %v15949_v35  ;;  %12479 = vmatprep.subr.bf16.mxu0 %v15949_v35 }
 0xb37   :  { %12481 = vmatprep.mubr.msk.bf16.mxu0 %vm13592_vm0, %v15949_v35 }
 0xb38   :  { %12474 = vmatmul.mubr.msk.bf16.vlgmr.msra.gmra.mxu1 %vm259_vm1, %v13369_v7 }
 0xb39   :  { %12486 = vmatpush3.bf16.msra.mxu1 %v14383_v14  ;;  %12480 = vmatpush3.bf16.msra.mxu0 %v14390_v52 }
 0xb3a   :  { %12487 = vmatprep.subr.bf16.mxu1 %v15949_v35  ;;  %12489 = vmatprep.mubr.msk.bf16.mxu1 %vm13592_vm0, %v15949_v35 }
 0xb3b   :  { %12493 = vmatprep.subr.bf16.mxu0 %v15949_v35 }
 0xb3c   :  { %12482 = vmatmul.mubr.msk.bf16.vlgmr.msra.gmra.mxu0 %vm259_vm1, %v13369_v7 }
 0xb3d   :  { %12488 = vmatpush3.bf16.msra.mxu1 %v14396_v60  ;;  %12495 = vmatprep.mubr.msk.bf16.mxu0 %vm13592_vm0, %v15949_v35 }
 0xb3e   :  { %12499 = vmatprep.subr.bf16.mxu1 %v15949_v35 }
 0xb40   :  { %12490 = vmatmul.mubr.msk.bf16.vlgmr.msra.gmra.mxu1 %vm259_vm1, %v13369_v7 }
 0xb41   :  { %12501 = vmatprep.mubr.msk.bf16.mxu1 %vm13592_vm0, %v15949_v35 }
 0xbc4   :  { %v3931_v32 = vpop.f32.mrf.mxu0 }
 0xbc6   :  { %v12377_v33 = vpop.f32.mrf.mxu0 }
 0xbc8   :  { %v3934_v31 = vpop.f32.mrf.mxu0  ;;  %v3977_v61 = vpop.f32.mrf.mxu1 }
 0xbc9   :  { %v4075_v21 = vadd.f32 %v3977_v61, %v3931_v32 }
 0xbca   :  { %v12378_v50 = vpop.f32.mrf.mxu0  ;;  %v12383_v51 = vpop.f32.mrf.mxu1 }
 0xbcc   :  { %v3980_v55 = vpop.f32.mrf.mxu1  ;;  %v4023_v8 = vpop.f32.mrf.mxu0 }
 0xbcd   :  { %v4076_v58 = vadd.f32 %v4075_v21, %v4023_v8 }
 0xbce   :  { %v12384_v2 = vpop.f32.mrf.mxu1  ;;  %v12389_v3 = vpop.f32.mrf.mxu0 }
 0xbd0   :  { %v4026_v4 = vpop.f32.mrf.mxu0  ;;  %v4069_v9 = vpop.f32.mrf.mxu1 }
 0xbd1   :  { %v14666_v10 = vadd.f32 %v4076_v58, %v4069_v9 }
 0xbd2   :  { %v12390_v46 = vpop.f32.mrf.mxu0  ;;  %v12395_v12 = vpop.f32.mrf.mxu1 }
 0xbd4   :  { %v4072_v13 = vpop.f32.mrf.mxu1  ;;  %v4124_v49 = vpop.f32.mrf.mxu0 }
 0xbd5   :  { %v4125_v33 = vadd.f32 %v14430_v19, %v4124_v49 }
 0xbd6   :  { %v12396_v34 = vpop.f32.mrf.mxu1  ;;  %v12403_v14 = vpop.f32.mrf.mxu0 }
 0xbd7   :  { %v4573_v8 = vpack.c.bf16 %v4125_v33, %v4125_v33 }
 0xbd8   :  { %v4127_v52 = vpop.f32.mrf.mxu0  ;;  %v4164_v60 = vpop.f32.mrf.mxu1 }
 0xbda   :  { %v12404_v11 = vpop.f32.mrf.mxu0  ;;  %v12411_v5 = vpop.f32.mrf.mxu1 }
 0xbdc   :  { %v4167_v25 = vpop.f32.mrf.mxu1  ;;  %v4204_v23 = vpop.f32.mrf.mxu0 }
 0xbde   :  { %v12412_v28 = vpop.f32.mrf.mxu1  ;;  %v12419_v1 = vpop.f32.mrf.mxu0 }
 0xbe0   :  { %v4207_v16 = vpop.f32.mrf.mxu0  ;;  %v4244_v59 = vpop.f32.mrf.mxu1 }
 0xbe2   :  { %v12420_v17 = vpop.f32.mrf.mxu0  ;;  %v12427_v6 = vpop.f32.mrf.mxu1 }
 0xbe4   :  { %v4247_v18 = vpop.f32.mrf.mxu1  ;;  %v4287_v20 = vpop.f32.mrf.mxu0 }
 0xbe5   :  { %v4288_v62 = vadd.f32 %v14423_v15, %v4287_v20 }
 0xbe6   :  { %v12428_v38 = vpop.f32.mrf.mxu1  ;;  %v12435_v37 = vpop.f32.mrf.mxu0 }
 0xbe7   :  { %v4577_v27 = vpack.c.bf16 %v4288_v62, %v4288_v62 }
 0xbe8   :  { %v4290_v36 = vpop.f32.mrf.mxu0  ;;  %v4327_v22 = vpop.f32.mrf.mxu1 }
 0xbe9   :  { %v4585_v54 = vsel %vm931_vm2, %v4577_v27, 0  ;;  %v4328_v43 = vadd.f32 %v14427_v48, %v4327_v22  ;;  %v4165_v48 = vadd.f32 %v14440_v44, %v4164_v60  ;;  %v4205_v44 = vadd.f32 %v14450_v47, %v4204_v23 }
 0xbea   :  { %v12436_v7 = vpop.f32.mrf.mxu0  ;;  %v12443_v32 = vpop.f32.mrf.mxu1  ;;  %12494 = vmatpush3.bf16.xpose.msra.mxu0 %v4585_v54  ;;  %v4245_v47 = vadd.f32 %v14460_v57, %v4244_v59 }
 0xbeb   :  { %v4578_v31 = vpack.c.bf16 %v4328_v43, %v4328_v43  ;;  %12505 = vmatprep.subr.bf16.mxu0 %v15949_v35  ;;  %v4575_v60 = vpack.c.bf16 %v4205_v44, %v4205_v44 }
 0xbec   :  { %v4330_v61 = vpop.f32.mrf.mxu1  ;;  %v4367_v21 = vpop.f32.mrf.mxu0  ;;  %v4576_v16 = vpack.c.bf16 %v4245_v47, %v4245_v47 }
 0xbed   :  { %v4631_v15 = vsel %vm931_vm2, %v4578_v31, 0  ;;  %v4368_v50 = vadd.f32 %v14435_v26, %v4367_v21  ;;  %v4574_v26 = vpack.c.bf16 %v4165_v48, %v4165_v48 }
 0xbee   :  { %v12444_v51 = vpop.f32.mrf.mxu1  ;;  %v12451_v55 = vpop.f32.mrf.mxu0  ;;  %12500 = vmatpush3.bf16.xpose.msra.mxu1 %v4631_v15 }
 0xbef   :  { %v4579_v58 = vpack.c.bf16 %v4368_v50, %v4368_v50  ;;  %12511 = vmatprep.subr.bf16.mxu1 %v15949_v35 }
 0xbf0   :  { %v4370_v2 = vpop.f32.mrf.mxu0  ;;  %v4407_v19 = vpop.f32.mrf.mxu1 }
 0xbf1   :  { %v4677_v3 = vsel %vm931_vm2, %v4579_v58, 0  ;;  %v4408_v4 = vadd.f32 %v14445_v39, %v4407_v19  ;;  %12496 = vmatmul.mubr.msk.bf16.vlgmr.msra.gmra.mxu0 %vm931_vm2, %v4573_v8 }
 0xbf2   :  { %v12452_v9 = vpop.f32.mrf.mxu0  ;;  %v12459_v46 = vpop.f32.mrf.mxu1  ;;  %12506 = vmatpush3.bf16.xpose.msra.mxu0 %v4677_v3  ;;  %12507 = vmatprep.mubr.msk.bf16.mxu0 %vm13592_vm0, %v15949_v35 }
 0xbf3   :  { %v4580_v12 = vpack.c.bf16 %v4408_v4, %v4408_v4  ;;  %12517 = vmatprep.subr.bf16.mxu0 %v15949_v35 }
 0xbf4   :  { %v4410_v13 = vpop.f32.mrf.mxu1  ;;  %v4447_v49 = vpop.f32.mrf.mxu0 }
 0xbf5   :  { %v4723_v34 = vsel %vm931_vm2, %v4580_v12, 0  ;;  %12502 = vmatmul.mubr.msk.bf16.vlgmr.msra.gmra.mxu1 %vm931_vm2, %v4574_v26  ;;  %v4448_v39 = vadd.f32 %v14480_v42, %v4447_v49 }
 0xbf6   :  { %v12460_v14 = vpop.f32.mrf.mxu1  ;;  %12512 = vmatpush3.bf16.xpose.msra.mxu1 %v4723_v34  ;;  %12513 = vmatprep.mubr.msk.bf16.mxu1 %vm13592_vm0, %v15949_v35  ;;  %v12467_v52 = vpop.f32.mrf.mxu0 }
 0xbf7   :  { %v4813_v11 = vpack.c.bf16 %v4448_v39, %v4448_v39  ;;  %12523 = vmatprep.subr.bf16.mxu1 %v15949_v35 }
 0xbf8   :  { %v4487_v5 = vpop.f32.mrf.mxu1  ;;  %v4450_v25 = vpop.f32.mrf.mxu0 }
 0xbf9   :  { %12508 = vmatmul.mubr.msk.bf16.vlgmr.msra.gmra.mxu0 %vm931_vm2, %v4575_v60  ;;  %v4821_v23 = vsel %vm1171_vm3, %v4813_v11, 0  ;;  %v4488_v42 = vadd.f32 %v14483_v63, %v4487_v5  ;;  %v14717_v5 = vld [vmem:[%s14713_s23] ss:$0 sm:$0xff] }
 0xbfa   :  { %v12475_v28 = vpop.f32.mrf.mxu1  ;;  %v12468_v1 = vpop.f32.mrf.mxu0  ;;  %12518 = vmatpush3.bf16.msra.mxu0 %v4821_v23  ;;  %12519 = vmatprep.mubr.msk.bf16.mxu0 %vm13592_vm0, %v15949_v35  ;;  %v4084_v23 = vadd.f32 %v14717_v5, %v14666_v10 }
 0xbfb   :  { %v4814_v17 = vpack.c.bf16 %v4488_v42, %v4488_v42  ;;  %12529 = vmatprep.subr.bf16.mxu0 %v15949_v35 }
 0xbfc   :  { %v4490_v57 = vpop.f32.mrf.mxu1  ;;  %v14697_v59 = vpop.f32.mrf.mxu0 }
 0xbfd   :  { %12514 = vmatmul.mubr.msk.bf16.vlgmr.msra.gmra.mxu1 %vm931_vm2, %v4576_v16  ;;  %v4867_v6 = vsel %vm1171_vm3, %v4814_v17, 0  ;;  %v5181_v16 = vadd.f32 %v4084_v23, %v14252_v30 }
 0xbfe   :  { %v12476_v18 = vpop.f32.mrf.mxu1  ;;  %v12483_v20 = vpop.f32.mrf.mxu0  ;;  %12524 = vmatpush3.bf16.msra.mxu1 %v4867_v6  ;;  %12525 = vmatprep.mubr.msk.bf16.mxu1 %vm13592_vm0, %v15949_v35 }
 0xbff   :  { %12535 = vmatprep.subr.bf16.mxu1 %v15949_v35  ;;  %v5185_v6 = vsel %vm259_vm1, %v5181_v16, 0.0 }
 0xc00   :  { %v14704_v63 = vpop.f32.mrf.mxu1  ;;  %v4530_v62 = vpop.f32.mrf.mxu0 }
 0xc01   :  { %v4528_v62 = vadd.f32 %v14508_v24, %v14697_v59 }
 0xc02   :  { %v12491_v38 = vpop.f32.mrf.mxu1  ;;  %v12484_v37 = vpop.f32.mrf.mxu0 }
 0xc04   :  { %v4570_v27 = vpop.f32.mrf.mxu1 }
 0xc06   :  { %v12492_v36 = vpop.f32.mrf.mxu1 }
 0xc07   :  { %v4815_v36 = vpack.c.bf16 %v4528_v62, %v4528_v62 }
 0xcb1   :  { %v4621_v22 = vpop.f32.mrf.mxu0 }
 0xcb2   :  { %v4765_v54 = vsel %vm931_vm2, %v4621_v22, -inf }
 0xcb3   :  { %4766 = vmax.xlane.f32.xlu0 %v4765_v54  ;;  %v12497_v43 = vpop.f32.mrf.mxu0 }
 0xcb5   :  { %v4624_v7 = vpop.f32.mrf.mxu0  ;;  %v4667_v32 = vpop.f32.mrf.mxu1 }
 0xcb6   :  { %v4768_v33 = vsel %vm931_vm2, %v4667_v32, -inf }
 0xcb7   :  { %4769 = vmax.xlane.f32.xlu1 %v4768_v33  ;;  %v12498_v31 = vpop.f32.mrf.mxu0  ;;  %v12503_v61 = vpop.f32.mrf.mxu1 }
 0xcb8   :  { %v4913_v31 = vsel %vm1171_vm3, %v4815_v36, 0 }
 0xcb9   :  { %v4670_v21 = vpop.f32.mrf.mxu1  ;;  %v4713_v15 = vpop.f32.mrf.mxu0 }
 0xcba   :  { %v4771_v50 = vsel %vm931_vm2, %v4713_v15, -inf }
 0xcbb   :  { %v12504_v51 = vpop.f32.mrf.mxu1  ;;  %4772 = vmax.xlane.f32.xlu0 %v4771_v50  ;;  %v12509_v55 = vpop.f32.mrf.mxu0 }
 0xcbd   :  { %v4716_v8 = vpop.f32.mrf.mxu0  ;;  %v4759_v48 = vpop.f32.mrf.mxu1 }
 0xcbe   :  { %v4774_v58 = vsel %vm931_vm2, %v4759_v48, -inf }
 0xcbf   :  { %4775 = vmax.xlane.f32.xlu1 %v4774_v58  ;;  %v12510_v2 = vpop.f32.mrf.mxu0  ;;  %v12515_v19 = vpop.f32.mrf.mxu1 }
 0xcc1   :  { %v4762_v3 = vpop.f32.mrf.mxu1 }
 0xcc3   :  { %v12516_v4 = vpop.f32.mrf.mxu1 }
 0xd3c   :  { %v4767_v9 = vpop.xlane.xlu0 %4766 }
 0xd3d   :  { %v4777_v46 = vsub.f32 %v4621_v22, %v4767_v9  ;;  %v4568_v22 = vadd.f32 %v14513_v45, %v14704_v63 }
 0xd3f   :  { %v4781_v26 = vmul.f32 1.442695, %v4777_v46  ;;  %v4816_v24 = vpack.c.bf16 %v4568_v22, %v4568_v22 }
 0xd40   :  { %v4770_v44 = vpop.xlane.xlu1 %4769 }
 0xd41   :  { %13484 = vpow2.f32 %v4781_v26  ;;  %v4778_v12 = vsub.f32 %v4667_v32, %v4770_v44  ;;  %v4959_v63 = vsel %vm1171_vm3, %v4816_v24, 0 }
 0xd43   :  { %v4783_v13 = vmul.f32 1.442695, %v4778_v12 }
 0xd44   :  { %v4773_v49 = vpop.xlane.xlu0 %4772 }
 0xd45   :  { %13486 = vpow2.f32 %v4783_v13  ;;  %v4779_v34 = vsub.f32 %v4713_v15, %v4773_v49 }
 0xd47   :  { %v4785_v39 = vmul.f32 1.442695, %v4779_v34 }
 0xd48   :  { %v4776_v14 = vpop.xlane.xlu1 %4775 }
 0xd49   :  { %13488 = vpow2.f32 %v4785_v39  ;;  %v4780_v52 = vsub.f32 %v4759_v48, %v4776_v14 }
 0xd4b   :  { %v4787_v60 = vmul.f32 1.442695, %v4780_v52 }
 0xd4d   :  { %13490 = vpow2.f32 %v4787_v60 }
 0xd4e   :  { %v13485_v47 = vpop.eup %13484 }
 0xd4f   :  { %v4789_v11 = vsel %vm931_vm2, %v13485_v47, 0.0 }
 0xd50   :  { %4790 = vadd.xlane.f32.xlu0 %v4789_v11 }
 0xd52   :  { %v13487_v25 = vpop.eup %13486 }
 0xd53   :  { %v4792_v42 = vsel %vm931_vm2, %v13487_v25, 0.0 }
 0xd54   :  { %4793 = vadd.xlane.f32.xlu1 %v4792_v42 }
 0xd56   :  { %v13489_v28 = vpop.eup %13488 }
 0xd57   :  { %v4795_v1 = vsel %vm931_vm2, %v13489_v28, 0.0 }
 0xd58   :  { %4796 = vadd.xlane.f32.xlu0 %v4795_v1 }
 0xd5a   :  { %v13491_v17 = vpop.eup %13490 }
 0xd5b   :  { %v4798_v57 = vsel %vm931_vm2, %v13491_v17, 0.0 }
 0xd5c   :  { %4799 = vadd.xlane.f32.xlu1 %v4798_v57  ;;  %5186 = vadd.xlane.f32.xlu0 %v5185_v6 }
 0xdd9   :  { %v4791_v18 = vpop.xlane.xlu0 %4790 }
 0xdda   :  { %13492 = vrcp.f32 %v4791_v18 }
 0xddd   :  { %v4794_v20 = vpop.xlane.xlu1 %4793 }
 0xdde   :  { %13494 = vrcp.f32 %v4794_v20 }
 0xde1   :  { %v4797_v10 = vpop.xlane.xlu0 %4796 }
 0xde2   :  { %13496 = vrcp.f32 %v4797_v10 }
 0xde5   :  { %v4800_v38 = vpop.xlane.xlu1 %4799  ;;  %v5187_v37 = vpop.xlane.xlu0 %5186 }
 0xde6   :  { %13498 = vrcp.f32 %v4800_v38  ;;  %v5191_v30 = vmul.f32 0.03125, %v5187_v37 }
 0xde7   :  { %v13493_v27 = vpop.eup %13492 }
 0xde8   :  { %v4805_v54 = vmul.f32 %v13493_v27, %v13485_v47  ;;  %v14730_v43 = vsub.f32 %v5181_v16, %v5191_v30 }
 0xdea   :  { %v4809_v7 = vpack.c.bf16 %v4805_v54, %v4805_v54  ;;  %v5195_v32 = vmul.f32 %v14730_v43, %v14730_v43 }
 0xdeb   :  { %v13495_v33 = vpop.eup %13494 }
 0xdec   :  { %v4806_v59 = vmul.f32 %v13495_v33, %v13487_v25  ;;  %12520 = vmatmul.mubr.msk.bf16.vlgmr.msra.gmra.mxu0 %vm931_vm2, %v4809_v7  ;;  %v5197_v61 = vsel %vm259_vm1, %v5195_v32, 0.0 }
 0xded   :  { %12530 = vmatpush3.bf16.msra.mxu0 %v4913_v31  ;;  %5198 = vadd.xlane.f32.xlu0 %v5197_v61  ;;  %v13372_v31 = vld [vmem:[%s14787_s11 + $0x18] sm:$0xff]  }
 0xdee   :  { %v4810_v21 = vpack.c.bf16 %v4806_v59, %v4806_v59  ;;  %12531 = vmatprep.mubr.msk.bf16.mxu0 %vm13592_vm0, %v15949_v35  ;;  %12541 = vmatprep.subr.bf16.mxu0 %v15949_v35 }
 0xdef   :  { %v13497_v45 = vpop.eup %13496 }
 0xdf0   :  { %v4807_v15 = vmul.f32 %v13497_v45, %v13489_v28  ;;  %12526 = vmatmul.mubr.msk.bf16.vlgmr.msra.gmra.mxu1 %vm931_vm2, %v4810_v21 }
 0xdf1   :  { %12536 = vmatpush3.bf16.msra.mxu1 %v4959_v63  ;;  %12537 = vmatprep.mubr.msk.bf16.mxu1 %vm13592_vm0, %v15949_v35 }
 0xdf2   :  { %v4811_v50 = vpack.c.bf16 %v4807_v15, %v4807_v15  ;;  %12547 = vmatprep.subr.bf16.mxu1 %v15949_v35 }
 0xdf3   :  { %v13499_v51 = vpop.eup %13498 }
 0xdf4   :  { %v4808_v55 = vmul.f32 %v13499_v51, %v13491_v17  ;;  %12532 = vmatmul.mubr.msk.bf16.vlgmr.msra.gmra.mxu0 %vm931_vm2, %v4811_v50  ;;  %v11038_v51 = vld [vmem:[%s14794_s24] ss:$0 sm:$0xff] }
 0xdf5   :  { %12542 = vmatpush3.bf16.msra.mxu0 %v14541_v0  ;;  %12543 = vmatprep.mubr.msk.bf16.mxu0 %vm13592_vm0, %v15949_v35 }
 0xdf6   :  { %v4812_v8 = vpack.c.bf16 %v4808_v55, %v4808_v55  ;;  %12553 = vmatprep.subr.bf16.mxu0 %v15949_v35 }
 0xdf8   :  { %12538 = vmatmul.mubr.msk.bf16.vlgmr.msra.gmra.mxu1 %vm931_vm2, %v4812_v8 }
 0xdf9   :  { %12548 = vmatpush3.bf16.msra.mxu1 %v14547_v41  ;;  %12549 = vmatprep.mubr.msk.bf16.mxu1 %vm13592_vm0, %v15949_v35 }
 0xdfa   :  { %12559 = vmatprep.subr.bf16.mxu1 %v15949_v35 }
 0xe76   :  { %v5199_v24 = vpop.xlane.xlu0 %5198 }
 0xe77   :  { %v5203_v59 = vmul.f32 0.03125, %v5199_v24  ;;  %v14906_v24 = vld [vmem:[%s13635_s6 + $0x78] sm:$0xff]  }
 0xe79   :  { %v5205_v61 = vadd.f32 1e-05, %v5203_v59  ;;  %v14909_v59 = vld [vmem:[%s13664_s17 + $0x68] sm:$0xff]  }
 0xe7b   :  { %13500 = vrsqrt.f32 %v5205_v61  ;;  %v14920_v61 = vld [vmem:[%s13635_s6 + $0x70] sm:$0xff]  }
 0xe88   :  { %v13501_v15 = vpop.eup %13500 }
 0xe89   :  { %v5209_v50 = vmul.f32 %v13501_v15, %v14730_v43  ;;  %v13374_v43 = vld [vmem:[%s14787_s11 + $0x8] sm:$0xff]   ;;  %v14948_v15 = vld [vmem:[%s13664_s17 + $0x50] sm:$0xff]  }
 0xe8b   :  { %v5217_v8 = vmul.f32 %v11038_v51, %v5209_v50  ;;  %v14951_v50 = vld [vmem:[%s13779_s21 + $0x40] sm:$0xff]  }
 0xeac   :  { %v4857_v48 = vpop.f32.mrf.mxu0 }
 0xead   :  { %v5001_v58 = vpack.c.bf16 %v4857_v48, %v4857_v48 }
 0xeae   :  { %v12521_v2 = vpop.f32.mrf.mxu0 }
 0xeaf   :  { %12544 = vmatmul.mubr.msk.bf16.vlgmr.msra.gmra.mxu0 %vm931_vm2, %v5001_v58  ;;  %v11039_v58 = vld [vmem:[%s14799_s7] ss:$0 sm:$0xff]  ;;  %s14863_s7 = sld [smem:[%s15943_s0 + %s13619_s4]]  }
 0xeb0   :  { %v4860_v0 = vpop.f32.mrf.mxu0  ;;  %v4903_v19 = vpop.f32.mrf.mxu1  ;;  %12554 = vmatpush3.bf16.msra.mxu0 %v14553_v40  ;;  %12555 = vmatprep.mubr.msk.bf16.mxu0 %vm13592_vm0, %v15949_v35 }
 0xeb1   :  { %v5002_v3 = vpack.c.bf16 %v4903_v19, %v4903_v19  ;;  %12565 = vmatprep.subr.bf16.mxu0 %v15949_v35  ;;  %v5225_v0 = vadd.f32 %v11039_v58, %v5217_v8  ;;  %v14976_v8 = vld [vmem:[%s13664_s17 + $0x70] sm:$0xff]  }
 0xeb2   :  { %v12522_v41 = vpop.f32.mrf.mxu0  ;;  %v12527_v4 = vpop.f32.mrf.mxu1 }
 0xeb3   :  { %12550 = vmatmul.mubr.msk.bf16.vlgmr.msra.gmra.mxu1 %vm931_vm2, %v5002_v3  ;;  %v13373_v41 = vld [vmem:[%s14787_s11 + $0x10] sm:$0xff]   ;;  %v13375_v4 = vld [vmem:[%s14787_s11] sm:$0xff]  }
 0xeb4   :  { %v4906_v9 = vpop.f32.mrf.mxu1  ;;  %v4949_v46 = vpop.f32.mrf.mxu0  ;;  %12560 = vmatpush3.bf16.msra.mxu1 %v14561_v29  ;;  %12561 = vmatprep.mubr.msk.bf16.mxu1 %vm13592_vm0, %v15949_v35 }
 0xeb5   :  { %v5003_v26 = vpack.c.bf16 %v4949_v46, %v4949_v46  ;;  %12573 = vmatprep.subr.bf16.mxu1 %v15949_v35  ;;  %v11040_v9 = vld [vmem:[%s14819_s19] ss:$0 sm:$0xff] }
 0xeb6   :  { %v12528_v40 = vpop.f32.mrf.mxu1  ;;  %v12533_v44 = vpop.f32.mrf.mxu0 }
 0xeb7   :  { %12556 = vmatmul.mubr.msk.bf16.vlgmr.msra.gmra.mxu0 %vm931_vm2, %v5003_v26 }
 0xeb8   :  { %v4952_v12 = vpop.f32.mrf.mxu0  ;;  %v4995_v13 = vpop.f32.mrf.mxu1  ;;  %12569 = vmatprep.mubr.msk.bf16.mxu0 %vm13592_vm0, %v15949_v35 }
 0xeb9   :  { %v5004_v49 = vpack.c.bf16 %v4995_v13, %v4995_v13 }
 0xeba   :  { %v12534_v34 = vpop.f32.mrf.mxu0  ;;  %v12539_v39 = vpop.f32.mrf.mxu1 }
 0xebb   :  { %12562 = vmatmul.mubr.msk.bf16.vlgmr.msra.gmra.mxu1 %vm931_vm2, %v5004_v49 }
 0xebc   :  { %v4998_v29 = vpop.f32.mrf.mxu1  ;;  %12581 = vmatprep.mubr.msk.bf16.mxu1 %vm13592_vm0, %v15949_v35  ;;  %12574 = vmatpush3.bf16.msra.mxu1 %v13372_v31  ;;  %v14895_v31 = vld [vmem:[%s13664_s17 + $0x40] sm:$0xff]  }
 0xebd   :  { %12575 = vmatprep.subr.bf16.mxu1 %v15949_v35  ;;  %v11044_v29 = vld [vmem:[%s14828_s10] ss:$0 sm:$0xff] }
 0xebe   :  { %v12540_v14 = vpop.f32.mrf.mxu1 }
 0xec0   :  { %12576 = vmatpush3.bf16.msra.mxu1 %v13373_v41 }
 0xec1   :  { %12577 = vmatprep.subr.bf16.mxu1 %v15949_v35 }
 0xec4   :  { %12578 = vmatpush3.bf16.msra.mxu1 %v13374_v43 }
 0xec5   :  { %12579 = vmatprep.subr.bf16.mxu1 %v15949_v35 }
 0xec8   :  { %12580 = vmatpush3.bf16.msra.mxu1 %v13375_v4 }
 0xec9   :  { %12601 = vmatprep.subr.bf16.mxu1 %v15949_v35 }
 0xf6f   :  { %v5042_v52 = vpop.f32.mrf.mxu0 }
 0xf71   :  { %v12545_v60 = vpop.f32.mrf.mxu0 }
 0xf73   :  { %v5045_v47 = vpop.f32.mrf.mxu0  ;;  %v5085_v11 = vpop.f32.mrf.mxu1 }
 0xf74   :  { %v5177_v1 = vadd.f32 %v5085_v11, %v5042_v52 }
 0xf75   :  { %v12546_v25 = vpop.f32.mrf.mxu0  ;;  %v12551_v23 = vpop.f32.mrf.mxu1 }
 0xf77   :  { %v5088_v42 = vpop.f32.mrf.mxu1  ;;  %v5128_v28 = vpop.f32.mrf.mxu0 }
 0xf78   :  { %v5178_v57 = vadd.f32 %v5177_v1, %v5128_v28 }
 0xf79   :  { %v12552_v16 = vpop.f32.mrf.mxu1  ;;  %v12557_v17 = vpop.f32.mrf.mxu0 }
 0xf7b   :  { %v5131_v6 = vpop.f32.mrf.mxu0  ;;  %v5171_v18 = vpop.f32.mrf.mxu1 }
 0xf7c   :  { %v5179_v20 = vadd.f32 %v5178_v57, %v5171_v18  ;;  %v14836_v6 = vld [vmem:[%s13635_s6 + $0x48] sm:$0xff]  }
 0xf7d   :  { %v12558_v10 = vpop.f32.mrf.mxu0  ;;  %v12563_v62 = vpop.f32.mrf.mxu1  ;;  %v14839_v18 = vld [vmem:[%s13635_s6 + $0x68] sm:$0xff]  }
 0xf7e   :  { %v5180_v38 = vadd.f32 %v14717_v5, %v5179_v20  ;;  %v13371_v5 = vld [vmem:[%s14778_s1] sm:$0xff]  }
 0xf7f   :  { %v5174_v37 = vpop.f32.mrf.mxu1  ;;  %v14846_v20 = vld [vmem:[%s13635_s6 + $0x40] sm:$0xff]  }
 0xf80   :  { %v5182_v30 = vadd.f32 %v5180_v38, %v14576_v56  ;;  %v13370_v56 = vld [vmem:[%s14778_s1 + $0x8] sm:$0xff]   ;;  %v14849_v10 = vld [vmem:[%s13635_s6 + $0x60] sm:$0xff]  }
 0xf81   :  { %v12564_v27 = vpop.f32.mrf.mxu1  ;;  %12566 = vmatpush3.bf16.msra.mxu0 %v13370_v56 }
 0xf82   :  { %v5188_v36 = vsel %vm259_vm1, %v5182_v30, 0.0  ;;  %12567 = vmatprep.subr.bf16.mxu0 %v15949_v35  ;;  %v14866_v27 = vld [vmem:[%s14858_s30] ss:$0 sm:$0xff] }
 0xf83   :  { %5189 = vadd.xlane.f32.xlu1 %v5188_v36 }
 0xf85   :  { %12568 = vmatpush3.bf16.msra.mxu0 %v13371_v5  ;;  %v14892_v5 = vld [vmem:[%s13635_s6 + $0x50] sm:$0xff]  }
 0xf86   :  { %12585 = vmatprep.subr.bf16.mxu0 %v15949_v35 }
0x100c   :  { %v5190_v22 = vpop.xlane.xlu1 %5189 }
0x100d   :  { %v5192_v54 = vmul.f32 0.03125, %v5190_v22  ;;  %v14869_v22 = vld [vmem:[%s14863_s7] ss:$0 sm:$0xff] }
0x100f   :  { %v5194_v7 = vsub.f32 %v5182_v30, %v5192_v54 }
0x1011   :  { %v5196_v32 = vmul.f32 %v5194_v7, %v5194_v7 }
0x1013   :  { %v5200_v33 = vsel %vm259_vm1, %v5196_v32, 0.0  ;;  %v14876_v32 = vld [vmem:[%s13635_s6 + $0x58] sm:$0xff]   ;;  %s15953_s6 = sld [smem:[#allocation2_spill]] }
0x1014   :  { %5201 = vadd.xlane.f32.xlu1 %v5200_v33  ;;  %v14879_v33 = vld [vmem:[%s13664_s17 + $0x48] sm:$0xff]  }
0x109d   :  { %v5202_v21 = vpop.xlane.xlu1 %5201 }
0x109e   :  { %v5204_v45 = vmul.f32 0.03125, %v5202_v21  ;;  %v14923_v21 = vld [vmem:[%s13664_s17 + $0x60] sm:$0xff]  }
0x10a0   :  { %v5206_v63 = vadd.f32 1e-05, %v5204_v45  ;;  %v14934_v45 = vld [vmem:[%s13664_s17 + $0x58] sm:$0xff]  }
0x10a2   :  { %13502 = vrsqrt.f32 %v5206_v63  ;;  %v14937_v63 = vld [vmem:[%s13779_s21 + $0x48] sm:$0xff]  }
0x10af   :  { %v13503_v55 = vpop.eup %13502 }
0x10b0   :  { %v5210_v48 = vmul.f32 %v13503_v55, %v5194_v7  ;;  %v14965_v55 = vld [vmem:[%s13779_s21 + $0x68] sm:$0xff]  }
0x10b2   :  { %v5218_v2 = vmul.f32 %v11038_v51, %v5210_v48  ;;  %v14962_v51 = vld [vmem:[%s13664_s17 + $0x78] sm:$0xff]   ;;  %v14979_v48 = vld [vmem:[%s13779_s21 + $0x60] sm:$0xff]   ;;  %s15954_s17 = sld [smem:[#allocation3_spill]] }
0x10b4   :  { %v14804_v19 = vadd.f32 %v11039_v58, %v5218_v2  ;;  %v14990_v58 = vld [vmem:[%s13779_s21 + $0x58] sm:$0xff]   ;;  %v15000_v2 = vld [vmem:[%s13779_s21 + $0x50] sm:$0xff]  }
0x10b6   :  { %v5232_v3 = vpack.c.bf16 %v14804_v19, %v5225_v0 }
0x10b8   :  { %12570 = vmatmul.mubr.msk.bf16.vlgmr.msra.gmra.mxu0 %vm259_vm1, %v5232_v3  ;;  %v15016_v3 = vld [vmem:[%s13779_s21 + $0x70] sm:$0xff]  }
0x10b9   :  { %12589 = vmatprep.mubr.msk.bf16.mxu0 %vm13592_vm0, %v15949_v35  ;;  %12586 = vmatpush3.bf16.msra.mxu0 %v14836_v6 }
0x10ba   :  { %12587 = vmatprep.subr.bf16.mxu0 %v15949_v35 }
0x10bd   :  { %12588 = vmatpush3.bf16.msra.mxu0 %v14846_v20 }
0x10be   :  { %12593 = vmatprep.subr.bf16.mxu0 %v15949_v35 }
0x1178   :  { %v5288_v46 = vpop.f32.mrf.mxu0 }
0x1179   :  { %v5289_v40 = vadd.f32 %v11040_v9, %v5288_v46 }
0x117a   :  { %v12571_v26 = vpop.f32.mrf.mxu0 }
0x117b   :  { %v5295_v49 = vmax.f32 %v5289_v40, 0.0 }
0x117c   :  { %v5291_v44 = vpop.f32.mrf.mxu0 }
0x117d   :  { %v5292_v12 = vadd.f32 %v11040_v9, %v5291_v44 }
0x117e   :  { %v12572_v13 = vpop.f32.mrf.mxu0 }
0x117f   :  { %v5296_v34 = vmax.f32 %v5292_v12, 0.0  ;;  %v15028_v12 = vld [vmem:[%s13840_s25 + $0x4] ss:$0 sm:$0xff] }
0x1181   :  { %v5306_v39 = vpack.c.bf16 %v5296_v34, %v5295_v49 }
0x1183   :  { %12582 = vmatmul.mubr.msk.bf16.vlgmr.msra.gmra.mxu1 %vm5337_vm5, %v5306_v39 }
0x1184   :  { %12605 = vmatprep.mubr.msk.bf16.mxu1 %vm13592_vm0, %v15949_v35  ;;  %12602 = vmatpush3.bf16.msra.mxu1 %v14839_v18 }
0x1185   :  { %12603 = vmatprep.subr.bf16.mxu1 %v15949_v35 }
0x1188   :  { %12604 = vmatpush3.bf16.msra.mxu1 %v14849_v10 }
0x1189   :  { %12617 = vmatprep.subr.bf16.mxu1 %v15949_v35 }
0x1243   :  { %v5375_v14 = vpop.f32.mrf.mxu1 }
0x1244   :  { %v5376_v52 = vadd.f32 %v11044_v29, %v5375_v14 }
0x1245   :  { %v12583_v60 = vpop.f32.mrf.mxu1 }
0x1246   :  { %v5382_v47 = vadd.f32 %v5376_v52, %v5225_v0  ;;  %v15009_v0 = vld [vmem:[%s13779_s21 + $0x78] sm:$0xff]   ;;  %v15032_v52 = vld [vmem:[%s13845_s29 + $0x4] ss:$0 sm:$0xff]  ;;  %s15955_s21 = sld [smem:[#allocation4_spill]] }
0x1247   :  { %v5378_v11 = vpop.f32.mrf.mxu1 }
0x1248   :  { %v14831_v25 = vadd.f32 %v11044_v29, %v5378_v11  ;;  %v5386_v23 = vsel %vm259_vm1, %v5382_v47, 0.0 }
0x1249   :  { %5387 = vadd.xlane.f32.xlu0 %v5386_v23  ;;  %v12584_v42 = vpop.f32.mrf.mxu1 }
0x12d2   :  { %v5388_v28 = vpop.xlane.xlu0 %5387 }
0x12d3   :  { %v5392_v1 = vmul.f32 0.03125, %v5388_v28  ;;  %v15036_v28 = vld [vmem:[%s13840_s25 + $0x6] ss:$0 sm:$0xff] }
0x12d5   :  { %v5394_v16 = vsub.f32 %v5382_v47, %v5392_v1 }
0x12d7   :  { %v5396_v17 = vmul.f32 %v5394_v16, %v5394_v16 }
0x12d9   :  { %v5398_v57 = vsel %vm259_vm1, %v5396_v17, 0.0 }
0x12da   :  { %5399 = vadd.xlane.f32.xlu1 %v5398_v57 }
0x1363   :  { %v5400_v62 = vpop.xlane.xlu1 %5399 }
0x1364   :  { %v5404_v38 = vmul.f32 0.03125, %v5400_v62 }
0x1366   :  { %v5406_v37 = vadd.f32 1e-05, %v5404_v38 }
0x1368   :  { %13504 = vrsqrt.f32 %v5406_v37 }
0x1375   :  { %v13505_v30 = vpop.eup %13504 }
0x1376   :  { %v5410_v36 = vmul.f32 %v13505_v30, %v5394_v16 }
0x1378   :  { %v5418_v54 = vmul.f32 %v14866_v27, %v5410_v36  ;;  %v15042_v36 = vld [vmem:[%s13845_s29 + $0x6] ss:$0 sm:$0xff] }
0x137a   :  { %v14873_v7 = vadd.f32 %v14869_v22, %v5418_v54 }
0x137c   :  { %v14883_v56 = vpack.c.bf16 %v14873_v7, %v14873_v7 }
0x137e   :  { %12590 = vmatmul.mubr.msk.bf16.vlgmr.msra.gmra.mxu0 %vm259_vm1, %v14883_v56  ;;  %12606 = vmatmul.mubr.msk.bf16.vlgmr.msra.gmra.mxu1 %vm259_vm1, %v14883_v56 }
0x137f   :  { %12594 = vmatpush3.bf16.msra.mxu0 %v14876_v32  ;;  %12618 = vmatpush3.bf16.msra.mxu1 %v14879_v33 }
0x1380   :  { %12595 = vmatprep.subr.bf16.mxu0 %v15949_v35  ;;  %12619 = vmatprep.subr.bf16.mxu1 %v15949_v35 }
0x1381   :  { %12597 = vmatprep.mubr.msk.bf16.mxu0 %vm13592_vm0, %v15949_v35  ;;  %12621 = vmatprep.mubr.msk.bf16.mxu1 %vm13592_vm0, %v15949_v35 }
0x1383   :  { %12596 = vmatpush3.bf16.msra.mxu0 %v14892_v5  ;;  %12620 = vmatpush3.bf16.msra.mxu1 %v14895_v31 }
0x1384   :  { %12609 = vmatprep.subr.bf16.mxu0 %v15949_v35  ;;  %12633 = vmatprep.subr.bf16.mxu1 %v15949_v35 }
0x1386   :  { %12598 = vmatmul.mubr.msk.bf16.vlgmr.msra.gmra.mxu0 %vm259_vm1, %v14883_v56  ;;  %12622 = vmatmul.mubr.msk.bf16.vlgmr.msra.gmra.mxu1 %vm259_vm1, %v14883_v56 }
0x1387   :  { %12610 = vmatpush3.bf16.msra.mxu0 %v14906_v24  ;;  %12634 = vmatpush3.bf16.msra.mxu1 %v14909_v59 }
0x1388   :  { %12611 = vmatprep.subr.bf16.mxu0 %v15949_v35  ;;  %12635 = vmatprep.subr.bf16.mxu1 %v15949_v35 }
0x1389   :  { %12613 = vmatprep.mubr.msk.bf16.mxu0 %vm13592_vm0, %v15949_v35  ;;  %12637 = vmatprep.mubr.msk.bf16.mxu1 %vm13592_vm0, %v15949_v35 }
0x138b   :  { %12612 = vmatpush3.bf16.msra.mxu0 %v14920_v61  ;;  %12636 = vmatpush3.bf16.msra.mxu1 %v14923_v21 }
0x138c   :  { %12625 = vmatprep.subr.bf16.mxu0 %v15949_v35  ;;  %12649 = vmatprep.subr.bf16.mxu1 %v15949_v35 }
0x138e   :  { %12614 = vmatmul.mubr.msk.bf16.vlgmr.msra.gmra.mxu0 %vm259_vm1, %v14883_v56  ;;  %12638 = vmatmul.mubr.msk.bf16.vlgmr.msra.gmra.mxu1 %vm259_vm1, %v14883_v56 }
0x138f   :  { %12626 = vmatpush3.bf16.msra.mxu0 %v14934_v45  ;;  %12650 = vmatpush3.bf16.msra.mxu1 %v14937_v63 }
0x1390   :  { %12627 = vmatprep.subr.bf16.mxu0 %v15949_v35  ;;  %12651 = vmatprep.subr.bf16.mxu1 %v15949_v35 }
0x1391   :  { %12629 = vmatprep.mubr.msk.bf16.mxu0 %vm13592_vm0, %v15949_v35  ;;  %12653 = vmatprep.mubr.msk.bf16.mxu1 %vm13592_vm0, %v15949_v35 }
0x1393   :  { %12628 = vmatpush3.bf16.msra.mxu0 %v14948_v15  ;;  %12652 = vmatpush3.bf16.msra.mxu1 %v14951_v50 }
0x1394   :  { %12641 = vmatprep.subr.bf16.mxu0 %v15949_v35  ;;  %12665 = vmatprep.subr.bf16.mxu1 %v15949_v35 }
0x1396   :  { %12630 = vmatmul.mubr.msk.bf16.vlgmr.msra.gmra.mxu0 %vm259_vm1, %v14883_v56  ;;  %12654 = vmatmul.mubr.msk.bf16.vlgmr.msra.gmra.mxu1 %vm259_vm1, %v14883_v56 }
0x1397   :  { %12642 = vmatpush3.bf16.msra.mxu0 %v14962_v51  ;;  %12666 = vmatpush3.bf16.msra.mxu1 %v14965_v55 }
0x1398   :  { %12643 = vmatprep.subr.bf16.mxu0 %v15949_v35  ;;  %12667 = vmatprep.subr.bf16.mxu1 %v15949_v35 }
0x1399   :  { %12645 = vmatprep.mubr.msk.bf16.mxu0 %vm13592_vm0, %v15949_v35  ;;  %12669 = vmatprep.mubr.msk.bf16.mxu1 %vm13592_vm0, %v15949_v35 }
0x139b   :  { %12644 = vmatpush3.bf16.msra.mxu0 %v14976_v8  ;;  %12668 = vmatpush3.bf16.msra.mxu1 %v14979_v48 }
0x139c   :  { %12657 = vmatprep.subr.bf16.mxu0 %v15949_v35  ;;  %12681 = vmatprep.subr.bf16.mxu1 %v15949_v35 }
0x139e   :  { %12646 = vmatmul.mubr.msk.bf16.vlgmr.msra.gmra.mxu0 %vm259_vm1, %v14883_v56  ;;  %12670 = vmatmul.mubr.msk.bf16.vlgmr.msra.gmra.mxu1 %vm259_vm1, %v14883_v56 }
0x139f   :  { %12658 = vmatpush3.bf16.msra.mxu0 %v14990_v58  ;;  %12661 = vmatprep.mubr.msk.bf16.mxu0 %vm13592_vm0, %v15949_v35 }
0x13a0   :  { %12659 = vmatprep.subr.bf16.mxu0 %v15949_v35  ;;  %12683 = vmatprep.mubr.msk.bf16.mxu1 %vm13592_vm0, %v15949_v35 }
0x13a3   :  { %12660 = vmatpush3.bf16.msra.mxu0 %v15000_v2 }
0x13a4   :  { %12673 = vmatprep.subr.bf16.mxu0 %v15949_v35 }
0x13a6   :  { %12662 = vmatmul.mubr.msk.bf16.vlgmr.msra.gmra.mxu0 %vm259_vm1, %v14883_v56 }
0x13a7   :  { %12674 = vmatpush3.bf16.msra.mxu0 %v15009_v0  ;;  %12677 = vmatprep.mubr.msk.bf16.mxu0 %vm13592_vm0, %v15949_v35 }
0x13a8   :  { %12675 = vmatprep.subr.bf16.mxu0 %v15949_v35 }
0x13ab   :  { %12676 = vmatpush3.bf16.msra.mxu0 %v15016_v3 }
0x13ac   :  { %12687 = vmatprep.subr.bf16.mxu0 %v15949_v35 }
0x13ae   :  { %12678 = vmatmul.mubr.msk.bf16.vlgmr.msra.gmra.mxu0 %vm259_vm1, %v14883_v56 }
0x13af   :  { %12689 = vmatprep.mubr.msk.bf16.mxu0 %vm13592_vm0, %v15949_v35 }
0x143e   :  { %v5575_v41 = vpop.f32.mrf.mxu0  ;;  %v5679_v43 = vpop.f32.mrf.mxu1 }
0x143f   :  { %v5576_v1 = vadd.f32 %v15032_v52, %v5575_v41 }
0x1440   :  { %v12591_v4 = vpop.f32.mrf.mxu0  ;;  %v12607_v9 = vpop.f32.mrf.mxu1 }
0x1441   :  { %v6201_v37 = vpack.c.bf16 %v5576_v1, %v5576_v1 }
0x1442   :  { %v5578_v46 = vpop.f32.mrf.mxu0  ;;  %v5682_v26 = vpop.f32.mrf.mxu1 }
0x1443   :  { %v15047_v46 = vld [vmem:[%s13840_s25 + $0x5] ss:$0 sm:$0xff]  ;;  %v15050_v26 = vld [vmem:[%s13902_s3 + $0x4] ss:$0 sm:$0xff] }
0x1444   :  { %v12592_v40 = vpop.f32.mrf.mxu0  ;;  %v12608_v44 = vpop.f32.mrf.mxu1 }
0x1445   :  { %v5680_v40 = vadd.f32 %v15042_v36, %v5679_v43 }
0x1446   :  { %v5627_v13 = vpop.f32.mrf.mxu0  ;;  %v5807_v49 = vpop.f32.mrf.mxu1 }
0x1447   :  { %v5808_v34 = vadd.f32 %v15028_v12, %v5807_v49 }
0x1448   :  { %v12599_v39 = vpop.f32.mrf.mxu0  ;;  %v12623_v29 = vpop.f32.mrf.mxu1 }
0x1449   :  { %v6205_v14 = vpack.c.bf16 %v5808_v34, %v5808_v34 }
0x144a   :  { %v5630_v60 = vpop.f32.mrf.mxu0  ;;  %v5810_v47 = vpop.f32.mrf.mxu1 }
0x144b   :  { %v6213_v11 = vsel %vm931_vm2, %v6205_v14, 0  ;;  %v6203_v60 = vpack.c.bf16 %v5680_v40, %v5680_v40 }
0x144c   :  { %v12600_v23 = vpop.f32.mrf.mxu0  ;;  %v12624_v42 = vpop.f32.mrf.mxu1  ;;  %12682 = vmatpush3.bf16.xpose.msra.mxu1 %v6213_v11 }
0x144d   :  { %12693 = vmatprep.subr.bf16.mxu1 %v15949_v35  ;;  %v15059_v23 = vld [vmem:[%s13845_s29 + $0x5] ss:$0 sm:$0xff] }
0x144e   :  { %v5731_v16 = vpop.f32.mrf.mxu0  ;;  %v5911_v17 = vpop.f32.mrf.mxu1 }
0x144f   :  { %v5912_v57 = vadd.f32 %v15036_v28, %v5911_v17 }
0x1450   :  { %v12615_v62 = vpop.f32.mrf.mxu0  ;;  %v12639_v38 = vpop.f32.mrf.mxu1 }
0x1451   :  { %v6207_v30 = vpack.c.bf16 %v5912_v57, %v5912_v57  ;;  %v15065_v38 = vld [vmem:[%s13840_s25 + $0x7] ss:$0 sm:$0xff]  ;;  %s13620_s25 = smov 31  }
0x1452   :  { %v5734_v54 = vpop.f32.mrf.mxu0  ;;  %v5914_v56 = vpop.f32.mrf.mxu1 }
0x1453   :  { %v6305_v4 = vsel %vm931_vm2, %v6207_v30, 0  ;;  %12684 = vmatmul.mubr.msk.bf16.vlgmr.msra.gmra.mxu1 %vm931_vm2, %v6201_v37  ;;  %v5628_v37 = vadd.f32 %v15059_v23, %v5627_v13 }
0x1454   :  { %v12616_v41 = vpop.f32.mrf.mxu0  ;;  %v12640_v9 = vpop.f32.mrf.mxu1  ;;  %12694 = vmatpush3.bf16.xpose.msra.mxu1 %v6305_v4  ;;  %12695 = vmatprep.mubr.msk.bf16.mxu1 %vm13592_vm0, %v15949_v35 }
0x1455   :  { %12705 = vmatprep.subr.bf16.mxu1 %v15949_v35  ;;  %v6202_v9 = vpack.c.bf16 %v5628_v37, %v5628_v37 }
0x1456   :  { %v5859_v44 = vpop.f32.mrf.mxu0  ;;  %v6039_v49 = vpop.f32.mrf.mxu1 }
0x1457   :  { %v5860_v34 = vadd.f32 %v15047_v46, %v5859_v44  ;;  %v6040_v39 = vadd.f32 %v15050_v26, %v6039_v49  ;;  %v15076_v44 = vld [vmem:[%s13845_s29 + $0x7] ss:$0 sm:$0xff] }
0x1458   :  { %v12631_v29 = vpop.f32.mrf.mxu0  ;;  %v12655_v14 = vpop.f32.mrf.mxu1 }
0x1459   :  { %v6206_v47 = vpack.c.bf16 %v5860_v34, %v5860_v34  ;;  %v6441_v11 = vpack.c.bf16 %v6040_v39, %v6040_v39  ;;  %v15081_v14 = vld [vmem:[%s13902_s3 + $0x5] ss:$0 sm:$0xff] }
0x145a   :  { %v5862_v42 = vpop.f32.mrf.mxu0  ;;  %v6042_v1 = vpop.f32.mrf.mxu1 }
0x145b   :  { %v6259_v43 = vsel %vm931_vm2, %v6206_v47, 0  ;;  %v6449_v17 = vsel %vm1171_vm3, %v6441_v11, 0  ;;  %12696 = vmatmul.mubr.msk.bf16.vlgmr.msra.gmra.mxu1 %vm931_vm2, %v6203_v60  ;;  %v5732_v60 = vadd.f32 %v15076_v44, %v5731_v16 }
0x145c   :  { %v12632_v57 = vpop.f32.mrf.mxu0  ;;  %v12656_v62 = vpop.f32.mrf.mxu1  ;;  %12688 = vmatpush3.bf16.xpose.msra.mxu0 %v6259_v43  ;;  %12706 = vmatpush3.bf16.msra.mxu1 %v6449_v17 }
0x145d   :  { %12699 = vmatprep.subr.bf16.mxu0 %v15949_v35  ;;  %12707 = vmatprep.mubr.msk.bf16.mxu1 %vm13592_vm0, %v15949_v35  ;;  %v6204_v1 = vpack.c.bf16 %v5732_v60, %v5732_v60 }
0x145e   :  { %v5963_v30 = vpop.f32.mrf.mxu0  ;;  %v15071_v54 = vpop.f32.mrf.mxu1  ;;  %12717 = vmatprep.subr.bf16.mxu1 %v15949_v35 }
0x145f   :  { %v5964_v56 = vadd.f32 %v15065_v38, %v5963_v30 }
0x1460   :  { %v12647_v4 = vpop.f32.mrf.mxu0  ;;  %v12671_v41 = vpop.f32.mrf.mxu1 }
0x1461   :  { %v6208_v40 = vpack.c.bf16 %v5964_v56, %v5964_v56 }
0x1462   :  { %v5966_v13 = vpop.f32.mrf.mxu0  ;;  %v6146_v49 = vpop.f32.mrf.mxu1 }
0x1463   :  { %v6351_v34 = vsel %vm931_vm2, %v6208_v40, 0  ;;  %12690 = vmatmul.mubr.msk.bf16.vlgmr.msra.gmra.mxu0 %vm931_vm2, %v6202_v9 }
0x1464   :  { %v12648_v39 = vpop.f32.mrf.mxu0  ;;  %v12672_v29 = vpop.f32.mrf.mxu1  ;;  %12700 = vmatpush3.bf16.xpose.msra.mxu0 %v6351_v34  ;;  %12701 = vmatprep.mubr.msk.bf16.mxu0 %vm13592_vm0, %v15949_v35 }
0x1465   :  { %12711 = vmatprep.subr.bf16.mxu0 %v15949_v35 }
0x1466   :  { %v6091_v47 = vpop.f32.mrf.mxu0 }
0x1467   :  { %v6092_v11 = vadd.f32 %v15081_v14, %v6091_v47 }
0x1468   :  { %v12663_v42 = vpop.f32.mrf.mxu0 }
0x1469   :  { %v6442_v43 = vpack.c.bf16 %v6092_v11, %v6092_v11 }
0x146a   :  { %v6094_v17 = vpop.f32.mrf.mxu0 }
0x146b   :  { %v6495_v57 = vsel %vm1171_vm3, %v6442_v43, 0  ;;  %12702 = vmatmul.mubr.msk.bf16.vlgmr.msra.gmra.mxu0 %vm931_vm2, %v6204_v1 }
0x146c   :  { %v12664_v62 = vpop.f32.mrf.mxu0  ;;  %12712 = vmatpush3.bf16.msra.mxu0 %v6495_v57  ;;  %12713 = vmatprep.mubr.msk.bf16.mxu0 %vm13592_vm0, %v15949_v35 }
0x146d   :  { %12723 = vmatprep.subr.bf16.mxu0 %v15949_v35 }
0x146e   :  { %v15093_v16 = vpop.f32.mrf.mxu0 }
0x1470   :  { %v12679_v37 = vpop.f32.mrf.mxu0 }
0x1472   :  { %v6198_v30 = vpop.f32.mrf.mxu0 }
0x1474   :  { %v12680_v56 = vpop.f32.mrf.mxu0 }
0x1513   :  { %v6249_v4 = vpop.f32.mrf.mxu1 }
0x1514   :  { %v6250_v41 = vadd.f32 %v6249_v4, %v13921_v53 }
0x1515   :  { %v12685_v9 = vpop.f32.mrf.mxu1 }
0x1516   :  { %v6393_v40 = vsel %vm931_vm2, %v6250_v41, -inf }
0x1517   :  { %6394 = vmax.xlane.f32.xlu0 %v6393_v40  ;;  %v6252_v13 = vpop.f32.mrf.mxu1 }
0x1519   :  { %v12686_v49 = vpop.f32.mrf.mxu1 }
0x151b   :  { %v6341_v34 = vpop.f32.mrf.mxu1 }
0x151c   :  { %v6342_v39 = vadd.f32 %v6341_v34, %v13921_v53 }
0x151d   :  { %v12697_v29 = vpop.f32.mrf.mxu1 }
0x151e   :  { %v6399_v60 = vsel %vm931_vm2, %v6342_v39, -inf }
0x151f   :  { %6400 = vmax.xlane.f32.xlu0 %v6399_v60  ;;  %v6344_v47 = vpop.f32.mrf.mxu1 }
0x1521   :  { %v12698_v11 = vpop.f32.mrf.mxu1 }
0x1523   :  { %v6295_v42 = vpop.f32.mrf.mxu0 }
0x1524   :  { %v6296_v1 = vadd.f32 %v6295_v42, %v13921_v53 }
0x1525   :  { %v12691_v43 = vpop.f32.mrf.mxu0 }
0x1526   :  { %v6396_v17 = vsel %vm931_vm2, %v6296_v1, -inf }
0x1527   :  { %6397 = vmax.xlane.f32.xlu1 %v6396_v17  ;;  %v6298_v57 = vpop.f32.mrf.mxu0 }
0x1529   :  { %v12692_v62 = vpop.f32.mrf.mxu0 }
0x152b   :  { %v6387_v37 = vpop.f32.mrf.mxu0 }
0x152c   :  { %v6388_v30 = vadd.f32 %v6387_v37, %v13921_v53 }
0x152d   :  { %v12703_v56 = vpop.f32.mrf.mxu0 }
0x152e   :  { %v6402_v4 = vsel %vm931_vm2, %v6388_v30, -inf }
0x152f   :  { %6403 = vmax.xlane.f32.xlu1 %v6402_v4  ;;  %v6390_v9 = vpop.f32.mrf.mxu0 }
0x1531   :  { %v12704_v40 = vpop.f32.mrf.mxu0 }
0x15a0   :  { %v6395_v13 = vpop.xlane.xlu0 %6394 }
0x15a1   :  { %v6405_v49 = vsub.f32 %v6250_v41, %v6395_v13 }
0x15a3   :  { %v6409_v34 = vmul.f32 1.442695, %v6405_v49 }
0x15a5   :  { %13506 = vpow2.f32 %v6409_v34  ;;  %v15111_v34 = vld [vmem:[%s13902_s3 + $0x6] ss:$0 sm:$0xff] }
0x15a8   :  { %v6401_v29 = vpop.xlane.xlu0 %6400 }
0x15a9   :  { %v6407_v60 = vsub.f32 %v6342_v39, %v6401_v29  ;;  %v5383_v39 = vadd.f32 %v14831_v25, %v14804_v19  ;;  %v6144_v19 = vadd.f32 %v15111_v34, %v15071_v54 }
0x15ab   :  { %v6413_v47 = vmul.f32 1.442695, %v6407_v60 }
0x15ad   :  { %13508 = vpow2.f32 %v6413_v47 }
0x15b0   :  { %v6398_v11 = vpop.xlane.xlu1 %6397 }
0x15b1   :  { %v6406_v42 = vsub.f32 %v6296_v1, %v6398_v11  ;;  %v5389_v1 = vsel %vm259_vm1, %v5383_v39, 0.0  ;;  %v6443_v11 = vpack.c.bf16 %v6144_v19, %v6144_v19 }
0x15b2   :  { %v13507_v43 = vpop.eup %13506 }
0x15b3   :  { %v6411_v17 = vmul.f32 1.442695, %v6406_v42  ;;  %v6417_v57 = vsel %vm931_vm2, %v13507_v43, 0.0 }
0x15b4   :  { %6418 = vadd.xlane.f32.xlu0 %v6417_v57 }
0x15b5   :  { %13510 = vpow2.f32 %v6411_v17 }
0x15b8   :  { %v6404_v62 = vpop.xlane.xlu1 %6403 }
0x15b9   :  { %v6408_v37 = vsub.f32 %v6388_v30, %v6404_v62 }
0x15ba   :  { %v13509_v56 = vpop.eup %13508 }
0x15bb   :  { %v6415_v4 = vmul.f32 1.442695, %v6408_v37  ;;  %v6423_v41 = vsel %vm931_vm2, %v13509_v56, 0.0 }
0x15bc   :  { %6424 = vadd.xlane.f32.xlu0 %v6423_v41 }
0x15bd   :  { %13512 = vpow2.f32 %v6415_v4  ;;  %v6541_v4 = vsel %vm1171_vm3, %v6443_v11, 0 }
0x15c0   :  { %5390 = vadd.xlane.f32.xlu0 %v5389_v1 }
0x15c2   :  { %v13511_v9 = vpop.eup %13510 }
0x15c3   :  { %v6420_v40 = vsel %vm931_vm2, %v13511_v9, 0.0 }
0x15c4   :  { %6421 = vadd.xlane.f32.xlu1 %v6420_v40 }
0x15ca   :  { %v13513_v13 = vpop.eup %13512 }
0x15cb   :  { %v6426_v30 = vsel %vm931_vm2, %v13513_v13, 0.0 }
0x15cc   :  { %6427 = vadd.xlane.f32.xlu1 %v6426_v30 }
0x163d   :  { %v6419_v49 = vpop.xlane.xlu0 %6418 }
0x163e   :  { %13514 = vrcp.f32 %v6419_v49 }
0x1645   :  { %v6425_v29 = vpop.xlane.xlu0 %6424 }
0x1646   :  { %13516 = vrcp.f32 %v6425_v29 }
0x1649   :  { %v5391_v25 = vpop.xlane.xlu0 %5390 }
0x164a   :  { %v5393_v60 = vmul.f32 0.03125, %v5391_v25 }
0x164b   :  { %v13515_v47 = vpop.eup %13514 }
0x164c   :  { %v6433_v42 = vmul.f32 %v13515_v47, %v13507_v43  ;;  %v5395_v17 = vsub.f32 %v5383_v39, %v5393_v60  ;;  %v15122_v39 = vld [vmem:[%s13902_s3 + $0x7] ss:$0 sm:$0xff] }
0x164d   :  { %v6422_v57 = vpop.xlane.xlu1 %6421  ;;  %v6196_v30 = vadd.f32 %v15122_v39, %v15093_v16 }
0x164e   :  { %v6437_v62 = vpack.c.bf16 %v6433_v42, %v6433_v42  ;;  %13518 = vrcp.f32 %v6422_v57  ;;  %v5397_v37 = vmul.f32 %v5395_v17, %v5395_v17  ;;  %v11113_v42 = vld [vmem:[%s13946_s8 + $0x14] sm:$0xf] }
0x164f   :  { %v6444_v29 = vpack.c.bf16 %v6196_v30, %v6196_v30  ;;  %v15145_v57 = vsel %vm1171_vm3, %v11113_v42, 0 }
0x1650   :  { %12708 = vmatmul.mubr.msk.bf16.vlgmr.msra.gmra.mxu1 %vm931_vm2, %v6437_v62  ;;  %v5401_v41 = vsel %vm259_vm1, %v5397_v37, 0.0 }
0x1651   :  { %12718 = vmatpush3.bf16.msra.mxu1 %v6541_v4  ;;  %5402 = vadd.xlane.f32.xlu1 %v5401_v41  ;;  %v11114_v4 = vld [vmem:[%s13946_s8 + $0x18] sm:$0xf] }
0x1652   :  { %12719 = vmatprep.mubr.msk.bf16.mxu1 %vm13592_vm0, %v15949_v35  ;;  %12729 = vmatprep.subr.bf16.mxu1 %v15949_v35 }
0x1653   :  { %v13517_v54 = vpop.eup %13516 }
0x1654   :  { %v6435_v43 = vmul.f32 %v13517_v54, %v13509_v56  ;;  %v6587_v56 = vsel %vm1171_vm3, %v6444_v29, 0 }
0x1655   :  { %v6428_v1 = vpop.xlane.xlu1 %6427 }
0x1656   :  { %v6439_v40 = vpack.c.bf16 %v6435_v43, %v6435_v43  ;;  %13520 = vrcp.f32 %v6428_v1  ;;  %v15151_v43 = vsel %vm1171_vm3, %v11114_v4, 0 }
0x1658   :  { %12720 = vmatmul.mubr.msk.bf16.vlgmr.msra.gmra.mxu1 %vm931_vm2, %v6439_v40 }
0x1659   :  { %12731 = vmatprep.mubr.msk.bf16.mxu1 %vm13592_vm0, %v15949_v35 }
0x165b   :  { %v13519_v49 = vpop.eup %13518 }
0x165c   :  { %v6434_v19 = vmul.f32 %v13519_v49, %v13511_v9  ;;  %v11112_v9 = vld [vmem:[%s13946_s8 + $0x10] sm:$0xf] }
0x165d   :  { %v15139_v11 = vsel %vm1171_vm3, %v11112_v9, 0  ;;  %v11115_v9 = vld [vmem:[%s13946_s8 + $0x1c] sm:$0xf]  ;;  %s10861_s8 = sld [smem:[%s15943_s0 + %s13620_s25]]  }
0x165e   :  { %v6438_v25 = vpack.c.bf16 %v6434_v19, %v6434_v19  ;;  %12730 = vmatpush3.bf16.msra.mxu1 %v15139_v11 }
0x165f   :  { %12741 = vmatprep.subr.bf16.mxu1 %v15949_v35 }
0x1660   :  { %12714 = vmatmul.mubr.msk.bf16.vlgmr.msra.gmra.mxu0 %vm931_vm2, %v6438_v25 }
0x1661   :  { %12724 = vmatpush3.bf16.msra.mxu0 %v6587_v56  ;;  %12725 = vmatprep.mubr.msk.bf16.mxu0 %vm13592_vm0, %v15949_v35 }
0x1662   :  { %12735 = vmatprep.subr.bf16.mxu0 %v15949_v35 }
0x1663   :  { %v13521_v16 = vpop.eup %13520 }
0x1664   :  { %v6436_v60 = vmul.f32 %v13521_v16, %v13513_v13 }
0x1666   :  { %v6440_v47 = vpack.c.bf16 %v6436_v60, %v6436_v60 }
0x1668   :  { %12726 = vmatmul.mubr.msk.bf16.vlgmr.msra.gmra.mxu0 %vm931_vm2, %v6440_v47 }
0x1669   :  { %12737 = vmatprep.mubr.msk.bf16.mxu0 %vm13592_vm0, %v15949_v35  ;;  %12736 = vmatpush3.bf16.msra.mxu0 %v15145_v57 }
0x166a   :  { %12747 = vmatprep.subr.bf16.mxu0 %v15949_v35 }
0x16da   :  { %v5403_v13 = vpop.xlane.xlu1 %5402 }
0x16db   :  { %v5405_v62 = vmul.f32 0.03125, %v5403_v13 }
0x16dd   :  { %v5407_v37 = vadd.f32 1e-05, %v5405_v62 }
0x16df   :  { %13522 = vrsqrt.f32 %v5407_v37 }
0x16ec   :  { %v13523_v1 = vpop.eup %13522 }
0x16ed   :  { %v5411_v49 = vmul.f32 %v13523_v1, %v5395_v17 }
0x16ef   :  { %v5419_v25 = vmul.f32 %v14866_v27, %v5411_v49 }
0x16f1   :  { %v15164_v47 = vadd.f32 %v14869_v22, %v5419_v25 }
0x16f3   :  { %v15171_v27 = vpack.c.bf16 %v15164_v47, %v15164_v47 }
0x1710   :  { %v6485_v41 = vpop.f32.mrf.mxu1 }
0x1711   :  { %v6629_v54 = vpack.c.bf16 %v6485_v41, %v6485_v41 }
0x1712   :  { %v12709_v40 = vpop.f32.mrf.mxu1 }
0x1713   :  { %12732 = vmatmul.mubr.msk.bf16.vlgmr.msra.gmra.mxu1 %vm931_vm2, %v6629_v54 }
0x1714   :  { %v6488_v30 = vpop.f32.mrf.mxu1  ;;  %12742 = vmatpush3.bf16.msra.mxu1 %v15151_v43  ;;  %12743 = vmatprep.mubr.msk.bf16.mxu1 %vm13592_vm0, %v15949_v35 }
0x1715   :  { %12753 = vmatprep.subr.bf16.mxu1 %v15949_v35 }
0x1716   :  { %v12710_v29 = vpop.f32.mrf.mxu1 }
0x1718   :  { %v6577_v19 = vpop.f32.mrf.mxu1 }
0x1719   :  { %v6631_v56 = vpack.c.bf16 %v6577_v19, %v6577_v19 }
0x171a   :  { %v12721_v16 = vpop.f32.mrf.mxu1 }
0x171b   :  { %12744 = vmatmul.mubr.msk.bf16.vlgmr.msra.gmra.mxu1 %vm931_vm2, %v6631_v56 }
0x171c   :  { %v6580_v60 = vpop.f32.mrf.mxu1  ;;  %12754 = vmatpush3.bf16.msra.mxu1 %v14836_v6  ;;  %12757 = vmatprep.mubr.msk.bf16.mxu1 %vm13592_vm0, %v15949_v35  ;;  %v15175_v6 = vsel %vm1171_vm3, %v11115_v9, 0 }
0x171d   :  { %12755 = vmatprep.subr.bf16.mxu1 %v15949_v35 }
0x171e   :  { %v12722_v17 = vpop.f32.mrf.mxu1 }
0x1720   :  { %v6531_v42 = vpop.f32.mrf.mxu0  ;;  %12756 = vmatpush3.bf16.msra.mxu1 %v14846_v20 }
0x1721   :  { %v6630_v13 = vpack.c.bf16 %v6531_v42, %v6531_v42  ;;  %12769 = vmatprep.subr.bf16.mxu1 %v15949_v35 }
0x1722   :  { %v12715_v62 = vpop.f32.mrf.mxu0 }
0x1723   :  { %12738 = vmatmul.mubr.msk.bf16.vlgmr.msra.gmra.mxu0 %vm931_vm2, %v6630_v13  ;;  %12758 = vmatmul.mubr.msk.bf16.vlgmr.msra.gmra.mxu1 %vm259_vm1, %v15171_v27 }
0x1724   :  { %v6534_v22 = vpop.f32.mrf.mxu0  ;;  %12748 = vmatpush3.bf16.msra.mxu0 %v15175_v6  ;;  %12770 = vmatpush3.bf16.msra.mxu1 %v14839_v18 }
0x1725   :  { %12771 = vmatprep.subr.bf16.mxu1 %v15949_v35  ;;  %12749 = vmatprep.mubr.msk.bf16.mxu0 %vm13592_vm0, %v15949_v35 }
0x1726   :  { %v12716_v20 = vpop.f32.mrf.mxu0  ;;  %12773 = vmatprep.mubr.msk.bf16.mxu1 %vm13592_vm0, %v15949_v35  ;;  %12761 = vmatprep.subr.bf16.mxu0 %v15949_v35 }
0x1728   :  { %v6623_v37 = vpop.f32.mrf.mxu0  ;;  %12772 = vmatpush3.bf16.msra.mxu1 %v14849_v10 }
0x1729   :  { %v6632_v4 = vpack.c.bf16 %v6623_v37, %v6623_v37  ;;  %12785 = vmatprep.subr.bf16.mxu1 %v15949_v35 }
0x172a   :  { %v12727_v41 = vpop.f32.mrf.mxu0 }
0x172b   :  { %12750 = vmatmul.mubr.msk.bf16.vlgmr.msra.gmra.mxu0 %vm931_vm2, %v6632_v4  ;;  %12774 = vmatmul.mubr.msk.bf16.vlgmr.msra.gmra.mxu1 %vm259_vm1, %v15171_v27 }
0x172c   :  { %v6626_v18 = vpop.f32.mrf.mxu0  ;;  %12762 = vmatpush3.bf16.msra.mxu0 %v14876_v32  ;;  %12786 = vmatpush3.bf16.msra.mxu1 %v14879_v33 }
0x172d   :  { %12763 = vmatprep.subr.bf16.mxu0 %v15949_v35  ;;  %12787 = vmatprep.subr.bf16.mxu1 %v15949_v35 }
0x172e   :  { %v12728_v54 = vpop.f32.mrf.mxu0  ;;  %12765 = vmatprep.mubr.msk.bf16.mxu0 %vm13592_vm0, %v15949_v35  ;;  %12789 = vmatprep.mubr.msk.bf16.mxu1 %vm13592_vm0, %v15949_v35 }
0x1730   :  { %12764 = vmatpush3.bf16.msra.mxu0 %v14892_v5  ;;  %12788 = vmatpush3.bf16.msra.mxu1 %v14895_v31 }
0x1731   :  { %12777 = vmatprep.subr.bf16.mxu0 %v15949_v35  ;;  %12801 = vmatprep.subr.bf16.mxu1 %v15949_v35 }
0x1733   :  { %12766 = vmatmul.mubr.msk.bf16.vlgmr.msra.gmra.mxu0 %vm259_vm1, %v15171_v27  ;;  %12790 = vmatmul.mubr.msk.bf16.vlgmr.msra.gmra.mxu1 %vm259_vm1, %v15171_v27 }
0x1734   :  { %12778 = vmatpush3.bf16.msra.mxu0 %v14906_v24  ;;  %12802 = vmatpush3.bf16.msra.mxu1 %v14909_v59 }
0x1735   :  { %12779 = vmatprep.subr.bf16.mxu0 %v15949_v35  ;;  %12803 = vmatprep.subr.bf16.mxu1 %v15949_v35 }
0x1736   :  { %12781 = vmatprep.mubr.msk.bf16.mxu0 %vm13592_vm0, %v15949_v35  ;;  %12805 = vmatprep.mubr.msk.bf16.mxu1 %vm13592_vm0, %v15949_v35 }
0x1738   :  { %12780 = vmatpush3.bf16.msra.mxu0 %v14920_v61  ;;  %12804 = vmatpush3.bf16.msra.mxu1 %v14923_v21 }
0x1739   :  { %12793 = vmatprep.subr.bf16.mxu0 %v15949_v35  ;;  %12817 = vmatprep.subr.bf16.mxu1 %v15949_v35 }
0x173b   :  { %12782 = vmatmul.mubr.msk.bf16.vlgmr.msra.gmra.mxu0 %vm259_vm1, %v15171_v27  ;;  %12806 = vmatmul.mubr.msk.bf16.vlgmr.msra.gmra.mxu1 %vm259_vm1, %v15171_v27 }
0x173c   :  { %12794 = vmatpush3.bf16.msra.mxu0 %v14934_v45  ;;  %12818 = vmatpush3.bf16.msra.mxu1 %v14937_v63 }
0x173d   :  { %12795 = vmatprep.subr.bf16.mxu0 %v15949_v35  ;;  %12819 = vmatprep.subr.bf16.mxu1 %v15949_v35 }
0x173e   :  { %12797 = vmatprep.mubr.msk.bf16.mxu0 %vm13592_vm0, %v15949_v35  ;;  %12821 = vmatprep.mubr.msk.bf16.mxu1 %vm13592_vm0, %v15949_v35 }
0x1740   :  { %12796 = vmatpush3.bf16.msra.mxu0 %v14948_v15  ;;  %12820 = vmatpush3.bf16.msra.mxu1 %v14951_v50 }
0x1741   :  { %12809 = vmatprep.subr.bf16.mxu0 %v15949_v35  ;;  %12833 = vmatprep.subr.bf16.mxu1 %v15949_v35 }
0x1743   :  { %12798 = vmatmul.mubr.msk.bf16.vlgmr.msra.gmra.mxu0 %vm259_vm1, %v15171_v27  ;;  %12822 = vmatmul.mubr.msk.bf16.vlgmr.msra.gmra.mxu1 %vm259_vm1, %v15171_v27 }
0x1744   :  { %12810 = vmatpush3.bf16.msra.mxu0 %v14962_v51  ;;  %12834 = vmatpush3.bf16.msra.mxu1 %v14965_v55 }
0x1745   :  { %12811 = vmatprep.subr.bf16.mxu0 %v15949_v35  ;;  %12835 = vmatprep.subr.bf16.mxu1 %v15949_v35 }
0x1746   :  { %12813 = vmatprep.mubr.msk.bf16.mxu0 %vm13592_vm0, %v15949_v35  ;;  %12837 = vmatprep.mubr.msk.bf16.mxu1 %vm13592_vm0, %v15949_v35 }
0x1748   :  { %12812 = vmatpush3.bf16.msra.mxu0 %v14976_v8  ;;  %12836 = vmatpush3.bf16.msra.mxu1 %v14979_v48 }
0x1749   :  { %12825 = vmatprep.subr.bf16.mxu0 %v15949_v35  ;;  %12849 = vmatprep.subr.bf16.mxu1 %v15949_v35 }
0x174b   :  { %12814 = vmatmul.mubr.msk.bf16.vlgmr.msra.gmra.mxu0 %vm259_vm1, %v15171_v27  ;;  %12838 = vmatmul.mubr.msk.bf16.vlgmr.msra.gmra.mxu1 %vm259_vm1, %v15171_v27 }
0x174c   :  { %12826 = vmatpush3.bf16.msra.mxu0 %v14990_v58  ;;  %12829 = vmatprep.mubr.msk.bf16.mxu0 %vm13592_vm0, %v15949_v35 }
0x174d   :  { %12827 = vmatprep.subr.bf16.mxu0 %v15949_v35  ;;  %12851 = vmatprep.mubr.msk.bf16.mxu1 %vm13592_vm0, %v15949_v35 }
0x1750   :  { %12828 = vmatpush3.bf16.msra.mxu0 %v15000_v2 }
0x1751   :  { %12841 = vmatprep.subr.bf16.mxu0 %v15949_v35 }
0x1753   :  { %12830 = vmatmul.mubr.msk.bf16.vlgmr.msra.gmra.mxu0 %vm259_vm1, %v15171_v27 }
0x1754   :  { %12842 = vmatpush3.bf16.msra.mxu0 %v15009_v0  ;;  %12845 = vmatprep.mubr.msk.bf16.mxu0 %vm13592_vm0, %v15949_v35 }
0x1755   :  { %12843 = vmatprep.subr.bf16.mxu0 %v15949_v35 }
0x1758   :  { %12844 = vmatpush3.bf16.msra.mxu0 %v15016_v3 }
0x1759   :  { %12855 = vmatprep.subr.bf16.mxu0 %v15949_v35 }
0x175b   :  { %12846 = vmatmul.mubr.msk.bf16.vlgmr.msra.gmra.mxu0 %vm259_vm1, %v15171_v27 }
0x175c   :  { %12857 = vmatprep.mubr.msk.bf16.mxu0 %vm13592_vm0, %v15949_v35 }
0x17d3   :  { %v6673_v10 = vpop.f32.mrf.mxu1 }
0x17d5   :  { %v12733_v32 = vpop.f32.mrf.mxu1 }
0x17d7   :  { %v6676_v33 = vpop.f32.mrf.mxu1 }
0x17d9   :  { %v12734_v5 = vpop.f32.mrf.mxu1 }
0x17db   :  { %v6765_v31 = vpop.f32.mrf.mxu1 }
0x17dd   :  { %v12745_v24 = vpop.f32.mrf.mxu1 }
0x17df   :  { %v6768_v59 = vpop.f32.mrf.mxu1 }
0x17e1   :  { %v12746_v61 = vpop.f32.mrf.mxu1 }
0x17e3   :  { %v6719_v21 = vpop.f32.mrf.mxu0  ;;  %v6865_v45 = vpop.f32.mrf.mxu1 }
0x17e4   :  { %v6817_v63 = vadd.f32 %v6719_v21, %v6673_v10  ;;  %v6866_v20 = vadd.f32 %v15032_v52, %v6865_v45 }
0x17e5   :  { %v12739_v15 = vpop.f32.mrf.mxu0  ;;  %v12759_v50 = vpop.f32.mrf.mxu1 }
0x17e6   :  { %v6818_v51 = vadd.f32 %v6817_v63, %v6765_v31  ;;  %v7311_v54 = vpack.c.bf16 %v6866_v20, %v6866_v20 }
0x17e7   :  { %v6722_v55 = vpop.f32.mrf.mxu0  ;;  %v6868_v8 = vpop.f32.mrf.mxu1 }
0x17e9   :  { %v12740_v48 = vpop.f32.mrf.mxu0  ;;  %v12760_v58 = vpop.f32.mrf.mxu1 }
0x17eb   :  { %v6811_v2 = vpop.f32.mrf.mxu0  ;;  %v6945_v0 = vpop.f32.mrf.mxu1 }
0x17ec   :  { %v15277_v3 = vadd.f32 %v6818_v51, %v6811_v2  ;;  %v6946_v52 = vadd.f32 %v15042_v36, %v6945_v0 }
0x17ed   :  { %v12751_v1 = vpop.f32.mrf.mxu0  ;;  %v12775_v40 = vpop.f32.mrf.mxu1 }
0x17ee   :  { %v7313_v15 = vpack.c.bf16 %v6946_v52, %v6946_v52 }
0x17ef   :  { %v6814_v30 = vpop.f32.mrf.mxu0  ;;  %v6948_v49 = vpop.f32.mrf.mxu1 }
0x17f1   :  { %v12752_v29 = vpop.f32.mrf.mxu0  ;;  %v12776_v19 = vpop.f32.mrf.mxu1 }
0x17f3   :  { %v6905_v25 = vpop.f32.mrf.mxu0  ;;  %v7025_v56 = vpop.f32.mrf.mxu1 }
0x17f4   :  { %v7026_v16 = vadd.f32 %v15028_v12, %v7025_v56 }
0x17f5   :  { %v12767_v60 = vpop.f32.mrf.mxu0  ;;  %v12791_v17 = vpop.f32.mrf.mxu1 }
0x17f6   :  { %v7315_v9 = vpack.c.bf16 %v7026_v16, %v7026_v16 }
0x17f7   :  { %v6908_v42 = vpop.f32.mrf.mxu0  ;;  %v7028_v27 = vpop.f32.mrf.mxu1 }
0x17f8   :  { %v7323_v13 = vsel %vm931_vm2, %v7315_v9, 0 }
0x17f9   :  { %v12768_v62 = vpop.f32.mrf.mxu0  ;;  %v12792_v22 = vpop.f32.mrf.mxu1  ;;  %12850 = vmatpush3.bf16.xpose.msra.mxu1 %v7323_v13 }
0x17fa   :  { %12861 = vmatprep.subr.bf16.mxu1 %v15949_v35 }
0x17fb   :  { %v6985_v37 = vpop.f32.mrf.mxu0  ;;  %v7105_v4 = vpop.f32.mrf.mxu1 }
0x17fc   :  { %v7106_v41 = vadd.f32 %v15036_v28, %v7105_v4  ;;  %v6986_v60 = vadd.f32 %v15076_v44, %v6985_v37 }
0x17fd   :  { %v12783_v18 = vpop.f32.mrf.mxu0  ;;  %v12807_v12 = vpop.f32.mrf.mxu1 }
0x17fe   :  { %v7317_v10 = vpack.c.bf16 %v7106_v41, %v7106_v41  ;;  %v7314_v42 = vpack.c.bf16 %v6986_v60, %v6986_v60 }
0x17ff   :  { %v6988_v32 = vpop.f32.mrf.mxu0  ;;  %v7108_v33 = vpop.f32.mrf.mxu1 }
0x1800   :  { %v7415_v5 = vsel %vm931_vm2, %v7317_v10, 0  ;;  %12852 = vmatmul.mubr.msk.bf16.vlgmr.msra.gmra.mxu1 %vm931_vm2, %v7311_v54 }
0x1801   :  { %v12784_v31 = vpop.f32.mrf.mxu0  ;;  %v12808_v24 = vpop.f32.mrf.mxu1  ;;  %12862 = vmatpush3.bf16.xpose.msra.mxu1 %v7415_v5  ;;  %12863 = vmatprep.mubr.msk.bf16.mxu1 %vm13592_vm0, %v15949_v35 }
0x1802   :  { %12873 = vmatprep.subr.bf16.mxu1 %v15949_v35 }
0x1803   :  { %v7065_v28 = vpop.f32.mrf.mxu0  ;;  %v7185_v59 = vpop.f32.mrf.mxu1 }
0x1804   :  { %v7066_v61 = vadd.f32 %v15047_v46, %v7065_v28  ;;  %v7186_v21 = vadd.f32 %v15050_v26, %v7185_v59  ;;  %v6906_v46 = vadd.f32 %v15059_v23, %v6905_v25 }
0x1805   :  { %v12799_v45 = vpop.f32.mrf.mxu0  ;;  %v12823_v63 = vpop.f32.mrf.mxu1 }
0x1806   :  { %v7316_v50 = vpack.c.bf16 %v7066_v61, %v7066_v61  ;;  %v7551_v51 = vpack.c.bf16 %v7186_v21, %v7186_v21  ;;  %v7312_v49 = vpack.c.bf16 %v6906_v46, %v6906_v46 }
0x1807   :  { %v7068_v55 = vpop.f32.mrf.mxu0  ;;  %v7188_v8 = vpop.f32.mrf.mxu1 }
0x1808   :  { %v7369_v48 = vsel %vm931_vm2, %v7316_v50, 0  ;;  %v7559_v58 = vsel %vm1171_vm3, %v7551_v51, 0  ;;  %12864 = vmatmul.mubr.msk.bf16.vlgmr.msra.gmra.mxu1 %vm931_vm2, %v7313_v15 }
0x1809   :  { %v12800_v36 = vpop.f32.mrf.mxu0  ;;  %v12824_v2 = vpop.f32.mrf.mxu1  ;;  %12856 = vmatpush3.bf16.xpose.msra.mxu0 %v7369_v48  ;;  %12874 = vmatpush3.bf16.msra.mxu1 %v7559_v58 }
0x180a   :  { %12867 = vmatprep.subr.bf16.mxu0 %v15949_v35  ;;  %12875 = vmatprep.mubr.msk.bf16.mxu1 %vm13592_vm0, %v15949_v35 }
0x180b   :  { %v7145_v26 = vpop.f32.mrf.mxu0  ;;  %v15299_v0 = vpop.f32.mrf.mxu1  ;;  %12885 = vmatprep.subr.bf16.mxu1 %v15949_v35 }
0x180c   :  { %v7146_v1 = vadd.f32 %v15065_v38, %v7145_v26 }
0x180d   :  { %v12815_v40 = vpop.f32.mrf.mxu0  ;;  %v12839_v30 = vpop.f32.mrf.mxu1 }
0x180e   :  { %v7318_v29 = vpack.c.bf16 %v7146_v1, %v7146_v1 }
0x180f   :  { %v7148_v19 = vpop.f32.mrf.mxu0  ;;  %v7268_v56 = vpop.f32.mrf.mxu1 }
0x1810   :  { %v7461_v23 = vsel %vm931_vm2, %v7318_v29, 0  ;;  %12858 = vmatmul.mubr.msk.bf16.vlgmr.msra.gmra.mxu0 %vm931_vm2, %v7312_v49  ;;  %v15327_v19 = vld [vmem:[%s14157_s12 + $0x1] ss:$0 sm:$0xff]  ;;  %s13621_s12 = smov 29  }
0x1811   :  { %v12816_v25 = vpop.f32.mrf.mxu0  ;;  %v12840_v16 = vpop.f32.mrf.mxu1  ;;  %12868 = vmatpush3.bf16.xpose.msra.mxu0 %v7461_v23  ;;  %12869 = vmatprep.mubr.msk.bf16.mxu0 %vm13592_vm0, %v15949_v35  ;;  %v6826_v56 = vadd.f32 %v15327_v19, %v15277_v3 }
0x1812   :  { %12879 = vmatprep.subr.bf16.mxu0 %v15949_v35 }
0x1813   :  { %v7225_v38 = vpop.f32.mrf.mxu0 }
0x1814   :  { %v7226_v17 = vadd.f32 %v15081_v14, %v7225_v38 }
0x1815   :  { %v12831_v9 = vpop.f32.mrf.mxu0 }
0x1816   :  { %v7552_v27 = vpack.c.bf16 %v7226_v17, %v7226_v17  ;;  %v7919_v17 = vadd.f32 %v6826_v56, %v14873_v7  ;;  %v7266_v7 = vadd.f32 %v15111_v34, %v15299_v0 }
0x1817   :  { %v7228_v13 = vpop.f32.mrf.mxu0 }
0x1818   :  { %v7605_v62 = vsel %vm1171_vm3, %v7552_v27, 0  ;;  %12870 = vmatmul.mubr.msk.bf16.vlgmr.msra.gmra.mxu0 %vm931_vm2, %v7314_v42  ;;  %v7925_v9 = vsel %vm259_vm1, %v7919_v17, 0.0 }
0x1819   :  { %v12832_v22 = vpop.f32.mrf.mxu0  ;;  %12880 = vmatpush3.bf16.msra.mxu0 %v7605_v62  ;;  %12881 = vmatprep.mubr.msk.bf16.mxu0 %vm13592_vm0, %v15949_v35 }
0x181a   :  { %12891 = vmatprep.subr.bf16.mxu0 %v15949_v35 }
0x181b   :  { %v15315_v44 = vpop.f32.mrf.mxu0 }
0x181d   :  { %v12847_v20 = vpop.f32.mrf.mxu0 }
0x181f   :  { %v7308_v37 = vpop.f32.mrf.mxu0 }
0x1821   :  { %v12848_v14 = vpop.f32.mrf.mxu0 }
0x18c0   :  { %v7359_v4 = vpop.f32.mrf.mxu1 }
0x18c1   :  { %v7360_v41 = vadd.f32 %v7359_v4, %v13921_v53  ;;  %v7553_v4 = vpack.c.bf16 %v7266_v7, %v7266_v7  ;;  %v15423_v7 = vld [vmem:[%s14203_s22 + $0x40] sm:$0xff]  }
0x18c2   :  { %v12853_v18 = vpop.f32.mrf.mxu1 }
0x18c3   :  { %v7503_v12 = vsel %vm931_vm2, %v7360_v41, -inf }
0x18c4   :  { %7504 = vmax.xlane.f32.xlu0 %v7503_v12  ;;  %v7362_v54 = vpop.f32.mrf.mxu1 }
0x18c6   :  { %v12854_v10 = vpop.f32.mrf.mxu1 }
0x18c8   :  { %v7451_v32 = vpop.f32.mrf.mxu1 }
0x18c9   :  { %v7452_v33 = vadd.f32 %v7451_v32, %v13921_v53  ;;  %v7651_v32 = vsel %vm1171_vm3, %v7553_v4, 0  ;;  %v15443_v4 = vld [vmem:[%s14208_s27] ss:$0 sps:$4 sm:$0xff]  }
0x18ca   :  { %v12865_v5 = vpop.f32.mrf.mxu1 }
0x18cb   :  { %v7509_v31 = vsel %vm931_vm2, %v7452_v33, -inf }
0x18cc   :  { %7510 = vmax.xlane.f32.xlu0 %v7509_v31  ;;  %v7454_v24 = vpop.f32.mrf.mxu1 }
0x18cd   :  { %v7306_v24 = vadd.f32 %v15122_v39, %v15315_v44 }
0x18ce   :  { %v12866_v52 = vpop.f32.mrf.mxu1 }
0x18d0   :  { %v7405_v28 = vpop.f32.mrf.mxu0 }
0x18d1   :  { %v7406_v59 = vadd.f32 %v7405_v28, %v13921_v53  ;;  %v7554_v28 = vpack.c.bf16 %v7306_v24, %v7306_v24  ;;  %v15529_v24 = vld [vmem:[%s14356_s14 + $0x50] sm:$0xff]  }
0x18d2   :  { %v12859_v61 = vpop.f32.mrf.mxu0 }
0x18d3   :  { %v7506_v21 = vsel %vm931_vm2, %v7406_v59, -inf }
0x18d4   :  { %7507 = vmax.xlane.f32.xlu1 %v7506_v21  ;;  %v7408_v45 = vpop.f32.mrf.mxu0  ;;  %v7697_v21 = vsel %vm1171_vm3, %v7554_v28, 0  ;;  %v15548_v28 = vld [vmem:[%s14356_s14 + $0x70] sm:$0xff]  }
0x18d6   :  { %v12860_v63 = vpop.f32.mrf.mxu0 }
0x18d8   :  { %v7497_v15 = vpop.f32.mrf.mxu0 }
0x18d9   :  { %v7498_v50 = vadd.f32 %v7497_v15, %v13921_v53 }
0x18da   :  { %v12871_v51 = vpop.f32.mrf.mxu0 }
0x18db   :  { %v7512_v55 = vsel %vm931_vm2, %v7498_v50, -inf }
0x18dc   :  { %7513 = vmax.xlane.f32.xlu1 %v7512_v55  ;;  %v7500_v8 = vpop.f32.mrf.mxu0 }
0x18de   :  { %v12872_v48 = vpop.f32.mrf.mxu0 }
0x194d   :  { %v7505_v58 = vpop.xlane.xlu0 %7504 }
0x194e   :  { %v7515_v36 = vsub.f32 %v7360_v41, %v7505_v58  ;;  %v15367_v58 = vld [vmem:[%s14213_s2 + $0x1] ss:$0 sm:$0xff]  ;;  %s13622_s2 = smov 30  }
0x1950   :  { %v7519_v2 = vmul.f32 1.442695, %v7515_v36 }
0x1952   :  { %13524 = vpow2.f32 %v7519_v2 }
0x1955   :  { %v7511_v46 = vpop.xlane.xlu0 %7510 }
0x1956   :  { %v7517_v26 = vsub.f32 %v7452_v33, %v7511_v46  ;;  %v15370_v46 = vld [vmem:[%s14198_s16 + $0x48] sm:$0xff]  }
0x1958   :  { %v7523_v1 = vmul.f32 1.442695, %v7517_v26 }
0x195a   :  { %13526 = vpow2.f32 %v7523_v1 }
0x195d   :  { %v7508_v40 = vpop.xlane.xlu1 %7507 }
0x195e   :  { %v7516_v30 = vsub.f32 %v7406_v59, %v7508_v40 }
0x195f   :  { %v13525_v49 = vpop.eup %13524 }
0x1960   :  { %v7521_v29 = vmul.f32 1.442695, %v7516_v30  ;;  %v7527_v53 = vsel %vm931_vm2, %v13525_v49, 0.0  ;;  %v15374_v30 = vld [vmem:[%s14218_s9 + $0x1] ss:$0 sm:$0xff] }
0x1961   :  { %7528 = vadd.xlane.f32.xlu0 %v7527_v53 }
0x1962   :  { %13528 = vpow2.f32 %v7521_v29 }
0x1965   :  { %v7514_v23 = vpop.xlane.xlu1 %7513 }
0x1966   :  { %v7518_v25 = vsub.f32 %v7498_v50, %v7514_v23  ;;  %v15389_v23 = vld [vmem:[%s14198_s16 + $0x68] sm:$0xff]  }
0x1967   :  { %v13527_v16 = vpop.eup %13526 }
0x1968   :  { %v7525_v60 = vmul.f32 1.442695, %v7518_v25  ;;  %v7533_v38 = vsel %vm931_vm2, %v13527_v16, 0.0 }
0x1969   :  { %7534 = vadd.xlane.f32.xlu0 %v7533_v38 }
0x196a   :  { %13530 = vpow2.f32 %v7525_v60 }
0x196d   :  { %7926 = vadd.xlane.f32.xlu0 %v7925_v9 }
0x196f   :  { %v13529_v42 = vpop.eup %13528 }
0x1970   :  { %v7530_v27 = vsel %vm931_vm2, %v13529_v42, 0.0 }
0x1971   :  { %7531 = vadd.xlane.f32.xlu1 %v7530_v27  ;;  %v15412_v27 = vld [vmem:[%s14203_s22 + $0x48] sm:$0xff]  }
0x1977   :  { %v13531_v13 = vpop.eup %13530 }
0x1978   :  { %v7536_v3 = vsel %vm931_vm2, %v13531_v13, 0.0 }
0x1979   :  { %7537 = vadd.xlane.f32.xlu1 %v7536_v3 }
0x19ea   :  { %v7529_v62 = vpop.xlane.xlu0 %7528 }
0x19eb   :  { %13532 = vrcp.f32 %v7529_v62 }
0x19f2   :  { %v7535_v22 = vpop.xlane.xlu0 %7534 }
0x19f3   :  { %13534 = vrcp.f32 %v7535_v22  ;;  %v15420_v22 = vld [vmem:[%s14198_s16 + $0x50] sm:$0xff]  }
0x19f6   :  { %v7927_v20 = vpop.xlane.xlu0 %7926 }
0x19f7   :  { %v7931_v37 = vmul.f32 0.03125, %v7927_v20 }
0x19f8   :  { %v13533_v14 = vpop.eup %13532 }
0x19f9   :  { %v7543_v41 = vmul.f32 %v13533_v14, %v13525_v49  ;;  %v7933_v18 = vsub.f32 %v7919_v17, %v7931_v37  ;;  %v15379_v49 = vld [vmem:[%s14198_s16 + $0x40] sm:$0xff]   ;;  %v15434_v37 = vld [vmem:[%s14198_s16 + $0x78] sm:$0xff]   ;;  %v15437_v14 = vld [vmem:[%s14203_s22 + $0x68] sm:$0xff]  }
0x19fa   :  { %v7532_v12 = vpop.xlane.xlu1 %7531  ;;  %v15399_v17 = vld [vmem:[%s14198_s16 + $0x60] sm:$0xff]  }
0x19fb   :  { %v7547_v54 = vpack.c.bf16 %v7543_v41, %v7543_v41  ;;  %13536 = vrcp.f32 %v7532_v12  ;;  %v7935_v10 = vmul.f32 %v7933_v18, %v7933_v18  ;;  %v15450_v41 = vld [vmem:[%s14198_s16 + $0x70] sm:$0xff]   ;;  %v15464_v12 = vld [vmem:[%s14203_s22 + $0x58] sm:$0xff]  }
0x19fd   :  { %12876 = vmatmul.mubr.msk.bf16.vlgmr.msra.gmra.mxu1 %vm931_vm2, %v7547_v54  ;;  %v7937_v33 = vsel %vm259_vm1, %v7935_v10, 0.0  ;;  %v15473_v54 = vld [vmem:[%s14203_s22 + $0x50] sm:$0xff]   ;;  %v15482_v10 = vld [vmem:[%s14203_s22 + $0x78] sm:$0xff]  }
0x19fe   :  { %12886 = vmatpush3.bf16.msra.mxu1 %v7651_v32  ;;  %7938 = vadd.xlane.f32.xlu1 %v7937_v33  ;;  %v15489_v32 = vld [vmem:[%s14203_s22 + $0x70] sm:$0xff]   ;;  %v15501_v33 = vld [vmem:[%s14356_s14 + $0x48] sm:$0xff]  }
0x19ff   :  { %12887 = vmatprep.mubr.msk.bf16.mxu1 %vm13592_vm0, %v15949_v35  ;;  %12897 = vmatprep.subr.bf16.mxu1 %v15949_v35 }
0x1a00   :  { %v13535_v34 = vpop.eup %13534 }
0x1a01   :  { %v7545_v0 = vmul.f32 %v13535_v34, %v13527_v16  ;;  %v15506_v34 = vld [vmem:[%s14356_s14 + $0x40] sm:$0xff]  }
0x1a02   :  { %v7538_v5 = vpop.xlane.xlu1 %7537 }
0x1a03   :  { %v7549_v31 = vpack.c.bf16 %v7545_v0, %v7545_v0  ;;  %13538 = vrcp.f32 %v7538_v5  ;;  %v15511_v0 = vld [vmem:[%s14356_s14 + $0x68] sm:$0xff]   ;;  %v15517_v5 = vld [vmem:[%s14356_s14 + $0x58] sm:$0xff]  }
0x1a05   :  { %12888 = vmatmul.mubr.msk.bf16.vlgmr.msra.gmra.mxu1 %vm931_vm2, %v7549_v31  ;;  %v15524_v31 = vld [vmem:[%s14356_s14 + $0x60] sm:$0xff]  }
0x1a06   :  { %12898 = vmatpush3.bf16.msra.mxu1 %v15139_v11  ;;  %12899 = vmatprep.mubr.msk.bf16.mxu1 %vm13592_vm0, %v15949_v35 }
0x1a07   :  { %12909 = vmatprep.subr.bf16.mxu1 %v15949_v35 }
0x1a08   :  { %v13537_v52 = vpop.eup %13536 }
0x1a09   :  { %v7544_v59 = vmul.f32 %v13537_v52, %v13529_v42  ;;  %v15537_v52 = vld [vmem:[%s14356_s14 + $0x78] sm:$0xff]  }
0x1a0b   :  { %v7548_v61 = vpack.c.bf16 %v7544_v59, %v7544_v59 }
0x1a0d   :  { %12882 = vmatmul.mubr.msk.bf16.vlgmr.msra.gmra.mxu0 %vm931_vm2, %v7548_v61 }
0x1a0e   :  { %12892 = vmatpush3.bf16.msra.mxu0 %v7697_v21  ;;  %12893 = vmatprep.mubr.msk.bf16.mxu0 %vm13592_vm0, %v15949_v35 }
0x1a0f   :  { %12903 = vmatprep.subr.bf16.mxu0 %v15949_v35 }
0x1a10   :  { %v13539_v39 = vpop.eup %13538 }
0x1a11   :  { %v7546_v11 = vmul.f32 %v13539_v39, %v13531_v13 }
0x1a13   :  { %v7550_v44 = vpack.c.bf16 %v7546_v11, %v7546_v11 }
0x1a15   :  { %12894 = vmatmul.mubr.msk.bf16.vlgmr.msra.gmra.mxu0 %vm931_vm2, %v7550_v44 }
0x1a16   :  { %12904 = vmatpush3.bf16.msra.mxu0 %v15145_v57  ;;  %12905 = vmatprep.mubr.msk.bf16.mxu0 %vm13592_vm0, %v15949_v35 }
0x1a17   :  { %12915 = vmatprep.subr.bf16.mxu0 %v15949_v35 }
0x1a87   :  { %v7939_v45 = vpop.xlane.xlu1 %7938 }
0x1a88   :  { %v7943_v63 = vmul.f32 0.03125, %v7939_v45 }
0x1a8a   :  { %v7945_v15 = vadd.f32 1e-05, %v7943_v63 }
0x1a8c   :  { %13540 = vrsqrt.f32 %v7945_v15 }
0x1a99   :  { %v13541_v55 = vpop.eup %13540 }
0x1a9a   :  { %v7949_v57 = vmul.f32 %v13541_v55, %v7933_v18  ;;  %v15453_v18 = vld [vmem:[%s14203_s22 + $0x60] sm:$0xff]  }
0x1a9c   :  { %v7957_v26 = vmul.f32 %v15367_v58, %v7949_v57 }
0x1a9e   :  { %v15385_v29 = vadd.f32 %v15374_v30, %v7957_v26 }
0x1aa0   :  { %v8040_v16 = vpack.c.bf16 %v15385_v29, %v15385_v29 }
0x1abd   :  { %v7595_v50 = vpop.f32.mrf.mxu1 }
0x1abe   :  { %v7739_v51 = vpack.c.bf16 %v7595_v50, %v7595_v50 }
0x1abf   :  { %v12877_v8 = vpop.f32.mrf.mxu1 }
0x1ac0   :  { %12900 = vmatmul.mubr.msk.bf16.vlgmr.msra.gmra.mxu1 %vm931_vm2, %v7739_v51 }
0x1ac1   :  { %v7598_v48 = vpop.f32.mrf.mxu1  ;;  %12910 = vmatpush3.bf16.msra.mxu1 %v15151_v43  ;;  %12911 = vmatprep.mubr.msk.bf16.mxu1 %vm13592_vm0, %v15949_v35 }
0x1ac2   :  { %12921 = vmatprep.subr.bf16.mxu1 %v15949_v35 }
0x1ac3   :  { %v12878_v36 = vpop.f32.mrf.mxu1 }
0x1ac5   :  { %v7687_v2 = vpop.f32.mrf.mxu1 }
0x1ac6   :  { %v7741_v1 = vpack.c.bf16 %v7687_v2, %v7687_v2 }
0x1ac7   :  { %v12889_v40 = vpop.f32.mrf.mxu1 }
0x1ac8   :  { %12912 = vmatmul.mubr.msk.bf16.vlgmr.msra.gmra.mxu1 %vm931_vm2, %v7741_v1 }
0x1ac9   :  { %v7690_v43 = vpop.f32.mrf.mxu1  ;;  %12922 = vmatpush3.bf16.msra.mxu1 %v15370_v46  ;;  %12925 = vmatprep.mubr.msk.bf16.mxu1 %vm13592_vm0, %v15949_v35 }
0x1aca   :  { %12923 = vmatprep.subr.bf16.mxu1 %v15949_v35 }
0x1acb   :  { %v12890_v53 = vpop.f32.mrf.mxu1 }
0x1acd   :  { %v7641_v56 = vpop.f32.mrf.mxu0  ;;  %12924 = vmatpush3.bf16.msra.mxu1 %v15379_v49 }
0x1ace   :  { %v7740_v25 = vpack.c.bf16 %v7641_v56, %v7641_v56  ;;  %12937 = vmatprep.subr.bf16.mxu1 %v15949_v35 }
0x1acf   :  { %v12883_v60 = vpop.f32.mrf.mxu0 }
0x1ad0   :  { %12906 = vmatmul.mubr.msk.bf16.vlgmr.msra.gmra.mxu0 %vm931_vm2, %v7740_v25  ;;  %12926 = vmatmul.mubr.msk.bf16.vlgmr.msra.gmra.mxu1 %vm259_vm1, %v8040_v16 }
0x1ad1   :  { %v7644_v38 = vpop.f32.mrf.mxu0  ;;  %12916 = vmatpush3.bf16.msra.mxu0 %v15175_v6  ;;  %12938 = vmatpush3.bf16.msra.mxu1 %v15389_v23  ;;  %v15409_v6 = vld [vmem:[%s14198_s16 + $0x58] sm:$0xff]  }
0x1ad2   :  { %12939 = vmatprep.subr.bf16.mxu1 %v15949_v35  ;;  %12917 = vmatprep.mubr.msk.bf16.mxu0 %vm13592_vm0, %v15949_v35 }
0x1ad3   :  { %v12884_v9 = vpop.f32.mrf.mxu0  ;;  %12941 = vmatprep.mubr.msk.bf16.mxu1 %vm13592_vm0, %v15949_v35  ;;  %12929 = vmatprep.subr.bf16.mxu0 %v15949_v35 }
0x1ad4   :  { %v15559_v9 = vld [vmem:[%s14415_s20 + $0x4] ss:$0 sm:$0xff] }
0x1ad5   :  { %v7733_v42 = vpop.f32.mrf.mxu0  ;;  %12940 = vmatpush3.bf16.msra.mxu1 %v15399_v17 }
0x1ad6   :  { %v7742_v13 = vpack.c.bf16 %v7733_v42, %v7733_v42  ;;  %12953 = vmatprep.subr.bf16.mxu1 %v15949_v35 }
0x1ad7   :  { %v12895_v3 = vpop.f32.mrf.mxu0 }
0x1ad8   :  { %12918 = vmatmul.mubr.msk.bf16.vlgmr.msra.gmra.mxu0 %vm931_vm2, %v7742_v13  ;;  %12942 = vmatmul.mubr.msk.bf16.vlgmr.msra.gmra.mxu1 %vm259_vm1, %v8040_v16 }
0x1ad9   :  { %v7736_v62 = vpop.f32.mrf.mxu0  ;;  %12930 = vmatpush3.bf16.msra.mxu0 %v15409_v6  ;;  %12954 = vmatpush3.bf16.msra.mxu1 %v15412_v27 }
0x1ada   :  { %12931 = vmatprep.subr.bf16.mxu0 %v15949_v35  ;;  %12955 = vmatprep.subr.bf16.mxu1 %v15949_v35 }
0x1adb   :  { %v12896_v20 = vpop.f32.mrf.mxu0  ;;  %12933 = vmatprep.mubr.msk.bf16.mxu0 %vm13592_vm0, %v15949_v35  ;;  %12957 = vmatprep.mubr.msk.bf16.mxu1 %vm13592_vm0, %v15949_v35 }
0x1add   :  { %12932 = vmatpush3.bf16.msra.mxu0 %v15420_v22  ;;  %12956 = vmatpush3.bf16.msra.mxu1 %v15423_v7 }
0x1ade   :  { %12945 = vmatprep.subr.bf16.mxu0 %v15949_v35  ;;  %12969 = vmatprep.subr.bf16.mxu1 %v15949_v35 }
0x1ae0   :  { %12934 = vmatmul.mubr.msk.bf16.vlgmr.msra.gmra.mxu0 %vm259_vm1, %v8040_v16  ;;  %12958 = vmatmul.mubr.msk.bf16.vlgmr.msra.gmra.mxu1 %vm259_vm1, %v15443_v4 }
0x1ae1   :  { %12946 = vmatpush3.bf16.msra.mxu0 %v15434_v37  ;;  %12970 = vmatpush3.bf16.msra.mxu1 %v15437_v14 }
0x1ae2   :  { %12947 = vmatprep.subr.bf16.mxu0 %v15949_v35  ;;  %12971 = vmatprep.subr.bf16.mxu1 %v15949_v35 }
0x1ae3   :  { %12949 = vmatprep.mubr.msk.bf16.mxu0 %vm13592_vm0, %v15949_v35  ;;  %12973 = vmatprep.mubr.msk.bf16.mxu1 %vm13592_vm0, %v15949_v35 }
0x1ae5   :  { %12948 = vmatpush3.bf16.msra.mxu0 %v15450_v41  ;;  %12972 = vmatpush3.bf16.msra.mxu1 %v15453_v18 }
0x1ae6   :  { %12961 = vmatprep.subr.bf16.mxu0 %v15949_v35  ;;  %12985 = vmatprep.subr.bf16.mxu1 %v15949_v35 }
0x1ae8   :  { %12950 = vmatmul.mubr.msk.bf16.vlgmr.msra.gmra.mxu0 %vm259_vm1, %v8040_v16  ;;  %12974 = vmatmul.mubr.msk.bf16.vlgmr.msra.gmra.mxu1 %vm259_vm1, %v15443_v4 }
0x1ae9   :  { %12962 = vmatpush3.bf16.msra.mxu0 %v15464_v12  ;;  %12965 = vmatprep.mubr.msk.bf16.mxu0 %vm13592_vm0, %v15949_v35 }
0x1aea   :  { %12963 = vmatprep.subr.bf16.mxu0 %v15949_v35  ;;  %12989 = vmatprep.mubr.msk.bf16.mxu1 %vm13592_vm0, %v15949_v35 }
0x1aeb   :  { %12986 = vmatpush3.bf16.msra.mxu1 %v15501_v33 }
0x1aec   :  { %12987 = vmatprep.subr.bf16.mxu1 %v15949_v35 }
0x1aed   :  { %12964 = vmatpush3.bf16.msra.mxu0 %v15473_v54 }
0x1aee   :  { %12977 = vmatprep.subr.bf16.mxu0 %v15949_v35 }
0x1aef   :  { %12988 = vmatpush3.bf16.msra.mxu1 %v15506_v34 }
0x1af0   :  { %12966 = vmatmul.mubr.msk.bf16.vlgmr.msra.gmra.mxu0 %vm259_vm1, %v15443_v4  ;;  %13001 = vmatprep.subr.bf16.mxu1 %v15949_v35 }
0x1af1   :  { %12978 = vmatpush3.bf16.msra.mxu0 %v15482_v10  ;;  %12981 = vmatprep.mubr.msk.bf16.mxu0 %vm13592_vm0, %v15949_v35 }
0x1af2   :  { %12979 = vmatprep.subr.bf16.mxu0 %v15949_v35  ;;  %12990 = vmatmul.mubr.msk.bf16.vlgmr.msra.gmra.mxu1 %vm259_vm1, %v15443_v4 }
0x1af3   :  { %13002 = vmatpush3.bf16.msra.mxu1 %v15511_v0  ;;  %13005 = vmatprep.mubr.msk.bf16.mxu1 %vm13592_vm0, %v15949_v35 }
0x1af4   :  { %13003 = vmatprep.subr.bf16.mxu1 %v15949_v35 }
0x1af5   :  { %12980 = vmatpush3.bf16.msra.mxu0 %v15489_v32 }
0x1af6   :  { %12993 = vmatprep.subr.bf16.mxu0 %v15949_v35 }
0x1af7   :  { %13004 = vmatpush3.bf16.msra.mxu1 %v15524_v31 }
0x1af8   :  { %12982 = vmatmul.mubr.msk.bf16.vlgmr.msra.gmra.mxu0 %vm259_vm1, %v15443_v4  ;;  %13017 = vmatprep.subr.bf16.mxu1 %v15949_v35 }
0x1af9   :  { %12997 = vmatprep.mubr.msk.bf16.mxu0 %vm13592_vm0, %v15949_v35  ;;  %12994 = vmatpush3.bf16.msra.mxu0 %v15517_v5 }
0x1afa   :  { %12995 = vmatprep.subr.bf16.mxu0 %v15949_v35  ;;  %13006 = vmatmul.mubr.msk.bf16.vlgmr.msra.gmra.mxu1 %vm259_vm1, %v15443_v4 }
0x1afb   :  { %13019 = vmatprep.mubr.msk.bf16.mxu1 %vm13592_vm0, %v15949_v35 }
0x1afd   :  { %12996 = vmatpush3.bf16.msra.mxu0 %v15529_v24 }
0x1afe   :  { %13009 = vmatprep.subr.bf16.mxu0 %v15949_v35 }
0x1b00   :  { %12998 = vmatmul.mubr.msk.bf16.vlgmr.msra.gmra.mxu0 %vm259_vm1, %v15443_v4 }
0x1b01   :  { %13010 = vmatpush3.bf16.msra.mxu0 %v15537_v52  ;;  %13013 = vmatprep.mubr.msk.bf16.mxu0 %vm13592_vm0, %v15949_v35 }
0x1b02   :  { %13011 = vmatprep.subr.bf16.mxu0 %v15949_v35 }
0x1b05   :  { %13012 = vmatpush3.bf16.msra.mxu0 %v15548_v28 }
0x1b06   :  { %13023 = vmatprep.subr.bf16.mxu0 %v15949_v35 }
0x1b08   :  { %13014 = vmatmul.mubr.msk.bf16.vlgmr.msra.gmra.mxu0 %vm259_vm1, %v15443_v4 }
0x1b09   :  { %13025 = vmatprep.mubr.msk.bf16.mxu0 %vm13592_vm0, %v15949_v35 }
0x1b80   :  { %v7780_v59 = vpop.f32.mrf.mxu1 }
0x1b82   :  { %v12901_v61 = vpop.f32.mrf.mxu1 }
0x1b84   :  { %v7783_v21 = vpop.f32.mrf.mxu1 }
0x1b86   :  { %v12902_v39 = vpop.f32.mrf.mxu1 }
0x1b88   :  { %v7866_v11 = vpop.f32.mrf.mxu1 }
0x1b8a   :  { %v12913_v44 = vpop.f32.mrf.mxu1 }
0x1b8c   :  { %v7869_v45 = vpop.f32.mrf.mxu1 }
0x1b8d   :  { %v15567_v45 = vld [vmem:[%s14415_s20 + $0x6] ss:$0 sm:$0xff] }
0x1b8e   :  { %v12914_v63 = vpop.f32.mrf.mxu1 }
0x1b90   :  { %v7823_v15 = vpop.f32.mrf.mxu0  ;;  %v8114_v50 = vpop.f32.mrf.mxu1 }
0x1b91   :  { %v7915_v51 = vadd.f32 %v7823_v15, %v7780_v59  ;;  %v15563_v59 = vld [vmem:[%s14420_s28 + $0x4] ss:$0 sm:$0xff] }
0x1b92   :  { %v12907_v55 = vpop.f32.mrf.mxu0  ;;  %v12927_v8 = vpop.f32.mrf.mxu1  ;;  %v8115_v63 = vadd.f32 %v15563_v59, %v8114_v50 }
0x1b93   :  { %v7916_v48 = vadd.f32 %v7915_v51, %v7866_v11 }
0x1b94   :  { %v7826_v57 = vpop.f32.mrf.mxu0  ;;  %v8117_v36 = vpop.f32.mrf.mxu1 }
0x1b95   :  { %v8740_v57 = vpack.c.bf16 %v8115_v63, %v8115_v63 }
0x1b96   :  { %v12908_v2 = vpop.f32.mrf.mxu0  ;;  %v12928_v26 = vpop.f32.mrf.mxu1 }
0x1b97   :  { %v15573_v2 = vld [vmem:[%s14420_s28 + $0x6] ss:$0 sm:$0xff] }
0x1b98   :  { %v7909_v1 = vpop.f32.mrf.mxu0  ;;  %v8218_v40 = vpop.f32.mrf.mxu1 }
0x1b99   :  { %v15556_v43 = vadd.f32 %v7916_v48, %v7909_v1 }
0x1b9a   :  { %v12919_v53 = vpop.f32.mrf.mxu0  ;;  %v12943_v56 = vpop.f32.mrf.mxu1 }
0x1b9b   :  { %v15578_v56 = vld [vmem:[%s14415_s20 + $0x5] ss:$0 sm:$0xff] }
0x1b9c   :  { %v7912_v25 = vpop.f32.mrf.mxu0  ;;  %v8221_v16 = vpop.f32.mrf.mxu1 }
0x1b9d   :  { %v8219_v16 = vadd.f32 %v15573_v2, %v8218_v40 }
0x1b9e   :  { %v12920_v60 = vpop.f32.mrf.mxu0  ;;  %v12944_v38 = vpop.f32.mrf.mxu1 }
0x1ba0   :  { %v8166_v42 = vpop.f32.mrf.mxu0  ;;  %v8346_v13 = vpop.f32.mrf.mxu1 }
0x1ba1   :  { %v8347_v3 = vadd.f32 %v15559_v9, %v8346_v13 }
0x1ba2   :  { %v12935_v62 = vpop.f32.mrf.mxu0  ;;  %v12959_v20 = vpop.f32.mrf.mxu1 }
0x1ba3   :  { %v8744_v4 = vpack.c.bf16 %v8347_v3, %v8347_v3  ;;  %v8742_v3 = vpack.c.bf16 %v8219_v16, %v8219_v16  ;;  %v15586_v20 = vld [vmem:[%s14420_s28 + $0x5] ss:$0 sm:$0xff] }
0x1ba4   :  { %v8169_v61 = vpop.f32.mrf.mxu0  ;;  %v8349_v21 = vpop.f32.mrf.mxu1  ;;  %v8167_v40 = vadd.f32 %v15586_v20, %v8166_v42 }
0x1ba5   :  { %v8752_v39 = vsel %vm931_vm2, %v8744_v4, 0 }
0x1ba6   :  { %v12936_v11 = vpop.f32.mrf.mxu0  ;;  %v12960_v44 = vpop.f32.mrf.mxu1  ;;  %13018 = vmatpush3.bf16.xpose.msra.mxu1 %v8752_v39  ;;  %v15591_v39 = vld [vmem:[%s14415_s20 + $0x7] ss:$0 sm:$0xff]  ;;  %s10860_s20 = sld [smem:[%s15943_s0 + %s13622_s2]]  }
0x1ba7   :  { %13029 = vmatprep.subr.bf16.mxu1 %v15949_v35 }
0x1ba8   :  { %v8270_v15 = vpop.f32.mrf.mxu0  ;;  %v8450_v51 = vpop.f32.mrf.mxu1 }
0x1ba9   :  { %v8451_v55 = vadd.f32 %v15567_v45, %v8450_v51  ;;  %v8741_v51 = vpack.c.bf16 %v8167_v40, %v8167_v40 }
0x1baa   :  { %v12951_v8 = vpop.f32.mrf.mxu0  ;;  %v12975_v48 = vpop.f32.mrf.mxu1 }
0x1bab   :  { %v8746_v36 = vpack.c.bf16 %v8451_v55, %v8451_v55  ;;  %v15599_v8 = vld [vmem:[%s14420_s28 + $0x7] ss:$0 sm:$0xff]  ;;  %s13623_s28 = smov 32  }
0x1bac   :  { %v8273_v26 = vpop.f32.mrf.mxu0  ;;  %v8453_v1 = vpop.f32.mrf.mxu1  ;;  %v8271_v42 = vadd.f32 %v15599_v8, %v8270_v15 }
0x1bad   :  { %v8844_v53 = vsel %vm931_vm2, %v8746_v36, 0  ;;  %13020 = vmatmul.mubr.msk.bf16.vlgmr.msra.gmra.mxu1 %vm931_vm2, %v8740_v57  ;;  %v15611_v1 = vld [vmem:[%s14477_s5 + $0x4] ss:$0 sm:$0xff] }
0x1bae   :  { %v12952_v50 = vpop.f32.mrf.mxu0  ;;  %13030 = vmatpush3.bf16.xpose.msra.mxu1 %v8844_v53  ;;  %13031 = vmatprep.mubr.msk.bf16.mxu1 %vm13592_vm0, %v15949_v35  ;;  %v12976_v25 = vpop.f32.mrf.mxu1  ;;  %v8743_v26 = vpack.c.bf16 %v8271_v42, %v8271_v42 }
0x1baf   :  { %13041 = vmatprep.subr.bf16.mxu1 %v15949_v35 }
0x1bb0   :  { %v8398_v60 = vpop.f32.mrf.mxu0 }
0x1bb1   :  { %v8399_v38 = vadd.f32 %v15578_v56, %v8398_v60 }
0x1bb2   :  { %v12967_v13 = vpop.f32.mrf.mxu0  ;;  %v8578_v53 = vpop.f32.mrf.mxu1 }
0x1bb3   :  { %v8745_v62 = vpack.c.bf16 %v8399_v38, %v8399_v38  ;;  %v8579_v50 = vadd.f32 %v15611_v1, %v8578_v53 }
0x1bb4   :  { %v8401_v4 = vpop.f32.mrf.mxu0  ;;  %v12991_v25 = vpop.f32.mrf.mxu1 }
0x1bb5   :  { %v8798_v61 = vsel %vm931_vm2, %v8745_v62, 0  ;;  %13032 = vmatmul.mubr.msk.bf16.vlgmr.msra.gmra.mxu1 %vm931_vm2, %v8742_v3  ;;  %v8980_v16 = vpack.c.bf16 %v8579_v50, %v8579_v50  ;;  %v15619_v3 = vld [vmem:[%s14477_s5 + $0x5] ss:$0 sm:$0xff] }
0x1bb6   :  { %v12968_v21 = vpop.f32.mrf.mxu0  ;;  %13024 = vmatpush3.bf16.xpose.msra.mxu0 %v8798_v61  ;;  %13043 = vmatprep.mubr.msk.bf16.mxu1 %vm13592_vm0, %v15949_v35  ;;  %v8581_v60 = vpop.f32.mrf.mxu1 }
0x1bb7   :  { %13035 = vmatprep.subr.bf16.mxu0 %v15949_v35  ;;  %v8988_v38 = vsel %vm1171_vm3, %v8980_v16, 0 }
0x1bb8   :  { %v8502_v11 = vpop.f32.mrf.mxu0  ;;  %v12992_v15 = vpop.f32.mrf.mxu1  ;;  %13042 = vmatpush3.bf16.msra.mxu1 %v8988_v38 }
0x1bb9   :  { %v8503_v44 = vadd.f32 %v15591_v39, %v8502_v11  ;;  %13053 = vmatprep.subr.bf16.mxu1 %v15949_v35 }
0x1bba   :  { %v12983_v63 = vpop.f32.mrf.mxu0  ;;  %v15616_v13 = vpop.f32.mrf.mxu1 }
0x1bbb   :  { %v8747_v55 = vpack.c.bf16 %v8503_v44, %v8503_v44 }
0x1bbc   :  { %v8505_v48 = vpop.f32.mrf.mxu0  ;;  %v13007_v4 = vpop.f32.mrf.mxu1 }
0x1bbd   :  { %v8890_v57 = vsel %vm931_vm2, %v8747_v55, 0  ;;  %13026 = vmatmul.mubr.msk.bf16.vlgmr.msra.gmra.mxu0 %vm931_vm2, %v8741_v51 }
0x1bbe   :  { %v12984_v36 = vpop.f32.mrf.mxu0  ;;  %13036 = vmatpush3.bf16.xpose.msra.mxu0 %v8890_v57  ;;  %13037 = vmatprep.mubr.msk.bf16.mxu0 %vm13592_vm0, %v15949_v35  ;;  %v8685_v40 = vpop.f32.mrf.mxu1 }
0x1bbf   :  { %13047 = vmatprep.subr.bf16.mxu0 %v15949_v35 }
0x1bc0   :  { %v8630_v62 = vpop.f32.mrf.mxu0  ;;  %v13008_v63 = vpop.f32.mrf.mxu1 }
0x1bc1   :  { %v8631_v61 = vadd.f32 %v15619_v3, %v8630_v62 }
0x1bc2   :  { %v12999_v21 = vpop.f32.mrf.mxu0 }
0x1bc3   :  { %v8981_v11 = vpack.c.bf16 %v8631_v61, %v8631_v61 }
0x1bc4   :  { %v8633_v44 = vpop.f32.mrf.mxu0 }
0x1bc5   :  { %13038 = vmatmul.mubr.msk.bf16.vlgmr.msra.gmra.mxu0 %vm931_vm2, %v8743_v26  ;;  %v9034_v51 = vsel %vm1171_vm3, %v8981_v11, 0 }
0x1bc6   :  { %13049 = vmatprep.mubr.msk.bf16.mxu0 %vm13592_vm0, %v15949_v35  ;;  %v13000_v55 = vpop.f32.mrf.mxu0  ;;  %13048 = vmatpush3.bf16.msra.mxu0 %v9034_v51 }
0x1bc7   :  { %13059 = vmatprep.subr.bf16.mxu0 %v15949_v35 }
0x1bc8   :  { %v15624_v48 = vpop.f32.mrf.mxu0 }
0x1bca   :  { %v13015_v57 = vpop.f32.mrf.mxu0 }
0x1bcc   :  { %v8737_v36 = vpop.f32.mrf.mxu0 }
0x1bce   :  { %v13016_v42 = vpop.f32.mrf.mxu0 }
0x1c6d   :  { %v8788_v26 = vpop.f32.mrf.mxu1 }
0x1c6e   :  { %v8932_v53 = vsel %vm931_vm2, %v8788_v26, -inf }
0x1c6f   :  { %8933 = vmax.xlane.f32.xlu0 %v8932_v53  ;;  %v13021_v50 = vpop.f32.mrf.mxu1 }
0x1c71   :  { %v8791_v25 = vpop.f32.mrf.mxu1 }
0x1c73   :  { %v13022_v16 = vpop.f32.mrf.mxu1 }
0x1c75   :  { %v8880_v60 = vpop.f32.mrf.mxu1 }
0x1c76   :  { %v8938_v38 = vsel %vm931_vm2, %v8880_v60, -inf }
0x1c77   :  { %8939 = vmax.xlane.f32.xlu0 %v8938_v38  ;;  %v13033_v15 = vpop.f32.mrf.mxu1 }
0x1c79   :  { %v8883_v62 = vpop.f32.mrf.mxu1 }
0x1c7b   :  { %v13034_v4 = vpop.f32.mrf.mxu1 }
0x1c7d   :  { %v8834_v61 = vpop.f32.mrf.mxu0 }
0x1c7e   :  { %v8935_v21 = vsel %vm931_vm2, %v8834_v61, -inf }
0x1c7f   :  { %8936 = vmax.xlane.f32.xlu1 %v8935_v21  ;;  %v13027_v40 = vpop.f32.mrf.mxu0 }
0x1c81   :  { %v8837_v11 = vpop.f32.mrf.mxu0 }
0x1c82   :  { %v7918_v11 = vadd.f32 %v15327_v19, %v15556_v43 }
0x1c83   :  { %v13028_v44 = vpop.f32.mrf.mxu0 }
0x1c85   :  { %v8926_v63 = vpop.f32.mrf.mxu0 }
0x1c86   :  { %v8941_v51 = vsel %vm931_vm2, %v8926_v63, -inf }
0x1c87   :  { %8942 = vmax.xlane.f32.xlu1 %v8941_v51  ;;  %v13039_v55 = vpop.f32.mrf.mxu0 }
0x1c89   :  { %v8929_v57 = vpop.f32.mrf.mxu0 }
0x1c8a   :  { %v7920_v57 = vadd.f32 %v7918_v11, %v15164_v47 }
0x1c8b   :  { %v13040_v36 = vpop.f32.mrf.mxu0 }
0x1cf8   :  { %v8934_v42 = vpop.xlane.xlu0 %8933 }
0x1cf9   :  { %v8944_v53 = vsub.f32 %v8788_v26, %v8934_v42 }
0x1cfb   :  { %v8948_v50 = vmul.f32 1.442695, %v8944_v53 }
0x1cfd   :  { %13542 = vpow2.f32 %v8948_v50 }
0x1d00   :  { %v8940_v25 = vpop.xlane.xlu0 %8939 }
0x1d01   :  { %v8946_v16 = vsub.f32 %v8880_v60, %v8940_v25 }
0x1d03   :  { %v8952_v38 = vmul.f32 1.442695, %v8946_v16 }
0x1d05   :  { %13544 = vpow2.f32 %v8952_v38 }
0x1d08   :  { %v8937_v15 = vpop.xlane.xlu1 %8936 }
0x1d09   :  { %v8945_v62 = vsub.f32 %v8834_v61, %v8937_v15  ;;  %v7928_v61 = vsel %vm259_vm1, %v7920_v57, 0.0 }
0x1d0a   :  { %v13543_v4 = vpop.eup %13542 }
0x1d0b   :  { %v8950_v21 = vmul.f32 1.442695, %v8945_v62  ;;  %v8956_v40 = vsel %vm931_vm2, %v13543_v4, 0.0 }
0x1d0c   :  { %8957 = vadd.xlane.f32.xlu0 %v8956_v40 }
0x1d0d   :  { %13546 = vpow2.f32 %v8950_v21 }
0x1d10   :  { %v8943_v44 = vpop.xlane.xlu1 %8942 }
0x1d11   :  { %v8947_v51 = vsub.f32 %v8926_v63, %v8943_v44  ;;  %v15639_v63 = vld [vmem:[%s14477_s5 + $0x6] ss:$0 sm:$0xff] }
0x1d12   :  { %v13545_v26 = vpop.eup %13544  ;;  %v8683_v47 = vadd.f32 %v15639_v63, %v15616_v13 }
0x1d13   :  { %v8954_v55 = vmul.f32 1.442695, %v8947_v51  ;;  %v8962_v60 = vsel %vm931_vm2, %v13545_v26, 0.0 }
0x1d14   :  { %8963 = vadd.xlane.f32.xlu0 %v8962_v60  ;;  %v8982_v15 = vpack.c.bf16 %v8683_v47, %v8683_v47  ;;  %v15650_v60 = vld [vmem:[%s14477_s5 + $0x7] ss:$0 sm:$0xff] }
0x1d15   :  { %13548 = vpow2.f32 %v8954_v55 }
0x1d16   :  { %v9080_v51 = vsel %vm1171_vm3, %v8982_v15, 0  ;;  %v11267_v15 = vld [vmem:[%s14537_s13 + $0x14] sm:$0xf] }
0x1d18   :  { %7929 = vadd.xlane.f32.xlu0 %v7928_v61 }
0x1d1a   :  { %v13547_v36 = vpop.eup %13546 }
0x1d1b   :  { %v8959_v42 = vsel %vm931_vm2, %v13547_v36, 0.0 }
0x1d1c   :  { %8960 = vadd.xlane.f32.xlu1 %v8959_v42  ;;  %v8735_v42 = vadd.f32 %v15650_v60, %v15624_v48 }
0x1d22   :  { %v13549_v53 = vpop.eup %13548 }
0x1d23   :  { %v8965_v19 = vsel %vm931_vm2, %v13549_v53, 0.0 }
0x1d24   :  { %8966 = vadd.xlane.f32.xlu1 %v8965_v19 }
0x1d95   :  { %v8958_v43 = vpop.xlane.xlu0 %8957 }
0x1d96   :  { %13550 = vrcp.f32 %v8958_v43  ;;  %v8983_v43 = vpack.c.bf16 %v8735_v42, %v8735_v42 }
0x1d9d   :  { %v8964_v50 = vpop.xlane.xlu0 %8963 }
0x1d9e   :  { %13552 = vrcp.f32 %v8964_v50 }
0x1da1   :  { %v7930_v25 = vpop.xlane.xlu0 %7929 }
0x1da2   :  { %v7932_v16 = vmul.f32 0.03125, %v7930_v25 }
0x1da3   :  { %v13551_v38 = vpop.eup %13550 }
0x1da4   :  { %v8972_v62 = vmul.f32 %v13551_v38, %v13543_v4  ;;  %v7934_v21 = vsub.f32 %v7920_v57, %v7932_v16 }
0x1da5   :  { %v8961_v40 = vpop.xlane.xlu1 %8960 }
0x1da6   :  { %v8976_v11 = vpack.c.bf16 %v8972_v62, %v8972_v62  ;;  %13554 = vrcp.f32 %v8961_v40  ;;  %v7936_v44 = vmul.f32 %v7934_v21, %v7934_v21  ;;  %v15673_v62 = vsel %vm1171_vm3, %v11267_v15, 0 }
0x1da8   :  { %13044 = vmatmul.mubr.msk.bf16.vlgmr.msra.gmra.mxu1 %vm931_vm2, %v8976_v11  ;;  %v7940_v55 = vsel %vm259_vm1, %v7936_v44, 0.0  ;;  %v11268_v44 = vld [vmem:[%s14537_s13 + $0x18] sm:$0xf] }
0x1da9   :  { %13054 = vmatpush3.bf16.msra.mxu1 %v9080_v51  ;;  %7941 = vadd.xlane.f32.xlu1 %v7940_v55 }
0x1daa   :  { %13055 = vmatprep.mubr.msk.bf16.mxu1 %vm13592_vm0, %v15949_v35  ;;  %13065 = vmatprep.subr.bf16.mxu1 %v15949_v35 }
0x1dab   :  { %v13553_v13 = vpop.eup %13552 }
0x1dac   :  { %v8974_v4 = vmul.f32 %v13553_v13, %v13545_v26  ;;  %v9126_v26 = vsel %vm1171_vm3, %v8983_v43, 0  ;;  %v15679_v13 = vsel %vm1171_vm3, %v11268_v44, 0 }
0x1dad   :  { %v8967_v57 = vpop.xlane.xlu1 %8966 }
0x1dae   :  { %v8978_v61 = vpack.c.bf16 %v8974_v4, %v8974_v4  ;;  %13556 = vrcp.f32 %v8967_v57 }
0x1db0   :  { %13056 = vmatmul.mubr.msk.bf16.vlgmr.msra.gmra.mxu1 %vm931_vm2, %v8978_v61 }
0x1db1   :  { %13067 = vmatprep.mubr.msk.bf16.mxu1 %vm13592_vm0, %v15949_v35 }
0x1db3   :  { %v13555_v19 = vpop.eup %13554 }
0x1db4   :  { %v8973_v50 = vmul.f32 %v13555_v19, %v13547_v36  ;;  %v11266_v36 = vld [vmem:[%s14537_s13 + $0x10] sm:$0xf] }
0x1db5   :  { %v15667_v38 = vsel %vm1171_vm3, %v11266_v36, 0 }
0x1db6   :  { %v8977_v47 = vpack.c.bf16 %v8973_v50, %v8973_v50  ;;  %13066 = vmatpush3.bf16.msra.mxu1 %v15667_v38 }
0x1db7   :  { %13077 = vmatprep.subr.bf16.mxu1 %v15949_v35 }
0x1db8   :  { %13050 = vmatmul.mubr.msk.bf16.vlgmr.msra.gmra.mxu0 %vm931_vm2, %v8977_v47 }
0x1db9   :  { %13060 = vmatpush3.bf16.msra.mxu0 %v9126_v26  ;;  %13061 = vmatprep.mubr.msk.bf16.mxu0 %vm13592_vm0, %v15949_v35 }
0x1dba   :  { %13071 = vmatprep.subr.bf16.mxu0 %v15949_v35 }
0x1dbb   :  { %v13557_v48 = vpop.eup %13556 }
0x1dbc   :  { %v8975_v25 = vmul.f32 %v13557_v48, %v13549_v53 }
0x1dbe   :  { %v8979_v16 = vpack.c.bf16 %v8975_v25, %v8975_v25 }
0x1dc0   :  { %13062 = vmatmul.mubr.msk.bf16.vlgmr.msra.gmra.mxu0 %vm931_vm2, %v8979_v16  ;;  %v11269_v16 = vld [vmem:[%s14537_s13 + $0x1c] sm:$0xf] }
0x1dc1   :  { %13073 = vmatprep.mubr.msk.bf16.mxu0 %vm13592_vm0, %v15949_v35  ;;  %13072 = vmatpush3.bf16.msra.mxu0 %v15673_v62 }
0x1dc2   :  { %13083 = vmatprep.subr.bf16.mxu0 %v15949_v35 }
0x1e32   :  { %v7942_v53 = vpop.xlane.xlu1 %7941 }
0x1e33   :  { %v7944_v40 = vmul.f32 0.03125, %v7942_v53 }
0x1e35   :  { %v7946_v11 = vadd.f32 1e-05, %v7944_v40 }
0x1e37   :  { %13558 = vrsqrt.f32 %v7946_v11 }
0x1e44   :  { %v13559_v4 = vpop.eup %13558 }
0x1e45   :  { %v7950_v42 = vmul.f32 %v13559_v4, %v7934_v21 }
0x1e47   :  { %v7958_v50 = vmul.f32 %v15367_v58, %v7950_v42 }
0x1e49   :  { %v15693_v21 = vadd.f32 %v15374_v30, %v7958_v50 }
0x1e4b   :  { %v9366_v15 = vpack.c.bf16 %v15693_v21, %v15693_v21 }
0x1e68   :  { %v9024_v51 = vpop.f32.mrf.mxu1 }
0x1e69   :  { %v9168_v55 = vpack.c.bf16 %v9024_v51, %v9024_v51 }
0x1e6a   :  { %v13045_v57 = vpop.f32.mrf.mxu1 }
0x1e6b   :  { %13068 = vmatmul.mubr.msk.bf16.vlgmr.msra.gmra.mxu1 %vm931_vm2, %v9168_v55 }
0x1e6c   :  { %v9027_v61 = vpop.f32.mrf.mxu1  ;;  %13078 = vmatpush3.bf16.msra.mxu1 %v15679_v13  ;;  %13079 = vmatprep.mubr.msk.bf16.mxu1 %vm13592_vm0, %v15949_v35 }
0x1e6d   :  { %13089 = vmatprep.subr.bf16.mxu1 %v15949_v35 }
0x1e6e   :  { %v13046_v19 = vpop.f32.mrf.mxu1 }
0x1e70   :  { %v9116_v43 = vpop.f32.mrf.mxu1 }
0x1e71   :  { %v9170_v47 = vpack.c.bf16 %v9116_v43, %v9116_v43 }
0x1e72   :  { %v13057_v26 = vpop.f32.mrf.mxu1 }
0x1e73   :  { %13080 = vmatmul.mubr.msk.bf16.vlgmr.msra.gmra.mxu1 %vm931_vm2, %v9170_v47 }
0x1e74   :  { %v9119_v48 = vpop.f32.mrf.mxu1  ;;  %13090 = vmatpush3.bf16.msra.mxu1 %v15370_v46  ;;  %13093 = vmatprep.mubr.msk.bf16.mxu1 %vm13592_vm0, %v15949_v35  ;;  %v15701_v46 = vsel %vm1171_vm3, %v11269_v16, 0 }
0x1e75   :  { %13091 = vmatprep.subr.bf16.mxu1 %v15949_v35 }
0x1e76   :  { %v13058_v25 = vpop.f32.mrf.mxu1 }
0x1e78   :  { %v9070_v36 = vpop.f32.mrf.mxu0  ;;  %13092 = vmatpush3.bf16.msra.mxu1 %v15379_v49 }
0x1e79   :  { %v9169_v58 = vpack.c.bf16 %v9070_v36, %v9070_v36  ;;  %13105 = vmatprep.subr.bf16.mxu1 %v15949_v35 }
0x1e7a   :  { %v13051_v53 = vpop.f32.mrf.mxu0 }
0x1e7b   :  { %13074 = vmatmul.mubr.msk.bf16.vlgmr.msra.gmra.mxu0 %vm931_vm2, %v9169_v58  ;;  %13094 = vmatmul.mubr.msk.bf16.vlgmr.msra.gmra.mxu1 %vm259_vm1, %v9366_v15 }
0x1e7c   :  { %v9073_v30 = vpop.f32.mrf.mxu0  ;;  %13084 = vmatpush3.bf16.msra.mxu0 %v15701_v46  ;;  %13106 = vmatpush3.bf16.msra.mxu1 %v15389_v23 }
0x1e7d   :  { %13107 = vmatprep.subr.bf16.mxu1 %v15949_v35  ;;  %13085 = vmatprep.mubr.msk.bf16.mxu0 %vm13592_vm0, %v15949_v35 }
0x1e7e   :  { %v13052_v49 = vpop.f32.mrf.mxu0  ;;  %13109 = vmatprep.mubr.msk.bf16.mxu1 %vm13592_vm0, %v15949_v35  ;;  %13097 = vmatprep.subr.bf16.mxu0 %v15949_v35 }
0x1e80   :  { %v9162_v40 = vpop.f32.mrf.mxu0  ;;  %13108 = vmatpush3.bf16.msra.mxu1 %v15399_v17  ;;  %v13589_v17 = vld [vmem:[%s14208_s27 + $0x4] ss:$0 sps:$4 sm:$0xff]   ;;  %s10859_s27 = sld [smem:[%s15943_s0 + %s13621_s12]]  }
0x1e81   :  { %v9171_v11 = vpack.c.bf16 %v9162_v40, %v9162_v40  ;;  %13121 = vmatprep.subr.bf16.mxu1 %v15949_v35 }
0x1e82   :  { %v13063_v44 = vpop.f32.mrf.mxu0 }
0x1e83   :  { %13086 = vmatmul.mubr.msk.bf16.vlgmr.msra.gmra.mxu0 %vm931_vm2, %v9171_v11  ;;  %13110 = vmatmul.mubr.msk.bf16.vlgmr.msra.gmra.mxu1 %vm259_vm1, %v9366_v15 }
0x1e84   :  { %v9165_v23 = vpop.f32.mrf.mxu0  ;;  %13098 = vmatpush3.bf16.msra.mxu0 %v15409_v6  ;;  %13122 = vmatpush3.bf16.msra.mxu1 %v15412_v27 }
0x1e85   :  { %13099 = vmatprep.subr.bf16.mxu0 %v15949_v35  ;;  %13123 = vmatprep.subr.bf16.mxu1 %v15949_v35 }
0x1e86   :  { %v13064_v51 = vpop.f32.mrf.mxu0  ;;  %13101 = vmatprep.mubr.msk.bf16.mxu0 %vm13592_vm0, %v15949_v35  ;;  %13125 = vmatprep.mubr.msk.bf16.mxu1 %vm13592_vm0, %v15949_v35 }
0x1e88   :  { %13100 = vmatpush3.bf16.msra.mxu0 %v15420_v22  ;;  %13124 = vmatpush3.bf16.msra.mxu1 %v15423_v7 }
0x1e89   :  { %13113 = vmatprep.subr.bf16.mxu0 %v15949_v35  ;;  %13137 = vmatprep.subr.bf16.mxu1 %v15949_v35 }
0x1e8b   :  { %13102 = vmatmul.mubr.msk.bf16.vlgmr.msra.gmra.mxu0 %vm259_vm1, %v9366_v15  ;;  %13126 = vmatmul.mubr.msk.bf16.vlgmr.msra.gmra.mxu1 %vm259_vm1, %v13589_v17 }
0x1e8c   :  { %13114 = vmatpush3.bf16.msra.mxu0 %v15434_v37  ;;  %13138 = vmatpush3.bf16.msra.mxu1 %v15437_v14 }
0x1e8d   :  { %13115 = vmatprep.subr.bf16.mxu0 %v15949_v35  ;;  %13139 = vmatprep.subr.bf16.mxu1 %v15949_v35 }
0x1e8e   :  { %13117 = vmatprep.mubr.msk.bf16.mxu0 %vm13592_vm0, %v15949_v35  ;;  %13141 = vmatprep.mubr.msk.bf16.mxu1 %vm13592_vm0, %v15949_v35 }
0x1e90   :  { %13116 = vmatpush3.bf16.msra.mxu0 %v15450_v41  ;;  %13140 = vmatpush3.bf16.msra.mxu1 %v15453_v18 }
0x1e91   :  { %13129 = vmatprep.subr.bf16.mxu0 %v15949_v35  ;;  %13153 = vmatprep.subr.bf16.mxu1 %v15949_v35 }
0x1e93   :  { %13118 = vmatmul.mubr.msk.bf16.vlgmr.msra.gmra.mxu0 %vm259_vm1, %v9366_v15  ;;  %13142 = vmatmul.mubr.msk.bf16.vlgmr.msra.gmra.mxu1 %vm259_vm1, %v13589_v17 }
0x1e94   :  { %13130 = vmatpush3.bf16.msra.mxu0 %v15464_v12  ;;  %13133 = vmatprep.mubr.msk.bf16.mxu0 %vm13592_vm0, %v15949_v35 }
0x1e95   :  { %13131 = vmatprep.subr.bf16.mxu0 %v15949_v35  ;;  %13154 = vmatpush3.bf16.msra.mxu1 %v15501_v33 }
0x1e96   :  { %13155 = vmatprep.subr.bf16.mxu1 %v15949_v35  ;;  %13157 = vmatprep.mubr.msk.bf16.mxu1 %vm13592_vm0, %v15949_v35 }
0x1e98   :  { %13132 = vmatpush3.bf16.msra.mxu0 %v15473_v54 }
0x1e99   :  { %13145 = vmatprep.subr.bf16.mxu0 %v15949_v35  ;;  %13156 = vmatpush3.bf16.msra.mxu1 %v15506_v34 }
0x1e9a   :  { %13169 = vmatprep.subr.bf16.mxu1 %v15949_v35 }
0x1e9b   :  { %13134 = vmatmul.mubr.msk.bf16.vlgmr.msra.gmra.mxu0 %vm259_vm1, %v13589_v17 }
0x1e9c   :  { %13146 = vmatpush3.bf16.msra.mxu0 %v15482_v10  ;;  %13149 = vmatprep.mubr.msk.bf16.mxu0 %vm13592_vm0, %v15949_v35 }
0x1e9d   :  { %13147 = vmatprep.subr.bf16.mxu0 %v15949_v35  ;;  %13158 = vmatmul.mubr.msk.bf16.vlgmr.msra.gmra.mxu1 %vm259_vm1, %v13589_v17 }
0x1e9e   :  { %13170 = vmatpush3.bf16.msra.mxu1 %v15511_v0  ;;  %13173 = vmatprep.mubr.msk.bf16.mxu1 %vm13592_vm0, %v15949_v35 }
0x1e9f   :  { %13171 = vmatprep.subr.bf16.mxu1 %v15949_v35 }
0x1ea0   :  { %13148 = vmatpush3.bf16.msra.mxu0 %v15489_v32 }
0x1ea1   :  { %13161 = vmatprep.subr.bf16.mxu0 %v15949_v35 }
0x1ea2   :  { %13172 = vmatpush3.bf16.msra.mxu1 %v15524_v31 }
0x1ea3   :  { %13150 = vmatmul.mubr.msk.bf16.vlgmr.msra.gmra.mxu0 %vm259_vm1, %v13589_v17  ;;  %13185 = vmatprep.subr.bf16.mxu1 %v15949_v35 }
0x1ea4   :  { %13162 = vmatpush3.bf16.msra.mxu0 %v15517_v5  ;;  %13165 = vmatprep.mubr.msk.bf16.mxu0 %vm13592_vm0, %v15949_v35 }
0x1ea5   :  { %13163 = vmatprep.subr.bf16.mxu0 %v15949_v35  ;;  %13174 = vmatmul.mubr.msk.bf16.vlgmr.msra.gmra.mxu1 %vm259_vm1, %v13589_v17 }
0x1ea6   :  { %13187 = vmatprep.mubr.msk.bf16.mxu1 %vm13592_vm0, %v15949_v35 }
0x1ea8   :  { %13164 = vmatpush3.bf16.msra.mxu0 %v15529_v24 }
0x1ea9   :  { %13177 = vmatprep.subr.bf16.mxu0 %v15949_v35 }
0x1eab   :  { %13166 = vmatmul.mubr.msk.bf16.vlgmr.msra.gmra.mxu0 %vm259_vm1, %v13589_v17 }
0x1eac   :  { %13178 = vmatpush3.bf16.msra.mxu0 %v15537_v52  ;;  %13181 = vmatprep.mubr.msk.bf16.mxu0 %vm13592_vm0, %v15949_v35 }
0x1ead   :  { %13179 = vmatprep.subr.bf16.mxu0 %v15949_v35 }
0x1eb0   :  { %13180 = vmatpush3.bf16.msra.mxu0 %v15548_v28 }
0x1eb1   :  { %13191 = vmatprep.subr.bf16.mxu0 %v15949_v35 }
0x1eb3   :  { %13182 = vmatmul.mubr.msk.bf16.vlgmr.msra.gmra.mxu0 %vm259_vm1, %v13589_v17 }
0x1eb4   :  { %13193 = vmatprep.mubr.msk.bf16.mxu0 %vm13592_vm0, %v15949_v35 }
0x1f2b   :  { %v9212_v6 = vpop.f32.mrf.mxu1 }
0x1f2d   :  { %v13069_v27 = vpop.f32.mrf.mxu1 }
0x1f2f   :  { %v9215_v22 = vpop.f32.mrf.mxu1 }
0x1f31   :  { %v13070_v7 = vpop.f32.mrf.mxu1 }
0x1f33   :  { %v9304_v37 = vpop.f32.mrf.mxu1 }
0x1f35   :  { %v13081_v14 = vpop.f32.mrf.mxu1 }
0x1f37   :  { %v9307_v41 = vpop.f32.mrf.mxu1 }
0x1f39   :  { %v13082_v18 = vpop.f32.mrf.mxu1 }
0x1f3b   :  { %v9258_v12 = vpop.f32.mrf.mxu0  ;;  %v9404_v54 = vpop.f32.mrf.mxu1 }
0x1f3c   :  { %v9356_v10 = vadd.f32 %v9258_v12, %v9212_v6  ;;  %v9405_v49 = vadd.f32 %v15563_v59, %v9404_v54 }
0x1f3d   :  { %v13075_v32 = vpop.f32.mrf.mxu0  ;;  %v13095_v33 = vpop.f32.mrf.mxu1 }
0x1f3e   :  { %v9357_v34 = vadd.f32 %v9356_v10, %v9304_v37  ;;  %v9850_v51 = vpack.c.bf16 %v9405_v49, %v9405_v49 }
0x1f3f   :  { %v9261_v0 = vpop.f32.mrf.mxu0  ;;  %v9407_v5 = vpop.f32.mrf.mxu1 }
0x1f41   :  { %v13076_v31 = vpop.f32.mrf.mxu0  ;;  %v13096_v24 = vpop.f32.mrf.mxu1 }
0x1f43   :  { %v9350_v52 = vpop.f32.mrf.mxu0  ;;  %v9484_v28 = vpop.f32.mrf.mxu1 }
0x1f44   :  { %v15792_v55 = vadd.f32 %v9357_v34, %v9350_v52  ;;  %v9485_v37 = vadd.f32 %v15573_v2, %v9484_v28 }
0x1f45   :  { %v13087_v4 = vpop.f32.mrf.mxu0  ;;  %v13111_v57 = vpop.f32.mrf.mxu1 }
0x1f46   :  { %v9852_v12 = vpack.c.bf16 %v9485_v37, %v9485_v37 }
0x1f47   :  { %v9353_v61 = vpop.f32.mrf.mxu0  ;;  %v9487_v42 = vpop.f32.mrf.mxu1 }
0x1f49   :  { %v13088_v19 = vpop.f32.mrf.mxu0  ;;  %v13112_v43 = vpop.f32.mrf.mxu1 }
0x1f4b   :  { %v9444_v50 = vpop.f32.mrf.mxu0  ;;  %v9564_v47 = vpop.f32.mrf.mxu1 }
0x1f4c   :  { %v9565_v26 = vadd.f32 %v15559_v9, %v9564_v47 }
0x1f4d   :  { %v13103_v48 = vpop.f32.mrf.mxu0  ;;  %v13127_v25 = vpop.f32.mrf.mxu1 }
0x1f4e   :  { %v9854_v16 = vpack.c.bf16 %v9565_v26, %v9565_v26 }
0x1f4f   :  { %v9447_v36 = vpop.f32.mrf.mxu0  ;;  %v9567_v58 = vpop.f32.mrf.mxu1 }
0x1f50   :  { %v9862_v15 = vsel %vm931_vm2, %v9854_v16, 0 }
0x1f51   :  { %v13104_v53 = vpop.f32.mrf.mxu0  ;;  %v13128_v30 = vpop.f32.mrf.mxu1  ;;  %13186 = vmatpush3.bf16.xpose.msra.mxu1 %v9862_v15 }
0x1f52   :  { %13197 = vmatprep.subr.bf16.mxu1 %v15949_v35 }
0x1f53   :  { %v9524_v40 = vpop.f32.mrf.mxu0  ;;  %v9644_v11 = vpop.f32.mrf.mxu1 }
0x1f54   :  { %v9645_v44 = vadd.f32 %v15567_v45, %v9644_v11 }
0x1f55   :  { %v13119_v23 = vpop.f32.mrf.mxu0  ;;  %v13143_v9 = vpop.f32.mrf.mxu1 }
0x1f56   :  { %v9856_v17 = vpack.c.bf16 %v9645_v44, %v9645_v44 }
0x1f57   :  { %v9527_v6 = vpop.f32.mrf.mxu0  ;;  %v9647_v27 = vpop.f32.mrf.mxu1 }
0x1f58   :  { %v9954_v22 = vsel %vm931_vm2, %v9856_v17, 0  ;;  %13188 = vmatmul.mubr.msk.bf16.vlgmr.msra.gmra.mxu1 %vm931_vm2, %v9850_v51 }
0x1f59   :  { %v13120_v7 = vpop.f32.mrf.mxu0  ;;  %13198 = vmatpush3.bf16.xpose.msra.mxu1 %v9954_v22  ;;  %13199 = vmatprep.mubr.msk.bf16.mxu1 %vm13592_vm0, %v15949_v35  ;;  %v13144_v59 = vpop.f32.mrf.mxu1 }
0x1f5a   :  { %13209 = vmatprep.subr.bf16.mxu1 %v15949_v35 }
0x1f5b   :  { %v9604_v45 = vpop.f32.mrf.mxu0 }
0x1f5c   :  { %v9605_v14 = vadd.f32 %v15578_v56, %v9604_v45  ;;  %v9445_v56 = vadd.f32 %v15586_v20, %v9444_v50 }
0x1f5d   :  { %v13135_v41 = vpop.f32.mrf.mxu0  ;;  %v9724_v18 = vpop.f32.mrf.mxu1 }
0x1f5e   :  { %v9855_v54 = vpack.c.bf16 %v9605_v14, %v9605_v14  ;;  %v9725_v10 = vadd.f32 %v15611_v1, %v9724_v18  ;;  %v9851_v57 = vpack.c.bf16 %v9445_v56, %v9445_v56 }
0x1f5f   :  { %v9607_v32 = vpop.f32.mrf.mxu0  ;;  %v13159_v33 = vpop.f32.mrf.mxu1 }
0x1f60   :  { %v9908_v34 = vsel %vm931_vm2, %v9855_v54, 0  ;;  %13200 = vmatmul.mubr.msk.bf16.vlgmr.msra.gmra.mxu1 %vm931_vm2, %v9852_v12  ;;  %v10090_v0 = vpack.c.bf16 %v9725_v10, %v9725_v10 }
0x1f61   :  { %v13136_v5 = vpop.f32.mrf.mxu0  ;;  %13192 = vmatpush3.bf16.xpose.msra.mxu0 %v9908_v34  ;;  %v9727_v2 = vpop.f32.mrf.mxu1  ;;  %13211 = vmatprep.mubr.msk.bf16.mxu1 %vm13592_vm0, %v15949_v35 }
0x1f62   :  { %13203 = vmatprep.subr.bf16.mxu0 %v15949_v35  ;;  %v10098_v31 = vsel %vm1171_vm3, %v10090_v0, 0 }
0x1f63   :  { %v9684_v1 = vpop.f32.mrf.mxu0  ;;  %v13160_v24 = vpop.f32.mrf.mxu1  ;;  %13210 = vmatpush3.bf16.msra.mxu1 %v10098_v31 }
0x1f64   :  { %v9685_v52 = vadd.f32 %v15591_v39, %v9684_v1  ;;  %13221 = vmatprep.subr.bf16.mxu1 %v15949_v35  ;;  %v9525_v39 = vadd.f32 %v15599_v8, %v9524_v40 }
0x1f65   :  { %v13151_v28 = vpop.f32.mrf.mxu0  ;;  %v15816_v4 = vpop.f32.mrf.mxu1 }
0x1f66   :  { %v9857_v61 = vpack.c.bf16 %v9685_v52, %v9685_v52  ;;  %v9853_v16 = vpack.c.bf16 %v9525_v39, %v9525_v39  ;;  %v15838_v28 = vld [vmem:[%s14713_s23 + $0x1] ss:$0 sm:$0xff]  ;;  %s10862_s23 = sld [smem:[%s15943_s0 + %s13623_s28]]  }
0x1f67   :  { %v9687_v42 = vpop.f32.mrf.mxu0  ;;  %v13175_v19 = vpop.f32.mrf.mxu1 }
0x1f68   :  { %v10000_v20 = vsel %vm931_vm2, %v9857_v61, 0  ;;  %13194 = vmatmul.mubr.msk.bf16.vlgmr.msra.gmra.mxu0 %vm931_vm2, %v9851_v57  ;;  %v9365_v57 = vadd.f32 %v15838_v28, %v15792_v55 }
0x1f69   :  { %v13152_v43 = vpop.f32.mrf.mxu0  ;;  %13204 = vmatpush3.bf16.xpose.msra.mxu0 %v10000_v20  ;;  %13205 = vmatprep.mubr.msk.bf16.mxu0 %vm13592_vm0, %v15949_v35  ;;  %v9807_v50 = vpop.f32.mrf.mxu1 }
0x1f6a   :  { %13215 = vmatprep.subr.bf16.mxu0 %v15949_v35  ;;  %v10458_v50 = vadd.f32 %v9365_v57, %v15385_v29  ;;  %v9805_v29 = vadd.f32 %v15639_v63, %v15816_v4 }
0x1f6b   :  { %v9764_v47 = vpop.f32.mrf.mxu0  ;;  %v13176_v26 = vpop.f32.mrf.mxu1 }
0x1f6c   :  { %v9765_v48 = vadd.f32 %v15619_v3, %v9764_v47  ;;  %v10464_v39 = vsel %vm259_vm1, %v10458_v50, 0.0 }
0x1f6d   :  { %v13167_v25 = vpop.f32.mrf.mxu0 }
0x1f6e   :  { %v10091_v36 = vpack.c.bf16 %v9765_v48, %v9765_v48 }
0x1f6f   :  { %v9767_v58 = vpop.f32.mrf.mxu0 }
0x1f70   :  { %13206 = vmatmul.mubr.msk.bf16.vlgmr.msra.gmra.mxu0 %vm931_vm2, %v9853_v16  ;;  %v10144_v15 = vsel %vm1171_vm3, %v10091_v36, 0 }
0x1f71   :  { %v13168_v53 = vpop.f32.mrf.mxu0  ;;  %13216 = vmatpush3.bf16.msra.mxu0 %v10144_v15  ;;  %13217 = vmatprep.mubr.msk.bf16.mxu0 %vm13592_vm0, %v15949_v35 }
0x1f72   :  { %13227 = vmatprep.subr.bf16.mxu0 %v15949_v35  ;;  %v10092_v53 = vpack.c.bf16 %v9805_v29, %v9805_v29 }
0x1f73   :  { %v15830_v8 = vpop.f32.mrf.mxu0 }
0x1f75   :  { %v13183_v30 = vpop.f32.mrf.mxu0 }
0x1f77   :  { %v9847_v49 = vpop.f32.mrf.mxu0 }
0x1f79   :  { %v13184_v3 = vpop.f32.mrf.mxu0 }
0x2018   :  { %v9898_v40 = vpop.f32.mrf.mxu1 }
0x2019   :  { %v10042_v11 = vsel %vm931_vm2, %v9898_v40, -inf }
0x201a   :  { %10043 = vmax.xlane.f32.xlu0 %v10042_v11  ;;  %v13189_v44 = vpop.f32.mrf.mxu1 }
0x201b   :  { %v10190_v44 = vsel %vm1171_vm3, %v10092_v53, 0 }
0x201c   :  { %v9901_v23 = vpop.f32.mrf.mxu1 }
0x201e   :  { %v13190_v9 = vpop.f32.mrf.mxu1 }
0x2020   :  { %v9990_v51 = vpop.f32.mrf.mxu1 }
0x2021   :  { %v10048_v17 = vsel %vm931_vm2, %v9990_v51, -inf }
0x2022   :  { %10049 = vmax.xlane.f32.xlu0 %v10048_v17  ;;  %v13201_v6 = vpop.f32.mrf.mxu1  ;;  %v9845_v17 = vadd.f32 %v15650_v60, %v15830_v8 }
0x2024   :  { %v9993_v27 = vpop.f32.mrf.mxu1 }
0x2025   :  { %v10093_v27 = vpack.c.bf16 %v9845_v17, %v9845_v17 }
0x2026   :  { %v13202_v22 = vpop.f32.mrf.mxu1 }
0x2028   :  { %v9944_v7 = vpop.f32.mrf.mxu0 }
0x2029   :  { %v10045_v59 = vsel %vm931_vm2, %v9944_v7, -inf }
0x202a   :  { %10046 = vmax.xlane.f32.xlu1 %v10045_v59  ;;  %v13195_v37 = vpop.f32.mrf.mxu0  ;;  %v10236_v59 = vsel %vm1171_vm3, %v10093_v27, 0 }
0x202c   :  { %v9947_v45 = vpop.f32.mrf.mxu0 }
0x202e   :  { %v13196_v14 = vpop.f32.mrf.mxu0 }
0x2030   :  { %v10036_v41 = vpop.f32.mrf.mxu0 }
0x2031   :  { %v10051_v18 = vsel %vm931_vm2, %v10036_v41, -inf }
0x2032   :  { %10052 = vmax.xlane.f32.xlu1 %v10051_v18  ;;  %v13207_v12 = vpop.f32.mrf.mxu0 }
0x2034   :  { %v10039_v54 = vpop.f32.mrf.mxu0 }
0x2036   :  { %v13208_v10 = vpop.f32.mrf.mxu0 }
0x20a3   :  { %v10044_v32 = vpop.xlane.xlu0 %10043 }
0x20a4   :  { %v10054_v33 = vsub.f32 %v9898_v40, %v10044_v32 }
0x20a6   :  { %v10058_v34 = vmul.f32 1.442695, %v10054_v33 }
0x20a8   :  { %13560 = vpow2.f32 %v10058_v34 }
0x20ab   :  { %v10050_v0 = vpop.xlane.xlu0 %10049 }
0x20ac   :  { %v10056_v5 = vsub.f32 %v9990_v51, %v10050_v0 }
0x20ae   :  { %v10062_v2 = vmul.f32 1.442695, %v10056_v5 }
0x20b0   :  { %13562 = vpow2.f32 %v10062_v2 }
0x20b3   :  { %v10047_v56 = vpop.xlane.xlu1 %10046 }
0x20b4   :  { %v10055_v31 = vsub.f32 %v9944_v7, %v10047_v56 }
0x20b5   :  { %v13561_v1 = vpop.eup %13560 }
0x20b6   :  { %v10060_v24 = vmul.f32 1.442695, %v10055_v31  ;;  %v10066_v52 = vsel %vm931_vm2, %v13561_v1, 0.0 }
0x20b7   :  { %10067 = vadd.xlane.f32.xlu0 %v10066_v52 }
0x20b8   :  { %13564 = vpow2.f32 %v10060_v24 }
0x20bb   :  { %v10053_v61 = vpop.xlane.xlu1 %10052 }
0x20bc   :  { %v10057_v42 = vsub.f32 %v10036_v41, %v10053_v61 }
0x20bd   :  { %v13563_v19 = vpop.eup %13562 }
0x20be   :  { %v10064_v20 = vmul.f32 1.442695, %v10057_v42  ;;  %v10072_v43 = vsel %vm931_vm2, %v13563_v19, 0.0 }
0x20bf   :  { %10073 = vadd.xlane.f32.xlu0 %v10072_v43 }
0x20c0   :  { %13566 = vpow2.f32 %v10064_v20 }
0x20c3   :  { %10465 = vadd.xlane.f32.xlu0 %v10464_v39 }
0x20c5   :  { %v13565_v47 = vpop.eup %13564 }
0x20c6   :  { %v10069_v26 = vsel %vm931_vm2, %v13565_v47, 0.0 }
0x20c7   :  { %10070 = vadd.xlane.f32.xlu1 %v10069_v26 }
0x20cd   :  { %v13567_v48 = vpop.eup %13566 }
0x20ce   :  { %v10075_v55 = vsel %vm931_vm2, %v13567_v48, 0.0 }
0x20cf   :  { %10076 = vadd.xlane.f32.xlu1 %v10075_v55 }
0x2140   :  { %v10068_v25 = vpop.xlane.xlu0 %10067 }
0x2141   :  { %13568 = vrcp.f32 %v10068_v25 }
0x2148   :  { %v10074_v16 = vpop.xlane.xlu0 %10073 }
0x2149   :  { %13570 = vrcp.f32 %v10074_v16 }
0x214c   :  { %v10466_v36 = vpop.xlane.xlu0 %10465 }
0x214d   :  { %v10470_v58 = vmul.f32 0.03125, %v10466_v36 }
0x214e   :  { %v13569_v15 = vpop.eup %13568 }
0x214f   :  { %v10082_v30 = vmul.f32 %v13569_v15, %v13561_v1  ;;  %v15849_v49 = vsub.f32 %v10458_v50, %v10470_v58 }
0x2150   :  { %v10071_v3 = vpop.xlane.xlu1 %10070 }
0x2151   :  { %v10086_v40 = vpack.c.bf16 %v10082_v30, %v10082_v30  ;;  %13572 = vrcp.f32 %v10071_v3  ;;  %v10474_v11 = vmul.f32 %v15849_v49, %v15849_v49 }
0x2153   :  { %13212 = vmatmul.mubr.msk.bf16.vlgmr.msra.gmra.mxu1 %vm931_vm2, %v10086_v40  ;;  %v10476_v23 = vsel %vm259_vm1, %v10474_v11, 0.0 }
0x2154   :  { %13222 = vmatpush3.bf16.msra.mxu1 %v10190_v44  ;;  %10477 = vadd.xlane.f32.xlu0 %v10476_v23 }
0x2155   :  { %13223 = vmatprep.mubr.msk.bf16.mxu1 %vm13592_vm0, %v15949_v35  ;;  %13233 = vmatprep.subr.bf16.mxu1 %v15949_v35 }
0x2156   :  { %v13571_v63 = vpop.eup %13570 }
0x2157   :  { %v10084_v4 = vmul.f32 %v13571_v63, %v13563_v19  ;;  %v13424_v63 = vld [vmem:[%s14778_s1 + $0x18] sm:$0xff]  }
0x2158   :  { %v10077_v9 = vpop.xlane.xlu1 %10076 }
0x2159   :  { %v10088_v51 = vpack.c.bf16 %v10084_v4, %v10084_v4  ;;  %13574 = vrcp.f32 %v10077_v9  ;;  %v13425_v4 = vld [vmem:[%s14778_s1 + $0x10] sm:$0xff]   ;;  %s13624_s1 = smov 33  }
0x215b   :  { %13224 = vmatmul.mubr.msk.bf16.vlgmr.msra.gmra.mxu1 %vm931_vm2, %v10088_v51 }
0x215c   :  { %13234 = vmatpush3.bf16.msra.mxu1 %v15667_v38  ;;  %13235 = vmatprep.mubr.msk.bf16.mxu1 %vm13592_vm0, %v15949_v35 }
0x215d   :  { %13245 = vmatprep.subr.bf16.mxu1 %v15949_v35 }
0x215e   :  { %v13573_v6 = vpop.eup %13572 }
0x215f   :  { %v10083_v22 = vmul.f32 %v13573_v6, %v13565_v47 }
0x2161   :  { %v10087_v7 = vpack.c.bf16 %v10083_v22, %v10083_v22 }
0x2163   :  { %13218 = vmatmul.mubr.msk.bf16.vlgmr.msra.gmra.mxu0 %vm931_vm2, %v10087_v7 }
0x2164   :  { %13228 = vmatpush3.bf16.msra.mxu0 %v10236_v59  ;;  %13229 = vmatprep.mubr.msk.bf16.mxu0 %vm13592_vm0, %v15949_v35  ;;  %v11358_v59 = vld [vmem:[%s14794_s24 + $0x1] ss:$0 sm:$0xff] }
0x2165   :  { %13239 = vmatprep.subr.bf16.mxu0 %v15949_v35 }
0x2166   :  { %v13575_v60 = vpop.eup %13574 }
0x2167   :  { %v10085_v38 = vmul.f32 %v13575_v60, %v13567_v48 }
0x2169   :  { %v10089_v8 = vpack.c.bf16 %v10085_v38, %v10085_v38 }
0x216b   :  { %13230 = vmatmul.mubr.msk.bf16.vlgmr.msra.gmra.mxu0 %vm931_vm2, %v10089_v8 }
0x216c   :  { %13240 = vmatpush3.bf16.msra.mxu0 %v15673_v62  ;;  %13241 = vmatprep.mubr.msk.bf16.mxu0 %vm13592_vm0, %v15949_v35 }
0x216d   :  { %13251 = vmatprep.subr.bf16.mxu0 %v15949_v35 }
0x2213   :  { %v10134_v37 = vpop.f32.mrf.mxu1 }
0x2214   :  { %v10278_v45 = vpack.c.bf16 %v10134_v37, %v10134_v37  ;;  %v11359_v37 = vld [vmem:[%s15953_s6 + $0x1] ss:$0 sm:$0xff] }
0x2215   :  { %v13213_v14 = vpop.f32.mrf.mxu1 }
0x2216   :  { %13236 = vmatmul.mubr.msk.bf16.vlgmr.msra.gmra.mxu1 %vm931_vm2, %v10278_v45 }
0x2217   :  { %v10137_v41 = vpop.f32.mrf.mxu1  ;;  %13246 = vmatpush3.bf16.msra.mxu1 %v15679_v13  ;;  %13247 = vmatprep.mubr.msk.bf16.mxu1 %vm13592_vm0, %v15949_v35 }
0x2218   :  { %13257 = vmatprep.subr.bf16.mxu1 %v15949_v35 }
0x2219   :  { %v13214_v18 = vpop.f32.mrf.mxu1 }
0x221b   :  { %v10226_v62 = vpop.f32.mrf.mxu1 }
0x221c   :  { %v10280_v12 = vpack.c.bf16 %v10226_v62, %v10226_v62  ;;  %v13427_v62 = vld [vmem:[%s14787_s11 + $0x30] sm:$0xff]  }
0x221d   :  { %v13225_v54 = vpop.f32.mrf.mxu1 }
0x221e   :  { %13248 = vmatmul.mubr.msk.bf16.vlgmr.msra.gmra.mxu1 %vm931_vm2, %v10280_v12  ;;  %v13429_v12 = vld [vmem:[%s14787_s11 + $0x20] sm:$0xff]  }
0x221f   :  { %v10229_v10 = vpop.f32.mrf.mxu1  ;;  %13261 = vmatprep.mubr.msk.bf16.mxu1 %vm13592_vm0, %v15949_v35  ;;  %13258 = vmatpush3.bf16.msra.mxu1 %v13424_v63  ;;  %v11365_v54 = vld [vmem:[%s15954_s17 + $0x1] ss:$0 sm:$0xff] }
0x2220   :  { %13259 = vmatprep.subr.bf16.mxu1 %v15949_v35  ;;  %v11387_v63 = vld [vmem:[%s14863_s7 + $0x1] ss:$0 sm:$0xff]  ;;  %s10863_s7 = sld [smem:[%s15943_s0 + %s13624_s1]]  }
0x2221   :  { %v13226_v32 = vpop.f32.mrf.mxu1 }
0x2223   :  { %v10180_v33 = vpop.f32.mrf.mxu0  ;;  %13260 = vmatpush3.bf16.msra.mxu1 %v13425_v4 }
0x2224   :  { %v10279_v34 = vpack.c.bf16 %v10180_v33, %v10180_v33  ;;  %13277 = vmatprep.subr.bf16.mxu1 %v15949_v35 }
0x2225   :  { %v13219_v0 = vpop.f32.mrf.mxu0 }
0x2226   :  { %13242 = vmatmul.mubr.msk.bf16.vlgmr.msra.gmra.mxu0 %vm931_vm2, %v10279_v34 }
0x2227   :  { %v10183_v13 = vpop.f32.mrf.mxu0  ;;  %13252 = vmatpush3.bf16.msra.mxu0 %v15701_v46  ;;  %13253 = vmatprep.mubr.msk.bf16.mxu0 %vm13592_vm0, %v15949_v35 }
0x2228   :  { %13265 = vmatprep.subr.bf16.mxu0 %v15949_v35 }
0x2229   :  { %v13220_v5 = vpop.f32.mrf.mxu0 }
0x222b   :  { %v10272_v2 = vpop.f32.mrf.mxu0 }
0x222c   :  { %v10281_v56 = vpack.c.bf16 %v10272_v2, %v10272_v2 }
0x222d   :  { %v13231_v31 = vpop.f32.mrf.mxu0 }
0x222e   :  { %13254 = vmatmul.mubr.msk.bf16.vlgmr.msra.gmra.mxu0 %vm931_vm2, %v10281_v56  ;;  %v11378_v31 = vld [vmem:[%s15955_s21 + $0x1] ss:$0 sm:$0xff] }
0x222f   :  { %v10275_v1 = vpop.f32.mrf.mxu0  ;;  %13273 = vmatprep.mubr.msk.bf16.mxu0 %vm13592_vm0, %v15949_v35 }
0x2231   :  { %v13232_v24 = vpop.f32.mrf.mxu0 }
0x22d6   :  { %v10319_v52 = vpop.f32.mrf.mxu1 }
0x22d8   :  { %v13237_v57 = vpop.f32.mrf.mxu1 }
0x22da   :  { %v10322_v61 = vpop.f32.mrf.mxu1 }
0x22dc   :  { %v13238_v46 = vpop.f32.mrf.mxu1 }
0x22de   :  { %v10405_v42 = vpop.f32.mrf.mxu1 }
0x22e0   :  { %v13249_v19 = vpop.f32.mrf.mxu1 }
0x22e2   :  { %v10408_v20 = vpop.f32.mrf.mxu1 }
0x22e4   :  { %v13250_v43 = vpop.f32.mrf.mxu1 }
0x22e6   :  { %v10362_v50 = vpop.f32.mrf.mxu0 }
0x22e7   :  { %v10454_v47 = vadd.f32 %v10362_v50, %v10319_v52 }
0x22e8   :  { %v13243_v39 = vpop.f32.mrf.mxu0 }
0x22e9   :  { %v10455_v55 = vadd.f32 %v10454_v47, %v10405_v42 }
0x22ea   :  { %v10365_v26 = vpop.f32.mrf.mxu0 }
0x22ec   :  { %v13244_v48 = vpop.f32.mrf.mxu0 }
0x22ee   :  { %v10448_v25 = vpop.f32.mrf.mxu0 }
0x22ef   :  { %v10456_v16 = vadd.f32 %v10455_v55, %v10448_v25 }
0x22f0   :  { %v13255_v29 = vpop.f32.mrf.mxu0 }
0x22f1   :  { %v10457_v36 = vadd.f32 %v15838_v28, %v10456_v16  ;;  %v10478_v28 = vpop.xlane.xlu0 %10477 }
0x22f2   :  { %v10451_v58 = vpop.f32.mrf.mxu0  ;;  %v10482_v9 = vmul.f32 0.03125, %v10478_v28 }
0x22f3   :  { %v10459_v15 = vadd.f32 %v10457_v36, %v15693_v21  ;;  %v13426_v21 = vld [vmem:[%s14787_s11 + $0x38] sm:$0xff]  }
0x22f4   :  { %v13256_v53 = vpop.f32.mrf.mxu0  ;;  %13266 = vmatpush3.bf16.msra.mxu0 %v13426_v21  ;;  %v10484_v51 = vadd.f32 1e-05, %v10482_v9 }
0x22f5   :  { %v10467_v30 = vsel %vm259_vm1, %v10459_v15, 0.0  ;;  %13267 = vmatprep.subr.bf16.mxu0 %v15949_v35 }
0x22f6   :  { %10468 = vadd.xlane.f32.xlu1 %v10467_v30  ;;  %13576 = vrsqrt.f32 %v10484_v51 }
0x22f8   :  { %13268 = vmatpush3.bf16.msra.mxu0 %v13427_v62  ;;  %v13431_v62 = vld [vmem:[%s10861_s8] sm:$0xff]  }
0x22f9   :  { %13269 = vmatprep.subr.bf16.mxu0 %v15949_v35 }
0x2303   :  { %v13577_v22 = vpop.eup %13576 }
0x2304   :  { %v10488_v7 = vmul.f32 %v13577_v22, %v15849_v49  ;;  %v13428_v49 = vld [vmem:[%s14787_s11 + $0x28] sm:$0xff]  }
0x2305   :  { %13270 = vmatpush3.bf16.msra.mxu0 %v13428_v49 }
0x2306   :  { %v10496_v38 = vmul.f32 %v11358_v59, %v10488_v7  ;;  %13271 = vmatprep.subr.bf16.mxu0 %v15949_v35 }
0x2308   :  { %v10504_v14 = vadd.f32 %v11359_v37, %v10496_v38 }
0x2309   :  { %13272 = vmatpush3.bf16.msra.mxu0 %v13429_v12 }
0x237f   :  { %v10469_v3 = vpop.xlane.xlu1 %10468 }
0x2380   :  { %v10471_v40 = vmul.f32 0.03125, %v10469_v3 }
0x2382   :  { %v10473_v11 = vsub.f32 %v10459_v15, %v10471_v40 }
0x2384   :  { %v10475_v44 = vmul.f32 %v10473_v11, %v10473_v11 }
0x2386   :  { %v10479_v23 = vsel %vm259_vm1, %v10475_v44, 0.0  ;;  %v11386_v44 = vld [vmem:[%s14858_s30 + $0x1] ss:$0 sm:$0xff] }
0x2387   :  { %10480 = vadd.xlane.f32.xlu1 %v10479_v23 }
0x2410   :  { %v10481_v17 = vpop.xlane.xlu1 %10480 }
0x2411   :  { %v10483_v6 = vmul.f32 0.03125, %v10481_v17 }
0x2413   :  { %v10485_v27 = vadd.f32 1e-05, %v10483_v6 }
0x2415   :  { %13578 = vrsqrt.f32 %v10485_v27 }
0x2422   :  { %v13579_v60 = vpop.eup %13578 }
0x2423   :  { %v10489_v8 = vmul.f32 %v13579_v60, %v10473_v11 }
0x2425   :  { %v10497_v45 = vmul.f32 %v11358_v59, %v10489_v8 }
0x2427   :  { %v10505_v41 = vadd.f32 %v11359_v37, %v10497_v45 }
0x2429   :  { %v10513_v18 = vpack.c.bf16 %v10505_v41, %v10504_v14 }
0x242b   :  { %13262 = vmatmul.mubr.msk.bf16.vlgmr.msra.gmra.mxu1 %vm259_vm1, %v10513_v18  ;;  %v13430_v18 = vld [vmem:[%s10861_s8 + $0x8] sm:$0xff]  }
0x242c   :  { %13281 = vmatprep.mubr.msk.bf16.mxu1 %vm13592_vm0, %v15949_v35  ;;  %13278 = vmatpush3.bf16.msra.mxu1 %v13430_v18 }
0x242d   :  { %13279 = vmatprep.subr.bf16.mxu1 %v15949_v35 }
0x2430   :  { %13280 = vmatpush3.bf16.msra.mxu1 %v13431_v62 }
0x24eb   :  { %v10569_v10 = vpop.f32.mrf.mxu1 }
0x24ec   :  { %v10570_v33 = vadd.f32 %v11365_v54, %v10569_v10 }
0x24ed   :  { %v13263_v32 = vpop.f32.mrf.mxu1 }
0x24ee   :  { %v10576_v5 = vmax.f32 %v10570_v33, 0.0 }
0x24ef   :  { %v10572_v34 = vpop.f32.mrf.mxu1 }
0x24f0   :  { %v10573_v0 = vadd.f32 %v11365_v54, %v10572_v34 }
0x24f1   :  { %v13264_v13 = vpop.f32.mrf.mxu1 }
0x24f2   :  { %v10577_v2 = vmax.f32 %v10573_v0, 0.0  ;;  %v11388_v0 = vld [vmem:[%s10859_s27] ss:$0 sm:$0xff] }
0x24f4   :  { %v10589_v56 = vpack.c.bf16 %v10577_v2, %v10576_v5 }
0x24f6   :  { %13274 = vmatmul.mubr.msk.bf16.vlgmr.msra.gmra.mxu0 %vm5337_vm5, %v10589_v56  ;;  %v11389_v56 = vld [vmem:[%s10860_s20] ss:$0 sm:$0xff] }
0x25b6   :  { %v10657_v1 = vpop.f32.mrf.mxu0 }
0x25b7   :  { %v10658_v24 = vadd.f32 %v11378_v31, %v10657_v1 }
0x25b8   :  { %v13275_v52 = vpop.f32.mrf.mxu0 }
0x25b9   :  { %v10664_v57 = vadd.f32 %v10658_v24, %v10504_v14 }
0x25ba   :  { %v10660_v61 = vpop.f32.mrf.mxu0 }
0x25bb   :  { %v10661_v46 = vadd.f32 %v11378_v31, %v10660_v61  ;;  %v10670_v42 = vsel %vm259_vm1, %v10664_v57, 0.0 }
0x25bc   :  { %10671 = vadd.xlane.f32.xlu0 %v10670_v42  ;;  %v13276_v19 = vpop.f32.mrf.mxu0 }
0x25bd   :  { %v10665_v20 = vadd.f32 %v10661_v46, %v10505_v41 }
0x25bf   :  { %v10673_v43 = vsel %vm259_vm1, %v10665_v20, 0.0 }
0x25c0   :  { %10674 = vadd.xlane.f32.xlu1 %v10673_v43 }
0x2645   :  { %v10672_v50 = vpop.xlane.xlu0 %10671 }
0x2646   :  { %v10676_v39 = vmul.f32 0.03125, %v10672_v50 }
0x2648   :  { %v10678_v47 = vsub.f32 %v10664_v57, %v10676_v39  ;;  %v11390_v57 = vld [vmem:[%s10862_s23] ss:$0 sm:$0xff] }
0x2649   :  { %v10675_v26 = vpop.xlane.xlu1 %10674 }
0x264a   :  { %v10677_v48 = vmul.f32 0.03125, %v10675_v26  ;;  %v10680_v55 = vmul.f32 %v10678_v47, %v10678_v47 }
0x264c   :  { %v10679_v25 = vsub.f32 %v10665_v20, %v10677_v48  ;;  %v10682_v16 = vsel %vm259_vm1, %v10680_v55, 0.0 }
0x264d   :  { %10683 = vadd.xlane.f32.xlu0 %v10682_v16 }
0x264e   :  { %v10681_v29 = vmul.f32 %v10679_v25, %v10679_v25 }
0x2650   :  { %v10685_v36 = vsel %vm259_vm1, %v10681_v29, 0.0 }
0x2651   :  { %10686 = vadd.xlane.f32.xlu1 %v10685_v36 }
0x26d6   :  { %v10684_v58 = vpop.xlane.xlu0 %10683 }
0x26d7   :  { %v10688_v15 = vmul.f32 0.03125, %v10684_v58 }
0x26d9   :  { %v10690_v53 = vadd.f32 1e-05, %v10688_v15 }
0x26da   :  { %v10687_v30 = vpop.xlane.xlu1 %10686 }
0x26db   :  { %13580 = vrsqrt.f32 %v10690_v53  ;;  %v10689_v3 = vmul.f32 0.03125, %v10687_v30 }
0x26dd   :  { %v10691_v40 = vadd.f32 1e-05, %v10689_v3 }
0x26df   :  { %13582 = vrsqrt.f32 %v10691_v40 }
0x26e8   :  { %v13581_v11 = vpop.eup %13580 }
0x26e9   :  { %v10694_v23 = vmul.f32 %v13581_v11, %v10678_v47 }
0x26eb   :  { %v10702_v4 = vmul.f32 %v11386_v44, %v10694_v23 }
0x26ec   :  { %v13583_v21 = vpop.eup %13582 }
0x26ed   :  { %v10710_v28 = vadd.f32 %v11387_v63, %v10702_v4  ;;  %v10695_v9 = vmul.f32 %v13583_v21, %v10679_v25 }
0x26ef   :  { %v10714_v51 = vsel %vm259_vm1, %v10710_v28, 0.0  ;;  %v10703_v17 = vmul.f32 %v11386_v44, %v10695_v9 }
0x26f0   :  { %10715 = vadd.xlane.f32.xlu0 %v10714_v51 }
0x26f1   :  { %v10711_v6 = vadd.f32 %v11387_v63, %v10703_v17 }
0x26f3   :  { %v10717_v27 = vsel %vm259_vm1, %v10711_v6, 0.0 }
0x26f4   :  { %10718 = vadd.xlane.f32.xlu1 %v10717_v27 }
0x2779   :  { %v10716_v22 = vpop.xlane.xlu0 %10715 }
0x277a   :  { %v10720_v7 = vmul.f32 0.03125, %v10716_v22 }
0x277c   :  { %v10722_v59 = vsub.f32 %v10710_v28, %v10720_v7 }
0x277d   :  { %v10719_v60 = vpop.xlane.xlu1 %10718 }
0x277e   :  { %v10721_v38 = vmul.f32 0.03125, %v10719_v60  ;;  %v10724_v8 = vmul.f32 %v10722_v59, %v10722_v59 }
0x2780   :  { %v10723_v37 = vsub.f32 %v10711_v6, %v10721_v38  ;;  %v10726_v45 = vsel %vm259_vm1, %v10724_v8, 0.0 }
0x2781   :  { %10727 = vadd.xlane.f32.xlu0 %v10726_v45 }
0x2782   :  { %v10725_v14 = vmul.f32 %v10723_v37, %v10723_v37 }
0x2784   :  { %v10729_v41 = vsel %vm259_vm1, %v10725_v14, 0.0 }
0x2785   :  { %10730 = vadd.xlane.f32.xlu1 %v10729_v41 }
0x280a   :  { %v10728_v49 = vpop.xlane.xlu0 %10727 }
0x280b   :  { %v10732_v12 = vmul.f32 0.03125, %v10728_v49 }
0x280d   :  { %v10734_v54 = vadd.f32 1e-05, %v10732_v12 }
0x280e   :  { %v10731_v10 = vpop.xlane.xlu1 %10730 }
0x280f   :  { %13584 = vrsqrt.f32 %v10734_v54  ;;  %v10733_v32 = vmul.f32 0.03125, %v10731_v10 }
0x2811   :  { %v10735_v33 = vadd.f32 1e-05, %v10733_v32 }
0x2813   :  { %13586 = vrsqrt.f32 %v10735_v33 }
0x281c   :  { %v13585_v35 = vpop.eup %13584 }
0x281d   :  { %v10738_v34 = vmul.f32 %v13585_v35, %v10722_v59 }
0x281f   :  { %v10746_v5 = vmul.f32 %v11388_v0, %v10738_v34 }
0x2820   :  { %v13587_v13 = vpop.eup %13586 }
0x2821   :  { %v10739_v2 = vmul.f32 %v13587_v13, %v10723_v37  ;;  %v10754_v1 = vadd.f32 %v11389_v56, %v10746_v5 }
0x2823   :  { %v10747_v31 = vmul.f32 %v11388_v0, %v10739_v2 }
0x2825   :  { %v10755_v24 = vadd.f32 %v11389_v56, %v10747_v31 }
0x2827   :  { %v10761_v52 = vpack.c.bf16 %v10755_v24, %v10754_v1 }
0x2829   :  { %13282 = vmatmul.mubr.msk.bf16.vlgmr.msra.gmra.mxu1 %vm259_vm1, %v10761_v52 }
0x28e9   :  { %v10817_v61 = vpop.f32.mrf.mxu1 }
0x28ea   :  { %v10818_v46 = vadd.f32 %v11390_v57, %v10817_v61 }
0x28eb   :  { %v13283_v42 = vpop.f32.mrf.mxu1 }
0x28ec   :  { %10825 = vst.msk [vmem:[%s10863_s7] sm:$0xff] %vm10824_vm6, %v10818_v46 }
0x28ed   :  { %v10820_v19 = vpop.f32.mrf.mxu1 }
0x28ee   :  { %v10821_v20 = vadd.f32 %v11390_v57, %v10820_v19 }
0x28ef   :  { %v13284_v43 = vpop.f32.mrf.mxu1 }
0x28f0   :  { %10826 = vst.msk [vmem:[%s10863_s7 + $0x8] sm:$0xff] %vm10824_vm6, %v10821_v20 }

</bundles_post_ra>
